<compile_context>
chip_gen: v7x
topology: tpu7x:2x2x1
jax: 0.10.0
libtpu: 0.0.40
codegen_flags: <defaults>
</compile_context>

<pallas_src>
import functools

import jax
import jax.numpy as jnp
from jax.experimental import pallas as pl
from jax.experimental.pallas import tpu as pltpu

_BN_EPS = 1e-5
_LANE = 128


# ----------------------------------------------------------------------------
# Pallas kernel: one conv3x3x3 + folded BN (+ residual) + ReLU stage,
# one output d-slice per grid step, rolling 3-plane window in VMEM.
# ----------------------------------------------------------------------------
def _conv_bn_core(x_ref, w_ref, s_ref, b_ref, o_ref, win_ref, res_ref,
                  rows_per_chunk, last_slot):
    """Grid = (N, D+1); step j streams plane j and emits output slice j-1.

    x_ref:   (1, 1, H, W, Cin)  bf16 plane min(j, D-1)
    w_ref:   (9, 3*Cin, Cout)   bf16 weights, group kd*3+kh, rows (kw, cin)
    s_ref, b_ref: (1, Cout)     f32 folded BN scale / bias
    res_ref: (1, 1, H, W, Cout) optional residual plane (d = j-1)
    o_ref:   (1, 1, H, W, Cout) output plane (d = j-1)
    win_ref: (3, H+2, W, 3*Cin) rolling window; slot p%3 holds plane p in the
             kw-expanded layout win[r, x, kw*Cin+c] = input[r-1, x+kw-1, c]
             (zero outside the volume).  Halo rows / border columns stay zero.
    """
    _, hp, w, c3 = win_ref.shape
    h = hp - 2
    cin = c3 // 3
    cout = o_ref.shape[-1]
    j = pl.program_id(1)
    nj = pl.num_programs(1)                      # == D + 1

    # -- (1) prime: zero halo + the "plane -1" slot once per (core, batch) ----
    @pl.when(j == 0)
    def _():
        win_ref[...] = jnp.zeros_like(win_ref)

    # -- (2) stream plane j into slot j % 3 (kw-expanded), except on the final
    #        flush step where plane D does not exist (slot stays / is zeroed) --
    xs = x_ref[0, 0]                             # (H, W, Cin) bf16
    stream = j < nj - 1
    for s in range(3):                           # static slot -> static stores
        @pl.when(jnp.logical_and(stream, (j % 3) == s))
        def _(s=s):
            # kw = 1 (center): lane-aligned full-width store.
            win_ref[s, 1:h + 1, :, cin:2 * cin] = xs
            # kw = 0: column 0 stays zero (left spatial pad).
            win_ref[s, 1:h + 1, 1:w, 0:cin] = xs[:, 0:w - 1, :]
            # kw = 2: column W-1 stays zero (right spatial pad).
            win_ref[s, 1:h + 1, 0:w - 1, 2 * cin:3 * cin] = xs[:, 1:w, :]

    @pl.when(j == nj - 1)                        # plane D -> zeros
    def _():
        win_ref[last_slot, 1:h + 1, :, :] = jnp.zeros((h, w, c3), win_ref.dtype)

    # -- (3) compute output slice d = j - 1 ------------------------------------
    @pl.when(j >= 1)
    def _():
        scale = s_ref[...]                       # (1, Cout) f32
        bias = b_ref[...]
        for r0 in range(0, h, rows_per_chunk):
            rh = min(rows_per_chunk, h - r0)
            acc = jnp.zeros((rh * w, cout), jnp.float32)
            for kd in range(3):
                # slot holding plane (j-1) + (kd-1) = d + kd - 1
                slot = (j + 1 + kd) % 3
                for kh in range(3):
                    lhs = win_ref[slot, r0 + kh:r0 + kh + rh, :, :]
                    lhs = lhs.reshape(rh * w, c3)        # free if W % 8 == 0
                    acc = acc + jnp.dot(lhs, w_ref[kd * 3 + kh],
                                        preferred_element_type=jnp.float32)
            y = acc * scale + bias                       # folded BN affine (f32)
            if res_ref is not None:
                res = res_ref[0, 0, r0:r0 + rh, :, :].reshape(rh * w, cout)
                y = y + res.astype(jnp.float32)
            y = jnp.maximum(y, 0.0)
            o_ref[0, 0, r0:r0 + rh, :, :] = (
                y.reshape(rh, w, cout).astype(o_ref.dtype))


def _conv_bn_relu_kernel(x_ref, w_ref, s_ref, b_ref, o_ref, win_ref, *,
                         rows_per_chunk, last_slot):
    _conv_bn_core(x_ref, w_ref, s_ref, b_ref, o_ref, win_ref, None,
                  rows_per_chunk, last_slot)


def _conv_bn_add_relu_kernel(x_ref, w_ref, s_ref, b_ref, res_ref, o_ref,
                             win_ref, *, rows_per_chunk, last_slot):
    _conv_bn_core(x_ref, w_ref, s_ref, b_ref, o_ref, win_ref, res_ref,
                  rows_per_chunk, last_slot)


# ----------------------------------------------------------------------------
# pallas_call wrapper for one conv+bn(+residual)+relu stage
# ----------------------------------------------------------------------------
def _rows_per_chunk(h, w):
    # Target ~256 accumulator rows (M) per chunk: keeps the f32 accumulator
    # small (vreg-friendly) while still feeding the MXU a reasonable M.
    return max(1, min(h, 256 // max(w, 1)))


def _vmem_limit_bytes(working_set_bytes):
    cap = 64 * 1024 * 1024                     # conservative default (v7x VMEM)
    try:
        cap = int(pltpu.get_tpu_info().vmem_capacity_bytes)
    except Exception:                          # older jax / CPU tracing
        pass
    want = 2 * int(working_set_bytes) + (8 << 20)   # pipelining + compiler slack
    return int(max(32 << 20, min(want, int(cap * 0.9))))


def _conv_bn_relu_stage(x, w9, scale, bias, *, residual=None, out_dtype):
    """x: (N, D, H, W, Cin) bf16 (lane-padded). Returns (N, D, H, W, Cout)."""
    n, dd, h, w, cin = x.shape
    cout = w9.shape[-1]
    rpc = _rows_per_chunk(h, w)
    last_slot = dd % 3                            # slot of the flush step (j=D)

    def x_map(i, j):                              # stream plane j (clamped)
        return (i, jnp.minimum(j, dd - 1), 0, 0, 0)

    def out_map(i, j):                            # output slice d = j - 1
        return (i, jnp.maximum(j - 1, 0), 0, 0, 0)

    in_specs = [
        pl.BlockSpec((1, 1, h, w, cin), x_map),
        pl.BlockSpec((9, 3 * cin, cout), lambda i, j: (0, 0, 0)),  # resident W
        pl.BlockSpec((1, cout), lambda i, j: (0, 0)),
        pl.BlockSpec((1, cout), lambda i, j: (0, 0)),
    ]
    inputs = [x, w9, scale, bias]
    if residual is None:
        kernel = functools.partial(_conv_bn_relu_kernel,
                                   rows_per_chunk=rpc, last_slot=last_slot)
    else:
        in_specs.append(pl.BlockSpec((1, 1, h, w, cout), out_map))
        inputs.append(residual)
        kernel = functools.partial(_conv_bn_add_relu_kernel,
                                   rows_per_chunk=rpc, last_slot=last_slot)

    # VMEM budget from the actual working set (window + double-buffered plane /
    # residual / output + resident weights).
    bf16 = 2
    win_bytes = 3 * (h + 2) * w * 3 * cin * bf16
    io_bytes = 2 * (h * w * cin * bf16
                    + (h * w * cout * bf16 if residual is not None else 0)
                    + h * w * cout * jnp.dtype(out_dtype).itemsize)
    wt_bytes = 2 * 9 * 3 * cin * cout * bf16
    vmem_limit = _vmem_limit_bytes(win_bytes + io_bytes + wt_bytes)

    return pl.pallas_call(
        kernel,
        out_shape=jax.ShapeDtypeStruct((n, dd, h, w, cout), out_dtype),
        grid=(n, dd + 1),
        in_specs=in_specs,
        out_specs=pl.BlockSpec((1, 1, h, w, cout), out_map),
        scratch_shapes=[pltpu.VMEM((3, h + 2, w, 3 * cin), x.dtype)],
        compiler_params=pltpu.CompilerParams(
            dimension_semantics=("parallel", "arbitrary"),
            vmem_limit_bytes=vmem_limit,
        ),
    )(*inputs)


# ----------------------------------------------------------------------------
# Parameter preparation (plain JAX glue) and public forward
# ----------------------------------------------------------------------------
def _round_up(v, m):
    return (v + m - 1) // m * m


def _fold_bn(bn, c_pad):
    scale = bn["gamma"] / jnp.sqrt(bn["var"] + _BN_EPS)
    bias = bn["beta"] - bn["mean"] * scale
    pad = (0, c_pad - scale.shape[0])
    return (jnp.pad(scale, pad).reshape(1, c_pad).astype(jnp.float32),
            jnp.pad(bias, pad).reshape(1, c_pad).astype(jnp.float32))


def _group_conv_weight(w_oidhw, cin_pad, cout_pad):
    """(Cout, Cin, 3, 3, 3) -> (9, 3*cin_pad, cout_pad) bf16.

    Group index = kd*3 + kh; rows within a group ordered (kw, cin) to match the
    kernel's kw-expanded window layout.
    """
    cout, cin = w_oidhw.shape[0], w_oidhw.shape[1]
    wt = jnp.transpose(w_oidhw, (2, 3, 4, 1, 0))        # (kd, kh, kw, Cin, Cout)
    wt = jnp.pad(wt, ((0, 0), (0, 0), (0, 0),
                      (0, cin_pad - cin), (0, cout_pad - cout)))
    return wt.reshape(9, 3 * cin_pad, cout_pad).astype(jnp.bfloat16)


def _pad_channels(x_ndhwc, c_pad, dtype):
    c = x_ndhwc.shape[-1]
    if c_pad != c:
        x_ndhwc = jnp.pad(x_ndhwc, ((0, 0),) * 4 + ((0, c_pad - c),))
    return x_ndhwc.astype(dtype)


def basic_block_forward(params, x_ncdhw):
    """BasicBlock.forward (stride=1, downsample=None). NCDHW f32 in/out."""
    _, c_in, _, _, _ = x_ncdhw.shape
    planes = params["w1"].shape[0]
    if c_in != planes:
        raise NotImplementedError(
            "stride=1 / downsample=None path requires in_planes == planes")
    cin_p = _round_up(c_in, _LANE)
    out_p = _round_up(planes, _LANE)

    x = jnp.transpose(x_ncdhw, (0, 2, 3, 4, 1))          # NCDHW -> NDHWC
    x_b = _pad_channels(x, cin_p, jnp.bfloat16)          # lane-dense bf16 input

    w1 = _group_conv_weight(params["w1"], cin_p, out_p)
    w2 = _group_conv_weight(params["w2"], out_p, out_p)
    s1, b1 = _fold_bn(params["bn1"], out_p)
    s2, b2 = _fold_bn(params["bn2"], out_p)

    h1 = _conv_bn_relu_stage(x_b, w1, s1, b1, residual=None,
                             out_dtype=jnp.bfloat16)      # relu(bn1(conv1(x)))
    y = _conv_bn_relu_stage(h1, w2, s2, b2, residual=x_b,
                            out_dtype=jnp.bfloat16)       # relu(bn2(conv2(.))+x)

    y = y[..., :planes].astype(jnp.float32)
    return jnp.transpose(y, (0, 4, 1, 2, 3))              # NDHWC -> NCDHW


# ----------------------------------------------------------------------------
# Deterministic parameter init (shapes from BasicBlock.__init__)
# ----------------------------------------------------------------------------
def init_basic_block_params(key, in_planes, planes):
    ks = jax.random.split(key, 10)
    return {
        "w1": 0.1 * jax.random.normal(ks[0], (planes, in_planes, 3, 3, 3),
                                      jnp.float32),
        "w2": 0.1 * jax.random.normal(ks[1], (planes, planes, 3, 3, 3),
                                      jnp.float32),
        "bn1": {
            "gamma": 1.0 + 0.1 * jax.random.normal(ks[2], (planes,), jnp.float32),
            "beta": 0.1 * jax.random.normal(ks[3], (planes,), jnp.float32),
            "mean": 0.1 * jax.random.normal(ks[4], (planes,), jnp.float32),
            "var": jax.random.uniform(ks[5], (planes,), jnp.float32, 0.5, 1.5),
        },
        "bn2": {
            "gamma": 1.0 + 0.1 * jax.random.normal(ks[6], (planes,), jnp.float32),
            "beta": 0.1 * jax.random.normal(ks[7], (planes,), jnp.float32),
            "mean": 0.1 * jax.random.normal(ks[8], (planes,), jnp.float32),
            "var": jax.random.uniform(ks[9], (planes,), jnp.float32, 0.5, 1.5),
        },
    }


# Pure-JAX reference (correctness check only). conv_dtype / store_dtype let us
# evaluate the module under the kernel's precision policy (bf16 storage,
# f32 accumulation, bf16 final store).
def _reference_forward(params, x_ncdhw, conv_dtype=jnp.float32,
                       store_dtype=None):
    def q(a):
        return a.astype(conv_dtype).astype(jnp.float32)

    def conv(x, w):
        return jax.lax.conv_general_dilated(
            q(x), q(w), window_strides=(1, 1, 1),
            padding=((1, 1), (1, 1), (1, 1)),
            dimension_numbers=("NCDHW", "OIDHW", "NCDHW"),
            precision=jax.lax.Precision.HIGHEST)

    def bn(x, p):
        s = p["gamma"] / jnp.sqrt(p["var"] + _BN_EPS)
        b = p["beta"] - p["mean"] * s
        return x * s[None, :, None, None, None] + b[None, :, None, None, None]

    out = jax.nn.relu(bn(conv(x_ncdhw, params["w1"]), params["bn1"]))
    out = bn(conv(out, params["w2"]), params["bn2"]) + q(x_ncdhw)
    out = jax.nn.relu(out)
    if store_dtype is not None:
        out = out.astype(store_dtype).astype(jnp.float32)
    return out


if __name__ == "__main__":
    key = jax.random.PRNGKey(0)
    k_param, k_x = jax.random.split(key)

    N, C, D, H, W = 2, 8, 8, 8, 8          # in_planes = planes = 8, stride = 1
    params = init_basic_block_params(k_param, in_planes=C, planes=C)
    x = jax.random.normal(k_x, (N, C, D, H, W), jnp.float32)   # NCDHW input

    fwd = jax.jit(basic_block_forward)
    out = jax.block_until_ready(fwd(params, x))
    assert out.shape == (N, C, D, H, W)

    # Tight check: module evaluated under the same precision policy as the
    # kernel (bf16 conv operands, f32 accumulation, bf16 final store).
    # Tolerance covers one bf16 ulp of the stored output plus f32
    # summation-order slack.
    ref_bf16 = jax.block_until_ready(
        _reference_forward(params, x, conv_dtype=jnp.bfloat16,
                           store_dtype=jnp.bfloat16))
    err = float(jnp.max(jnp.abs(out - ref_bf16)))
    assert jnp.allclose(out, ref_bf16, atol=1e-2, rtol=2e-2), \
        f"precision-matched max abs err {err}"

    # Loose sanity check against the pure-f32 module forward (gap bounded by the
    # deliberate bf16 quantization of conv operands and the bf16 output store).
    ref_f32 = jax.block_until_ready(
        _reference_forward(params, x, conv_dtype=jnp.float32))
    assert jnp.allclose(out, ref_f32, atol=8e-2, rtol=8e-2), \
        f"f32 max abs err {float(jnp.max(jnp.abs(out - ref_f32)))}"

    print("KERNEL_OK")
</pallas_src>

<mosaic_0001>
module attributes {stable_mosaic.version = 11 : i64} {
  func.func @_conv_bn_relu_kernel(%arg0: i32, %arg1: i32, %arg2: memref<1x1x8x8x128xbf16, #tpu.memory_space<vmem>>, %arg3: memref<9x384x128xbf16, #tpu.memory_space<vmem>>, %arg4: memref<1x128xf32, #tpu.memory_space<vmem>>, %arg5: memref<1x128xf32, #tpu.memory_space<vmem>>, %arg6: memref<1x1x8x8x128xbf16, #tpu.memory_space<vmem>>, %arg7: memref<3x10x8x384xbf16, #tpu.memory_space<vmem>>) attributes {dimension_semantics = [#tpu.dimension_semantics<parallel>, #tpu.dimension_semantics<arbitrary>], iteration_bounds = array<i64: 2, 9>, scalar_prefetch = 0 : i64, scratch_operands = 1 : i64, tpu.core_type = #tpu.core_type<tc>, window_params = [{transform_indices = @transform_0, window_bounds = array<i64: 1, 1, 8, 8, 128>}, {pipeline_mode = #tpu.pipeline_mode<synchronous>, transform_indices = @transform_1, window_bounds = array<i64: 9, 384, 128>}, {pipeline_mode = #tpu.pipeline_mode<synchronous>, transform_indices = @transform_2, window_bounds = array<i64: 1, 128>}, {pipeline_mode = #tpu.pipeline_mode<synchronous>, transform_indices = @transform_3, window_bounds = array<i64: 1, 128>}, {transform_indices = @transform_4, window_bounds = array<i64: 1, 1, 8, 8, 128>}]} {
    %c0_i32 = arith.constant 0 : i32
    %0 = arith.cmpi eq, %arg1, %c0_i32 : i32
    %1 = arith.extui %0 : i1 to i32
    %c0_i32_0 = arith.constant 0 : i32
    %2 = arith.cmpi ne, %1, %c0_i32_0 : i32
    scf.if %2 {
      %cst = arith.constant 0.000000e+00 : bf16
      %54 = vector.broadcast %cst : bf16 to vector<3x10x8x384xbf16>
      %c0_30 = arith.constant 0 : index
      %c0_31 = arith.constant 0 : index
      %c0_32 = arith.constant 0 : index
      %c0_33 = arith.constant 0 : index
      %55 = vector.load %arg7[%c0_30, %c0_31, %c0_32, %c0_33] : memref<3x10x8x384xbf16, #tpu.memory_space<vmem>>, vector<3x10x8x384xbf16>
      tpu.vector_store %arg7[%c0_30, %c0_31, %c0_32, %c0_33], %54 {strides = array<i32>} : memref<3x10x8x384xbf16, #tpu.memory_space<vmem>>, vector<3x10x8x384xbf16>,
    } else {
    }
    %c0 = arith.constant 0 : index
    %c0_1 = arith.constant 0 : index
    %c0_2 = arith.constant 0 : index
    %c0_3 = arith.constant 0 : index
    %c0_4 = arith.constant 0 : index
    %3 = vector.load %arg2[%c0, %c0_1, %c0_2, %c0_3, %c0_4] : memref<1x1x8x8x128xbf16, #tpu.memory_space<vmem>>, vector<1x1x8x8x128xbf16>
    %4 = vector.shape_cast %3 : vector<1x1x8x8x128xbf16> to vector<8x8x128xbf16>
    %c8_i32 = arith.constant 8 : i32
    %5 = arith.cmpi slt, %arg1, %c8_i32 : i32
    %c3_i32 = arith.constant 3 : i32
    %c0_i32_5 = arith.constant 0 : i32
    %6 = arith.cmpi eq, %c3_i32, %c0_i32_5 : i32
    %c1_i32 = arith.constant 1 : i32
    %7 = arith.select %6, %c1_i32, %c3_i32 : i32
    %8 = arith.remsi %arg1, %7 : i32
    %c0_i32_6 = arith.constant 0 : i32
    %9 = arith.cmpi ne, %8, %c0_i32_6 : i32
    %c0_i32_7 = arith.constant 0 : i32
    %10 = arith.cmpi slt, %8, %c0_i32_7 : i32
    %c0_i32_8 = arith.constant 0 : i32
    %11 = arith.cmpi slt, %7, %c0_i32_8 : i32
    %12 = arith.xori %10, %11 : i1
    %13 = arith.andi %12, %9 : i1
    %14 = arith.addi %8, %7 : i32
    %15 = arith.select %13, %14, %8 : i32
    %c0_i32_9 = arith.constant 0 : i32
    %16 = arith.cmpi eq, %15, %c0_i32_9 : i32
    %17 = arith.andi %5, %16 : i1
    %18 = arith.extui %17 : i1 to i32
    %c0_i32_10 = arith.constant 0 : i32
    %19 = arith.cmpi ne, %18, %c0_i32_10 : i32
    scf.if %19 {
      %c0_30 = arith.constant 0 : index
      %c1 = arith.constant 1 : index
      %c0_31 = arith.constant 0 : index
      %c128 = arith.constant 128 : index
      %54 = vector.load %arg7[%c0_30, %c1, %c0_31, %c128] : memref<3x10x8x384xbf16, #tpu.memory_space<vmem>>, vector<1x8x8x128xbf16>
      %55 = vector.shape_cast %54 : vector<1x8x8x128xbf16> to vector<8x8x128xbf16>
      %56 = vector.shape_cast %4 : vector<8x8x128xbf16> to vector<1x8x8x128xbf16>
      tpu.vector_store %arg7[%c0_30, %c1, %c0_31, %c128], %56 {strides = array<i32>} : memref<3x10x8x384xbf16, #tpu.memory_space<vmem>>, vector<1x8x8x128xbf16>,
      %57 = vector.extract_strided_slice %4 {offsets = [0, 0, 0], sizes = [8, 7, 128], strides = [1, 1, 1]} : vector<8x8x128xbf16> to vector<8x7x128xbf16>
      %c0_32 = arith.constant 0 : index
      %c1_33 = arith.constant 1 : index
      %c1_34 = arith.constant 1 : index
      %c0_35 = arith.constant 0 : index
      %58 = vector.load %arg7[%c0_32, %c1_33, %c1_34, %c0_35] : memref<3x10x8x384xbf16, #tpu.memory_space<vmem>>, vector<1x8x7x128xbf16>
      %59 = vector.shape_cast %58 : vector<1x8x7x128xbf16> to vector<8x7x128xbf16>
      %60 = vector.shape_cast %57 : vector<8x7x128xbf16> to vector<1x8x7x128xbf16>
      tpu.vector_store %arg7[%c0_32, %c1_33, %c1_34, %c0_35], %60 {strides = array<i32>} : memref<3x10x8x384xbf16, #tpu.memory_space<vmem>>, vector<1x8x7x128xbf16>,
      %61 = vector.extract_strided_slice %4 {offsets = [0, 1, 0], sizes = [8, 7, 128], strides = [1, 1, 1]} : vector<8x8x128xbf16> to vector<8x7x128xbf16>
      %c0_36 = arith.constant 0 : index
      %c1_37 = arith.constant 1 : index
      %c0_38 = arith.constant 0 : index
      %c256 = arith.constant 256 : index
      %62 = vector.load %arg7[%c0_36, %c1_37, %c0_38, %c256] : memref<3x10x8x384xbf16, #tpu.memory_space<vmem>>, vector<1x8x7x128xbf16>
      %63 = vector.shape_cast %62 : vector<1x8x7x128xbf16> to vector<8x7x128xbf16>
      %64 = vector.shape_cast %61 : vector<8x7x128xbf16> to vector<1x8x7x128xbf16>
      tpu.vector_store %arg7[%c0_36, %c1_37, %c0_38, %c256], %64 {strides = array<i32>} : memref<3x10x8x384xbf16, #tpu.memory_space<vmem>>, vector<1x8x7x128xbf16>,
    } else {
    }
    %c3_i32_11 = arith.constant 3 : i32
    %c0_i32_12 = arith.constant 0 : i32
    %20 = arith.cmpi eq, %c3_i32_11, %c0_i32_12 : i32
    %c1_i32_13 = arith.constant 1 : i32
    %21 = arith.select %20, %c1_i32_13, %c3_i32_11 : i32
    %22 = arith.remsi %arg1, %21 : i32
    %c0_i32_14 = arith.constant 0 : i32
    %23 = arith.cmpi ne, %22, %c0_i32_14 : i32
    %c0_i32_15 = arith.constant 0 : i32
    %24 = arith.cmpi slt, %22, %c0_i32_15 : i32
    %c0_i32_16 = arith.constant 0 : i32
    %25 = arith.cmpi slt, %21, %c0_i32_16 : i32
    %26 = arith.xori %24, %25 : i1
    %27 = arith.andi %26, %23 : i1
    %28 = arith.addi %22, %21 : i32
    %29 = arith.select %27, %28, %22 : i32
    %c1_i32_17 = arith.constant 1 : i32
    %30 = arith.cmpi eq, %29, %c1_i32_17 : i32
    %31 = arith.andi %5, %30 : i1
    %32 = arith.extui %31 : i1 to i32
    %c0_i32_18 = arith.constant 0 : i32
    %33 = arith.cmpi ne, %32, %c0_i32_18 : i32
    scf.if %33 {
      %c1 = arith.constant 1 : index
      %c1_30 = arith.constant 1 : index
      %c0_31 = arith.constant 0 : index
      %c128 = arith.constant 128 : index
      %54 = vector.load %arg7[%c1, %c1_30, %c0_31, %c128] : memref<3x10x8x384xbf16, #tpu.memory_space<vmem>>, vector<1x8x8x128xbf16>
      %55 = vector.shape_cast %54 : vector<1x8x8x128xbf16> to vector<8x8x128xbf16>
      %56 = vector.shape_cast %4 : vector<8x8x128xbf16> to vector<1x8x8x128xbf16>
      tpu.vector_store %arg7[%c1, %c1_30, %c0_31, %c128], %56 {strides = array<i32>} : memref<3x10x8x384xbf16, #tpu.memory_space<vmem>>, vector<1x8x8x128xbf16>,
      %57 = vector.extract_strided_slice %4 {offsets = [0, 0, 0], sizes = [8, 7, 128], strides = [1, 1, 1]} : vector<8x8x128xbf16> to vector<8x7x128xbf16>
      %c1_32 = arith.constant 1 : index
      %c1_33 = arith.constant 1 : index
      %c1_34 = arith.constant 1 : index
      %c0_35 = arith.constant 0 : index
      %58 = vector.load %arg7[%c1_32, %c1_33, %c1_34, %c0_35] : memref<3x10x8x384xbf16, #tpu.memory_space<vmem>>, vector<1x8x7x128xbf16>
      %59 = vector.shape_cast %58 : vector<1x8x7x128xbf16> to vector<8x7x128xbf16>
      %60 = vector.shape_cast %57 : vector<8x7x128xbf16> to vector<1x8x7x128xbf16>
      tpu.vector_store %arg7[%c1_32, %c1_33, %c1_34, %c0_35], %60 {strides = array<i32>} : memref<3x10x8x384xbf16, #tpu.memory_space<vmem>>, vector<1x8x7x128xbf16>,
      %61 = vector.extract_strided_slice %4 {offsets = [0, 1, 0], sizes = [8, 7, 128], strides = [1, 1, 1]} : vector<8x8x128xbf16> to vector<8x7x128xbf16>
      %c1_36 = arith.constant 1 : index
      %c1_37 = arith.constant 1 : index
      %c0_38 = arith.constant 0 : index
      %c256 = arith.constant 256 : index
      %62 = vector.load %arg7[%c1_36, %c1_37, %c0_38, %c256] : memref<3x10x8x384xbf16, #tpu.memory_space<vmem>>, vector<1x8x7x128xbf16>
      %63 = vector.shape_cast %62 : vector<1x8x7x128xbf16> to vector<8x7x128xbf16>
      %64 = vector.shape_cast %61 : vector<8x7x128xbf16> to vector<1x8x7x128xbf16>
      tpu.vector_store %arg7[%c1_36, %c1_37, %c0_38, %c256], %64 {strides = array<i32>} : memref<3x10x8x384xbf16, #tpu.memory_space<vmem>>, vector<1x8x7x128xbf16>,
    } else {
    }
    %c3_i32_19 = arith.constant 3 : i32
    %c0_i32_20 = arith.constant 0 : i32
    %34 = arith.cmpi eq, %c3_i32_19, %c0_i32_20 : i32
    %c1_i32_21 = arith.constant 1 : i32
    %35 = arith.select %34, %c1_i32_21, %c3_i32_19 : i32
    %36 = arith.remsi %arg1, %35 : i32
    %c0_i32_22 = arith.constant 0 : i32
    %37 = arith.cmpi ne, %36, %c0_i32_22 : i32
    %c0_i32_23 = arith.constant 0 : i32
    %38 = arith.cmpi slt, %36, %c0_i32_23 : i32
    %c0_i32_24 = arith.constant 0 : i32
    %39 = arith.cmpi slt, %35, %c0_i32_24 : i32
    %40 = arith.xori %38, %39 : i1
    %41 = arith.andi %40, %37 : i1
    %42 = arith.addi %36, %35 : i32
    %43 = arith.select %41, %42, %36 : i32
    %c2_i32 = arith.constant 2 : i32
    %44 = arith.cmpi eq, %43, %c2_i32 : i32
    %45 = arith.andi %5, %44 : i1
    %46 = arith.extui %45 : i1 to i32
    %c0_i32_25 = arith.constant 0 : i32
    %47 = arith.cmpi ne, %46, %c0_i32_25 : i32
    scf.if %47 {
      %c2 = arith.constant 2 : index
      %c1 = arith.constant 1 : index
      %c0_30 = arith.constant 0 : index
      %c128 = arith.constant 128 : index
      %54 = vector.load %arg7[%c2, %c1, %c0_30, %c128] : memref<3x10x8x384xbf16, #tpu.memory_space<vmem>>, vector<1x8x8x128xbf16>
      %55 = vector.shape_cast %54 : vector<1x8x8x128xbf16> to vector<8x8x128xbf16>
      %56 = vector.shape_cast %4 : vector<8x8x128xbf16> to vector<1x8x8x128xbf16>
      tpu.vector_store %arg7[%c2, %c1, %c0_30, %c128], %56 {strides = array<i32>} : memref<3x10x8x384xbf16, #tpu.memory_space<vmem>>, vector<1x8x8x128xbf16>,
      %57 = vector.extract_strided_slice %4 {offsets = [0, 0, 0], sizes = [8, 7, 128], strides = [1, 1, 1]} : vector<8x8x128xbf16> to vector<8x7x128xbf16>
      %c2_31 = arith.constant 2 : index
      %c1_32 = arith.constant 1 : index
      %c1_33 = arith.constant 1 : index
      %c0_34 = arith.constant 0 : index
      %58 = vector.load %arg7[%c2_31, %c1_32, %c1_33, %c0_34] : memref<3x10x8x384xbf16, #tpu.memory_space<vmem>>, vector<1x8x7x128xbf16>
      %59 = vector.shape_cast %58 : vector<1x8x7x128xbf16> to vector<8x7x128xbf16>
      %60 = vector.shape_cast %57 : vector<8x7x128xbf16> to vector<1x8x7x128xbf16>
      tpu.vector_store %arg7[%c2_31, %c1_32, %c1_33, %c0_34], %60 {strides = array<i32>} : memref<3x10x8x384xbf16, #tpu.memory_space<vmem>>, vector<1x8x7x128xbf16>,
      %61 = vector.extract_strided_slice %4 {offsets = [0, 1, 0], sizes = [8, 7, 128], strides = [1, 1, 1]} : vector<8x8x128xbf16> to vector<8x7x128xbf16>
      %c2_35 = arith.constant 2 : index
      %c1_36 = arith.constant 1 : index
      %c0_37 = arith.constant 0 : index
      %c256 = arith.constant 256 : index
      %62 = vector.load %arg7[%c2_35, %c1_36, %c0_37, %c256] : memref<3x10x8x384xbf16, #tpu.memory_space<vmem>>, vector<1x8x7x128xbf16>
      %63 = vector.shape_cast %62 : vector<1x8x7x128xbf16> to vector<8x7x128xbf16>
      %64 = vector.shape_cast %61 : vector<8x7x128xbf16> to vector<1x8x7x128xbf16>
      tpu.vector_store %arg7[%c2_35, %c1_36, %c0_37, %c256], %64 {strides = array<i32>} : memref<3x10x8x384xbf16, #tpu.memory_space<vmem>>, vector<1x8x7x128xbf16>,
    } else {
    }
    %c8_i32_26 = arith.constant 8 : i32
    %48 = arith.cmpi eq, %arg1, %c8_i32_26 : i32
    %49 = arith.extui %48 : i1 to i32
    %c0_i32_27 = arith.constant 0 : i32
    %50 = arith.cmpi ne, %49, %c0_i32_27 : i32
    scf.if %50 {
      %cst = arith.constant 0.000000e+00 : bf16
      %54 = vector.broadcast %cst : bf16 to vector<8x8x384xbf16>
      %c2 = arith.constant 2 : index
      %c1 = arith.constant 1 : index
      %c0_30 = arith.constant 0 : index
      %c0_31 = arith.constant 0 : index
      %55 = vector.load %arg7[%c2, %c1, %c0_30, %c0_31] : memref<3x10x8x384xbf16, #tpu.memory_space<vmem>>, vector<1x8x8x384xbf16>
      %56 = vector.shape_cast %55 : vector<1x8x8x384xbf16> to vector<8x8x384xbf16>
      %57 = vector.shape_cast %54 : vector<8x8x384xbf16> to vector<1x8x8x384xbf16>
      tpu.vector_store %arg7[%c2, %c1, %c0_30, %c0_31], %57 {strides = array<i32>} : memref<3x10x8x384xbf16, #tpu.memory_space<vmem>>, vector<1x8x8x384xbf16>,
    } else {
    }
    %c1_i32_28 = arith.constant 1 : i32
    %51 = arith.cmpi sge, %arg1, %c1_i32_28 : i32
    %52 = arith.extui %51 : i1 to i32
    %c0_i32_29 = arith.constant 0 : i32
    %53 = arith.cmpi ne, %52, %c0_i32_29 : i32
    scf.if %53 {
      %c0_30 = arith.constant 0 : index
      %c0_31 = arith.constant 0 : index
      %54 = vector.load %arg4[%c0_30, %c0_31] : memref<1x128xf32, #tpu.memory_space<vmem>>, vector<1x128xf32>
      %c0_32 = arith.constant 0 : index
      %c0_33 = arith.constant 0 : index
      %55 = vector.load %arg5[%c0_32, %c0_33] : memref<1x128xf32, #tpu.memory_space<vmem>>, vector<1x128xf32>
      %cst = arith.constant 0.000000e+00 : f32
      %56 = vector.broadcast %cst : f32 to vector<64x128xf32>
      %c1_i32_34 = arith.constant 1 : i32
      %57 = arith.addi %arg1, %c1_i32_34 : i32
      %c0_i32_35 = arith.constant 0 : i32
      %58 = arith.addi %57, %c0_i32_35 : i32
      %c3_i32_36 = arith.constant 3 : i32
      %c0_i32_37 = arith.constant 0 : i32
      %59 = arith.cmpi eq, %c3_i32_36, %c0_i32_37 : i32
      %c1_i32_38 = arith.constant 1 : i32
      %60 = arith.select %59, %c1_i32_38, %c3_i32_36 : i32
      %61 = arith.remsi %58, %60 : i32
      %c0_i32_39 = arith.constant 0 : i32
      %62 = arith.cmpi ne, %61, %c0_i32_39 : i32
      %c0_i32_40 = arith.constant 0 : i32
      %63 = arith.cmpi slt, %61, %c0_i32_40 : i32
      %c0_i32_41 = arith.constant 0 : i32
      %64 = arith.cmpi slt, %60, %c0_i32_41 : i32
      %65 = arith.xori %63, %64 : i1
      %66 = arith.andi %65, %62 : i1
      %67 = arith.addi %61, %60 : i32
      %68 = arith.select %66, %67, %61 : i32
      %69 = arith.index_cast %68 : i32 to index
      %c0_42 = arith.constant 0 : index
      %c0_43 = arith.constant 0 : index
      %c0_44 = arith.constant 0 : index
      %70 = vector.load %arg7[%69, %c0_42, %c0_43, %c0_44] : memref<3x10x8x384xbf16, #tpu.memory_space<vmem>>, vector<1x8x8x384xbf16>
      %71 = vector.shape_cast %70 : vector<1x8x8x384xbf16> to vector<8x8x384xbf16>
      %72 = vector.shape_cast %71 : vector<8x8x384xbf16> to vector<64x384xbf16>
      %c0_45 = arith.constant 0 : index
      %c0_46 = arith.constant 0 : index
      %c0_47 = arith.constant 0 : index
      %73 = vector.load %arg3[%c0_45, %c0_46, %c0_47] : memref<9x384x128xbf16, #tpu.memory_space<vmem>>, vector<1x384x128xbf16>
      %74 = vector.shape_cast %73 : vector<1x384x128xbf16> to vector<384x128xbf16>
      %cst_48 = arith.constant dense<0.000000e+00> : vector<64x128xf32>
      %75 = tpu.matmul %72, %74, %cst_48 {dimension_numbers = #tpu.dot_dimension_numbers<[1], [0], [0], [1], [0, 0, 1, 1], [], []>} : vector<64x384xbf16>, vector<384x128xbf16>, vector<64x128xf32> -> vector<64x128xf32>
      %76 = arith.addf %56, %75 : vector<64x128xf32>
      %77 = arith.index_cast %68 : i32 to index
      %c1 = arith.constant 1 : index
      %c0_49 = arith.constant 0 : index
      %c0_50 = arith.constant 0 : index
      %78 = vector.load %arg7[%77, %c1, %c0_49, %c0_50] : memref<3x10x8x384xbf16, #tpu.memory_space<vmem>>, vector<1x8x8x384xbf16>
      %79 = vector.shape_cast %78 : vector<1x8x8x384xbf16> to vector<8x8x384xbf16>
      %80 = vector.shape_cast %79 : vector<8x8x384xbf16> to vector<64x384xbf16>
      %c1_51 = arith.constant 1 : index
      %c0_52 = arith.constant 0 : index
      %c0_53 = arith.constant 0 : index
      %81 = vector.load %arg3[%c1_51, %c0_52, %c0_53] : memref<9x384x128xbf16, #tpu.memory_space<vmem>>, vector<1x384x128xbf16>
      %82 = vector.shape_cast %81 : vector<1x384x128xbf16> to vector<384x128xbf16>
      %cst_54 = arith.constant dense<0.000000e+00> : vector<64x128xf32>
      %83 = tpu.matmul %80, %82, %cst_54 {dimension_numbers = #tpu.dot_dimension_numbers<[1], [0], [0], [1], [0, 0, 1, 1], [], []>} : vector<64x384xbf16>, vector<384x128xbf16>, vector<64x128xf32> -> vector<64x128xf32>
      %84 = arith.addf %76, %83 : vector<64x128xf32>
      %85 = arith.index_cast %68 : i32 to index
      %c2 = arith.constant 2 : index
      %c0_55 = arith.constant 0 : index
      %c0_56 = arith.constant 0 : index
      %86 = vector.load %arg7[%85, %c2, %c0_55, %c0_56] : memref<3x10x8x384xbf16, #tpu.memory_space<vmem>>, vector<1x8x8x384xbf16>
      %87 = vector.shape_cast %86 : vector<1x8x8x384xbf16> to vector<8x8x384xbf16>
      %88 = vector.shape_cast %87 : vector<8x8x384xbf16> to vector<64x384xbf16>
      %c2_57 = arith.constant 2 : index
      %c0_58 = arith.constant 0 : index
      %c0_59 = arith.constant 0 : index
      %89 = vector.load %arg3[%c2_57, %c0_58, %c0_59] : memref<9x384x128xbf16, #tpu.memory_space<vmem>>, vector<1x384x128xbf16>
      %90 = vector.shape_cast %89 : vector<1x384x128xbf16> to vector<384x128xbf16>
      %cst_60 = arith.constant dense<0.000000e+00> : vector<64x128xf32>
      %91 = tpu.matmul %88, %90, %cst_60 {dimension_numbers = #tpu.dot_dimension_numbers<[1], [0], [0], [1], [0, 0, 1, 1], [], []>} : vector<64x384xbf16>, vector<384x128xbf16>, vector<64x128xf32> -> vector<64x128xf32>
      %92 = arith.addf %84, %91 : vector<64x128xf32>
      %c1_i32_61 = arith.constant 1 : i32
      %93 = arith.addi %arg1, %c1_i32_61 : i32
      %c1_i32_62 = arith.constant 1 : i32
      %94 = arith.addi %93, %c1_i32_62 : i32
      %c3_i32_63 = arith.constant 3 : i32
      %c0_i32_64 = arith.constant 0 : i32
      %95 = arith.cmpi eq, %c3_i32_63, %c0_i32_64 : i32
      %c1_i32_65 = arith.constant 1 : i32
      %96 = arith.select %95, %c1_i32_65, %c3_i32_63 : i32
      %97 = arith.remsi %94, %96 : i32
      %c0_i32_66 = arith.constant 0 : i32
      %98 = arith.cmpi ne, %97, %c0_i32_66 : i32
      %c0_i32_67 = arith.constant 0 : i32
      %99 = arith.cmpi slt, %97, %c0_i32_67 : i32
      %c0_i32_68 = arith.constant 0 : i32
      %100 = arith.cmpi slt, %96, %c0_i32_68 : i32
      %101 = arith.xori %99, %100 : i1
      %102 = arith.andi %101, %98 : i1
      %103 = arith.addi %97, %96 : i32
      %104 = arith.select %102, %103, %97 : i32
      %105 = arith.index_cast %104 : i32 to index
      %c0_69 = arith.constant 0 : index
      %c0_70 = arith.constant 0 : index
      %c0_71 = arith.constant 0 : index
      %106 = vector.load %arg7[%105, %c0_69, %c0_70, %c0_71] : memref<3x10x8x384xbf16, #tpu.memory_space<vmem>>, vector<1x8x8x384xbf16>
      %107 = vector.shape_cast %106 : vector<1x8x8x384xbf16> to vector<8x8x384xbf16>
      %108 = vector.shape_cast %107 : vector<8x8x384xbf16> to vector<64x384xbf16>
      %c3 = arith.constant 3 : index
      %c0_72 = arith.constant 0 : index
      %c0_73 = arith.constant 0 : index
      %109 = vector.load %arg3[%c3, %c0_72, %c0_73] : memref<9x384x128xbf16, #tpu.memory_space<vmem>>, vector<1x384x128xbf16>
      %110 = vector.shape_cast %109 : vector<1x384x128xbf16> to vector<384x128xbf16>
      %cst_74 = arith.constant dense<0.000000e+00> : vector<64x128xf32>
      %111 = tpu.matmul %108, %110, %cst_74 {dimension_numbers = #tpu.dot_dimension_numbers<[1], [0], [0], [1], [0, 0, 1, 1], [], []>} : vector<64x384xbf16>, vector<384x128xbf16>, vector<64x128xf32> -> vector<64x128xf32>
      %112 = arith.addf %92, %111 : vector<64x128xf32>
      %113 = arith.index_cast %104 : i32 to index
      %c1_75 = arith.constant 1 : index
      %c0_76 = arith.constant 0 : index
      %c0_77 = arith.constant 0 : index
      %114 = vector.load %arg7[%113, %c1_75, %c0_76, %c0_77] : memref<3x10x8x384xbf16, #tpu.memory_space<vmem>>, vector<1x8x8x384xbf16>
      %115 = vector.shape_cast %114 : vector<1x8x8x384xbf16> to vector<8x8x384xbf16>
      %116 = vector.shape_cast %115 : vector<8x8x384xbf16> to vector<64x384xbf16>
      %c4 = arith.constant 4 : index
      %c0_78 = arith.constant 0 : index
      %c0_79 = arith.constant 0 : index
      %117 = vector.load %arg3[%c4, %c0_78, %c0_79] : memref<9x384x128xbf16, #tpu.memory_space<vmem>>, vector<1x384x128xbf16>
      %118 = vector.shape_cast %117 : vector<1x384x128xbf16> to vector<384x128xbf16>
      %cst_80 = arith.constant dense<0.000000e+00> : vector<64x128xf32>
      %119 = tpu.matmul %116, %118, %cst_80 {dimension_numbers = #tpu.dot_dimension_numbers<[1], [0], [0], [1], [0, 0, 1, 1], [], []>} : vector<64x384xbf16>, vector<384x128xbf16>, vector<64x128xf32> -> vector<64x128xf32>
      %120 = arith.addf %112, %119 : vector<64x128xf32>
      %121 = arith.index_cast %104 : i32 to index
      %c2_81 = arith.constant 2 : index
      %c0_82 = arith.constant 0 : index
      %c0_83 = arith.constant 0 : index
      %122 = vector.load %arg7[%121, %c2_81, %c0_82, %c0_83] : memref<3x10x8x384xbf16, #tpu.memory_space<vmem>>, vector<1x8x8x384xbf16>
      %123 = vector.shape_cast %122 : vector<1x8x8x384xbf16> to vector<8x8x384xbf16>
      %124 = vector.shape_cast %123 : vector<8x8x384xbf16> to vector<64x384xbf16>
      %c5 = arith.constant 5 : index
      %c0_84 = arith.constant 0 : index
      %c0_85 = arith.constant 0 : index
      %125 = vector.load %arg3[%c5, %c0_84, %c0_85] : memref<9x384x128xbf16, #tpu.memory_space<vmem>>, vector<1x384x128xbf16>
      %126 = vector.shape_cast %125 : vector<1x384x128xbf16> to vector<384x128xbf16>
      %cst_86 = arith.constant dense<0.000000e+00> : vector<64x128xf32>
      %127 = tpu.matmul %124, %126, %cst_86 {dimension_numbers = #tpu.dot_dimension_numbers<[1], [0], [0], [1], [0, 0, 1, 1], [], []>} : vector<64x384xbf16>, vector<384x128xbf16>, vector<64x128xf32> -> vector<64x128xf32>
      %128 = arith.addf %120, %127 : vector<64x128xf32>
      %c1_i32_87 = arith.constant 1 : i32
      %129 = arith.addi %arg1, %c1_i32_87 : i32
      %c2_i32_88 = arith.constant 2 : i32
      %130 = arith.addi %129, %c2_i32_88 : i32
      %c3_i32_89 = arith.constant 3 : i32
      %c0_i32_90 = arith.constant 0 : i32
      %131 = arith.cmpi eq, %c3_i32_89, %c0_i32_90 : i32
      %c1_i32_91 = arith.constant 1 : i32
      %132 = arith.select %131, %c1_i32_91, %c3_i32_89 : i32
      %133 = arith.remsi %130, %132 : i32
      %c0_i32_92 = arith.constant 0 : i32
      %134 = arith.cmpi ne, %133, %c0_i32_92 : i32
      %c0_i32_93 = arith.constant 0 : i32
      %135 = arith.cmpi slt, %133, %c0_i32_93 : i32
      %c0_i32_94 = arith.constant 0 : i32
      %136 = arith.cmpi slt, %132, %c0_i32_94 : i32
      %137 = arith.xori %135, %136 : i1
      %138 = arith.andi %137, %134 : i1
      %139 = arith.addi %133, %132 : i32
      %140 = arith.select %138, %139, %133 : i32
      %141 = arith.index_cast %140 : i32 to index
      %c0_95 = arith.constant 0 : index
      %c0_96 = arith.constant 0 : index
      %c0_97 = arith.constant 0 : index
      %142 = vector.load %arg7[%141, %c0_95, %c0_96, %c0_97] : memref<3x10x8x384xbf16, #tpu.memory_space<vmem>>, vector<1x8x8x384xbf16>
      %143 = vector.shape_cast %142 : vector<1x8x8x384xbf16> to vector<8x8x384xbf16>
      %144 = vector.shape_cast %143 : vector<8x8x384xbf16> to vector<64x384xbf16>
      %c6 = arith.constant 6 : index
      %c0_98 = arith.constant 0 : index
      %c0_99 = arith.constant 0 : index
      %145 = vector.load %arg3[%c6, %c0_98, %c0_99] : memref<9x384x128xbf16, #tpu.memory_space<vmem>>, vector<1x384x128xbf16>
      %146 = vector.shape_cast %145 : vector<1x384x128xbf16> to vector<384x128xbf16>
      %cst_100 = arith.constant dense<0.000000e+00> : vector<64x128xf32>
      %147 = tpu.matmul %144, %146, %cst_100 {dimension_numbers = #tpu.dot_dimension_numbers<[1], [0], [0], [1], [0, 0, 1, 1], [], []>} : vector<64x384xbf16>, vector<384x128xbf16>, vector<64x128xf32> -> vector<64x128xf32>
      %148 = arith.addf %128, %147 : vector<64x128xf32>
      %149 = arith.index_cast %140 : i32 to index
      %c1_101 = arith.constant 1 : index
      %c0_102 = arith.constant 0 : index
      %c0_103 = arith.constant 0 : index
      %150 = vector.load %arg7[%149, %c1_101, %c0_102, %c0_103] : memref<3x10x8x384xbf16, #tpu.memory_space<vmem>>, vector<1x8x8x384xbf16>
      %151 = vector.shape_cast %150 : vector<1x8x8x384xbf16> to vector<8x8x384xbf16>
      %152 = vector.shape_cast %151 : vector<8x8x384xbf16> to vector<64x384xbf16>
      %c7 = arith.constant 7 : index
      %c0_104 = arith.constant 0 : index
      %c0_105 = arith.constant 0 : index
      %153 = vector.load %arg3[%c7, %c0_104, %c0_105] : memref<9x384x128xbf16, #tpu.memory_space<vmem>>, vector<1x384x128xbf16>
      %154 = vector.shape_cast %153 : vector<1x384x128xbf16> to vector<384x128xbf16>
      %cst_106 = arith.constant dense<0.000000e+00> : vector<64x128xf32>
      %155 = tpu.matmul %152, %154, %cst_106 {dimension_numbers = #tpu.dot_dimension_numbers<[1], [0], [0], [1], [0, 0, 1, 1], [], []>} : vector<64x384xbf16>, vector<384x128xbf16>, vector<64x128xf32> -> vector<64x128xf32>
      %156 = arith.addf %148, %155 : vector<64x128xf32>
      %157 = arith.index_cast %140 : i32 to index
      %c2_107 = arith.constant 2 : index
      %c0_108 = arith.constant 0 : index
      %c0_109 = arith.constant 0 : index
      %158 = vector.load %arg7[%157, %c2_107, %c0_108, %c0_109] : memref<3x10x8x384xbf16, #tpu.memory_space<vmem>>, vector<1x8x8x384xbf16>
      %159 = vector.shape_cast %158 : vector<1x8x8x384xbf16> to vector<8x8x384xbf16>
      %160 = vector.shape_cast %159 : vector<8x8x384xbf16> to vector<64x384xbf16>
      %c8 = arith.constant 8 : index
      %c0_110 = arith.constant 0 : index
      %c0_111 = arith.constant 0 : index
      %161 = vector.load %arg3[%c8, %c0_110, %c0_111] : memref<9x384x128xbf16, #tpu.memory_space<vmem>>, vector<1x384x128xbf16>
      %162 = vector.shape_cast %161 : vector<1x384x128xbf16> to vector<384x128xbf16>
      %cst_112 = arith.constant dense<0.000000e+00> : vector<64x128xf32>
      %163 = tpu.matmul %160, %162, %cst_112 {dimension_numbers = #tpu.dot_dimension_numbers<[1], [0], [0], [1], [0, 0, 1, 1], [], []>} : vector<64x384xbf16>, vector<384x128xbf16>, vector<64x128xf32> -> vector<64x128xf32>
      %164 = arith.addf %156, %163 : vector<64x128xf32>
      %165 = vector.broadcast %54 : vector<1x128xf32> to vector<64x128xf32>
      %166 = arith.mulf %164, %165 : vector<64x128xf32>
      %167 = vector.broadcast %55 : vector<1x128xf32> to vector<64x128xf32>
      %168 = arith.addf %166, %167 : vector<64x128xf32>
      %cst_113 = arith.constant 0.000000e+00 : f32
      %169 = vector.broadcast %cst_113 : f32 to vector<64x128xf32>
      %170 = arith.maximumf %168, %169 : vector<64x128xf32>
      %171 = vector.shape_cast %170 : vector<64x128xf32> to vector<8x8x128xf32>
      %172 = arith.truncf %171 : vector<8x8x128xf32> to vector<8x8x128xbf16>
      %c0_114 = arith.constant 0 : index
      %c0_115 = arith.constant 0 : index
      %c0_116 = arith.constant 0 : index
      %c0_117 = arith.constant 0 : index
      %c0_118 = arith.constant 0 : index
      %173 = vector.load %arg6[%c0_114, %c0_115, %c0_116, %c0_117, %c0_118] : memref<1x1x8x8x128xbf16, #tpu.memory_space<vmem>>, vector<1x1x8x8x128xbf16>
      %174 = vector.shape_cast %173 : vector<1x1x8x8x128xbf16> to vector<8x8x128xbf16>
      %175 = vector.shape_cast %172 : vector<8x8x128xbf16> to vector<1x1x8x8x128xbf16>
      tpu.vector_store %arg6[%c0_114, %c0_115, %c0_116, %c0_117, %c0_118], %175 {strides = array<i32>} : memref<1x1x8x8x128xbf16, #tpu.memory_space<vmem>>, vector<1x1x8x8x128xbf16>,
    } else {
    }
    return
  }
  func.func @transform_0(%arg0: i32, %arg1: i32) -> (i32, i32, i32, i32, i32) {
    %c7_i32 = arith.constant 7 : i32
    %0 = arith.minsi %arg1, %c7_i32 : i32
    %c0_i32 = arith.constant 0 : i32
    %c0_i32_0 = arith.constant 0 : i32
    %c0_i32_1 = arith.constant 0 : i32
    %c0_i32_2 = arith.constant 0 : i32
    return %arg0, %0, %c0_i32, %c0_i32_0, %c0_i32_1 : i32, i32, i32, i32, i32
  }
  func.func @transform_1(%arg0: i32, %arg1: i32) -> (i32, i32, i32) {
    %c0_i32 = arith.constant 0 : i32
    %c0_i32_0 = arith.constant 0 : i32
    %c0_i32_1 = arith.constant 0 : i32
    %c0_i32_2 = arith.constant 0 : i32
    return %c0_i32, %c0_i32_0, %c0_i32_1 : i32, i32, i32
  }
  func.func @transform_2(%arg0: i32, %arg1: i32) -> (i32, i32) {
    %c0_i32 = arith.constant 0 : i32
    %c0_i32_0 = arith.constant 0 : i32
    %c0_i32_1 = arith.constant 0 : i32
    return %c0_i32, %c0_i32_0 : i32, i32
  }
  func.func @transform_3(%arg0: i32, %arg1: i32) -> (i32, i32) {
    %c0_i32 = arith.constant 0 : i32
    %c0_i32_0 = arith.constant 0 : i32
    %c0_i32_1 = arith.constant 0 : i32
    return %c0_i32, %c0_i32_0 : i32, i32
  }
  func.func @transform_4(%arg0: i32, %arg1: i32) -> (i32, i32, i32, i32, i32) {
    %c1_i32 = arith.constant 1 : i32
    %0 = arith.subi %arg1, %c1_i32 : i32
    %c0_i32 = arith.constant 0 : i32
    %1 = arith.maxsi %0, %c0_i32 : i32
    %c0_i32_0 = arith.constant 0 : i32
    %c0_i32_1 = arith.constant 0 : i32
    %c0_i32_2 = arith.constant 0 : i32
    %c0_i32_3 = arith.constant 0 : i32
    return %arg0, %1, %c0_i32_0, %c0_i32_1, %c0_i32_2 : i32, i32, i32, i32, i32
  }
}

module attributes {stable_mosaic.version = 11 : i64} {
  func.func @_conv_bn_add_relu_kernel(%arg0: i32, %arg1: i32, %arg2: memref<1x1x8x8x128xbf16, #tpu.memory_space<vmem>>, %arg3: memref<9x384x128xbf16, #tpu.memory_space<vmem>>, %arg4: memref<1x128xf32, #tpu.memory_space<vmem>>, %arg5: memref<1x128xf32, #tpu.memory_space<vmem>>, %arg6: memref<1x1x8x8x128xbf16, #tpu.memory_space<vmem>>, %arg7: memref<1x1x8x8x128xbf16, #tpu.memory_space<vmem>>, %arg8: memref<3x10x8x384xbf16, #tpu.memory_space<vmem>>) attributes {dimension_semantics = [#tpu.dimension_semantics<parallel>, #tpu.dimension_semantics<arbitrary>], iteration_bounds = array<i64: 2, 9>, scalar_prefetch = 0 : i64, scratch_operands = 1 : i64, tpu.core_type = #tpu.core_type<tc>, window_params = [{transform_indices = @transform_0, window_bounds = array<i64: 1, 1, 8, 8, 128>}, {pipeline_mode = #tpu.pipeline_mode<synchronous>, transform_indices = @transform_1, window_bounds = array<i64: 9, 384, 128>}, {pipeline_mode = #tpu.pipeline_mode<synchronous>, transform_indices = @transform_2, window_bounds = array<i64: 1, 128>}, {pipeline_mode = #tpu.pipeline_mode<synchronous>, transform_indices = @transform_3, window_bounds = array<i64: 1, 128>}, {transform_indices = @transform_4, window_bounds = array<i64: 1, 1, 8, 8, 128>}, {transform_indices = @transform_5, window_bounds = array<i64: 1, 1, 8, 8, 128>}]} {
    %c0_i32 = arith.constant 0 : i32
    %0 = arith.cmpi eq, %arg1, %c0_i32 : i32
    %1 = arith.extui %0 : i1 to i32
    %c0_i32_0 = arith.constant 0 : i32
    %2 = arith.cmpi ne, %1, %c0_i32_0 : i32
    scf.if %2 {
      %cst = arith.constant 0.000000e+00 : bf16
      %54 = vector.broadcast %cst : bf16 to vector<3x10x8x384xbf16>
      %c0_30 = arith.constant 0 : index
      %c0_31 = arith.constant 0 : index
      %c0_32 = arith.constant 0 : index
      %c0_33 = arith.constant 0 : index
      %55 = vector.load %arg8[%c0_30, %c0_31, %c0_32, %c0_33] : memref<3x10x8x384xbf16, #tpu.memory_space<vmem>>, vector<3x10x8x384xbf16>
      tpu.vector_store %arg8[%c0_30, %c0_31, %c0_32, %c0_33], %54 {strides = array<i32>} : memref<3x10x8x384xbf16, #tpu.memory_space<vmem>>, vector<3x10x8x384xbf16>,
    } else {
    }
    %c0 = arith.constant 0 : index
    %c0_1 = arith.constant 0 : index
    %c0_2 = arith.constant 0 : index
    %c0_3 = arith.constant 0 : index
    %c0_4 = arith.constant 0 : index
    %3 = vector.load %arg2[%c0, %c0_1, %c0_2, %c0_3, %c0_4] : memref<1x1x8x8x128xbf16, #tpu.memory_space<vmem>>, vector<1x1x8x8x128xbf16>
    %4 = vector.shape_cast %3 : vector<1x1x8x8x128xbf16> to vector<8x8x128xbf16>
    %c8_i32 = arith.constant 8 : i32
    %5 = arith.cmpi slt, %arg1, %c8_i32 : i32
    %c3_i32 = arith.constant 3 : i32
    %c0_i32_5 = arith.constant 0 : i32
    %6 = arith.cmpi eq, %c3_i32, %c0_i32_5 : i32
    %c1_i32 = arith.constant 1 : i32
    %7 = arith.select %6, %c1_i32, %c3_i32 : i32
    %8 = arith.remsi %arg1, %7 : i32
    %c0_i32_6 = arith.constant 0 : i32
    %9 = arith.cmpi ne, %8, %c0_i32_6 : i32
    %c0_i32_7 = arith.constant 0 : i32
    %10 = arith.cmpi slt, %8, %c0_i32_7 : i32
    %c0_i32_8 = arith.constant 0 : i32
    %11 = arith.cmpi slt, %7, %c0_i32_8 : i32
    %12 = arith.xori %10, %11 : i1
    %13 = arith.andi %12, %9 : i1
    %14 = arith.addi %8, %7 : i32
    %15 = arith.select %13, %14, %8 : i32
    %c0_i32_9 = arith.constant 0 : i32
    %16 = arith.cmpi eq, %15, %c0_i32_9 : i32
    %17 = arith.andi %5, %16 : i1
    %18 = arith.extui %17 : i1 to i32
    %c0_i32_10 = arith.constant 0 : i32
    %19 = arith.cmpi ne, %18, %c0_i32_10 : i32
    scf.if %19 {
      %c0_30 = arith.constant 0 : index
      %c1 = arith.constant 1 : index
      %c0_31 = arith.constant 0 : index
      %c128 = arith.constant 128 : index
      %54 = vector.load %arg8[%c0_30, %c1, %c0_31, %c128] : memref<3x10x8x384xbf16, #tpu.memory_space<vmem>>, vector<1x8x8x128xbf16>
      %55 = vector.shape_cast %54 : vector<1x8x8x128xbf16> to vector<8x8x128xbf16>
      %56 = vector.shape_cast %4 : vector<8x8x128xbf16> to vector<1x8x8x128xbf16>
      tpu.vector_store %arg8[%c0_30, %c1, %c0_31, %c128], %56 {strides = array<i32>} : memref<3x10x8x384xbf16, #tpu.memory_space<vmem>>, vector<1x8x8x128xbf16>,
      %57 = vector.extract_strided_slice %4 {offsets = [0, 0, 0], sizes = [8, 7, 128], strides = [1, 1, 1]} : vector<8x8x128xbf16> to vector<8x7x128xbf16>
      %c0_32 = arith.constant 0 : index
      %c1_33 = arith.constant 1 : index
      %c1_34 = arith.constant 1 : index
      %c0_35 = arith.constant 0 : index
      %58 = vector.load %arg8[%c0_32, %c1_33, %c1_34, %c0_35] : memref<3x10x8x384xbf16, #tpu.memory_space<vmem>>, vector<1x8x7x128xbf16>
      %59 = vector.shape_cast %58 : vector<1x8x7x128xbf16> to vector<8x7x128xbf16>
      %60 = vector.shape_cast %57 : vector<8x7x128xbf16> to vector<1x8x7x128xbf16>
      tpu.vector_store %arg8[%c0_32, %c1_33, %c1_34, %c0_35], %60 {strides = array<i32>} : memref<3x10x8x384xbf16, #tpu.memory_space<vmem>>, vector<1x8x7x128xbf16>,
      %61 = vector.extract_strided_slice %4 {offsets = [0, 1, 0], sizes = [8, 7, 128], strides = [1, 1, 1]} : vector<8x8x128xbf16> to vector<8x7x128xbf16>
      %c0_36 = arith.constant 0 : index
      %c1_37 = arith.constant 1 : index
      %c0_38 = arith.constant 0 : index
      %c256 = arith.constant 256 : index
      %62 = vector.load %arg8[%c0_36, %c1_37, %c0_38, %c256] : memref<3x10x8x384xbf16, #tpu.memory_space<vmem>>, vector<1x8x7x128xbf16>
      %63 = vector.shape_cast %62 : vector<1x8x7x128xbf16> to vector<8x7x128xbf16>
      %64 = vector.shape_cast %61 : vector<8x7x128xbf16> to vector<1x8x7x128xbf16>
      tpu.vector_store %arg8[%c0_36, %c1_37, %c0_38, %c256], %64 {strides = array<i32>} : memref<3x10x8x384xbf16, #tpu.memory_space<vmem>>, vector<1x8x7x128xbf16>,
    } else {
    }
    %c3_i32_11 = arith.constant 3 : i32
    %c0_i32_12 = arith.constant 0 : i32
    %20 = arith.cmpi eq, %c3_i32_11, %c0_i32_12 : i32
    %c1_i32_13 = arith.constant 1 : i32
    %21 = arith.select %20, %c1_i32_13, %c3_i32_11 : i32
    %22 = arith.remsi %arg1, %21 : i32
    %c0_i32_14 = arith.constant 0 : i32
    %23 = arith.cmpi ne, %22, %c0_i32_14 : i32
    %c0_i32_15 = arith.constant 0 : i32
    %24 = arith.cmpi slt, %22, %c0_i32_15 : i32
    %c0_i32_16 = arith.constant 0 : i32
    %25 = arith.cmpi slt, %21, %c0_i32_16 : i32
    %26 = arith.xori %24, %25 : i1
    %27 = arith.andi %26, %23 : i1
    %28 = arith.addi %22, %21 : i32
    %29 = arith.select %27, %28, %22 : i32
    %c1_i32_17 = arith.constant 1 : i32
    %30 = arith.cmpi eq, %29, %c1_i32_17 : i32
    %31 = arith.andi %5, %30 : i1
    %32 = arith.extui %31 : i1 to i32
    %c0_i32_18 = arith.constant 0 : i32
    %33 = arith.cmpi ne, %32, %c0_i32_18 : i32
    scf.if %33 {
      %c1 = arith.constant 1 : index
      %c1_30 = arith.constant 1 : index
      %c0_31 = arith.constant 0 : index
      %c128 = arith.constant 128 : index
      %54 = vector.load %arg8[%c1, %c1_30, %c0_31, %c128] : memref<3x10x8x384xbf16, #tpu.memory_space<vmem>>, vector<1x8x8x128xbf16>
      %55 = vector.shape_cast %54 : vector<1x8x8x128xbf16> to vector<8x8x128xbf16>
      %56 = vector.shape_cast %4 : vector<8x8x128xbf16> to vector<1x8x8x128xbf16>
      tpu.vector_store %arg8[%c1, %c1_30, %c0_31, %c128], %56 {strides = array<i32>} : memref<3x10x8x384xbf16, #tpu.memory_space<vmem>>, vector<1x8x8x128xbf16>,
      %57 = vector.extract_strided_slice %4 {offsets = [0, 0, 0], sizes = [8, 7, 128], strides = [1, 1, 1]} : vector<8x8x128xbf16> to vector<8x7x128xbf16>
      %c1_32 = arith.constant 1 : index
      %c1_33 = arith.constant 1 : index
      %c1_34 = arith.constant 1 : index
      %c0_35 = arith.constant 0 : index
      %58 = vector.load %arg8[%c1_32, %c1_33, %c1_34, %c0_35] : memref<3x10x8x384xbf16, #tpu.memory_space<vmem>>, vector<1x8x7x128xbf16>
      %59 = vector.shape_cast %58 : vector<1x8x7x128xbf16> to vector<8x7x128xbf16>
      %60 = vector.shape_cast %57 : vector<8x7x128xbf16> to vector<1x8x7x128xbf16>
      tpu.vector_store %arg8[%c1_32, %c1_33, %c1_34, %c0_35], %60 {strides = array<i32>} : memref<3x10x8x384xbf16, #tpu.memory_space<vmem>>, vector<1x8x7x128xbf16>,
      %61 = vector.extract_strided_slice %4 {offsets = [0, 1, 0], sizes = [8, 7, 128], strides = [1, 1, 1]} : vector<8x8x128xbf16> to vector<8x7x128xbf16>
      %c1_36 = arith.constant 1 : index
      %c1_37 = arith.constant 1 : index
      %c0_38 = arith.constant 0 : index
      %c256 = arith.constant 256 : index
      %62 = vector.load %arg8[%c1_36, %c1_37, %c0_38, %c256] : memref<3x10x8x384xbf16, #tpu.memory_space<vmem>>, vector<1x8x7x128xbf16>
      %63 = vector.shape_cast %62 : vector<1x8x7x128xbf16> to vector<8x7x128xbf16>
      %64 = vector.shape_cast %61 : vector<8x7x128xbf16> to vector<1x8x7x128xbf16>
      tpu.vector_store %arg8[%c1_36, %c1_37, %c0_38, %c256], %64 {strides = array<i32>} : memref<3x10x8x384xbf16, #tpu.memory_space<vmem>>, vector<1x8x7x128xbf16>,
    } else {
    }
    %c3_i32_19 = arith.constant 3 : i32
    %c0_i32_20 = arith.constant 0 : i32
    %34 = arith.cmpi eq, %c3_i32_19, %c0_i32_20 : i32
    %c1_i32_21 = arith.constant 1 : i32
    %35 = arith.select %34, %c1_i32_21, %c3_i32_19 : i32
    %36 = arith.remsi %arg1, %35 : i32
    %c0_i32_22 = arith.constant 0 : i32
    %37 = arith.cmpi ne, %36, %c0_i32_22 : i32
    %c0_i32_23 = arith.constant 0 : i32
    %38 = arith.cmpi slt, %36, %c0_i32_23 : i32
    %c0_i32_24 = arith.constant 0 : i32
    %39 = arith.cmpi slt, %35, %c0_i32_24 : i32
    %40 = arith.xori %38, %39 : i1
    %41 = arith.andi %40, %37 : i1
    %42 = arith.addi %36, %35 : i32
    %43 = arith.select %41, %42, %36 : i32
    %c2_i32 = arith.constant 2 : i32
    %44 = arith.cmpi eq, %43, %c2_i32 : i32
    %45 = arith.andi %5, %44 : i1
    %46 = arith.extui %45 : i1 to i32
    %c0_i32_25 = arith.constant 0 : i32
    %47 = arith.cmpi ne, %46, %c0_i32_25 : i32
    scf.if %47 {
      %c2 = arith.constant 2 : index
      %c1 = arith.constant 1 : index
      %c0_30 = arith.constant 0 : index
      %c128 = arith.constant 128 : index
      %54 = vector.load %arg8[%c2, %c1, %c0_30, %c128] : memref<3x10x8x384xbf16, #tpu.memory_space<vmem>>, vector<1x8x8x128xbf16>
      %55 = vector.shape_cast %54 : vector<1x8x8x128xbf16> to vector<8x8x128xbf16>
      %56 = vector.shape_cast %4 : vector<8x8x128xbf16> to vector<1x8x8x128xbf16>
      tpu.vector_store %arg8[%c2, %c1, %c0_30, %c128], %56 {strides = array<i32>} : memref<3x10x8x384xbf16, #tpu.memory_space<vmem>>, vector<1x8x8x128xbf16>,
      %57 = vector.extract_strided_slice %4 {offsets = [0, 0, 0], sizes = [8, 7, 128], strides = [1, 1, 1]} : vector<8x8x128xbf16> to vector<8x7x128xbf16>
      %c2_31 = arith.constant 2 : index
      %c1_32 = arith.constant 1 : index
      %c1_33 = arith.constant 1 : index
      %c0_34 = arith.constant 0 : index
      %58 = vector.load %arg8[%c2_31, %c1_32, %c1_33, %c0_34] : memref<3x10x8x384xbf16, #tpu.memory_space<vmem>>, vector<1x8x7x128xbf16>
      %59 = vector.shape_cast %58 : vector<1x8x7x128xbf16> to vector<8x7x128xbf16>
      %60 = vector.shape_cast %57 : vector<8x7x128xbf16> to vector<1x8x7x128xbf16>
      tpu.vector_store %arg8[%c2_31, %c1_32, %c1_33, %c0_34], %60 {strides = array<i32>} : memref<3x10x8x384xbf16, #tpu.memory_space<vmem>>, vector<1x8x7x128xbf16>,
      %61 = vector.extract_strided_slice %4 {offsets = [0, 1, 0], sizes = [8, 7, 128], strides = [1, 1, 1]} : vector<8x8x128xbf16> to vector<8x7x128xbf16>
      %c2_35 = arith.constant 2 : index
      %c1_36 = arith.constant 1 : index
      %c0_37 = arith.constant 0 : index
      %c256 = arith.constant 256 : index
      %62 = vector.load %arg8[%c2_35, %c1_36, %c0_37, %c256] : memref<3x10x8x384xbf16, #tpu.memory_space<vmem>>, vector<1x8x7x128xbf16>
      %63 = vector.shape_cast %62 : vector<1x8x7x128xbf16> to vector<8x7x128xbf16>
      %64 = vector.shape_cast %61 : vector<8x7x128xbf16> to vector<1x8x7x128xbf16>
      tpu.vector_store %arg8[%c2_35, %c1_36, %c0_37, %c256], %64 {strides = array<i32>} : memref<3x10x8x384xbf16, #tpu.memory_space<vmem>>, vector<1x8x7x128xbf16>,
    } else {
    }
    %c8_i32_26 = arith.constant 8 : i32
    %48 = arith.cmpi eq, %arg1, %c8_i32_26 : i32
    %49 = arith.extui %48 : i1 to i32
    %c0_i32_27 = arith.constant 0 : i32
    %50 = arith.cmpi ne, %49, %c0_i32_27 : i32
    scf.if %50 {
      %cst = arith.constant 0.000000e+00 : bf16
      %54 = vector.broadcast %cst : bf16 to vector<8x8x384xbf16>
      %c2 = arith.constant 2 : index
      %c1 = arith.constant 1 : index
      %c0_30 = arith.constant 0 : index
      %c0_31 = arith.constant 0 : index
      %55 = vector.load %arg8[%c2, %c1, %c0_30, %c0_31] : memref<3x10x8x384xbf16, #tpu.memory_space<vmem>>, vector<1x8x8x384xbf16>
      %56 = vector.shape_cast %55 : vector<1x8x8x384xbf16> to vector<8x8x384xbf16>
      %57 = vector.shape_cast %54 : vector<8x8x384xbf16> to vector<1x8x8x384xbf16>
      tpu.vector_store %arg8[%c2, %c1, %c0_30, %c0_31], %57 {strides = array<i32>} : memref<3x10x8x384xbf16, #tpu.memory_space<vmem>>, vector<1x8x8x384xbf16>,
    } else {
    }
    %c1_i32_28 = arith.constant 1 : i32
    %51 = arith.cmpi sge, %arg1, %c1_i32_28 : i32
    %52 = arith.extui %51 : i1 to i32
    %c0_i32_29 = arith.constant 0 : i32
    %53 = arith.cmpi ne, %52, %c0_i32_29 : i32
    scf.if %53 {
      %c0_30 = arith.constant 0 : index
      %c0_31 = arith.constant 0 : index
      %54 = vector.load %arg4[%c0_30, %c0_31] : memref<1x128xf32, #tpu.memory_space<vmem>>, vector<1x128xf32>
      %c0_32 = arith.constant 0 : index
      %c0_33 = arith.constant 0 : index
      %55 = vector.load %arg5[%c0_32, %c0_33] : memref<1x128xf32, #tpu.memory_space<vmem>>, vector<1x128xf32>
      %cst = arith.constant 0.000000e+00 : f32
      %56 = vector.broadcast %cst : f32 to vector<64x128xf32>
      %c1_i32_34 = arith.constant 1 : i32
      %57 = arith.addi %arg1, %c1_i32_34 : i32
      %c0_i32_35 = arith.constant 0 : i32
      %58 = arith.addi %57, %c0_i32_35 : i32
      %c3_i32_36 = arith.constant 3 : i32
      %c0_i32_37 = arith.constant 0 : i32
      %59 = arith.cmpi eq, %c3_i32_36, %c0_i32_37 : i32
      %c1_i32_38 = arith.constant 1 : i32
      %60 = arith.select %59, %c1_i32_38, %c3_i32_36 : i32
      %61 = arith.remsi %58, %60 : i32
      %c0_i32_39 = arith.constant 0 : i32
      %62 = arith.cmpi ne, %61, %c0_i32_39 : i32
      %c0_i32_40 = arith.constant 0 : i32
      %63 = arith.cmpi slt, %61, %c0_i32_40 : i32
      %c0_i32_41 = arith.constant 0 : i32
      %64 = arith.cmpi slt, %60, %c0_i32_41 : i32
      %65 = arith.xori %63, %64 : i1
      %66 = arith.andi %65, %62 : i1
      %67 = arith.addi %61, %60 : i32
      %68 = arith.select %66, %67, %61 : i32
      %69 = arith.index_cast %68 : i32 to index
      %c0_42 = arith.constant 0 : index
      %c0_43 = arith.constant 0 : index
      %c0_44 = arith.constant 0 : index
      %70 = vector.load %arg8[%69, %c0_42, %c0_43, %c0_44] : memref<3x10x8x384xbf16, #tpu.memory_space<vmem>>, vector<1x8x8x384xbf16>
      %71 = vector.shape_cast %70 : vector<1x8x8x384xbf16> to vector<8x8x384xbf16>
      %72 = vector.shape_cast %71 : vector<8x8x384xbf16> to vector<64x384xbf16>
      %c0_45 = arith.constant 0 : index
      %c0_46 = arith.constant 0 : index
      %c0_47 = arith.constant 0 : index
      %73 = vector.load %arg3[%c0_45, %c0_46, %c0_47] : memref<9x384x128xbf16, #tpu.memory_space<vmem>>, vector<1x384x128xbf16>
      %74 = vector.shape_cast %73 : vector<1x384x128xbf16> to vector<384x128xbf16>
      %cst_48 = arith.constant dense<0.000000e+00> : vector<64x128xf32>
      %75 = tpu.matmul %72, %74, %cst_48 {dimension_numbers = #tpu.dot_dimension_numbers<[1], [0], [0], [1], [0, 0, 1, 1], [], []>} : vector<64x384xbf16>, vector<384x128xbf16>, vector<64x128xf32> -> vector<64x128xf32>
      %76 = arith.addf %56, %75 : vector<64x128xf32>
      %77 = arith.index_cast %68 : i32 to index
      %c1 = arith.constant 1 : index
      %c0_49 = arith.constant 0 : index
      %c0_50 = arith.constant 0 : index
      %78 = vector.load %arg8[%77, %c1, %c0_49, %c0_50] : memref<3x10x8x384xbf16, #tpu.memory_space<vmem>>, vector<1x8x8x384xbf16>
      %79 = vector.shape_cast %78 : vector<1x8x8x384xbf16> to vector<8x8x384xbf16>
      %80 = vector.shape_cast %79 : vector<8x8x384xbf16> to vector<64x384xbf16>
      %c1_51 = arith.constant 1 : index
      %c0_52 = arith.constant 0 : index
      %c0_53 = arith.constant 0 : index
      %81 = vector.load %arg3[%c1_51, %c0_52, %c0_53] : memref<9x384x128xbf16, #tpu.memory_space<vmem>>, vector<1x384x128xbf16>
      %82 = vector.shape_cast %81 : vector<1x384x128xbf16> to vector<384x128xbf16>
      %cst_54 = arith.constant dense<0.000000e+00> : vector<64x128xf32>
      %83 = tpu.matmul %80, %82, %cst_54 {dimension_numbers = #tpu.dot_dimension_numbers<[1], [0], [0], [1], [0, 0, 1, 1], [], []>} : vector<64x384xbf16>, vector<384x128xbf16>, vector<64x128xf32> -> vector<64x128xf32>
      %84 = arith.addf %76, %83 : vector<64x128xf32>
      %85 = arith.index_cast %68 : i32 to index
      %c2 = arith.constant 2 : index
      %c0_55 = arith.constant 0 : index
      %c0_56 = arith.constant 0 : index
      %86 = vector.load %arg8[%85, %c2, %c0_55, %c0_56] : memref<3x10x8x384xbf16, #tpu.memory_space<vmem>>, vector<1x8x8x384xbf16>
      %87 = vector.shape_cast %86 : vector<1x8x8x384xbf16> to vector<8x8x384xbf16>
      %88 = vector.shape_cast %87 : vector<8x8x384xbf16> to vector<64x384xbf16>
      %c2_57 = arith.constant 2 : index
      %c0_58 = arith.constant 0 : index
      %c0_59 = arith.constant 0 : index
      %89 = vector.load %arg3[%c2_57, %c0_58, %c0_59] : memref<9x384x128xbf16, #tpu.memory_space<vmem>>, vector<1x384x128xbf16>
      %90 = vector.shape_cast %89 : vector<1x384x128xbf16> to vector<384x128xbf16>
      %cst_60 = arith.constant dense<0.000000e+00> : vector<64x128xf32>
      %91 = tpu.matmul %88, %90, %cst_60 {dimension_numbers = #tpu.dot_dimension_numbers<[1], [0], [0], [1], [0, 0, 1, 1], [], []>} : vector<64x384xbf16>, vector<384x128xbf16>, vector<64x128xf32> -> vector<64x128xf32>
      %92 = arith.addf %84, %91 : vector<64x128xf32>
      %c1_i32_61 = arith.constant 1 : i32
      %93 = arith.addi %arg1, %c1_i32_61 : i32
      %c1_i32_62 = arith.constant 1 : i32
      %94 = arith.addi %93, %c1_i32_62 : i32
      %c3_i32_63 = arith.constant 3 : i32
      %c0_i32_64 = arith.constant 0 : i32
      %95 = arith.cmpi eq, %c3_i32_63, %c0_i32_64 : i32
      %c1_i32_65 = arith.constant 1 : i32
      %96 = arith.select %95, %c1_i32_65, %c3_i32_63 : i32
      %97 = arith.remsi %94, %96 : i32
      %c0_i32_66 = arith.constant 0 : i32
      %98 = arith.cmpi ne, %97, %c0_i32_66 : i32
      %c0_i32_67 = arith.constant 0 : i32
      %99 = arith.cmpi slt, %97, %c0_i32_67 : i32
      %c0_i32_68 = arith.constant 0 : i32
      %100 = arith.cmpi slt, %96, %c0_i32_68 : i32
      %101 = arith.xori %99, %100 : i1
      %102 = arith.andi %101, %98 : i1
      %103 = arith.addi %97, %96 : i32
      %104 = arith.select %102, %103, %97 : i32
      %105 = arith.index_cast %104 : i32 to index
      %c0_69 = arith.constant 0 : index
      %c0_70 = arith.constant 0 : index
      %c0_71 = arith.constant 0 : index
      %106 = vector.load %arg8[%105, %c0_69, %c0_70, %c0_71] : memref<3x10x8x384xbf16, #tpu.memory_space<vmem>>, vector<1x8x8x384xbf16>
      %107 = vector.shape_cast %106 : vector<1x8x8x384xbf16> to vector<8x8x384xbf16>
      %108 = vector.shape_cast %107 : vector<8x8x384xbf16> to vector<64x384xbf16>
      %c3 = arith.constant 3 : index
      %c0_72 = arith.constant 0 : index
      %c0_73 = arith.constant 0 : index
      %109 = vector.load %arg3[%c3, %c0_72, %c0_73] : memref<9x384x128xbf16, #tpu.memory_space<vmem>>, vector<1x384x128xbf16>
      %110 = vector.shape_cast %109 : vector<1x384x128xbf16> to vector<384x128xbf16>
      %cst_74 = arith.constant dense<0.000000e+00> : vector<64x128xf32>
      %111 = tpu.matmul %108, %110, %cst_74 {dimension_numbers = #tpu.dot_dimension_numbers<[1], [0], [0], [1], [0, 0, 1, 1], [], []>} : vector<64x384xbf16>, vector<384x128xbf16>, vector<64x128xf32> -> vector<64x128xf32>
      %112 = arith.addf %92, %111 : vector<64x128xf32>
      %113 = arith.index_cast %104 : i32 to index
      %c1_75 = arith.constant 1 : index
      %c0_76 = arith.constant 0 : index
      %c0_77 = arith.constant 0 : index
      %114 = vector.load %arg8[%113, %c1_75, %c0_76, %c0_77] : memref<3x10x8x384xbf16, #tpu.memory_space<vmem>>, vector<1x8x8x384xbf16>
      %115 = vector.shape_cast %114 : vector<1x8x8x384xbf16> to vector<8x8x384xbf16>
      %116 = vector.shape_cast %115 : vector<8x8x384xbf16> to vector<64x384xbf16>
      %c4 = arith.constant 4 : index
      %c0_78 = arith.constant 0 : index
      %c0_79 = arith.constant 0 : index
      %117 = vector.load %arg3[%c4, %c0_78, %c0_79] : memref<9x384x128xbf16, #tpu.memory_space<vmem>>, vector<1x384x128xbf16>
      %118 = vector.shape_cast %117 : vector<1x384x128xbf16> to vector<384x128xbf16>
      %cst_80 = arith.constant dense<0.000000e+00> : vector<64x128xf32>
      %119 = tpu.matmul %116, %118, %cst_80 {dimension_numbers = #tpu.dot_dimension_numbers<[1], [0], [0], [1], [0, 0, 1, 1], [], []>} : vector<64x384xbf16>, vector<384x128xbf16>, vector<64x128xf32> -> vector<64x128xf32>
      %120 = arith.addf %112, %119 : vector<64x128xf32>
      %121 = arith.index_cast %104 : i32 to index
      %c2_81 = arith.constant 2 : index
      %c0_82 = arith.constant 0 : index
      %c0_83 = arith.constant 0 : index
      %122 = vector.load %arg8[%121, %c2_81, %c0_82, %c0_83] : memref<3x10x8x384xbf16, #tpu.memory_space<vmem>>, vector<1x8x8x384xbf16>
      %123 = vector.shape_cast %122 : vector<1x8x8x384xbf16> to vector<8x8x384xbf16>
      %124 = vector.shape_cast %123 : vector<8x8x384xbf16> to vector<64x384xbf16>
      %c5 = arith.constant 5 : index
      %c0_84 = arith.constant 0 : index
      %c0_85 = arith.constant 0 : index
      %125 = vector.load %arg3[%c5, %c0_84, %c0_85] : memref<9x384x128xbf16, #tpu.memory_space<vmem>>, vector<1x384x128xbf16>
      %126 = vector.shape_cast %125 : vector<1x384x128xbf16> to vector<384x128xbf16>
      %cst_86 = arith.constant dense<0.000000e+00> : vector<64x128xf32>
      %127 = tpu.matmul %124, %126, %cst_86 {dimension_numbers = #tpu.dot_dimension_numbers<[1], [0], [0], [1], [0, 0, 1, 1], [], []>} : vector<64x384xbf16>, vector<384x128xbf16>, vector<64x128xf32> -> vector<64x128xf32>
      %128 = arith.addf %120, %127 : vector<64x128xf32>
      %c1_i32_87 = arith.constant 1 : i32
      %129 = arith.addi %arg1, %c1_i32_87 : i32
      %c2_i32_88 = arith.constant 2 : i32
      %130 = arith.addi %129, %c2_i32_88 : i32
      %c3_i32_89 = arith.constant 3 : i32
      %c0_i32_90 = arith.constant 0 : i32
      %131 = arith.cmpi eq, %c3_i32_89, %c0_i32_90 : i32
      %c1_i32_91 = arith.constant 1 : i32
      %132 = arith.select %131, %c1_i32_91, %c3_i32_89 : i32
      %133 = arith.remsi %130, %132 : i32
      %c0_i32_92 = arith.constant 0 : i32
      %134 = arith.cmpi ne, %133, %c0_i32_92 : i32
      %c0_i32_93 = arith.constant 0 : i32
      %135 = arith.cmpi slt, %133, %c0_i32_93 : i32
      %c0_i32_94 = arith.constant 0 : i32
      %136 = arith.cmpi slt, %132, %c0_i32_94 : i32
      %137 = arith.xori %135, %136 : i1
      %138 = arith.andi %137, %134 : i1
      %139 = arith.addi %133, %132 : i32
      %140 = arith.select %138, %139, %133 : i32
      %141 = arith.index_cast %140 : i32 to index
      %c0_95 = arith.constant 0 : index
      %c0_96 = arith.constant 0 : index
      %c0_97 = arith.constant 0 : index
      %142 = vector.load %arg8[%141, %c0_95, %c0_96, %c0_97] : memref<3x10x8x384xbf16, #tpu.memory_space<vmem>>, vector<1x8x8x384xbf16>
      %143 = vector.shape_cast %142 : vector<1x8x8x384xbf16> to vector<8x8x384xbf16>
      %144 = vector.shape_cast %143 : vector<8x8x384xbf16> to vector<64x384xbf16>
      %c6 = arith.constant 6 : index
      %c0_98 = arith.constant 0 : index
      %c0_99 = arith.constant 0 : index
      %145 = vector.load %arg3[%c6, %c0_98, %c0_99] : memref<9x384x128xbf16, #tpu.memory_space<vmem>>, vector<1x384x128xbf16>
      %146 = vector.shape_cast %145 : vector<1x384x128xbf16> to vector<384x128xbf16>
      %cst_100 = arith.constant dense<0.000000e+00> : vector<64x128xf32>
      %147 = tpu.matmul %144, %146, %cst_100 {dimension_numbers = #tpu.dot_dimension_numbers<[1], [0], [0], [1], [0, 0, 1, 1], [], []>} : vector<64x384xbf16>, vector<384x128xbf16>, vector<64x128xf32> -> vector<64x128xf32>
      %148 = arith.addf %128, %147 : vector<64x128xf32>
      %149 = arith.index_cast %140 : i32 to index
      %c1_101 = arith.constant 1 : index
      %c0_102 = arith.constant 0 : index
      %c0_103 = arith.constant 0 : index
      %150 = vector.load %arg8[%149, %c1_101, %c0_102, %c0_103] : memref<3x10x8x384xbf16, #tpu.memory_space<vmem>>, vector<1x8x8x384xbf16>
      %151 = vector.shape_cast %150 : vector<1x8x8x384xbf16> to vector<8x8x384xbf16>
      %152 = vector.shape_cast %151 : vector<8x8x384xbf16> to vector<64x384xbf16>
      %c7 = arith.constant 7 : index
      %c0_104 = arith.constant 0 : index
      %c0_105 = arith.constant 0 : index
      %153 = vector.load %arg3[%c7, %c0_104, %c0_105] : memref<9x384x128xbf16, #tpu.memory_space<vmem>>, vector<1x384x128xbf16>
      %154 = vector.shape_cast %153 : vector<1x384x128xbf16> to vector<384x128xbf16>
      %cst_106 = arith.constant dense<0.000000e+00> : vector<64x128xf32>
      %155 = tpu.matmul %152, %154, %cst_106 {dimension_numbers = #tpu.dot_dimension_numbers<[1], [0], [0], [1], [0, 0, 1, 1], [], []>} : vector<64x384xbf16>, vector<384x128xbf16>, vector<64x128xf32> -> vector<64x128xf32>
      %156 = arith.addf %148, %155 : vector<64x128xf32>
      %157 = arith.index_cast %140 : i32 to index
      %c2_107 = arith.constant 2 : index
      %c0_108 = arith.constant 0 : index
      %c0_109 = arith.constant 0 : index
      %158 = vector.load %arg8[%157, %c2_107, %c0_108, %c0_109] : memref<3x10x8x384xbf16, #tpu.memory_space<vmem>>, vector<1x8x8x384xbf16>
      %159 = vector.shape_cast %158 : vector<1x8x8x384xbf16> to vector<8x8x384xbf16>
      %160 = vector.shape_cast %159 : vector<8x8x384xbf16> to vector<64x384xbf16>
      %c8 = arith.constant 8 : index
      %c0_110 = arith.constant 0 : index
      %c0_111 = arith.constant 0 : index
      %161 = vector.load %arg3[%c8, %c0_110, %c0_111] : memref<9x384x128xbf16, #tpu.memory_space<vmem>>, vector<1x384x128xbf16>
      %162 = vector.shape_cast %161 : vector<1x384x128xbf16> to vector<384x128xbf16>
      %cst_112 = arith.constant dense<0.000000e+00> : vector<64x128xf32>
      %163 = tpu.matmul %160, %162, %cst_112 {dimension_numbers = #tpu.dot_dimension_numbers<[1], [0], [0], [1], [0, 0, 1, 1], [], []>} : vector<64x384xbf16>, vector<384x128xbf16>, vector<64x128xf32> -> vector<64x128xf32>
      %164 = arith.addf %156, %163 : vector<64x128xf32>
      %165 = vector.broadcast %54 : vector<1x128xf32> to vector<64x128xf32>
      %166 = arith.mulf %164, %165 : vector<64x128xf32>
      %167 = vector.broadcast %55 : vector<1x128xf32> to vector<64x128xf32>
      %168 = arith.addf %166, %167 : vector<64x128xf32>
      %c0_113 = arith.constant 0 : index
      %c0_114 = arith.constant 0 : index
      %c0_115 = arith.constant 0 : index
      %c0_116 = arith.constant 0 : index
      %c0_117 = arith.constant 0 : index
      %169 = vector.load %arg6[%c0_113, %c0_114, %c0_115, %c0_116, %c0_117] : memref<1x1x8x8x128xbf16, #tpu.memory_space<vmem>>, vector<1x1x8x8x128xbf16>
      %170 = vector.shape_cast %169 : vector<1x1x8x8x128xbf16> to vector<8x8x128xbf16>
      %171 = vector.shape_cast %170 : vector<8x8x128xbf16> to vector<64x128xbf16>
      %172 = arith.extf %171 : vector<64x128xbf16> to vector<64x128xf32>
      %173 = arith.addf %168, %172 : vector<64x128xf32>
      %cst_118 = arith.constant 0.000000e+00 : f32
      %174 = vector.broadcast %cst_118 : f32 to vector<64x128xf32>
      %175 = arith.maximumf %173, %174 : vector<64x128xf32>
      %176 = vector.shape_cast %175 : vector<64x128xf32> to vector<8x8x128xf32>
      %177 = arith.truncf %176 : vector<8x8x128xf32> to vector<8x8x128xbf16>
      %c0_119 = arith.constant 0 : index
      %c0_120 = arith.constant 0 : index
      %c0_121 = arith.constant 0 : index
      %c0_122 = arith.constant 0 : index
      %c0_123 = arith.constant 0 : index
      %178 = vector.load %arg7[%c0_119, %c0_120, %c0_121, %c0_122, %c0_123] : memref<1x1x8x8x128xbf16, #tpu.memory_space<vmem>>, vector<1x1x8x8x128xbf16>
      %179 = vector.shape_cast %178 : vector<1x1x8x8x128xbf16> to vector<8x8x128xbf16>
      %180 = vector.shape_cast %177 : vector<8x8x128xbf16> to vector<1x1x8x8x128xbf16>
      tpu.vector_store %arg7[%c0_119, %c0_120, %c0_121, %c0_122, %c0_123], %180 {strides = array<i32>} : memref<1x1x8x8x128xbf16, #tpu.memory_space<vmem>>, vector<1x1x8x8x128xbf16>,
    } else {
    }
    return
  }
  func.func @transform_0(%arg0: i32, %arg1: i32) -> (i32, i32, i32, i32, i32) {
    %c7_i32 = arith.constant 7 : i32
    %0 = arith.minsi %arg1, %c7_i32 : i32
    %c0_i32 = arith.constant 0 : i32
    %c0_i32_0 = arith.constant 0 : i32
    %c0_i32_1 = arith.constant 0 : i32
    %c0_i32_2 = arith.constant 0 : i32
    return %arg0, %0, %c0_i32, %c0_i32_0, %c0_i32_1 : i32, i32, i32, i32, i32
  }
  func.func @transform_1(%arg0: i32, %arg1: i32) -> (i32, i32, i32) {
    %c0_i32 = arith.constant 0 : i32
    %c0_i32_0 = arith.constant 0 : i32
    %c0_i32_1 = arith.constant 0 : i32
    %c0_i32_2 = arith.constant 0 : i32
    return %c0_i32, %c0_i32_0, %c0_i32_1 : i32, i32, i32
  }
  func.func @transform_2(%arg0: i32, %arg1: i32) -> (i32, i32) {
    %c0_i32 = arith.constant 0 : i32
    %c0_i32_0 = arith.constant 0 : i32
    %c0_i32_1 = arith.constant 0 : i32
    return %c0_i32, %c0_i32_0 : i32, i32
  }
  func.func @transform_3(%arg0: i32, %arg1: i32) -> (i32, i32) {
    %c0_i32 = arith.constant 0 : i32
    %c0_i32_0 = arith.constant 0 : i32
    %c0_i32_1 = arith.constant 0 : i32
    return %c0_i32, %c0_i32_0 : i32, i32
  }
  func.func @transform_4(%arg0: i32, %arg1: i32) -> (i32, i32, i32, i32, i32) {
    %c1_i32 = arith.constant 1 : i32
    %0 = arith.subi %arg1, %c1_i32 : i32
    %c0_i32 = arith.constant 0 : i32
    %1 = arith.maxsi %0, %c0_i32 : i32
    %c0_i32_0 = arith.constant 0 : i32
    %c0_i32_1 = arith.constant 0 : i32
    %c0_i32_2 = arith.constant 0 : i32
    %c0_i32_3 = arith.constant 0 : i32
    return %arg0, %1, %c0_i32_0, %c0_i32_1, %c0_i32_2 : i32, i32, i32, i32, i32
  }
  func.func @transform_5(%arg0: i32, %arg1: i32) -> (i32, i32, i32, i32, i32) {
    %c1_i32 = arith.constant 1 : i32
    %0 = arith.subi %arg1, %c1_i32 : i32
    %c0_i32 = arith.constant 0 : i32
    %1 = arith.maxsi %0, %c0_i32 : i32
    %c0_i32_0 = arith.constant 0 : i32
    %c0_i32_1 = arith.constant 0 : i32
    %c0_i32_2 = arith.constant 0 : i32
    %c0_i32_3 = arith.constant 0 : i32
    return %arg0, %1, %c0_i32_0, %c0_i32_1, %c0_i32_2 : i32, i32, i32, i32, i32
  }
}

</mosaic_0001>

<bundles_post_ra>
// kernel: basic_block_forward.3
= control target key start
LH: loop header
LB: loop body
LE: loop exit
PB: predicated region body
PF: predicated region fallthrough
CT: control target
= control target key end

     0   :  { %s7119_s18 = smov 0   ;;  %s7121_s19 = smov 0   ;;  %s8461_s0 = inlined_call_operand.vmem [shape: bf16[2,8,8,8,128], index: 0, kind: input, shape index: {}]   ;;  %s8462_s1 = inlined_call_operand.vmem [shape: bf16[9,384,128], index: 1, kind: input, shape index: {}]   ;;  %s8463_s2 = inlined_call_operand.vmem [shape: f32[1,128], index: 2, kind: input, shape index: {}]   ;;  %s8464_s3 = inlined_call_operand.vmem [shape: f32[1,128], index: 3, kind: input, shape index: {}]   ;;  %s8465_s4 = inlined_call_operand.vmem [shape: bf16[2,8,8,8,128], index: 4, kind: input, shape index: {}]   ;;  %s8466_s5 = inlined_call_operand.vmem [shape: bf16[2,8,8,8,128], index: 5, kind: output, shape index: {}]  }
   0x1   :  { %s7123_s20 = smov 0   ;;  %s7125_s21 = smov 0  }
   0x2   :  { %s7127_s22 = smov 0  }
   0x3 LB: > { %s24_s23 = sadd.s32 1, %s7077_s20  ;;  %s27_s24 = sadd.s32 1, %s7081_s21  ;;  %s7085_s22 = sphi %s7127_s22, %s15_s22   ;;  %s7081_s21 = sphi %s7125_s21, %s8482_s21   ;;  %s7077_s20 = sphi %s7123_s20, %s8481_s20   ;;  %s7073_s19 = sphi %s7121_s19, %s8480_s19   ;;  %s7069_s18 = sphi %s7119_s18, %s8479_s18  }
   0x4   : > { %p25_p0 = scmp.ge.s32.totalorder %s24_s23, 9  ;;  %p4963_p1 = scmp.ge.s32.totalorder %s7085_s22, 1 }
   0x5   : > { %p249_p2 = scmp.lt.s32.totalorder %s7085_s22, 19 }
   0x6   : > { %s8484_s23 = smov (%p25_p0, %s24_s23), 0  ;;  %s8486_s24 = smov (!%p25_p0, %s27_s24), %s7081_s21 }
   0x7   : > { %p250_p3 = pnand %p4963_p1, %p249_p2  ;;  %p29_p4 = scmp.ge.s32.totalorder %s8486_s24, 2 }
   0x8   : > { %p302_p5 = scmp.lt.s32.totalorder (!%p250_p3), %s7069_s18, 7  ;;  %p304_p6 = scmp.lt.s32.totalorder (!%p250_p3), %s7073_s19, 1 }
   0x9   : > { %s8488_s24 = smov (%p29_p4, %s8486_s24), 0  ;;  %253 = sbr.rel (%p250_p3) target bundleno = 718 (0x2ce), region = 40 }
   0xa   : > { %s4970_s25 = sadd.s32 (!%p250_p3), 4294967295, %s7069_s18  ;;  %p4988_p9 = scmp.ne.s32.totalorder (!%p250_p3), %s7069_s18, 0 }
   0xb   : > { %p316_p7 = scmp.gt.s32.totalorder (!%p250_p3), %s4970_s25, 0  ;;  %p4971_p8 = scmp.lt.s32.totalorder (!%p250_p3), %s4970_s25, 7 }
  0x10   : > { %s303_s26 = scalar_select %p302_p5, %s7069_s18, 7 }
  0x11   : > { %s8490_s19 = smov (!%p304_p6, %s7073_s19), 1  ;;  %s8494_s25 = smov (!%p316_p7, %s4970_s25), 0 }
  0x12   : > { %s8492_s26 = smov (!%p302_p5, %s303_s26), 7  ;;  %s4968_s27 = sshll.u32 %s8490_s19, 6  ;;  %v7087_v0 = vmov (!%p4988_p9), 0  }
  0x13   : > { %s4967_s28 = sshll.u32 %s8492_s26, 3  ;;  %s8496_s25 = smov (!%p4971_p8, %s8494_s25), 7  ;;  %350 = vst [vmem:[#allocation2] sm:$0xff] (!%p4988_p9), %v7087_v0  ;;  %351 = vst [vmem:[#allocation2 + $0x8] sm:$0xf] (!%p4988_p9), %v7087_v0 }
  0x14   : > { %s310_s29 = sadd.s32 %s4968_s27, %s4967_s28  ;;  %s4976_s9 = sshll.u32 %s8496_s25, 3  ;;  %352 = vst [vmem:[#allocation2 + $0xc] sm:$0xff] (!%p4988_p9), %v7087_v0  ;;  %353 = vst [vmem:[#allocation2 + $0x14] sm:$0xf] (!%p4988_p9), %v7087_v0 }
  0x15   : > { %s4969_s30 = sshll.u32 %s310_s29, 2  ;;  %s324_s10 = sadd.s32 %s4976_s9, %s4968_s27  ;;  %354 = vst [vmem:[#allocation2 + $0x18] sm:$0xff] (!%p4988_p9), %v7087_v0  ;;  %355 = vst [vmem:[#allocation2 + $0x20] sm:$0xf] (!%p4988_p9), %v7087_v0 }
  0x16   : > { %s7157_s8 = scalar_lea.vmem %s8461_s0, %s4969_s30  ;;  %s4978_s11 = sshll.u32 %s324_s10, 2  ;;  %356 = vst [vmem:[#allocation2 + $0x24] sm:$0xff] (!%p4988_p9), %v7087_v0  ;;  %357 = vst [vmem:[#allocation2 + $0x2c] sm:$0xf] (!%p4988_p9), %v7087_v0 }
  0x17   : > { %s7162_s14 = scalar_lea.vmem %s8465_s4, %s4978_s11  ;;  %s7167_s17 = scalar_lea.vmem %s8466_s5, %s4978_s11  ;;  %358 = vst [vmem:[#allocation2 + $0x30] sm:$0xff] (!%p4988_p9), %v7087_v0  ;;  %359 = vst [vmem:[#allocation2 + $0x38] sm:$0xf] (!%p4988_p9), %v7087_v0 }
  0x18   : > { %349 = sbr.rel (%p4988_p9) target bundleno = 49 (0x31), region = 44  ;;  %360 = vst [vmem:[#allocation2 + $0x3c] sm:$0xff] (!%p4988_p9), %v7087_v0  ;;  %361 = vst [vmem:[#allocation2 + $0x44] sm:$0xf] (!%p4988_p9), %v7087_v0 }
  0x19   : > { %362 = vst [vmem:[#allocation2 + $0x48] sm:$0xff] (!%p4988_p9), %v7087_v0  ;;  %363 = vst [vmem:[#allocation2 + $0x50] sm:$0xf] (!%p4988_p9), %v7087_v0 }
  0x1a   : > { %364 = vst [vmem:[#allocation2 + $0x54] sm:$0xff] (!%p4988_p9), %v7087_v0  ;;  %365 = vst [vmem:[#allocation2 + $0x5c] sm:$0xf] (!%p4988_p9), %v7087_v0 }
  0x1b   : > { %366 = vst [vmem:[#allocation2 + $0x60] sm:$0xff] (!%p4988_p9), %v7087_v0  ;;  %367 = vst [vmem:[#allocation2 + $0x68] sm:$0xf] (!%p4988_p9), %v7087_v0 }
  0x1c   : > { %368 = vst [vmem:[#allocation2 + $0x6c] sm:$0xff] (!%p4988_p9), %v7087_v0  ;;  %369 = vst [vmem:[#allocation2 + $0x74] sm:$0xf] (!%p4988_p9), %v7087_v0 }
  0x1d   : > { %370 = vst [vmem:[#allocation2 + $0x78] sm:$0xff] (!%p4988_p9), %v7087_v0  ;;  %371 = vst [vmem:[#allocation2 + $0x80] sm:$0xf] (!%p4988_p9), %v7087_v0 }
  0x1e   : > { %372 = vst [vmem:[#allocation2 + $0x84] sm:$0xff] (!%p4988_p9), %v7087_v0  ;;  %373 = vst [vmem:[#allocation2 + $0x8c] sm:$0xf] (!%p4988_p9), %v7087_v0 }
  0x1f   : > { %374 = vst [vmem:[#allocation2 + $0x90] sm:$0xff] %v7087_v0  ;;  %375 = vst [vmem:[#allocation2 + $0x98] sm:$0xf] %v7087_v0 }
  0x20   : > { %376 = vst [vmem:[#allocation2 + $0x9c] sm:$0xff] %v7087_v0  ;;  %377 = vst [vmem:[#allocation2 + $0xa4] sm:$0xf] %v7087_v0 }
  0x21   : > { %378 = vst [vmem:[#allocation2 + $0xa8] sm:$0xff] %v7087_v0  ;;  %379 = vst [vmem:[#allocation2 + $0xb0] sm:$0xf] %v7087_v0 }
  0x22   : > { %380 = vst [vmem:[#allocation2 + $0xb4] sm:$0xff] %v7087_v0  ;;  %381 = vst [vmem:[#allocation2 + $0xbc] sm:$0xf] %v7087_v0 }
  0x23   : > { %382 = vst [vmem:[#allocation2 + $0xc0] sm:$0xff] %v7087_v0  ;;  %383 = vst [vmem:[#allocation2 + $0xc8] sm:$0xf] %v7087_v0 }
  0x24   : > { %384 = vst [vmem:[#allocation2 + $0xcc] sm:$0xff] %v7087_v0  ;;  %385 = vst [vmem:[#allocation2 + $0xd4] sm:$0xf] %v7087_v0 }
  0x25   : > { %386 = vst [vmem:[#allocation2 + $0xd8] sm:$0xff] %v7087_v0  ;;  %387 = vst [vmem:[#allocation2 + $0xe0] sm:$0xf] %v7087_v0 }
  0x26   : > { %388 = vst [vmem:[#allocation2 + $0xe4] sm:$0xff] %v7087_v0  ;;  %389 = vst [vmem:[#allocation2 + $0xec] sm:$0xf] %v7087_v0 }
  0x27   : > { %390 = vst [vmem:[#allocation2 + $0xf0] sm:$0xff] %v7087_v0  ;;  %391 = vst [vmem:[#allocation2 + $0xf8] sm:$0xf] %v7087_v0 }
  0x28   : > { %392 = vst [vmem:[#allocation2 + $0xfc] sm:$0xff] %v7087_v0  ;;  %393 = vst [vmem:[#allocation2 + $0x104] sm:$0xf] %v7087_v0 }
  0x29   : > { %394 = vst [vmem:[#allocation2 + $0x108] sm:$0xff] %v7087_v0  ;;  %395 = vst [vmem:[#allocation2 + $0x110] sm:$0xf] %v7087_v0 }
  0x2a   : > { %396 = vst [vmem:[#allocation2 + $0x114] sm:$0xff] %v7087_v0  ;;  %397 = vst [vmem:[#allocation2 + $0x11c] sm:$0xf] %v7087_v0 }
  0x2b   : > { %398 = vst [vmem:[#allocation2 + $0x120] sm:$0xff] %v7087_v0  ;;  %399 = vst [vmem:[#allocation2 + $0x128] sm:$0xf] %v7087_v0 }
  0x2c   : > { %400 = vst [vmem:[#allocation2 + $0x12c] sm:$0xff] %v7087_v0  ;;  %401 = vst [vmem:[#allocation2 + $0x134] sm:$0xf] %v7087_v0 }
  0x2d   : > { %402 = vst [vmem:[#allocation2 + $0x138] sm:$0xff] %v7087_v0  ;;  %403 = vst [vmem:[#allocation2 + $0x140] sm:$0xf] %v7087_v0 }
  0x2e   : > { %404 = vst [vmem:[#allocation2 + $0x144] sm:$0xff] %v7087_v0  ;;  %405 = vst [vmem:[#allocation2 + $0x14c] sm:$0xf] %v7087_v0 }
  0x2f   : > { %406 = vst [vmem:[#allocation2 + $0x150] sm:$0xff] %v7087_v0  ;;  %407 = vst [vmem:[#allocation2 + $0x158] sm:$0xf] %v7087_v0 }
  0x30   : > { %408 = vst [vmem:[#allocation2 + $0x15c] sm:$0xff] %v7087_v0  ;;  %409 = vst [vmem:[#allocation2 + $0x164] sm:$0xf] %v7087_v0 }
  0x31 PF: > { %v7171_v1 = vld [vmem:[%s7157_s8] sm:$0xf]  ;;  %v7174_v2 = vld [vmem:[%s7157_s8 + $0x4] sm:$0xf]  ;;  %v7177_v3 = vld [vmem:[%s7157_s8 + $0x8] sm:$0xf] }
  0x32   : > { %v7180_v4 = vld [vmem:[%s7157_s8 + $0xc] sm:$0xf]  ;;  %v7183_v5 = vld [vmem:[%s7157_s8 + $0x10] sm:$0xf]  ;;  %v7186_v6 = vld [vmem:[%s7157_s8 + $0x14] sm:$0xf] }
  0x33   : > { %v7189_v7 = vld [vmem:[%s7157_s8 + $0x18] sm:$0xf]  ;;  %v7192_v8 = vld [vmem:[%s7157_s8 + $0x1c] sm:$0xf]  ;;  %s420_s19 = ssub.s32 0, %s7069_s18  ;;  %p419_p10 = scmp.lt.s32.totalorder %s7069_s18, 0 }
  0x34   : > { %s4989_s25 = smin.u32 %s7069_s18, %s420_s19  ;;  %p418_p12 = scmp.lt.s32.totalorder %s7069_s18, 8 }
  0x35   : > { %6733 = sdivrem.u32 %s4989_s25, 3 }
  0x3e   : > { %s6734_s26 = spop.drf %6733 }
  0x3f   : > { %s424_s27 = ssub.s32 0, %s6734_s26 }
  0x40   : > { %s8498_s27 = smov (!%p419_p10, %s424_s27), %s6734_s26 }
  0x41   : > { %p4991_p11 = scmp.lt.s32.totalorder %s8498_s27, 0  ;;  %s430_s28 = sadd.s32 3, %s8498_s27 }
  0x43   : > { %s8500_s28 = smov (!%p4991_p11, %s430_s28), %s8498_s27 }
  0x44   : > { %p432_p13 = scmp.eq.s32.totalorder %s8500_s28, 0 }
  0x46   : > { %p433_p0 = pnand %p432_p13, %p418_p12 }
  0x47   : > { %438 = vst [vmem:[#allocation2 + $0x10] sm:$0xf] (!%p433_p0), %v7171_v1  ;;  %439 = vst [vmem:[#allocation2 + $0x1c] sm:$0xf] (!%p433_p0), %v7174_v2  ;;  %v447_v9 = vshrl.u32 (!%p433_p0), %v7171_v1, 16  ;;  %vm510_vm0 = vcmask (!%p433_p0), 1043456  }
  0x48   : > { %436 = sbr.rel (%p433_p0) target bundleno = 99 (0x63), region = 48  ;;  %440 = vst [vmem:[#allocation2 + $0x28] sm:$0xf] (!%p433_p0), %v7177_v3  ;;  %441 = vst [vmem:[#allocation2 + $0x34] sm:$0xf] (!%p433_p0), %v7180_v4  ;;  %v450_v10 = vshll.u32 (!%p433_p0), %v7171_v1, 16 }
  0x49   : > { %442 = vst [vmem:[#allocation2 + $0x40] sm:$0xf] (!%p433_p0), %v7183_v5  ;;  %443 = vst [vmem:[#allocation2 + $0x4c] sm:$0xf] (!%p433_p0), %v7186_v6  ;;  %vm511_vm1 = vsmask.f32 (!%p433_p0), 7938 }
  0x4a   : > { %444 = vst [vmem:[#allocation2 + $0x58] sm:$0xf] (!%p433_p0), %v7189_v7  ;;  %445 = vst [vmem:[#allocation2 + $0x64] sm:$0xf] (!%p433_p0), %v7192_v8  ;;  %v454_v11 = vshrl.u32 (!%p433_p0), %v7174_v2, 16  ;;  %v457_v12 = vshll.u32 (!%p433_p0), %v7174_v2, 16 }
  0x4b   : > { %v449_v13 = vrot.slane (!%p433_p0), %v447_v9, 7  ;;  %v513_v14 = vld [vmem:[#allocation2 + $0xc] sm:$0xf] (!%p433_p0)  ;;  %v461_v15 = vshrl.u32 (!%p433_p0), %v7177_v3, 16  ;;  %v464_v16 = vshll.u32 (!%p433_p0), %v7177_v3, 16  ;;  %v468_v17 = vshrl.u32 (!%p433_p0), %v7180_v4, 16  ;;  %vm7219_vm2 = vmand (!%p433_p0), %vm510_vm0, %vm511_vm1 }
  0x4c   : > { %v456_v19 = vrot.slane (!%p433_p0), %v454_v11, 7  ;;  %v516_v20 = vld [vmem:[#allocation2 + $0x18] sm:$0xf] (!%p433_p0)  ;;  %v471_v21 = vshll.u32 (!%p433_p0), %v7180_v4, 16  ;;  %v475_v22 = vshrl.u32 (!%p433_p0), %v7183_v5, 16  ;;  %v478_v23 = vshll.u32 (!%p433_p0), %v7183_v5, 16 }
  0x4d   : > { %v452_v24 = vor.u32 (!%p433_p0), %v450_v10, %v449_v13  ;;  %v463_v25 = vrot.slane (!%p433_p0), %v461_v15, 7  ;;  %v519_v26 = vld [vmem:[#allocation2 + $0x24] sm:$0xf] (!%p433_p0)  ;;  %v470_v27 = vrot.slane (!%p433_p0), %v468_v17, 7  ;;  %v482_v28 = vshrl.u32 (!%p433_p0), %v7186_v6, 16 }
  0x4e   : > { %v459_v29 = vor.u32 (!%p433_p0), %v457_v12, %v456_v19  ;;  %v522_v30 = vld [vmem:[#allocation2 + $0x30] sm:$0xf] (!%p433_p0)  ;;  %v477_v31 = vrot.slane (!%p433_p0), %v475_v22, 7  ;;  %v485_v32 = vshll.u32 (!%p433_p0), %v7186_v6, 16  ;;  %v489_v33 = vshrl.u32 (!%p433_p0), %v7189_v7, 16 }
  0x4f   : > { %v514_v34 = vsel %vm7219_vm2, %v452_v24, %v513_v14  ;;  %v466_v35 = vor.u32 %v464_v16, %v463_v25  ;;  %v473_v36 = vor.u32 %v471_v21, %v470_v27  ;;  %v525_v37 = vld [vmem:[#allocation2 + $0x3c] sm:$0xf]  ;;  %v484_v38 = vrot.slane %v482_v28, 7  ;;  %v528_v41 = vld [vmem:[#allocation2 + $0x48] sm:$0xf] }
  0x50   : > { %515 = vst [vmem:[#allocation2 + $0xc] sm:$0xf] %v514_v34  ;;  %v517_v39 = vsel %vm7219_vm2, %v459_v29, %v516_v20  ;;  %v480_v40 = vor.u32 %v478_v23, %v477_v31  ;;  %v491_v42 = vrot.slane %v489_v33, 7  ;;  %v492_v43 = vshll.u32 %v7189_v7, 16  ;;  %v531_v47 = vld [vmem:[#allocation2 + $0x54] sm:$0xf] }
  0x51   : > { %518 = vst [vmem:[#allocation2 + $0x18] sm:$0xf] %v517_v39  ;;  %v520_v44 = vsel %vm7219_vm2, %v466_v35, %v519_v26  ;;  %v523_v45 = vsel %vm7219_vm2, %v473_v36, %v522_v30  ;;  %v487_v46 = vor.u32 %v485_v32, %v484_v38  ;;  %v496_v48 = vshrl.u32 %v7192_v8, 16  ;;  %v534_v57 = vld [vmem:[#allocation2 + $0x60] sm:$0xf] }
  0x52   : > { %521 = vst [vmem:[#allocation2 + $0x24] sm:$0xf] %v520_v44  ;;  %524 = vst [vmem:[#allocation2 + $0x30] sm:$0xf] %v523_v45  ;;  %v526_v49 = vsel %vm7219_vm2, %v480_v40, %v525_v37  ;;  %v494_v50 = vor.u32 %v492_v43, %v491_v42  ;;  %v499_v51 = vshll.u32 %v7192_v8, 16  ;;  %v537_v52 = vrot.slane %v447_v9, 4 }
  0x53   : > { %527 = vst [vmem:[#allocation2 + $0x3c] sm:$0xf] %v526_v49  ;;  %v529_v53 = vsel %vm7219_vm2, %v487_v46, %v528_v41  ;;  %v498_v54 = vrot.slane %v496_v48, 7  ;;  %v538_v55 = vrot.slane %v450_v10, 5  ;;  %vm577_vm3 = vsmask.f32 3328 }
  0x54   : > { %530 = vst [vmem:[#allocation2 + $0x48] sm:$0xf] %v529_v53  ;;  %v532_v56 = vsel %vm7219_vm2, %v494_v50, %v531_v47  ;;  %v541_v58 = vrot.slane %v454_v11, 4  ;;  %v542_v59 = vrot.slane %v457_v12, 5  ;;  %v545_v60 = vrot.slane %v461_v15, 4  ;;  %vm7247_vm4 = vmand %vm510_vm0, %vm577_vm3 }
  0x55   : > { %533 = vst [vmem:[#allocation2 + $0x54] sm:$0xf] %v532_v56  ;;  %v501_v61 = vor.u32 %v499_v51, %v498_v54  ;;  %v539_v62 = vor.u32 %v538_v55, %v537_v52  ;;  %v546_v63 = vrot.slane %v464_v16, 5  ;;  %v549_v0 = vrot.slane %v468_v17, 4  ;;  %v579_v10 = vld [vmem:[#allocation2 + $0x14] sm:$0xf] }
  0x56   : > { %v543_v13 = vor.u32 %v542_v59, %v541_v58  ;;  %v550_v14 = vrot.slane %v471_v21, 5  ;;  %v553_v19 = vrot.slane %v475_v22, 4  ;;  %v554_v20 = vrot.slane %v478_v23, 5  ;;  %v582_v15 = vld [vmem:[#allocation2 + $0x20] sm:$0xf] }
  0x57   : > { %v535_v11 = vsel %vm7219_vm2, %v501_v61, %v534_v57  ;;  %v540_v12 = vrot.slane %v539_v62, 4  ;;  %v547_v24 = vor.u32 %v546_v63, %v545_v60  ;;  %v557_v25 = vrot.slane %v482_v28, 4  ;;  %v585_v17 = vld [vmem:[#allocation2 + $0x2c] sm:$0xf]  ;;  %v588_v27 = vld [vmem:[#allocation2 + $0x38] sm:$0xf] }
  0x58   : > { %536 = vst [vmem:[#allocation2 + $0x60] sm:$0xf] %v535_v11  ;;  %v544_v16 = vrot.slane %v543_v13, 4  ;;  %v551_v26 = vor.u32 %v550_v14, %v549_v0  ;;  %v555_v29 = vor.u32 %v554_v20, %v553_v19  ;;  %v558_v30 = vrot.slane %v485_v32, 5  ;;  %v591_v22 = vld [vmem:[#allocation2 + $0x44] sm:$0xf] }
  0x59   : > { %v580_v31 = vsel %vm7247_vm4, %v540_v12, %v579_v10  ;;  %v548_v21 = vrot.slane %v547_v24, 4  ;;  %v561_v23 = vrot.slane %v489_v33, 4  ;;  %v562_v34 = vrot.slane %v492_v43, 5  ;;  %v594_v38 = vld [vmem:[#allocation2 + $0x50] sm:$0xf] }
  0x5a   : > { %581 = vst [vmem:[#allocation2 + $0x14] sm:$0xf] %v580_v31  ;;  %v583_v18 = vsel %vm7247_vm4, %v544_v16, %v582_v15  ;;  %v552_v35 = vrot.slane %v551_v26, 4  ;;  %v556_v28 = vrot.slane %v555_v29, 4  ;;  %v559_v36 = vor.u32 %v558_v30, %v557_v25  ;;  %v597_v43 = vld [vmem:[#allocation2 + $0x5c] sm:$0xf] }
  0x5b   : > { %584 = vst [vmem:[#allocation2 + $0x20] sm:$0xf] %v583_v18  ;;  %v586_v37 = vsel %vm7247_vm4, %v548_v21, %v585_v17  ;;  %v563_v32 = vor.u32 %v562_v34, %v561_v23  ;;  %v565_v39 = vrot.slane %v496_v48, 4  ;;  %v566_v40 = vrot.slane %v499_v51, 5  ;;  %v600_v47 = vld [vmem:[#allocation2 + $0x68] sm:$0xf] }
  0x5c   : > { %587 = vst [vmem:[#allocation2 + $0x2c] sm:$0xf] %v586_v37  ;;  %v589_v33 = vsel %vm7247_vm4, %v552_v35, %v588_v27  ;;  %v592_v41 = vsel %vm7247_vm4, %v556_v28, %v591_v22  ;;  %v560_v42 = vrot.slane %v559_v36, 4 }
  0x5d   : > { %590 = vst [vmem:[#allocation2 + $0x38] sm:$0xf] %v589_v33  ;;  %593 = vst [vmem:[#allocation2 + $0x44] sm:$0xf] %v592_v41  ;;  %v564_v44 = vrot.slane %v563_v32, 4  ;;  %v567_v45 = vor.u32 %v566_v40, %v565_v39 }
  0x5e   : > { %v595_v46 = vsel %vm7247_vm4, %v560_v42, %v594_v38 }
  0x5f   : > { %596 = vst [vmem:[#allocation2 + $0x50] sm:$0xf] %v595_v46  ;;  %v598_v48 = vsel %vm7247_vm4, %v564_v44, %v597_v43  ;;  %v568_v49 = vrot.slane %v567_v45, 4 }
  0x60   : > { %599 = vst [vmem:[#allocation2 + $0x5c] sm:$0xf] %v598_v48 }
  0x61   : > { %v601_v50 = vsel %vm7247_vm4, %v568_v49, %v600_v47 }
  0x62   : > { %602 = vst [vmem:[#allocation2 + $0x68] sm:$0xf] %v601_v50 }
  0x63 PF: > { %p603_p1 = scmp.eq.s32.totalorder %s8500_s28, 1 }
  0x65   : > { %p604_p2 = pnand %p603_p1, %p418_p12 }
  0x66   : > { %609 = vst [vmem:[#allocation2 + $0x88] sm:$0xf] (!%p604_p2), %v7171_v1  ;;  %610 = vst [vmem:[#allocation2 + $0x94] sm:$0xf] (!%p604_p2), %v7174_v2  ;;  %v618_v51 = vshrl.u32 (!%p604_p2), %v7171_v1, 16  ;;  %vm681_vm5 = vcmask (!%p604_p2), 1043456  }
  0x67   : > { %607 = sbr.rel (%p604_p2) target bundleno = 130 (0x82), region = 52  ;;  %611 = vst [vmem:[#allocation2 + $0xa0] sm:$0xf] (!%p604_p2), %v7177_v3  ;;  %612 = vst [vmem:[#allocation2 + $0xac] sm:$0xf] (!%p604_p2), %v7180_v4  ;;  %v621_v52 = vshll.u32 (!%p604_p2), %v7171_v1, 16 }
  0x68   : > { %613 = vst [vmem:[#allocation2 + $0xb8] sm:$0xf] (!%p604_p2), %v7183_v5  ;;  %614 = vst [vmem:[#allocation2 + $0xc4] sm:$0xf] (!%p604_p2), %v7186_v6  ;;  %vm682_vm6 = vsmask.f32 (!%p604_p2), 7938 }
  0x69   : > { %615 = vst [vmem:[#allocation2 + $0xd0] sm:$0xf] (!%p604_p2), %v7189_v7  ;;  %616 = vst [vmem:[#allocation2 + $0xdc] sm:$0xf] (!%p604_p2), %v7192_v8  ;;  %v625_v53 = vshrl.u32 (!%p604_p2), %v7174_v2, 16  ;;  %v628_v54 = vshll.u32 (!%p604_p2), %v7174_v2, 16 }
  0x6a   : > { %v620_v55 = vrot.slane (!%p604_p2), %v618_v51, 7  ;;  %v684_v56 = vld [vmem:[#allocation2 + $0x84] sm:$0xf] (!%p604_p2)  ;;  %v632_v57 = vshrl.u32 (!%p604_p2), %v7177_v3, 16  ;;  %v635_v58 = vshll.u32 (!%p604_p2), %v7177_v3, 16  ;;  %v639_v59 = vshrl.u32 (!%p604_p2), %v7180_v4, 16  ;;  %vm7288_vm7 = vmand (!%p604_p2), %vm681_vm5, %vm682_vm6 }
  0x6b   : > { %v627_v61 = vrot.slane (!%p604_p2), %v625_v53, 7  ;;  %v687_v62 = vld [vmem:[#allocation2 + $0x90] sm:$0xf] (!%p604_p2)  ;;  %v642_v63 = vshll.u32 (!%p604_p2), %v7180_v4, 16  ;;  %v646_v0 = vshrl.u32 (!%p604_p2), %v7183_v5, 16  ;;  %v649_v9 = vshll.u32 (!%p604_p2), %v7183_v5, 16 }
  0x6c   : > { %v623_v10 = vor.u32 (!%p604_p2), %v621_v52, %v620_v55  ;;  %v634_v13 = vrot.slane (!%p604_p2), %v632_v57, 7  ;;  %v690_v14 = vld [vmem:[#allocation2 + $0x9c] sm:$0xf] (!%p604_p2)  ;;  %v641_v19 = vrot.slane (!%p604_p2), %v639_v59, 7  ;;  %v653_v20 = vshrl.u32 (!%p604_p2), %v7186_v6, 16 }
  0x6d   : > { %v630_v11 = vor.u32 (!%p604_p2), %v628_v54, %v627_v61  ;;  %v693_v12 = vld [vmem:[#allocation2 + $0xa8] sm:$0xf] (!%p604_p2)  ;;  %v648_v15 = vrot.slane (!%p604_p2), %v646_v0, 7  ;;  %v656_v24 = vshll.u32 (!%p604_p2), %v7186_v6, 16  ;;  %v660_v25 = vshrl.u32 (!%p604_p2), %v7189_v7, 16 }
  0x6e   : > { %v685_v16 = vsel %vm7288_vm7, %v623_v10, %v684_v56  ;;  %v637_v17 = vor.u32 %v635_v58, %v634_v13  ;;  %v644_v26 = vor.u32 %v642_v63, %v641_v19  ;;  %v696_v27 = vld [vmem:[#allocation2 + $0xb4] sm:$0xf]  ;;  %v655_v29 = vrot.slane %v653_v20, 7  ;;  %v699_v21 = vld [vmem:[#allocation2 + $0xc0] sm:$0xf] }
  0x6f   : > { %686 = vst [vmem:[#allocation2 + $0x84] sm:$0xf] %v685_v16  ;;  %v688_v30 = vsel %vm7288_vm7, %v630_v11, %v687_v62  ;;  %v651_v31 = vor.u32 %v649_v9, %v648_v15  ;;  %v662_v22 = vrot.slane %v660_v25, 7  ;;  %v663_v23 = vshll.u32 %v7189_v7, 16  ;;  %v702_v28 = vld [vmem:[#allocation2 + $0xcc] sm:$0xf] }
  0x70   : > { %689 = vst [vmem:[#allocation2 + $0x90] sm:$0xf] %v688_v30  ;;  %v691_v34 = vsel %vm7288_vm7, %v637_v17, %v690_v14  ;;  %v694_v18 = vsel %vm7288_vm7, %v644_v26, %v693_v12  ;;  %v658_v35 = vor.u32 %v656_v24, %v655_v29  ;;  %v667_v36 = vshrl.u32 %v7192_v8, 16  ;;  %v705_v43 = vld [vmem:[#allocation2 + $0xd8] sm:$0xf] }
  0x71   : > { %692 = vst [vmem:[#allocation2 + $0x9c] sm:$0xf] %v691_v34  ;;  %695 = vst [vmem:[#allocation2 + $0xa8] sm:$0xf] %v694_v18  ;;  %v697_v37 = vsel %vm7288_vm7, %v651_v31, %v696_v27  ;;  %v665_v38 = vor.u32 %v663_v23, %v662_v22  ;;  %v670_v32 = vshll.u32 %v7192_v8, 16  ;;  %v708_v39 = vrot.slane %v618_v51, 4 }
  0x72   : > { %698 = vst [vmem:[#allocation2 + $0xb4] sm:$0xf] %v697_v37  ;;  %v700_v40 = vsel %vm7288_vm7, %v658_v35, %v699_v21  ;;  %v669_v33 = vrot.slane %v667_v36, 7  ;;  %v709_v41 = vrot.slane %v621_v52, 5  ;;  %vm748_vm8 = vsmask.f32 3328 }
  0x73   : > { %701 = vst [vmem:[#allocation2 + $0xc0] sm:$0xf] %v700_v40  ;;  %v703_v42 = vsel %vm7288_vm7, %v665_v38, %v702_v28  ;;  %v712_v44 = vrot.slane %v625_v53, 4  ;;  %v713_v45 = vrot.slane %v628_v54, 5  ;;  %v716_v46 = vrot.slane %v632_v57, 4  ;;  %vm7316_vm9 = vmand %vm681_vm5, %vm748_vm8 }
  0x74   : > { %704 = vst [vmem:[#allocation2 + $0xcc] sm:$0xf] %v703_v42  ;;  %v672_v47 = vor.u32 %v670_v32, %v669_v33  ;;  %v710_v48 = vor.u32 %v709_v41, %v708_v39  ;;  %v717_v49 = vrot.slane %v635_v58, 5  ;;  %v720_v50 = vrot.slane %v639_v59, 4  ;;  %v750_v52 = vld [vmem:[#allocation2 + $0x8c] sm:$0xf] }
  0x75   : > { %v714_v55 = vor.u32 %v713_v45, %v712_v44  ;;  %v721_v56 = vrot.slane %v642_v63, 5  ;;  %v724_v61 = vrot.slane %v646_v0, 4  ;;  %v725_v62 = vrot.slane %v649_v9, 5  ;;  %v753_v57 = vld [vmem:[#allocation2 + $0x98] sm:$0xf] }
  0x76   : > { %v706_v53 = vsel %vm7288_vm7, %v672_v47, %v705_v43  ;;  %v711_v54 = vrot.slane %v710_v48, 4  ;;  %v718_v10 = vor.u32 %v717_v49, %v716_v46  ;;  %v728_v13 = vrot.slane %v653_v20, 4  ;;  %v756_v59 = vld [vmem:[#allocation2 + $0xa4] sm:$0xf]  ;;  %v759_v19 = vld [vmem:[#allocation2 + $0xb0] sm:$0xf] }
  0x77   : > { %707 = vst [vmem:[#allocation2 + $0xd8] sm:$0xf] %v706_v53  ;;  %v715_v58 = vrot.slane %v714_v55, 4  ;;  %v722_v14 = vor.u32 %v721_v56, %v720_v50  ;;  %v726_v11 = vor.u32 %v725_v62, %v724_v61  ;;  %v729_v12 = vrot.slane %v656_v24, 5  ;;  %v762_v0 = vld [vmem:[#allocation2 + $0xbc] sm:$0xf] }
  0x78   : > { %v751_v15 = vsel %vm7316_vm9, %v711_v54, %v750_v52  ;;  %v719_v63 = vrot.slane %v718_v10, 4  ;;  %v732_v9 = vrot.slane %v660_v25, 4  ;;  %v733_v16 = vrot.slane %v663_v23, 5  ;;  %v765_v29 = vld [vmem:[#allocation2 + $0xc8] sm:$0xf] }
  0x79   : > { %752 = vst [vmem:[#allocation2 + $0x8c] sm:$0xf] %v751_v15  ;;  %v754_v60 = vsel %vm7316_vm9, %v715_v58, %v753_v57  ;;  %v723_v17 = vrot.slane %v722_v14, 4  ;;  %v727_v20 = vrot.slane %v726_v11, 4  ;;  %v730_v26 = vor.u32 %v729_v12, %v728_v13  ;;  %v768_v23 = vld [vmem:[#allocation2 + $0xd4] sm:$0xf] }
  0x7a   : > { %755 = vst [vmem:[#allocation2 + $0x98] sm:$0xf] %v754_v60  ;;  %v757_v27 = vsel %vm7316_vm9, %v719_v63, %v756_v59  ;;  %v734_v24 = vor.u32 %v733_v16, %v732_v9  ;;  %v736_v30 = vrot.slane %v667_v36, 4  ;;  %v737_v31 = vrot.slane %v670_v32, 5  ;;  %v771_v28 = vld [vmem:[#allocation2 + $0xe0] sm:$0xf] }
  0x7b   : > { %758 = vst [vmem:[#allocation2 + $0xa4] sm:$0xf] %v757_v27  ;;  %v760_v25 = vsel %vm7316_vm9, %v723_v17, %v759_v19  ;;  %v763_v21 = vsel %vm7316_vm9, %v727_v20, %v762_v0  ;;  %v731_v22 = vrot.slane %v730_v26, 4 }
  0x7c   : > { %761 = vst [vmem:[#allocation2 + $0xb0] sm:$0xf] %v760_v25  ;;  %764 = vst [vmem:[#allocation2 + $0xbc] sm:$0xf] %v763_v21  ;;  %v735_v34 = vrot.slane %v734_v24, 4  ;;  %v738_v18 = vor.u32 %v737_v31, %v736_v30 }
  0x7d   : > { %v766_v35 = vsel %vm7316_vm9, %v731_v22, %v765_v29 }
  0x7e   : > { %767 = vst [vmem:[#allocation2 + $0xc8] sm:$0xf] %v766_v35  ;;  %v769_v36 = vsel %vm7316_vm9, %v735_v34, %v768_v23  ;;  %v739_v37 = vrot.slane %v738_v18, 4 }
  0x7f   : > { %770 = vst [vmem:[#allocation2 + $0xd4] sm:$0xf] %v769_v36 }
  0x80   : > { %v772_v38 = vsel %vm7316_vm9, %v739_v37, %v771_v28 }
  0x81   : > { %773 = vst [vmem:[#allocation2 + $0xe0] sm:$0xf] %v772_v38 }
  0x82 PF: > { %p774_p3 = scmp.eq.s32.totalorder %s8500_s28, 2 }
  0x84   : > { %p775_p4 = pnand %p774_p3, %p418_p12 }
  0x85   : > { %780 = vst [vmem:[#allocation2 + $0x100] sm:$0xf] (!%p775_p4), %v7171_v1  ;;  %781 = vst [vmem:[#allocation2 + $0x10c] sm:$0xf] (!%p775_p4), %v7174_v2  ;;  %v789_v32 = vshrl.u32 (!%p775_p4), %v7171_v1, 16  ;;  %vm852_vm10 = vcmask (!%p775_p4), 1043456  }
  0x86   : > { %778 = sbr.rel (%p775_p4) target bundleno = 161 (0xa1), region = 56  ;;  %782 = vst [vmem:[#allocation2 + $0x118] sm:$0xf] (!%p775_p4), %v7177_v3  ;;  %783 = vst [vmem:[#allocation2 + $0x124] sm:$0xf] (!%p775_p4), %v7180_v4  ;;  %v792_v39 = vshll.u32 (!%p775_p4), %v7171_v1, 16 }
  0x87   : > { %784 = vst [vmem:[#allocation2 + $0x130] sm:$0xf] (!%p775_p4), %v7183_v5  ;;  %785 = vst [vmem:[#allocation2 + $0x13c] sm:$0xf] (!%p775_p4), %v7186_v6  ;;  %vm853_vm11 = vsmask.f32 (!%p775_p4), 7938 }
  0x88   : > { %786 = vst [vmem:[#allocation2 + $0x148] sm:$0xf] (!%p775_p4), %v7189_v7  ;;  %787 = vst [vmem:[#allocation2 + $0x154] sm:$0xf] (!%p775_p4), %v7192_v8  ;;  %v796_v40 = vshrl.u32 (!%p775_p4), %v7174_v2, 16  ;;  %v799_v33 = vshll.u32 (!%p775_p4), %v7174_v2, 16 }
  0x89   : > { %v791_v41 = vrot.slane (!%p775_p4), %v789_v32, 7  ;;  %v855_v42 = vld [vmem:[#allocation2 + $0xfc] sm:$0xf] (!%p775_p4)  ;;  %v803_v43 = vshrl.u32 (!%p775_p4), %v7177_v3, 16  ;;  %v806_v44 = vshll.u32 (!%p775_p4), %v7177_v3, 16  ;;  %v810_v45 = vshrl.u32 (!%p775_p4), %v7180_v4, 16  ;;  %vm7357_vm12 = vmand (!%p775_p4), %vm852_vm10, %vm853_vm11 }
  0x8a   : > { %v798_v47 = vrot.slane (!%p775_p4), %v796_v40, 7  ;;  %v858_v48 = vld [vmem:[#allocation2 + $0x108] sm:$0xf] (!%p775_p4)  ;;  %v813_v1 = vshll.u32 (!%p775_p4), %v7180_v4, 16  ;;  %v817_v49 = vshrl.u32 (!%p775_p4), %v7183_v5, 16  ;;  %v820_v2 = vshll.u32 (!%p775_p4), %v7183_v5, 16 }
  0x8b   : > { %v794_v50 = vor.u32 (!%p775_p4), %v792_v39, %v791_v41  ;;  %v805_v51 = vrot.slane (!%p775_p4), %v803_v43, 7  ;;  %v861_v52 = vld [vmem:[#allocation2 + $0x114] sm:$0xf] (!%p775_p4)  ;;  %v812_v55 = vrot.slane (!%p775_p4), %v810_v45, 7  ;;  %v824_v3 = vshrl.u32 (!%p775_p4), %v7186_v6, 16 }
  0x8c   : > { %v801_v56 = vor.u32 (!%p775_p4), %v799_v33, %v798_v47  ;;  %v864_v61 = vld [vmem:[#allocation2 + $0x120] sm:$0xf] (!%p775_p4)  ;;  %v819_v62 = vrot.slane (!%p775_p4), %v817_v49, 7  ;;  %v827_v53 = vshll.u32 (!%p775_p4), %v7186_v6, 16  ;;  %v831_v54 = vshrl.u32 (!%p775_p4), %v7189_v7, 16 }
  0x8d   : > { %v856_v4 = vsel %vm7357_vm12, %v794_v50, %v855_v42  ;;  %v808_v57 = vor.u32 %v806_v44, %v805_v51  ;;  %v815_v10 = vor.u32 %v813_v1, %v812_v55  ;;  %v867_v13 = vld [vmem:[#allocation2 + $0x12c] sm:$0xf]  ;;  %v826_v5 = vrot.slane %v824_v3, 7  ;;  %v870_v14 = vld [vmem:[#allocation2 + $0x138] sm:$0xf] }
  0x8e   : > { %857 = vst [vmem:[#allocation2 + $0xfc] sm:$0xf] %v856_v4  ;;  %v859_v58 = vsel %vm7357_vm12, %v801_v56, %v858_v48  ;;  %v822_v59 = vor.u32 %v820_v2, %v819_v62  ;;  %v833_v19 = vrot.slane %v831_v54, 7  ;;  %v834_v11 = vshll.u32 %v7189_v7, 16  ;;  %v873_v63 = vld [vmem:[#allocation2 + $0x144] sm:$0xf] }
  0x8f   : > { %860 = vst [vmem:[#allocation2 + $0x108] sm:$0xf] %v859_v58  ;;  %v862_v6 = vsel %vm7357_vm12, %v808_v57, %v861_v52  ;;  %v865_v12 = vsel %vm7357_vm12, %v815_v10, %v864_v61  ;;  %v829_v15 = vor.u32 %v827_v53, %v826_v5  ;;  %v838_v0 = vshrl.u32 %v7192_v8, 16  ;;  %v876_v29 = vld [vmem:[#allocation2 + $0x150] sm:$0xf] }
  0x90   : > { %863 = vst [vmem:[#allocation2 + $0x114] sm:$0xf] %v862_v6  ;;  %866 = vst [vmem:[#allocation2 + $0x120] sm:$0xf] %v865_v12  ;;  %v868_v9 = vsel %vm7357_vm12, %v822_v59, %v867_v13  ;;  %v836_v16 = vor.u32 %v834_v11, %v833_v19  ;;  %v841_v60 = vshll.u32 %v7192_v8, 16  ;;  %v879_v7 = vrot.slane %v789_v32, 4 }
  0x91   : > { %869 = vst [vmem:[#allocation2 + $0x12c] sm:$0xf] %v868_v9  ;;  %v871_v17 = vsel %vm7357_vm12, %v829_v15, %v870_v14  ;;  %v840_v20 = vrot.slane %v838_v0, 7  ;;  %v880_v26 = vrot.slane %v792_v39, 5  ;;  %vm919_vm13 = vsmask.f32 3328 }
  0x92   : > { %872 = vst [vmem:[#allocation2 + $0x138] sm:$0xf] %v871_v17  ;;  %v874_v27 = vsel %vm7357_vm12, %v836_v16, %v873_v63  ;;  %v883_v24 = vrot.slane %v796_v40, 4  ;;  %v884_v30 = vrot.slane %v799_v33, 5  ;;  %v887_v31 = vrot.slane %v803_v43, 4  ;;  %vm7385_vm14 = vmand %vm852_vm10, %vm919_vm13 }
  0x93   : > { %875 = vst [vmem:[#allocation2 + $0x144] sm:$0xf] %v874_v27  ;;  %v843_v25 = vor.u32 %v841_v60, %v840_v20  ;;  %v881_v21 = vor.u32 %v880_v26, %v879_v7  ;;  %v888_v8 = vrot.slane %v806_v44, 5  ;;  %v891_v22 = vrot.slane %v810_v45, 4  ;;  %v921_v34 = vld [vmem:[#allocation2 + $0x104] sm:$0xf] }
  0x94   : > { %v885_v18 = vor.u32 %v884_v30, %v883_v24  ;;  %v892_v35 = vrot.slane %v813_v1, 5  ;;  %v895_v28 = vrot.slane %v817_v49, 4  ;;  %v896_v36 = vrot.slane %v820_v2, 5  ;;  %v924_v32 = vld [vmem:[#allocation2 + $0x110] sm:$0xf] }
  0x95   : > { %v877_v37 = vsel %vm7357_vm12, %v843_v25, %v876_v29  ;;  %v882_v38 = vrot.slane %v881_v21, 4  ;;  %v889_v39 = vor.u32 %v888_v8, %v887_v31  ;;  %v899_v40 = vrot.slane %v824_v3, 4  ;;  %v927_v41 = vld [vmem:[#allocation2 + $0x11c] sm:$0xf]  ;;  %v930_v43 = vld [vmem:[#allocation2 + $0x128] sm:$0xf] }
  0x96   : > { %878 = vst [vmem:[#allocation2 + $0x150] sm:$0xf] %v877_v37  ;;  %v886_v33 = vrot.slane %v885_v18, 4  ;;  %v893_v42 = vor.u32 %v892_v35, %v891_v22  ;;  %v897_v44 = vor.u32 %v896_v36, %v895_v28  ;;  %v900_v45 = vrot.slane %v827_v53, 5  ;;  %v933_v1 = vld [vmem:[#allocation2 + $0x134] sm:$0xf] }
  0x97   : > { %v922_v47 = vsel %vm7385_vm14, %v882_v38, %v921_v34  ;;  %v890_v48 = vrot.slane %v889_v39, 4  ;;  %v903_v49 = vrot.slane %v831_v54, 4  ;;  %v904_v2 = vrot.slane %v834_v11, 5  ;;  %v936_v3 = vld [vmem:[#allocation2 + $0x140] sm:$0xf] }
  0x98   : > { %923 = vst [vmem:[#allocation2 + $0x104] sm:$0xf] %v922_v47  ;;  %v925_v46 = vsel %vm7385_vm14, %v886_v33, %v924_v32  ;;  %v894_v50 = vrot.slane %v893_v42, 4  ;;  %v898_v51 = vrot.slane %v897_v44, 4  ;;  %v901_v52 = vor.u32 %v900_v45, %v899_v40  ;;  %v939_v57 = vld [vmem:[#allocation2 + $0x14c] sm:$0xf] }
  0x99   : > { %926 = vst [vmem:[#allocation2 + $0x110] sm:$0xf] %v925_v46  ;;  %v928_v55 = vsel %vm7385_vm14, %v890_v48, %v927_v41  ;;  %v905_v56 = vor.u32 %v904_v2, %v903_v49  ;;  %v907_v61 = vrot.slane %v838_v0, 4  ;;  %v908_v62 = vrot.slane %v841_v60, 5  ;;  %v942_v58 = vld [vmem:[#allocation2 + $0x158] sm:$0xf] }
  0x9a   : > { %929 = vst [vmem:[#allocation2 + $0x11c] sm:$0xf] %v928_v55  ;;  %v931_v53 = vsel %vm7385_vm14, %v894_v50, %v930_v43  ;;  %v934_v54 = vsel %vm7385_vm14, %v898_v51, %v933_v1  ;;  %v902_v4 = vrot.slane %v901_v52, 4 }
  0x9b   : > { %932 = vst [vmem:[#allocation2 + $0x128] sm:$0xf] %v931_v53  ;;  %935 = vst [vmem:[#allocation2 + $0x134] sm:$0xf] %v934_v54  ;;  %v906_v10 = vrot.slane %v905_v56, 4  ;;  %v909_v13 = vor.u32 %v908_v62, %v907_v61 }
  0x9c   : > { %v937_v5 = vsel %vm7385_vm14, %v902_v4, %v936_v3 }
  0x9d   : > { %938 = vst [vmem:[#allocation2 + $0x140] sm:$0xf] %v937_v5  ;;  %v940_v59 = vsel %vm7385_vm14, %v906_v10, %v939_v57  ;;  %v910_v14 = vrot.slane %v909_v13, 4 }
  0x9e   : > { %941 = vst [vmem:[#allocation2 + $0x14c] sm:$0xf] %v940_v59 }
  0x9f   : > { %v943_v19 = vsel %vm7385_vm14, %v910_v14, %v942_v58 }
  0xa0   : > { %944 = vst [vmem:[#allocation2 + $0x158] sm:$0xf] %v943_v19 }
  0xa1 PF: > { %p4992_p5 = scmp.ne.s32.totalorder %s7069_s18, 8 }
  0xa2   : > { %v7088_v11 = vmov (!%p4992_p5), 0  }
  0xa3   : > { %948 = sbr.rel (%p4992_p5) target bundleno = 171 (0xab), region = 60  ;;  %950 = vst [vmem:[#allocation2 + $0xfc] sm:$0xff] (!%p4992_p5), %v7088_v11  ;;  %951 = vst [vmem:[#allocation2 + $0x104] sm:$0xf] (!%p4992_p5), %v7088_v11 }
  0xa4   : > { %952 = vst [vmem:[#allocation2 + $0x108] sm:$0xff] (!%p4992_p5), %v7088_v11  ;;  %953 = vst [vmem:[#allocation2 + $0x110] sm:$0xf] (!%p4992_p5), %v7088_v11 }
  0xa5   : > { %954 = vst [vmem:[#allocation2 + $0x114] sm:$0xff] (!%p4992_p5), %v7088_v11  ;;  %955 = vst [vmem:[#allocation2 + $0x11c] sm:$0xf] (!%p4992_p5), %v7088_v11 }
  0xa6   : > { %956 = vst [vmem:[#allocation2 + $0x120] sm:$0xff] (!%p4992_p5), %v7088_v11  ;;  %957 = vst [vmem:[#allocation2 + $0x128] sm:$0xf] (!%p4992_p5), %v7088_v11 }
  0xa7   : > { %958 = vst [vmem:[#allocation2 + $0x12c] sm:$0xff] (!%p4992_p5), %v7088_v11  ;;  %959 = vst [vmem:[#allocation2 + $0x134] sm:$0xf] (!%p4992_p5), %v7088_v11 }
  0xa8   : > { %960 = vst [vmem:[#allocation2 + $0x138] sm:$0xff] (!%p4992_p5), %v7088_v11  ;;  %961 = vst [vmem:[#allocation2 + $0x140] sm:$0xf] (!%p4992_p5), %v7088_v11 }
  0xa9   : > { %962 = vst [vmem:[#allocation2 + $0x144] sm:$0xff] (!%p4992_p5), %v7088_v11  ;;  %963 = vst [vmem:[#allocation2 + $0x14c] sm:$0xf] (!%p4992_p5), %v7088_v11 }
  0xaa   : > { %964 = vst [vmem:[#allocation2 + $0x150] sm:$0xff] %v7088_v11  ;;  %965 = vst [vmem:[#allocation2 + $0x158] sm:$0xf] %v7088_v11 }
  0xab PF: > { %p4993_p6 = scmp.lt.s32.totalorder %s7069_s18, 1 }
  0xac   : > { %v6735_v6 = vld [vmem:[%s8462_s1 + $0x100] sm:$0xff] (!%p4993_p6)   ;;  %s7413_s6 = sadd.s32 (!%p4993_p6), 1, %s7069_s18  ;;  %v6738_v63 = vld [vmem:[%s8462_s1 + $0x108] sm:$0xff] (!%p4993_p6)   ;;  %s7430_s25 = sadd.s32 (!%p4993_p6), 2, %s7069_s18  ;;  %v6741_v16 = vld [vmem:[%s8462_s1 + $0x110] sm:$0xff] (!%p4993_p6)  }
  0xad   : > { %969 = sbr.rel (%p4993_p6) target bundleno = 718 (0x2ce), region = 64  ;;  %v6736_v12 = vld [vmem:[%s8462_s1 + $0x140] sm:$0xff] (!%p4993_p6)   ;;  %5869 = vmatprep.subr.bf16.mxu0 (!%p4993_p6), %v6735_v6  ;;  %s974_s11 = ssub.s32 (!%p4993_p6), 0, %s7413_s6  ;;  %v6739_v0 = vld [vmem:[%s8462_s1 + $0x148] sm:$0xff] (!%p4993_p6)   ;;  %v6742_v60 = vld [vmem:[%s8462_s1 + $0x150] sm:$0xff] (!%p4993_p6)  }
  0xae   : > { %v6737_v15 = vld [vmem:[%s8462_s1 + $0xc0] sm:$0xff] (!%p4993_p6)   ;;  %6337 = vmatprep.subr.bf16.mxu1 (!%p4993_p6), %v6736_v12  ;;  %s4994_s15 = smin.u32 (!%p4993_p6), %s974_s11, %s7413_s6  ;;  %v6740_v9 = vld [vmem:[%s8462_s1 + $0xc8] sm:$0xff] (!%p4993_p6)   ;;  %s2213_s30 = ssub.s32 (!%p4993_p6), 0, %s7430_s25  ;;  %v6743_v7 = vld [vmem:[%s8462_s1 + $0xd0] sm:$0xff] (!%p4993_p6)  }
  0xaf   : > { %5870 = vmatpush3.bf16.msra.mxu0 (!%p4993_p6), %v6737_v15  ;;  %6338 = vmatpush3.bf16.msra.mxu1 (!%p4993_p6), %v6736_v12  ;;  %7041 = sdivrem.u32 (!%p4993_p6), %s4994_s15, 3  ;;  %s5236_s9 = smin.u32 (!%p4993_p6), %s2213_s30, %s7430_s25  ;;  %v6744_v17 = vld [vmem:[%s8462_s1 + $0x118] sm:$0xff] (!%p4993_p6)   ;;  %v6747_v27 = vld [vmem:[%s8462_s1 + $0x120] sm:$0xff] (!%p4993_p6)   ;;  %v6750_v30 = vld [vmem:[%s8462_s1 + $0x128] sm:$0xff] (!%p4993_p6)  }
  0xb0   : > { %5871 = vmatprep.subr.bf16.mxu0 (!%p4993_p6), %v6738_v63  ;;  %6339 = vmatprep.subr.bf16.mxu1 (!%p4993_p6), %v6739_v0  ;;  %7043 = sdivrem.u32 (!%p4993_p6), %s5236_s9, 3  ;;  %v6745_v20 = vld [vmem:[%s8462_s1 + $0x158] sm:$0xff] (!%p4993_p6)   ;;  %p973_p7 = scmp.lt.s32.totalorder (!%p4993_p6), %s7413_s6, 0  ;;  %v6748_v29 = vld [vmem:[%s8462_s1 + $0x160] sm:$0xff] (!%p4993_p6)   ;;  %v6751_v31 = vld [vmem:[%s8462_s1 + $0x168] sm:$0xff] (!%p4993_p6)  }
  0xb1   : > { %v6746_v26 = vld [vmem:[%s8462_s1 + $0xd8] sm:$0xff] (!%p4993_p6)   ;;  %v6749_v24 = vld [vmem:[%s8462_s1 + $0xe0] sm:$0xff] (!%p4993_p6)   ;;  %v6752_v25 = vld [vmem:[%s8462_s1 + $0xe8] sm:$0xff] (!%p4993_p6)   ;;  %p2212_p9 = scmp.lt.s32.totalorder (!%p4993_p6), %s7430_s25, 0  ;;  %s7736_s19 = sadd.s32 (!%p4993_p6), 3, %s7069_s18 }
  0xb2   : > { %v6753_v21 = vld [vmem:[%s8462_s1 + $0x130] sm:$0xff] (!%p4993_p6)   ;;  %v6756_v23 = vld [vmem:[%s8462_s1 + $0x138] sm:$0xff] (!%p4993_p6)   ;;  %v6762_v38 = vld [vmem:[%s8462_s1 + $0x40] sm:$0xff] (!%p4993_p6)   ;;  %s3469_s28 = ssub.s32 (!%p4993_p6), 0, %s7736_s19  ;;  %p3468_p11 = scmp.lt.s32.totalorder (!%p4993_p6), %s7736_s19, 0 }
  0xb3   : > { %5872 = vmatpush3.bf16.msra.mxu0 (!%p4993_p6), %v6740_v9  ;;  %6340 = vmatpush3.bf16.msra.mxu1 (!%p4993_p6), %v6739_v0  ;;  %v6754_v8 = vld [vmem:[%s8462_s1 + $0x170] sm:$0xff] (!%p4993_p6)   ;;  %v6757_v34 = vld [vmem:[%s8462_s1 + $0x178] sm:$0xff] (!%p4993_p6)   ;;  %v6763_v32 = vld [vmem:[%s8462_s1 + $0x80] sm:$0xff] (!%p4993_p6)   ;;  %s5526_s18 = smin.u32 (!%p4993_p6), %s3469_s28, %s7736_s19 }
  0xb4   : > { %5873 = vmatprep.subr.bf16.mxu0 %v6741_v16  ;;  %6341 = vmatprep.subr.bf16.mxu1 %v6742_v60  ;;  %v6755_v22 = vld [vmem:[%s8462_s1 + $0xf0] sm:$0xff]   ;;  %v6758_v37 = vld [vmem:[%s8462_s1 + $0xf8] sm:$0xff]   ;;  %v6765_v39 = vld [vmem:[%s8462_s1] sm:$0xff]   ;;  %7045 = sdivrem.u32 %s5526_s18, 3 }
  0xb5   : > { %v6766_v33 = vld [vmem:[%s8462_s1 + $0x48] sm:$0xff]   ;;  %v6771_v48 = vld [vmem:[%s8462_s1 + $0x50] sm:$0xff]   ;;  %v6774_v2 = vld [vmem:[%s8462_s1 + $0x58] sm:$0xff]  }
  0xb6   : > { %v6767_v41 = vld [vmem:[%s8462_s1 + $0x88] sm:$0xff]   ;;  %v6772_v1 = vld [vmem:[%s8462_s1 + $0x90] sm:$0xff]   ;;  %v6775_v46 = vld [vmem:[%s8462_s1 + $0x98] sm:$0xff]  }
  0xb7   : > { %5874 = vmatpush3.bf16.msra.mxu0 %v6743_v7  ;;  %6342 = vmatpush3.bf16.msra.mxu1 %v6742_v60  ;;  %v6768_v45 = vld [vmem:[%s8462_s1 + $0x8] sm:$0xff]   ;;  %v6773_v49 = vld [vmem:[%s8462_s1 + $0x10] sm:$0xff]   ;;  %v6776_v55 = vld [vmem:[%s8462_s1 + $0x18] sm:$0xff]  }
  0xb8   : > { %5875 = vmatprep.subr.bf16.mxu0 %v6744_v17  ;;  %6343 = vmatprep.subr.bf16.mxu1 %v6745_v20  ;;  %s7042_s7 = spop.drf %7041  ;;  %v6779_v56 = vld [vmem:[%s8462_s1 + $0x60] sm:$0xff]   ;;  %v6782_v53 = vld [vmem:[%s8462_s1 + $0x68] sm:$0xff]   ;;  %v6788_v58 = vld [vmem:[%s8462_s1 + $0x70] sm:$0xff]  }
  0xb9   : > { %s978_s8 = ssub.s32 0, %s7042_s7  ;;  %v6780_v61 = vld [vmem:[%s8462_s1 + $0xa0] sm:$0xff]   ;;  %v6783_v54 = vld [vmem:[%s8462_s1 + $0xa8] sm:$0xff]   ;;  %v6789_v19 = vld [vmem:[%s8462_s1 + $0xb0] sm:$0xff]   ;;  %s7044_s16 = spop.drf %7043 }
  0xba   : > { %s8502_s8 = smov (!%p973_p7, %s978_s8), %s7042_s7  ;;  %v6781_v62 = vld [vmem:[%s8462_s1 + $0x20] sm:$0xff]   ;;  %v6784_v5 = vld [vmem:[%s8462_s1 + $0x28] sm:$0xff]   ;;  %v6791_v11 = vld [vmem:[%s8462_s1 + $0x30] sm:$0xff]   ;;  %s2217_s29 = ssub.s32 0, %s7044_s16 }
  0xbb   : > { %5876 = vmatpush3.bf16.msra.mxu0 %v6746_v26  ;;  %6344 = vmatpush3.bf16.msra.mxu1 %v6745_v20  ;;  %p4996_p8 = scmp.lt.s32.totalorder %s8502_s8, 0  ;;  %s984_s15 = sadd.s32 3, %s8502_s8  ;;  %v6792_v6 = vld [vmem:[%s8462_s1 + $0x78] sm:$0xff]   ;;  %v6798_v60 = vld [vmem:[%s8462_s1 + $0x1c0] sm:$0xff]   ;;  %v6802_v26 = vld [vmem:[%s8462_s1 + $0x1c8] sm:$0xff]  }
  0xbc   : > { %5877 = vmatprep.subr.bf16.mxu0 %v6747_v27  ;;  %6345 = vmatprep.subr.bf16.mxu1 %v6748_v29  ;;  %v6793_v12 = vld [vmem:[%s8462_s1 + $0xb8] sm:$0xff]   ;;  %v6799_v7 = vld [vmem:[%s8462_s1 + $0x200] sm:$0xff]   ;;  %s8506_s29 = smov (!%p2212_p9, %s2217_s29), %s7044_s16 }
  0xbd   : > { %s8504_s15 = smov (!%p4996_p8, %s984_s15), %s8502_s8  ;;  %v6794_v9 = vld [vmem:[%s8462_s1 + $0x38] sm:$0xff]   ;;  %v6801_v20 = vld [vmem:[%s8462_s1 + $0x180] sm:$0xff]   ;;  %p5238_p10 = scmp.lt.s32.totalorder %s8506_s29, 0 }
  0xbe   : > { %s5824_s30 = smul.u32 120, %s8504_s15  ;;  %s2223_s27 = sadd.s32 3, %s8506_s29 }
  0xbf   : > { %5878 = vmatpush3.bf16.msra.mxu0 %v6749_v24  ;;  %6346 = vmatpush3.bf16.msra.mxu1 %v6748_v29  ;;  %v6803_v29 = vld [vmem:[%s8462_s1 + $0x208] sm:$0xff]   ;;  %s8508_s27 = smov (!%p5238_p10, %s2223_s27), %s8506_s29 }
  0xc0   : > { %5879 = vmatprep.subr.bf16.mxu0 %v6750_v30  ;;  %6347 = vmatprep.subr.bf16.mxu1 %v6751_v31  ;;  %s7489_s12 = scalar_lea.vmem [#allocation2], %s5824_s30  ;;  %v6804_v24 = vld [vmem:[%s8462_s1 + $0x188] sm:$0xff]   ;;  %s5825_s29 = smul.u32 120, %s8508_s27 }
  0xc1   : > { %v7492_v18 = vld [vmem:[%s7489_s12 + $0xc] sm:$0xff]  ;;  %v7495_v35 = vld [vmem:[%s7489_s12 + $0x18] sm:$0xff]  ;;  %v6761_v36 = vld [vmem:[%s7489_s12 + $0x14] ss:$12 sps:$4 sm:$0xff]   ;;  %s7046_s27 = spop.drf %7045 }
  0xc2   : > { %v5064_v28 = vcombine.high %v7492_v18, %v7495_v35  ;;  %6353 = vmatprep.mubr.bf16.mxu1 %v6761_v36  ;;  %v6764_v40 = vld [vmem:[%s7489_s12 + $0x2c] ss:$12 sps:$4 sm:$0xff]   ;;  %v7520_v42 = vld [vmem:[%s7489_s12 + $0x24] sm:$0xff]  ;;  %v5063_v43 = vcombine.low %v7492_v18, %v7495_v35  ;;  %v7525_v44 = vld [vmem:[%s7489_s12 + $0x30] sm:$0xff]  ;;  %s7786_s15 = scalar_lea.vmem [#allocation2], %s5825_s29  ;;  %s3473_s26 = ssub.s32 0, %s7046_s27 }
  0xc3   : > { %5880 = vmatpush3.bf16.msra.mxu0 %v6752_v25  ;;  %6348 = vmatpush3.bf16.msra.mxu1 %v6751_v31  ;;  %v5067_v47 = vcombine.high %v7520_v42, %v7525_v44  ;;  %v7548_v50 = vld [vmem:[%s7489_s12 + $0x3c] sm:$0xff]  ;;  %v5066_v51 = vcombine.low %v7520_v42, %v7525_v44  ;;  %v7553_v52 = vld [vmem:[%s7489_s12 + $0x48] sm:$0xff]  ;;  %v7576_v4 = vld [vmem:[%s7489_s12 + $0x54] sm:$0xff]  ;;  %v7635_v30 = vcombine.high %v7495_v35, %v7520_v42  ;;  %s8510_s26 = smov (!%p3468_p11, %s3473_s26), %s7046_s27 }
  0xc4   : > { %5881 = vmatprep.subr.bf16.mxu0 %v6753_v21  ;;  %6349 = vmatprep.subr.bf16.mxu1 %v6754_v8  ;;  %v5070_v3 = vcombine.high %v7548_v50, %v7553_v52  ;;  %v6787_v57 = vld [vmem:[%s7489_s12 + $0x44] ss:$12 sps:$4 sm:$0xff]   ;;  %v5069_v10 = vcombine.low %v7548_v50, %v7553_v52  ;;  %v6790_v14 = vld [vmem:[%s7489_s12 + $0x5c] ss:$12 sps:$4 sm:$0xff]   ;;  %v6800_v17 = vld [vmem:[%s7489_s12 + $0x20] ss:$12 sps:$4 sm:$0xff]  }
  0xc5   : > { %1361 = vmatprep.mubr.bf16.mxu0 %v5064_v28  ;;  %v7582_v13 = vld [vmem:[%s7489_s12 + $0x60] sm:$0xff]  ;;  %v6797_v15 = vld [vmem:[%s7489_s12 + $0x8] ss:$12 sps:$4 sm:$0xff]   ;;  %p5528_p12 = scmp.lt.s32.totalorder %s8510_s26, 0  ;;  %s3479_s6 = sadd.s32 3, %s8510_s26 }
  0xc6   : > { %v5073_v59 = vcombine.high %v7576_v4, %v7582_v13  ;;  %v5072_v63 = vcombine.low %v7576_v4, %v7582_v13  ;;  %v989_v0 = vld [vmem:[%s7489_s12] sm:$0xff]  ;;  %v6807_v31 = vld [vmem:[%s8462_s1 + $0x1d0] sm:$0xff]  }
  0xc7   : > { %5882 = vmatpush3.bf16.msra.mxu0 %v6755_v22  ;;  %6350 = vmatpush3.bf16.msra.mxu1 %v6754_v8  ;;  %v5100_v16 = vcombine.high %v989_v0, %v7492_v18  ;;  %v5099_v27 = vcombine.low %v989_v0, %v7492_v18  ;;  %v6808_v25 = vld [vmem:[%s8462_s1 + $0x210] sm:$0xff]   ;;  %v6810_v8 = vld [vmem:[%s8462_s1 + $0x1d8] sm:$0xff]   ;;  %v7652_v22 = vcombine.low %v7495_v35, %v7520_v42  ;;  %v6815_v18 = vld [vmem:[%s8462_s1 + $0x1e0] sm:$0xff]   ;;  %s8512_s6 = smov (!%p5528_p12, %s3479_s6), %s8510_s26 }
  0xc8   : > { %5883 = vmatprep.subr.bf16.mxu0 %v6756_v23  ;;  %6351 = vmatprep.subr.bf16.mxu1 %v6757_v34  ;;  %v6809_v21 = vld [vmem:[%s8462_s1 + $0x190] sm:$0xff]   ;;  %v6811_v23 = vld [vmem:[%s8462_s1 + $0x218] sm:$0xff]   ;;  %v7666_v35 = vcombine.high %v7525_v44, %v7548_v50  ;;  %v6816_v36 = vld [vmem:[%s8462_s1 + $0x220] sm:$0xff]   ;;  %v7696_v42 = vcombine.high %v7553_v52, %v7576_v4  ;;  %s5826_s7 = smul.u32 120, %s8512_s6 }
  0xc9   : > { %v6823_v28 = vld [vmem:[%s7489_s12 + $0x38] ss:$12 sps:$4 sm:$0xff]   ;;  %v6855_v0 = vld [vmem:[%s8462_s1 + $0x2f0] sm:$0xff]  }
  0xca   : > { %s8078_s30 = scalar_lea.vmem [#allocation2], %s5826_s7 }
  0xcb   : > { %5884 = vmatpush3.bf16.msra.mxu0 %v6758_v37  ;;  %6352 = vmatpush3.bf16.msra.mxu1 %v6757_v34  ;;  %v6812_v34 = vld [vmem:[%s8462_s1 + $0x198] sm:$0xff]   ;;  %v6817_v37 = vld [vmem:[%s8462_s1 + $0x1a0] sm:$0xff]  }
  0xcc   : > { %5921 = vmatprep.subr.bf16.mxu0 %v6762_v38  ;;  %6361 = vmatprep.subr.bf16.mxu1 %v6763_v32  ;;  %v6818_v38 = vld [vmem:[%s8462_s1 + $0x1e8] sm:$0xff]  }
  0xce   : > { %1362 = vmatmul.mubr.bf16.vlgmr.msra.gmra.mrb[0].mxu0 %v5063_v43  ;;  %6354 = vmatmul.mubr.bf16.vlgmr.msra.gmra.mrb[0].mxu1 %v6764_v40  ;;  %v6819_v40 = vld [vmem:[%s8462_s1 + $0x228] sm:$0xff]  }
  0xcf   : > { %5922 = vmatpush3.bf16.msra.mxu0 %v6765_v39  ;;  %6362 = vmatpush3.bf16.msra.mxu1 %v6763_v32  ;;  %v6826_v32 = vld [vmem:[%s7489_s12 + $0x50] ss:$12 sps:$4 sm:$0xff]   ;;  %v7682_v39 = vcombine.low %v7525_v44, %v7548_v50  ;;  %v6831_v43 = vld [vmem:[%s7489_s12 + $0x20] ss:$12 sps:$4 sm:$0xff]   ;;  %v6834_v50 = vld [vmem:[%s7489_s12 + $0x38] ss:$12 sps:$4 sm:$0xff]  }
  0xd0   : > { %5923 = vmatprep.subr.bf16.mxu0 %v6766_v33  ;;  %6363 = vmatprep.subr.bf16.mxu1 %v6767_v41  ;;  %v6820_v33 = vld [vmem:[%s8462_s1 + $0x1a8] sm:$0xff]   ;;  %v6825_v44 = vld [vmem:[%s8462_s1 + $0x230] sm:$0xff]  }
  0xd1   : > { %1369 = vmatprep.mubr.bf16.mxu0 %v5067_v47  ;;  %6357 = vmatprep.mubr.bf16.mxu1 %v6787_v57  ;;  %v6828_v47 = vld [vmem:[%s8462_s1 + $0x1f8] sm:$0xff]  }
  0xd2   : > { %v6844_v57 = vld [vmem:[%s8462_s1 + $0x258] sm:$0xff]  }
  0xd3   : > { %5924 = vmatpush3.bf16.msra.mxu0 %v6768_v45  ;;  %6364 = vmatpush3.bf16.msra.mxu1 %v6767_v41  ;;  %v6824_v41 = vld [vmem:[%s8462_s1 + $0x1f0] sm:$0xff]  }
  0xd4   : > { %5925 = vmatprep.subr.bf16.mxu0 %v6771_v48  ;;  %6365 = vmatprep.subr.bf16.mxu1 %v6772_v1  ;;  %v6827_v45 = vld [vmem:[%s8462_s1 + $0x1b0] sm:$0xff]   ;;  %v7711_v48 = vcombine.low %v7553_v52, %v7576_v4  ;;  %v6836_v52 = vld [vmem:[%s8462_s1 + $0x288] sm:$0xff]   ;;  %v6843_v4 = vld [vmem:[%s8462_s1 + $0x2d8] sm:$0xff]  }
  0xd6   : > { %1370 = vmatmul.mubr.bf16.gmra.mrb[4].mxu0 %v5066_v51  ;;  %6358 = vmatmul.mubr.bf16.gmra.mrb[4].mxu1 %v6790_v14  ;;  %v6835_v51 = vld [vmem:[%s8462_s1 + $0x240] sm:$0xff]   ;;  %v6848_v14 = vld [vmem:[%s8462_s1 + $0x2a8] sm:$0xff]  }
  0xd7   : > { %5926 = vmatpush3.bf16.msra.mxu0 %v6773_v49  ;;  %6366 = vmatpush3.bf16.msra.mxu1 %v6772_v1  ;;  %v6829_v1 = vld [vmem:[%s8462_s1 + $0x238] sm:$0xff]  }
  0xd8   : > { %5927 = vmatprep.subr.bf16.mxu0 %v6774_v2  ;;  %6367 = vmatprep.subr.bf16.mxu1 %v6775_v46  ;;  %v6830_v49 = vld [vmem:[%s8462_s1 + $0x1b8] sm:$0xff]   ;;  %v6832_v2 = vld [vmem:[%s8462_s1 + $0x280] sm:$0xff]  }
  0xd9   : > { %1377 = vmatprep.mubr.bf16.mxu0 %v5070_v3  ;;  %6377 = vmatprep.mubr.bf16.mxu1 %v6797_v15  ;;  %v6838_v3 = vld [vmem:[%s8462_s1 + $0x248] sm:$0xff]  }
  0xdb   : > { %5928 = vmatpush3.bf16.msra.mxu0 %v6776_v55  ;;  %6368 = vmatpush3.bf16.msra.mxu1 %v6775_v46  ;;  %v6833_v46 = vld [vmem:[%s8462_s1 + $0x2c0] sm:$0xff]   ;;  %v6837_v55 = vld [vmem:[%s8462_s1 + $0x2c8] sm:$0xff]  }
  0xdc   : > { %5929 = vmatprep.subr.bf16.mxu0 %v6779_v56  ;;  %6369 = vmatprep.subr.bf16.mxu1 %v6780_v61  ;;  %v6839_v56 = vld [vmem:[%s8462_s1 + $0x290] sm:$0xff]  }
  0xde   : > { %1378 = vmatmul.mubr.bf16.gmra.mrb[8].mxu0 %v5069_v10  ;;  %v6845_v10 = vld [vmem:[%s8462_s1 + $0x2a0] sm:$0xff]  }
  0xdf   : > { %5930 = vmatpush3.bf16.msra.mxu0 %v6781_v62  ;;  %6370 = vmatpush3.bf16.msra.mxu1 %v6780_v61  ;;  %v6840_v61 = vld [vmem:[%s8462_s1 + $0x2d0] sm:$0xff]  }
  0xe0   : > { %5931 = vmatprep.subr.bf16.mxu0 %v6782_v53  ;;  %6371 = vmatprep.subr.bf16.mxu1 %v6783_v54  ;;  %v6841_v62 = vld [vmem:[%s8462_s1 + $0x250] sm:$0xff]   ;;  %v6842_v53 = vld [vmem:[%s8462_s1 + $0x298] sm:$0xff]  }
  0xe1   : > { %1385 = vmatprep.mubr.bf16.mxu0 %v5073_v59  ;;  %v6847_v59 = vld [vmem:[%s8462_s1 + $0x260] sm:$0xff]  }
  0xe3   : > { %5932 = vmatpush3.bf16.msra.mxu0 %v6784_v5  ;;  %6372 = vmatpush3.bf16.msra.mxu1 %v6783_v54  ;;  %v6853_v54 = vld [vmem:[%s7489_s12 + $0x50] ss:$12 sps:$4 sm:$0xff]   ;;  %v6856_v5 = vld [vmem:[%s7489_s12 + $0x68] ss:$12 sps:$4 sm:$0xff]  }
  0xe4   : > { %5933 = vmatprep.subr.bf16.mxu0 %v6788_v58  ;;  %6373 = vmatprep.subr.bf16.mxu1 %v6789_v19  ;;  %v6846_v58 = vld [vmem:[%s8462_s1 + $0x2e0] sm:$0xff]  }
  0xe6   : > { %1386 = vmatmul.mubr.bf16.gmra.mrb[12].mxu0 %v5072_v63  ;;  %v6854_v63 = vld [vmem:[%s8462_s1 + $0x2b0] sm:$0xff]  }
  0xe7   : > { %5934 = vmatpush3.bf16.msra.mxu0 %v6791_v11  ;;  %6374 = vmatpush3.bf16.msra.mxu1 %v6789_v19  ;;  %v6849_v19 = vld [vmem:[%s8462_s1 + $0x2e8] sm:$0xff]  }
  0xe8   : > { %5935 = vmatprep.subr.bf16.mxu0 %v6792_v6  ;;  %6375 = vmatprep.subr.bf16.mxu1 %v6793_v12  ;;  %v6863_v11 = vld [vmem:[%s7786_s15 + $0x8] ss:$12 sps:$4 sm:$0xff]   ;;  %v5150_v6 = vld [vmem:[%s7489_s12 + $0x6c] sm:$0xff] }
  0xe9   : > { %1699 = vmatprep.mubr.bf16.mxu0 %v5100_v16  ;;  %v5210_v15 = vcombine.high %v7582_v13, %v5150_v6  ;;  %v7803_v16 = vld [vmem:[%s7786_s15 + $0xc] sm:$0xff] }
  0xeb   : > { %5936 = vmatpush3.bf16.msra.mxu0 %v6794_v9  ;;  %6376 = vmatpush3.bf16.msra.mxu1 %v6793_v12  ;;  %v6850_v12 = vld [vmem:[%s8462_s1 + $0x268] sm:$0xff]   ;;  %v2228_v9 = vld [vmem:[%s7786_s15] sm:$0xff] }
  0xec   : > { %5973 = vmatprep.subr.bf16.mxu0 %v6798_v60  ;;  %6385 = vmatprep.subr.bf16.mxu1 %v6799_v7  ;;  %v6857_v60 = vld [vmem:[%s8462_s1 + $0x270] sm:$0xff]  }
  0xee   : > { %1700 = vmatmul.mubr.bf16.vlgmr.msra.gmra.mrb[16].mxu0 %v5099_v27  ;;  %6378 = vmatmul.mubr.bf16.vlgmr.msra.gmra.mrb[0].mxu1 %v6800_v17  ;;  %v5209_v17 = vcombine.low %v7582_v13, %v5150_v6  ;;  %v6860_v27 = vld [vmem:[%s8462_s1 + $0x278] sm:$0xff]   ;;  %v6864_v13 = vld [vmem:[%s8462_s1 + $0x340] sm:$0xff]  }
  0xef   : > { %5974 = vmatpush3.bf16.msra.mxu0 %v6801_v20  ;;  %6386 = vmatpush3.bf16.msra.mxu1 %v6799_v7  ;;  %v6858_v7 = vld [vmem:[%s8462_s1 + $0x2b8] sm:$0xff]  }
  0xf0   : > { %5975 = vmatprep.subr.bf16.mxu0 %v6802_v26  ;;  %6387 = vmatprep.subr.bf16.mxu1 %v6803_v29  ;;  %v6859_v20 = vld [vmem:[%s8462_s1 + $0x2f8] sm:$0xff]   ;;  %v5289_v26 = vcombine.high %v2228_v9, %v7803_v16 }
  0xf1   : > { %1707 = vmatprep.mubr.bf16.mxu0 %v7635_v30  ;;  %6381 = vmatprep.mubr.bf16.mxu1 %v6823_v28  ;;  %v6875_v28 = vld [vmem:[%s8462_s1 + $0x310] sm:$0xff]  }
  0xf3   : > { %5976 = vmatpush3.bf16.msra.mxu0 %v6804_v24  ;;  %6388 = vmatpush3.bf16.msra.mxu1 %v6803_v29  ;;  %v6865_v29 = vld [vmem:[%s8462_s1 + $0x380] sm:$0xff]  }
  0xf4   : > { %5977 = vmatprep.subr.bf16.mxu0 %v6807_v31  ;;  %6389 = vmatprep.subr.bf16.mxu1 %v6808_v25  ;;  %v6867_v24 = vld [vmem:[%s8462_s1 + $0x300] sm:$0xff]   ;;  %v6868_v31 = vld [vmem:[%s8462_s1 + $0x348] sm:$0xff]  }
  0xf6   : > { %1708 = vmatmul.mubr.bf16.gmra.mrb[20].mxu0 %v7652_v22  ;;  %6382 = vmatmul.mubr.bf16.gmra.mrb[4].mxu1 %v6826_v32  ;;  %v7869_v32 = vld [vmem:[%s7786_s15 + $0x3c] sm:$0xff] }
  0xf7   : > { %5978 = vmatpush3.bf16.msra.mxu0 %v6809_v21  ;;  %6390 = vmatpush3.bf16.msra.mxu1 %v6808_v25  ;;  %v6869_v25 = vld [vmem:[%s8462_s1 + $0x388] sm:$0xff]   ;;  %v7836_v21 = vld [vmem:[%s7786_s15 + $0x18] sm:$0xff] }
  0xf8   : > { %5979 = vmatprep.subr.bf16.mxu0 %v6810_v8  ;;  %6391 = vmatprep.subr.bf16.mxu1 %v6811_v23  ;;  %v5288_v8 = vcombine.low %v2228_v9, %v7803_v16  ;;  %v6913_v9 = vld [vmem:[%s8462_s1 + $0x458] sm:$0xff]  }
  0xf9   : > { %1715 = vmatprep.mubr.bf16.mxu0 %v7666_v35  ;;  %6401 = vmatprep.mubr.bf16.mxu1 %v6831_v43  ;;  %v6881_v43 = vld [vmem:[%s8462_s1 + $0x360] sm:$0xff]  }
  0xfb   : > { %5980 = vmatpush3.bf16.msra.mxu0 %v6812_v34  ;;  %6392 = vmatpush3.bf16.msra.mxu1 %v6811_v23  ;;  %v6870_v23 = vld [vmem:[%s8462_s1 + $0x308] sm:$0xff]  }
  0xfc   : > { %5981 = vmatprep.subr.bf16.mxu0 %v6815_v18  ;;  %6393 = vmatprep.subr.bf16.mxu1 %v6816_v36  ;;  %v6873_v18 = vld [vmem:[%s8462_s1 + $0x350] sm:$0xff]  }
  0xfe   : > { %1716 = vmatmul.mubr.bf16.gmra.mrb[24].mxu0 %v7682_v39 }
  0xff   : > { %5982 = vmatpush3.bf16.msra.mxu0 %v6817_v37  ;;  %6394 = vmatpush3.bf16.msra.mxu1 %v6816_v36  ;;  %v6876_v36 = vld [vmem:[%s8462_s1 + $0x358] sm:$0xff]  }
 0x100   : > { %5983 = vmatprep.subr.bf16.mxu0 %v6818_v38  ;;  %6395 = vmatprep.subr.bf16.mxu1 %v6819_v40  ;;  %v6877_v37 = vld [vmem:[%s8462_s1 + $0x398] sm:$0xff]   ;;  %v7866_v38 = vld [vmem:[%s7786_s15 + $0x30] sm:$0xff] }
 0x101   : > { %1723 = vmatprep.mubr.bf16.mxu0 %v7696_v42 }
 0x103   : > { %5984 = vmatpush3.bf16.msra.mxu0 %v6820_v33  ;;  %6396 = vmatpush3.bf16.msra.mxu1 %v6819_v40  ;;  %v6892_v33 = vld [vmem:[%s7786_s15 + $0x50] ss:$12 sps:$4 sm:$0xff]  }
 0x104   : > { %5985 = vmatprep.subr.bf16.mxu0 %v6824_v41  ;;  %6397 = vmatprep.subr.bf16.mxu1 %v6825_v44  ;;  %v6878_v41 = vld [vmem:[%s8462_s1 + $0x318] sm:$0xff]  }
 0x106   : > { %1724 = vmatmul.mubr.bf16.gmra.mrb[28].mxu0 %v7711_v48 }
 0x107   : > { %5986 = vmatpush3.bf16.msra.mxu0 %v6827_v45  ;;  %6398 = vmatpush3.bf16.msra.mxu1 %v6825_v44  ;;  %v6882_v44 = vld [vmem:[%s8462_s1 + $0x3a0] sm:$0xff]  }
 0x108   : > { %5987 = vmatprep.subr.bf16.mxu0 %v6828_v47  ;;  %6399 = vmatprep.subr.bf16.mxu1 %v6829_v1  ;;  %v6883_v45 = vld [vmem:[%s8462_s1 + $0x320] sm:$0xff]   ;;  %v6884_v47 = vld [vmem:[%s8462_s1 + $0x368] sm:$0xff]  }
 0x109   : > { %2105 = vmatprep.mubr.bf16.mxu0 %v7635_v30  ;;  %v6866_v30 = vld [vmem:[%s7786_s15 + $0x20] ss:$12 sps:$4 sm:$0xff]  }
 0x10b   : > { %5988 = vmatpush3.bf16.msra.mxu0 %v6830_v49  ;;  %6400 = vmatpush3.bf16.msra.mxu1 %v6829_v1  ;;  %v7902_v1 = vld [vmem:[%s7786_s15 + $0x48] sm:$0xff]  ;;  %v6899_v49 = vld [vmem:[%s7786_s15 + $0x14] ss:$12 sps:$4 sm:$0xff]  }
 0x10c   : > { %6025 = vmatprep.subr.bf16.mxu0 %v6832_v2  ;;  %6409 = vmatprep.subr.bf16.mxu1 %v6833_v46  ;;  %v7907_v2 = vcombine.low %v7866_v38, %v7869_v32 }
 0x10e   : > { %2106 = vmatmul.mubr.bf16.vlgmr.msra.gmra.mrb[32].mxu0 %v7652_v22  ;;  %6402 = vmatmul.mubr.bf16.vlgmr.msra.gmra.mrb[0].mxu1 %v6834_v50  ;;  %v7840_v22 = vld [vmem:[%s7786_s15 + $0x24] sm:$0xff] }
 0x10f   : > { %6026 = vmatpush3.bf16.msra.mxu0 %v6835_v51  ;;  %6410 = vmatpush3.bf16.msra.mxu1 %v6833_v46  ;;  %v7847_v34 = vcombine.high %v7836_v21, %v7840_v22  ;;  %v7874_v40 = vcombine.low %v7836_v21, %v7840_v22  ;;  %v7910_v46 = vld [vmem:[%s7786_s15 + $0x54] sm:$0xff]  ;;  %v6886_v50 = vld [vmem:[%s8462_s1 + $0x328] sm:$0xff]   ;;  %v5393_v6 = vcombine.high %v7840_v22, %v7866_v38 }
 0x110   : > { %6027 = vmatprep.subr.bf16.mxu0 %v6836_v52  ;;  %6411 = vmatprep.subr.bf16.mxu1 %v6837_v55  ;;  %v7918_v51 = vcombine.high %v7902_v1, %v7910_v46  ;;  %v6890_v52 = vld [vmem:[%s8462_s1 + $0x370] sm:$0xff]  }
 0x111   : > { %2113 = vmatprep.mubr.bf16.mxu0 %v7666_v35  ;;  %6405 = vmatprep.mubr.bf16.mxu1 %v6853_v54  ;;  %v6874_v35 = vld [vmem:[%s8462_s1 + $0x390] sm:$0xff]   ;;  %v5390_v54 = vcombine.high %v7803_v16, %v7836_v21 }
 0x113   : > { %6028 = vmatpush3.bf16.msra.mxu0 %v6838_v3  ;;  %6412 = vmatpush3.bf16.msra.mxu1 %v6837_v55  ;;  %v6891_v55 = vld [vmem:[%s8462_s1 + $0x3b0] sm:$0xff]  }
 0x114   : > { %6029 = vmatprep.subr.bf16.mxu0 %v6839_v56  ;;  %6413 = vmatprep.subr.bf16.mxu1 %v6840_v61  ;;  %v6893_v3 = vld [vmem:[%s8462_s1 + $0x330] sm:$0xff]   ;;  %v6894_v56 = vld [vmem:[%s8462_s1 + $0x378] sm:$0xff]  }
 0x116   : > { %2114 = vmatmul.mubr.bf16.gmra.mrb[36].mxu0 %v7682_v39  ;;  %6406 = vmatmul.mubr.bf16.gmra.mrb[4].mxu1 %v6856_v5  ;;  %v6889_v39 = vld [vmem:[%s7786_s15 + $0x38] ss:$12 sps:$4 sm:$0xff]  }
 0x117   : > { %6030 = vmatpush3.bf16.msra.mxu0 %v6841_v62  ;;  %6414 = vmatpush3.bf16.msra.mxu1 %v6840_v61  ;;  %v7935_v61 = vcombine.low %v7902_v1, %v7910_v46  ;;  %v6895_v62 = vld [vmem:[%s8462_s1 + $0x3b8] sm:$0xff]   ;;  %v6903_v5 = vld [vmem:[%s8462_s1 + $0x3c0] sm:$0xff]  }
 0x118   : > { %6031 = vmatprep.subr.bf16.mxu0 %v6842_v53  ;;  %6415 = vmatprep.subr.bf16.mxu1 %v6843_v4  ;;  %v6896_v53 = vld [vmem:[%s8462_s1 + $0x338] sm:$0xff]  }
 0x119   : > { %2121 = vmatprep.mubr.bf16.mxu0 %v7696_v42  ;;  %6425 = vmatprep.mubr.bf16.mxu1 %v6863_v11  ;;  %v7883_v42 = vcombine.high %v7866_v38, %v7869_v32  ;;  %v6909_v11 = vld [vmem:[%s8462_s1 + $0x410] sm:$0xff]  }
 0x11b   : > { %6032 = vmatpush3.bf16.msra.mxu0 %v6844_v57  ;;  %6416 = vmatpush3.bf16.msra.mxu1 %v6843_v4  ;;  %v6900_v4 = vld [vmem:[%s8462_s1 + $0x400] sm:$0xff]  }
 0x11c   : > { %6033 = vmatprep.subr.bf16.mxu0 %v6845_v10  ;;  %6417 = vmatprep.subr.bf16.mxu1 %v6846_v58  ;;  %v6901_v57 = vld [vmem:[%s8462_s1 + $0x440] sm:$0xff]   ;;  %v6902_v10 = vld [vmem:[%s7786_s15 + $0x2c] ss:$12 sps:$4 sm:$0xff]  }
 0x11e   : > { %2122 = vmatmul.mubr.bf16.gmra.mrb[40].mxu0 %v7711_v48  ;;  %v6885_v48 = vld [vmem:[%s8462_s1 + $0x3a8] sm:$0xff]  }
 0x11f   : > { %6034 = vmatpush3.bf16.msra.mxu0 %v6847_v59  ;;  %6418 = vmatpush3.bf16.msra.mxu1 %v6846_v58  ;;  %v6904_v58 = vld [vmem:[%s8462_s1 + $0x408] sm:$0xff]   ;;  %v5389_v59 = vcombine.low %v7803_v16, %v7836_v21  ;;  %v5392_v16 = vcombine.low %v7840_v22, %v7866_v38  ;;  %v6927_v22 = vld [vmem:[%s8462_s1 + $0x470] sm:$0xff]   ;;  %v6935_v38 = vld [vmem:[%s8462_s1 + $0x500] sm:$0xff]  }
 0x120   : > { %6035 = vmatprep.subr.bf16.mxu0 %v6848_v14  ;;  %6419 = vmatprep.subr.bf16.mxu1 %v6849_v19  ;;  %v6905_v14 = vld [vmem:[%s8462_s1 + $0x448] sm:$0xff]  }
 0x121   : > { %2129 = vmatprep.mubr.bf16.mxu0 %v5210_v15  ;;  %v6910_v15 = vld [vmem:[%s8462_s1 + $0x450] sm:$0xff]  }
 0x123   : > { %6036 = vmatpush3.bf16.msra.mxu0 %v6850_v12  ;;  %6420 = vmatpush3.bf16.msra.mxu1 %v6849_v19  ;;  %v6906_v19 = vld [vmem:[%s8462_s1 + $0x3c8] sm:$0xff]   ;;  %v6925_v12 = vld [vmem:[%s7786_s15 + $0x44] ss:$12 sps:$4 sm:$0xff]  }
 0x124   : > { %6037 = vmatprep.subr.bf16.mxu0 %v6854_v63  ;;  %6421 = vmatprep.subr.bf16.mxu1 %v6855_v0  ;;  %v6911_v63 = vld [vmem:[%s8462_s1 + $0x3d0] sm:$0xff]  }
 0x126   : > { %2130 = vmatmul.mubr.bf16.gmra.mrb[44].mxu0 %v5209_v17  ;;  %v6917_v17 = vld [vmem:[%s8462_s1 + $0x420] sm:$0xff]  }
 0x127   : > { %6038 = vmatpush3.bf16.msra.mxu0 %v6857_v60  ;;  %6422 = vmatpush3.bf16.msra.mxu1 %v6855_v0  ;;  %v6912_v0 = vld [vmem:[%s8462_s1 + $0x418] sm:$0xff]  }
 0x128   : > { %6039 = vmatprep.subr.bf16.mxu0 %v6858_v7  ;;  %6423 = vmatprep.subr.bf16.mxu1 %v6859_v20  ;;  %v6928_v60 = vld [vmem:[%s7786_s15 + $0x5c] ss:$12 sps:$4 sm:$0xff]  }
 0x129   : > { %2533 = vmatprep.mubr.bf16.mxu0 %v5289_v26  ;;  %v6914_v7 = vld [vmem:[%s8462_s1 + $0x3d8] sm:$0xff]   ;;  %v6933_v26 = vld [vmem:[%s7786_s15 + $0x20] ss:$12 sps:$4 sm:$0xff]  }
 0x12b   : > { %6040 = vmatpush3.bf16.msra.mxu0 %v6860_v27  ;;  %6424 = vmatpush3.bf16.msra.mxu1 %v6859_v20  ;;  %v5396_v20 = vcombine.high %v7869_v32, %v7902_v1  ;;  %v6918_v27 = vld [vmem:[%s8462_s1 + $0x460] sm:$0xff]  }
 0x12c   : > { %6077 = vmatprep.subr.bf16.mxu0 %v6864_v13  ;;  %6433 = vmatprep.subr.bf16.mxu1 %v6865_v29  ;;  %v6919_v13 = vld [vmem:[%s8462_s1 + $0x3e0] sm:$0xff]  }
 0x12e   : > { %2534 = vmatmul.mubr.bf16.vlgmr.msra.gmra.mrb[48].mxu0 %v5288_v8  ;;  %6426 = vmatmul.mubr.bf16.vlgmr.msra.gmra.mrb[0].mxu1 %v6866_v30  ;;  %v5395_v30 = vcombine.low %v7869_v32, %v7902_v1  ;;  %v6926_v8 = vld [vmem:[%s8462_s1 + $0x430] sm:$0xff]   ;;  %v6936_v32 = vld [vmem:[%s7786_s15 + $0x38] ss:$12 sps:$4 sm:$0xff]  }
 0x12f   : > { %6078 = vmatpush3.bf16.msra.mxu0 %v6867_v24  ;;  %6434 = vmatpush3.bf16.msra.mxu1 %v6865_v29  ;;  %v6920_v29 = vld [vmem:[%s8462_s1 + $0x428] sm:$0xff]  }
 0x130   : > { %6079 = vmatprep.subr.bf16.mxu0 %v6868_v31  ;;  %6435 = vmatprep.subr.bf16.mxu1 %v6869_v25  ;;  %v6921_v24 = vld [vmem:[%s8462_s1 + $0x468] sm:$0xff]   ;;  %v8013_v31 = vld [vmem:[%s7786_s15 + $0x60] sm:$0xff] }
 0x131   : > { %2541 = vmatprep.mubr.bf16.mxu0 %v7847_v34  ;;  %6429 = vmatprep.mubr.bf16.mxu1 %v6889_v39  ;;  %v5399_v21 = vcombine.high %v7910_v46, %v8013_v31  ;;  %v6937_v39 = vld [vmem:[%s8462_s1 + $0x480] sm:$0xff]   ;;  %v6965_v1 = vld [vmem:[%s8078_s30 + $0x8] ss:$12 sps:$4 sm:$0xff]  }
 0x133   : > { %6080 = vmatpush3.bf16.msra.mxu0 %v6870_v23  ;;  %6436 = vmatpush3.bf16.msra.mxu1 %v6869_v25  ;;  %v6922_v25 = vld [vmem:[%s8462_s1 + $0x3e8] sm:$0xff]   ;;  %v6929_v23 = vld [vmem:[%s8462_s1 + $0x3f0] sm:$0xff]  }
 0x134   : > { %6081 = vmatprep.subr.bf16.mxu0 %v6873_v18  ;;  %6437 = vmatprep.subr.bf16.mxu1 %v6874_v35  ;;  %v6930_v18 = vld [vmem:[%s8462_s1 + $0x438] sm:$0xff]  }
 0x136   : > { %2542 = vmatmul.mubr.bf16.gmra.mrb[52].mxu0 %v7874_v40  ;;  %6430 = vmatmul.mubr.bf16.gmra.mrb[4].mxu1 %v6892_v33  ;;  %v6938_v33 = vld [vmem:[%s8462_s1 + $0x4c8] sm:$0xff]  }
 0x137   : > { %6082 = vmatpush3.bf16.msra.mxu0 %v6875_v28  ;;  %6438 = vmatpush3.bf16.msra.mxu1 %v6874_v35  ;;  %v5398_v35 = vcombine.low %v7910_v46, %v8013_v31  ;;  %v6931_v28 = vld [vmem:[%s8462_s1 + $0x478] sm:$0xff]   ;;  %v6947_v46 = vld [vmem:[%s8462_s1 + $0x4e0] sm:$0xff]  }
 0x138   : > { %6083 = vmatprep.subr.bf16.mxu0 %v6876_v36  ;;  %6439 = vmatprep.subr.bf16.mxu1 %v6877_v37  ;;  %v6932_v36 = vld [vmem:[%s8462_s1 + $0x3f8] sm:$0xff]  }
 0x139   : > { %2549 = vmatprep.mubr.bf16.mxu0 %v7883_v42  ;;  %6449 = vmatprep.mubr.bf16.mxu1 %v6899_v49  ;;  %v6946_v49 = vld [vmem:[%s8462_s1 + $0x498] sm:$0xff]  }
 0x13b   : > { %6084 = vmatpush3.bf16.msra.mxu0 %v6878_v41  ;;  %6440 = vmatpush3.bf16.msra.mxu1 %v6877_v37  ;;  %v6934_v37 = vld [vmem:[%s8462_s1 + $0x4c0] sm:$0xff]   ;;  %v6939_v41 = vld [vmem:[%s8462_s1 + $0x508] sm:$0xff]  }
 0x13c   : > { %6085 = vmatprep.subr.bf16.mxu0 %v6881_v43  ;;  %6441 = vmatprep.subr.bf16.mxu1 %v6882_v44  ;;  %v6941_v43 = vld [vmem:[%s8462_s1 + $0x4d0] sm:$0xff]  }
 0x13e   : > { %2550 = vmatmul.mubr.bf16.gmra.mrb[56].mxu0 %v7907_v2 }
 0x13f   : > { %6086 = vmatpush3.bf16.msra.mxu0 %v6883_v45  ;;  %6442 = vmatpush3.bf16.msra.mxu1 %v6882_v44  ;;  %v6955_v44 = vld [vmem:[%s7786_s15 + $0x50] ss:$12 sps:$4 sm:$0xff]  }
 0x140   : > { %6087 = vmatprep.subr.bf16.mxu0 %v6884_v47  ;;  %6443 = vmatprep.subr.bf16.mxu1 %v6885_v48  ;;  %v6942_v45 = vld [vmem:[%s8462_s1 + $0x510] sm:$0xff]   ;;  %v6944_v47 = vld [vmem:[%s8462_s1 + $0x4d8] sm:$0xff]  }
 0x141   : > { %2557 = vmatprep.mubr.bf16.mxu0 %v7918_v51 }
 0x143   : > { %6088 = vmatpush3.bf16.msra.mxu0 %v6886_v50  ;;  %6444 = vmatpush3.bf16.msra.mxu1 %v6885_v48  ;;  %v6945_v48 = vld [vmem:[%s8462_s1 + $0x518] sm:$0xff]   ;;  %v6948_v50 = vld [vmem:[%s8462_s1 + $0x520] sm:$0xff]  }
 0x144   : > { %6089 = vmatprep.subr.bf16.mxu0 %v6890_v52  ;;  %6445 = vmatprep.subr.bf16.mxu1 %v6891_v55  ;;  %v6950_v52 = vld [vmem:[%s8462_s1 + $0x4e8] sm:$0xff]  }
 0x146   : > { %2558 = vmatmul.mubr.bf16.gmra.mrb[60].mxu0 %v7935_v61 }
 0x147   : > { %6090 = vmatpush3.bf16.msra.mxu0 %v6893_v3  ;;  %6446 = vmatpush3.bf16.msra.mxu1 %v6891_v55  ;;  %v6951_v55 = vld [vmem:[%s8462_s1 + $0x528] sm:$0xff]  }
 0x148   : > { %6091 = vmatprep.subr.bf16.mxu0 %v6894_v56  ;;  %6447 = vmatprep.subr.bf16.mxu1 %v6895_v62  ;;  %v6952_v3 = vld [vmem:[%s8462_s1 + $0x4a8] sm:$0xff]  }
 0x149   : > { %2947 = vmatprep.mubr.bf16.mxu0 %v5390_v54  ;;  %v3484_v54 = vld [vmem:[%s8078_s30] sm:$0xff] }
 0x14b   : > { %6092 = vmatpush3.bf16.msra.mxu0 %v6896_v53  ;;  %6448 = vmatpush3.bf16.msra.mxu1 %v6895_v62  ;;  %v6956_v62 = vld [vmem:[%s8462_s1 + $0x4f0] sm:$0xff]  }
 0x14c   : > { %6129 = vmatprep.subr.bf16.mxu0 %v6900_v4  ;;  %6457 = vmatprep.subr.bf16.mxu1 %v6901_v57  ;;  %v6957_v53 = vld [vmem:[%s8462_s1 + $0x530] sm:$0xff]  }
 0x14d   : > { %v8122_v4 = vld [vmem:[%s8078_s30 + $0xc] sm:$0xff] }
 0x14e   : > { %2948 = vmatmul.mubr.bf16.vlgmr.msra.gmra.mrb[64].mxu0 %v5389_v59  ;;  %6450 = vmatmul.mubr.bf16.vlgmr.msra.gmra.mrb[0].mxu1 %v6902_v10  ;;  %v6962_v59 = vld [vmem:[%s8462_s1 + $0x4b8] sm:$0xff]  }
 0x14f   : > { %6130 = vmatpush3.bf16.msra.mxu0 %v6903_v5  ;;  %6458 = vmatpush3.bf16.msra.mxu1 %v6901_v57  ;;  %v6960_v57 = vld [vmem:[%s8462_s1 + $0x4f8] sm:$0xff]  }
 0x150   : > { %6131 = vmatprep.subr.bf16.mxu0 %v6904_v58  ;;  %6459 = vmatprep.subr.bf16.mxu1 %v6905_v14  ;;  %v6961_v5 = vld [vmem:[%s8462_s1 + $0x538] sm:$0xff]   ;;  %v5579_v58 = vcombine.high %v3484_v54, %v8122_v4 }
 0x151   : > { %2955 = vmatprep.mubr.bf16.mxu0 %v5393_v6  ;;  %6453 = vmatprep.mubr.bf16.mxu1 %v6925_v12  ;;  %v6968_v6 = vld [vmem:[%s8078_s30 + $0x20] ss:$12 sps:$4 sm:$0xff]  }
 0x152   : > { %v6970_v12 = vld [vmem:[%s8462_s1 + $0x588] sm:$0xff]  }
 0x153   : > { %6132 = vmatpush3.bf16.msra.mxu0 %v6906_v19  ;;  %6460 = vmatpush3.bf16.msra.mxu1 %v6905_v14  ;;  %v6966_v14 = vld [vmem:[%s8462_s1 + $0x580] sm:$0xff]  }
 0x154   : > { %6133 = vmatprep.subr.bf16.mxu0 %v6909_v11  ;;  %6461 = vmatprep.subr.bf16.mxu1 %v6910_v15  ;;  %v6967_v19 = vld [vmem:[%s8462_s1 + $0x5c0] sm:$0xff]  }
 0x155   : > { %v6969_v11 = vld [vmem:[%s8462_s1 + $0x540] sm:$0xff]  }
 0x156   : > { %2956 = vmatmul.mubr.bf16.gmra.mrb[68].mxu0 %v5392_v16  ;;  %6454 = vmatmul.mubr.bf16.gmra.mrb[4].mxu1 %v6928_v60  ;;  %v6972_v16 = vld [vmem:[%s8462_s1 + $0x548] sm:$0xff]   ;;  %v6975_v60 = vld [vmem:[%s8462_s1 + $0x590] sm:$0xff]  }
 0x157   : > { %6134 = vmatpush3.bf16.msra.mxu0 %v6911_v63  ;;  %6462 = vmatpush3.bf16.msra.mxu1 %v6910_v15  ;;  %v6971_v15 = vld [vmem:[%s8462_s1 + $0x5c8] sm:$0xff]   ;;  %v8152_v63 = vld [vmem:[%s8078_s30 + $0x18] sm:$0xff] }
 0x158   : > { %6135 = vmatprep.subr.bf16.mxu0 %v6912_v0  ;;  %6463 = vmatprep.subr.bf16.mxu1 %v6913_v9  ;;  %v5578_v0 = vcombine.low %v3484_v54, %v8122_v4 }
 0x159   : > { %2963 = vmatprep.mubr.bf16.mxu0 %v5396_v20  ;;  %6473 = vmatprep.mubr.bf16.mxu1 %v6933_v26  ;;  %v6976_v20 = vld [vmem:[%s8462_s1 + $0x5d0] sm:$0xff]  }
 0x15a   : > { %v6977_v26 = vld [vmem:[%s8462_s1 + $0x550] sm:$0xff]  }
 0x15b   : > { %6136 = vmatpush3.bf16.msra.mxu0 %v6914_v7  ;;  %6464 = vmatpush3.bf16.msra.mxu1 %v6913_v9  ;;  %v8156_v9 = vld [vmem:[%s8078_s30 + $0x24] sm:$0xff] }
 0x15c   : > { %6137 = vmatprep.subr.bf16.mxu0 %v6917_v17  ;;  %6465 = vmatprep.subr.bf16.mxu1 %v6918_v27  ;;  %v8166_v7 = vcombine.high %v8152_v63, %v8156_v9  ;;  %v6991_v17 = vld [vmem:[%s8078_s30 + $0x38] ss:$12 sps:$4 sm:$0xff]  }
 0x15e   : > { %2964 = vmatmul.mubr.bf16.gmra.mrb[72].mxu0 %v5395_v30  ;;  %v8190_v30 = vcombine.low %v8152_v63, %v8156_v9 }
 0x15f   : > { %6138 = vmatpush3.bf16.msra.mxu0 %v6919_v13  ;;  %6466 = vmatpush3.bf16.msra.mxu1 %v6918_v27  ;;  %v6978_v27 = vld [vmem:[%s8462_s1 + $0x598] sm:$0xff]  }
 0x160   : > { %6139 = vmatprep.subr.bf16.mxu0 %v6920_v29  ;;  %6467 = vmatprep.subr.bf16.mxu1 %v6921_v24  ;;  %v6979_v13 = vld [vmem:[%s8462_s1 + $0x5d8] sm:$0xff]   ;;  %v8183_v29 = vld [vmem:[%s8078_s30 + $0x30] sm:$0xff] }
 0x161   : > { %2971 = vmatprep.mubr.bf16.mxu0 %v5399_v21  ;;  %v6983_v21 = vld [vmem:[%s8462_s1 + $0x5a0] sm:$0xff]  }
 0x163   : > { %6140 = vmatpush3.bf16.msra.mxu0 %v6922_v25  ;;  %6468 = vmatpush3.bf16.msra.mxu1 %v6921_v24  ;;  %v8186_v24 = vld [vmem:[%s8078_s30 + $0x3c] sm:$0xff] }
 0x164   : > { %6141 = vmatprep.subr.bf16.mxu0 %v6926_v8  ;;  %6469 = vmatprep.subr.bf16.mxu1 %v6927_v22  ;;  %v6980_v25 = vld [vmem:[%s8462_s1 + $0x558] sm:$0xff]   ;;  %v8202_v8 = vcombine.high %v8183_v29, %v8186_v24 }
 0x166   : > { %2972 = vmatmul.mubr.bf16.gmra.mrb[76].mxu0 %v5398_v35  ;;  %v6986_v35 = vld [vmem:[%s8462_s1 + $0x5a8] sm:$0xff]  }
 0x167   : > { %6142 = vmatpush3.bf16.msra.mxu0 %v6929_v23  ;;  %6470 = vmatpush3.bf16.msra.mxu1 %v6927_v22  ;;  %v7001_v22 = vld [vmem:[%s8078_s30 + $0x14] ss:$12 sps:$4 sm:$0xff]  }
 0x168   : > { %6143 = vmatprep.subr.bf16.mxu0 %v6930_v18  ;;  %6471 = vmatprep.subr.bf16.mxu1 %v6931_v28  ;;  %v6984_v23 = vld [vmem:[%s8462_s1 + $0x5e0] sm:$0xff]  }
 0x169   : > { %3361 = vmatprep.mubr.bf16.mxu0 %v7847_v34  ;;  %v6940_v34 = vld [vmem:[%s8462_s1 + $0x488] sm:$0xff]   ;;  %v6985_v18 = vld [vmem:[%s8462_s1 + $0x560] sm:$0xff]  }
 0x16b   : > { %6144 = vmatpush3.bf16.msra.mxu0 %v6932_v36  ;;  %6472 = vmatpush3.bf16.msra.mxu1 %v6931_v28  ;;  %v6987_v28 = vld [vmem:[%s8462_s1 + $0x5e8] sm:$0xff]  }
 0x16c   : > { %6181 = vmatprep.subr.bf16.mxu0 %v6934_v37  ;;  %6481 = vmatprep.subr.bf16.mxu1 %v6935_v38  ;;  %v8219_v36 = vld [vmem:[%s8078_s30 + $0x48] sm:$0xff]  ;;  %v8223_v37 = vcombine.low %v8183_v29, %v8186_v24 }
 0x16e   : > { %3362 = vmatmul.mubr.bf16.vlgmr.msra.gmra.mrb[80].mxu0 %v7874_v40  ;;  %6474 = vmatmul.mubr.bf16.vlgmr.msra.gmra.mrb[0].mxu1 %v6936_v32  ;;  %v6943_v40 = vld [vmem:[%s8462_s1 + $0x490] sm:$0xff]   ;;  %v6988_v32 = vld [vmem:[%s8462_s1 + $0x568] sm:$0xff]  }
 0x16f   : > { %6182 = vmatpush3.bf16.msra.mxu0 %v6937_v39  ;;  %6482 = vmatpush3.bf16.msra.mxu1 %v6935_v38  ;;  %v8226_v38 = vld [vmem:[%s8078_s30 + $0x54] sm:$0xff] }
 0x170   : > { %6183 = vmatprep.subr.bf16.mxu0 %v6938_v33  ;;  %6483 = vmatprep.subr.bf16.mxu1 %v6939_v41  ;;  %v8234_v39 = vcombine.high %v8219_v36, %v8226_v38  ;;  %v6992_v33 = vld [vmem:[%s8462_s1 + $0x5b0] sm:$0xff]  }
 0x171   : > { %3369 = vmatprep.mubr.bf16.mxu0 %v7883_v42  ;;  %6477 = vmatprep.mubr.bf16.mxu1 %v6955_v44  ;;  %v6958_v42 = vld [vmem:[%s7786_s15 + $0x68] ss:$12 sps:$4 sm:$0xff]  }
 0x172   : > { %v6995_v44 = vld [vmem:[%s8462_s1 + $0x570] sm:$0xff]  }
 0x173   : > { %6184 = vmatpush3.bf16.msra.mxu0 %v6940_v34  ;;  %6484 = vmatpush3.bf16.msra.mxu1 %v6939_v41  ;;  %v6993_v41 = vld [vmem:[%s8462_s1 + $0x5f0] sm:$0xff]  }
 0x174   : > { %6185 = vmatprep.subr.bf16.mxu0 %v6941_v43  ;;  %6485 = vmatprep.subr.bf16.mxu1 %v6942_v45 }
 0x176   : > { %3370 = vmatmul.mubr.bf16.gmra.mrb[84].mxu0 %v7907_v2  ;;  %6478 = vmatmul.mubr.bf16.gmra.mrb[4].mxu1 %v6958_v42  ;;  %v6949_v2 = vld [vmem:[%s8462_s1 + $0x4a0] sm:$0xff]   ;;  %v8253_v42 = vcombine.low %v8219_v36, %v8226_v38 }
 0x177   : > { %6186 = vmatpush3.bf16.msra.mxu0 %v6943_v40  ;;  %6486 = vmatpush3.bf16.msra.mxu1 %v6942_v45 }
 0x178   : > { %6187 = vmatprep.subr.bf16.mxu0 %v6944_v47  ;;  %6487 = vmatprep.subr.bf16.mxu1 %v6945_v48  ;;  %v6996_v47 = vld [vmem:[%s8462_s1 + $0x5b8] sm:$0xff]  }
 0x179   : > { %3377 = vmatprep.mubr.bf16.mxu0 %v7918_v51  ;;  %6497 = vmatprep.mubr.bf16.mxu1 %v6965_v1  ;;  %v5440_v51 = vld [vmem:[%s7786_s15 + $0x6c] sm:$0xff]  ;;  %v6997_v1 = vld [vmem:[%s8462_s1 + $0x5f8] sm:$0xff]  }
 0x17a   : > { %v5500_v56 = vcombine.high %v8013_v31, %v5440_v51  ;;  %v5499_v10 = vcombine.low %v8013_v31, %v5440_v51  ;;  %v6994_v31 = vld [vmem:[%s8078_s30 + $0x50] ss:$12 sps:$4 sm:$0xff]   ;;  %v7002_v51 = vld [vmem:[%s8462_s1 + $0x640] sm:$0xff]  }
 0x17b   : > { %6188 = vmatpush3.bf16.msra.mxu0 %v6946_v49  ;;  %6488 = vmatpush3.bf16.msra.mxu1 %v6945_v48  ;;  %v8259_v49 = vld [vmem:[%s8078_s30 + $0x60] sm:$0xff] }
 0x17c   : > { %6189 = vmatprep.subr.bf16.mxu0 %v6947_v46  ;;  %6489 = vmatprep.subr.bf16.mxu1 %v6948_v50 }
 0x17e   : > { %3378 = vmatmul.mubr.bf16.gmra.mrb[88].mxu0 %v7935_v61  ;;  %v6959_v61 = vld [vmem:[%s8462_s1 + $0x4b0] sm:$0xff]  }
 0x17f   : > { %6190 = vmatpush3.bf16.msra.mxu0 %v6949_v2  ;;  %6490 = vmatpush3.bf16.msra.mxu1 %v6948_v50  ;;  %v5689_v50 = vcombine.high %v8226_v38, %v8259_v49  ;;  %v5688_v2 = vcombine.low %v8226_v38, %v8259_v49 }
 0x180   : > { %6191 = vmatprep.subr.bf16.mxu0 %v6950_v52  ;;  %6491 = vmatprep.subr.bf16.mxu1 %v6951_v55  ;;  %v6998_v52 = vld [vmem:[%s8462_s1 + $0x578] sm:$0xff]  }
 0x181   : > { %3385 = vmatprep.mubr.bf16.mxu0 %v5500_v56 }
 0x183   : > { %6192 = vmatpush3.bf16.msra.mxu0 %v6952_v3  ;;  %6492 = vmatpush3.bf16.msra.mxu1 %v6951_v55  ;;  %v5680_v55 = vcombine.high %v8122_v4, %v8152_v63  ;;  %v7003_v3 = vld [vmem:[%s8462_s1 + $0x680] sm:$0xff]  }
 0x184   : > { %6193 = vmatprep.subr.bf16.mxu0 %v6956_v62  ;;  %6493 = vmatprep.subr.bf16.mxu1 %v6957_v53 }
 0x186   : > { %3386 = vmatmul.mubr.bf16.gmra.mrb[92].mxu0 %v5499_v10  ;;  %v7006_v10 = vld [vmem:[%s8462_s1 + $0x648] sm:$0xff]  }
 0x187   : > { %6194 = vmatpush3.bf16.msra.mxu0 %v6959_v61  ;;  %6494 = vmatpush3.bf16.msra.mxu1 %v6957_v53  ;;  %v7004_v53 = vld [vmem:[%s8078_s30 + $0x2c] ss:$12 sps:$4 sm:$0xff]   ;;  %v7005_v61 = vld [vmem:[%s8462_s1 + $0x600] sm:$0xff]  }
 0x188   : > { %6195 = vmatprep.subr.bf16.mxu0 %v6960_v57  ;;  %6495 = vmatprep.subr.bf16.mxu1 %v6961_v5 }
 0x189   : > { %3789 = vmatprep.mubr.bf16.mxu0 %v5579_v58  ;;  %v5679_v58 = vcombine.low %v8122_v4, %v8152_v63  ;;  %v7026_v4 = vld [vmem:[%s8078_s30 + $0x44] ss:$12 sps:$4 sm:$0xff]  }
 0x18b   : > { %6196 = vmatpush3.bf16.msra.mxu0 %v6962_v59  ;;  %6496 = vmatpush3.bf16.msra.mxu1 %v6961_v5  ;;  %v7007_v59 = vld [vmem:[%s8462_s1 + $0x688] sm:$0xff]  }
 0x18c   : > { %6233 = vmatprep.subr.bf16.mxu0 %v6966_v14  ;;  %6505 = vmatprep.subr.bf16.mxu1 %v6967_v19 }
 0x18e   : > { %3790 = vmatmul.mubr.bf16.vlgmr.msra.gmra.mrb[96].mxu0 %v5578_v0  ;;  %6498 = vmatmul.mubr.bf16.vlgmr.msra.gmra.mrb[0].mxu1 %v6968_v6  ;;  %v7011_v6 = vld [vmem:[%s8462_s1 + $0x650] sm:$0xff]  }
 0x18f   : > { %6234 = vmatpush3.bf16.msra.mxu0 %v6969_v11  ;;  %6506 = vmatpush3.bf16.msra.mxu1 %v6967_v19  ;;  %v7008_v19 = vld [vmem:[%s8462_s1 + $0x608] sm:$0xff]   ;;  %v5683_v11 = vcombine.high %v8156_v9, %v8183_v29 }
 0x190   : > { %6235 = vmatprep.subr.bf16.mxu0 %v6970_v12  ;;  %6507 = vmatprep.subr.bf16.mxu1 %v6971_v15  ;;  %v7012_v12 = vld [vmem:[%s8462_s1 + $0x690] sm:$0xff]  }
 0x191   : > { %3797 = vmatprep.mubr.bf16.mxu0 %v8166_v7  ;;  %6501 = vmatprep.mubr.bf16.mxu1 %v6991_v17 }
 0x193   : > { %6236 = vmatpush3.bf16.msra.mxu0 %v6972_v16  ;;  %6508 = vmatpush3.bf16.msra.mxu1 %v6971_v15 }
 0x194   : > { %6237 = vmatprep.subr.bf16.mxu0 %v6975_v60  ;;  %6509 = vmatprep.subr.bf16.mxu1 %v6976_v20  ;;  %v7013_v60 = vld [vmem:[%s8462_s1 + $0x610] sm:$0xff]  }
 0x196   : > { %3798 = vmatmul.mubr.bf16.gmra.mrb[100].mxu0 %v8190_v30  ;;  %6502 = vmatmul.mubr.bf16.gmra.mrb[4].mxu1 %v6994_v31 }
 0x197   : > { %6238 = vmatpush3.bf16.msra.mxu0 %v6977_v26  ;;  %6510 = vmatpush3.bf16.msra.mxu1 %v6976_v20  ;;  %v5682_v20 = vcombine.low %v8156_v9, %v8183_v29  ;;  %v7014_v26 = vld [vmem:[%s8462_s1 + $0x658] sm:$0xff]   ;;  %v5686_v29 = vcombine.high %v8186_v24, %v8219_v36 }
 0x198   : > { %6239 = vmatprep.subr.bf16.mxu0 %v6978_v27  ;;  %6511 = vmatprep.subr.bf16.mxu1 %v6979_v13  ;;  %v7015_v27 = vld [vmem:[%s8462_s1 + $0x698] sm:$0xff]  }
 0x199   : > { %3805 = vmatprep.mubr.bf16.mxu0 %v8202_v8  ;;  %6521 = vmatprep.mubr.bf16.mxu1 %v7001_v22  ;;  %v7016_v9 = vld [vmem:[%s8462_s1 + $0x618] sm:$0xff]   ;;  %v7020_v22 = vld [vmem:[%s8462_s1 + $0x6a0] sm:$0xff]  }
 0x19b   : > { %6240 = vmatpush3.bf16.msra.mxu0 %v6980_v25  ;;  %6512 = vmatpush3.bf16.msra.mxu1 %v6979_v13  ;;  %v7028_v13 = vld [vmem:[%s8078_s30 + $0x5c] ss:$12 sps:$4 sm:$0xff]   ;;  %v7035_v25 = vld [vmem:[%s8078_s30 + $0x20] ss:$12 sps:$4 sm:$0xff]  }
 0x19c   : > { %6241 = vmatprep.subr.bf16.mxu0 %v6983_v21  ;;  %6513 = vmatprep.subr.bf16.mxu1 %v6984_v23  ;;  %v7019_v21 = vld [vmem:[%s8462_s1 + $0x660] sm:$0xff]  }
 0x19e   : > { %3806 = vmatmul.mubr.bf16.gmra.mrb[104].mxu0 %v8223_v37 }
 0x19f   : > { %6242 = vmatpush3.bf16.msra.mxu0 %v6985_v18  ;;  %6514 = vmatpush3.bf16.msra.mxu1 %v6984_v23 }
 0x1a0   : > { %6243 = vmatprep.subr.bf16.mxu0 %v6986_v35  ;;  %6515 = vmatprep.subr.bf16.mxu1 %v6987_v28 }
 0x1a1   : > { %v5885_v34 = vpop.f32.mrb[0].mxu0  ;;  %3813 = vmatprep.mubr.bf16.mxu0 %v8234_v39 }
 0x1a2   : > { %v5886_v43 = vpop.f32.mrb[1].mxu0 }
 0x1a3   : > { %v8246_v45 = vadd.f32 %v5886_v43, %v5885_v34  ;;  %v5888_v40 = vpop.f32.mrb[2].mxu0  ;;  %6244 = vmatpush3.bf16.msra.mxu0 %v6988_v32  ;;  %6516 = vmatpush3.bf16.msra.mxu1 %v6987_v28  ;;  %v7021_v32 = vld [vmem:[%s8462_s1 + $0x620] sm:$0xff]   ;;  %v7022_v34 = vld [vmem:[%s8462_s1 + $0x668] sm:$0xff]  }
 0x1a4   : > { %v5889_v48 = vpop.f32.mrb[3].mxu0  ;;  %6245 = vmatprep.subr.bf16.mxu0 %v6992_v33  ;;  %6517 = vmatprep.subr.bf16.mxu1 %v6993_v41  ;;  %v7023_v43 = vld [vmem:[%s8462_s1 + $0x6a8] sm:$0xff]  }
 0x1a5   : > { %v8261_v46 = vadd.f32 %v5889_v48, %v5888_v40  ;;  %v7024_v40 = vld [vmem:[%s8462_s1 + $0x628] sm:$0xff]  }
 0x1a6   : > { %3814 = vmatmul.mubr.bf16.gmra.mrb[108].mxu0 %v8253_v42 }
 0x1a7   : > { %6246 = vmatpush3.bf16.msra.mxu0 %v6995_v44  ;;  %6518 = vmatpush3.bf16.msra.mxu1 %v6993_v41  ;;  %v5685_v41 = vcombine.low %v8186_v24, %v8219_v36  ;;  %v7029_v24 = vld [vmem:[%s8462_s1 + $0x670] sm:$0xff]  }
 0x1a8   : > { %6247 = vmatprep.subr.bf16.mxu0 %v6996_v47  ;;  %6519 = vmatprep.subr.bf16.mxu1 %v6997_v1  ;;  %v7030_v36 = vld [vmem:[%s8462_s1 + $0x6b0] sm:$0xff]  }
 0x1a9   : > { %v5891_v56 = vpop.f32.mrb[4].mxu0  ;;  %4203 = vmatprep.mubr.bf16.mxu0 %v5680_v55  ;;  %v7031_v55 = vld [vmem:[%s8462_s1 + $0x630] sm:$0xff]  }
 0x1aa   : > { %v5892_v62 = vpop.f32.mrb[5].mxu0 }
 0x1ab   : > { %v8283_v54 = vadd.f32 %v5892_v62, %v5891_v56  ;;  %v5894_v57 = vpop.f32.mrb[6].mxu0  ;;  %6248 = vmatpush3.bf16.msra.mxu0 %v6998_v52  ;;  %6520 = vmatpush3.bf16.msra.mxu1 %v6997_v1 }
 0x1ac   : > { %v5895_v5 = vpop.f32.mrb[7].mxu0  ;;  %6285 = vmatprep.subr.bf16.mxu0 %v7002_v51  ;;  %6529 = vmatprep.subr.bf16.mxu1 %v7003_v3 }
 0x1ad   : > { %v8293_v14 = vadd.f32 %v5895_v5, %v5894_v57 }
 0x1ae   : > { %4204 = vmatmul.mubr.bf16.vlgmr.msra.gmra.mrb[112].mxu0 %v5679_v58  ;;  %6522 = vmatmul.mubr.bf16.vlgmr.msra.gmra.mrb[0].mxu1 %v7004_v53 }
 0x1af   : > { %6286 = vmatpush3.bf16.msra.mxu0 %v7005_v61  ;;  %6530 = vmatpush3.bf16.msra.mxu1 %v7003_v3  ;;  %v7032_v3 = vld [vmem:[%s8462_s1 + $0x678] sm:$0xff]  }
 0x1b0   : > { %6287 = vmatprep.subr.bf16.mxu0 %v7006_v10  ;;  %6531 = vmatprep.subr.bf16.mxu1 %v7007_v59  ;;  %v7034_v61 = vld [vmem:[%s8462_s1 + $0x638] sm:$0xff]  }
 0x1b1   : > { %v5897_v15 = vpop.f32.mrb[8].mxu0  ;;  %4211 = vmatprep.mubr.bf16.mxu0 %v5683_v11  ;;  %6525 = vmatprep.mubr.bf16.mxu1 %v7026_v4 }
 0x1b2   : > { %v5898_v63 = vpop.f32.mrb[9].mxu0 }
 0x1b3   : > { %v8307_v0 = vadd.f32 %v5898_v63, %v5897_v15  ;;  %v5900_v16 = vpop.f32.mrb[10].mxu0  ;;  %6288 = vmatpush3.bf16.msra.mxu0 %v7008_v19  ;;  %6532 = vmatpush3.bf16.msra.mxu1 %v7007_v59  ;;  %v7037_v59 = vld [vmem:[%s8078_s30 + $0x50] ss:$12 sps:$4 sm:$0xff]   ;;  %v7038_v15 = vld [vmem:[%s8078_s30 + $0x68] ss:$12 sps:$4 sm:$0xff]  }
 0x1b4   : > { %v5901_v17 = vpop.f32.mrb[11].mxu0  ;;  %6289 = vmatprep.subr.bf16.mxu0 %v7011_v6  ;;  %6533 = vmatprep.subr.bf16.mxu1 %v7012_v12 }
 0x1b5   : > { %v8321_v31 = vadd.f32 %v5901_v17, %v5900_v16  ;;  %v5730_v16 = vld [vmem:[%s8078_s30 + $0x6c] sm:$0xff] }
 0x1b6   : > { %4212 = vmatmul.mubr.bf16.gmra.mrb[116].mxu0 %v5682_v20  ;;  %6526 = vmatmul.mubr.bf16.gmra.mrb[4].mxu1 %v7028_v13  ;;  %v5790_v13 = vcombine.high %v8259_v49, %v5730_v16 }
 0x1b7   : > { %6290 = vmatpush3.bf16.msra.mxu0 %v7013_v60  ;;  %6534 = vmatpush3.bf16.msra.mxu1 %v7012_v12 }
 0x1b8   : > { %6291 = vmatprep.subr.bf16.mxu0 %v7014_v26  ;;  %6535 = vmatprep.subr.bf16.mxu1 %v7015_v27 }
 0x1b9   : > { %v5903_v23 = vpop.f32.mrb[12].mxu0  ;;  %4219 = vmatprep.mubr.bf16.mxu0 %v5686_v29  ;;  %6545 = vmatprep.mubr.bf16.mxu1 %v7035_v25  ;;  %v5789_v25 = vcombine.low %v8259_v49, %v5730_v16 }
 0x1ba   : > { %v5904_v18 = vpop.f32.mrb[13].mxu0 }
 0x1bb   : > { %v8335_v35 = vadd.f32 %v5904_v18, %v5903_v23  ;;  %v5906_v28 = vpop.f32.mrb[14].mxu0  ;;  %6292 = vmatpush3.bf16.msra.mxu0 %v7016_v9  ;;  %6536 = vmatpush3.bf16.msra.mxu1 %v7015_v27 }
 0x1bc   : > { %v5907_v33 = vpop.f32.mrb[15].mxu0  ;;  %6293 = vmatprep.subr.bf16.mxu0 %v7019_v21  ;;  %6537 = vmatprep.subr.bf16.mxu1 %v7020_v22 }
 0x1bd   : > { %v8348_v44 = vadd.f32 %v5907_v33, %v5906_v28 }
 0x1be   : > { %4220 = vmatmul.mubr.bf16.gmra.mrb[120].mxu0 %v5685_v41 }
 0x1bf   : > { %6294 = vmatpush3.bf16.msra.mxu0 %v7021_v32  ;;  %6538 = vmatpush3.bf16.msra.mxu1 %v7020_v22 }
 0x1c0   : > { %6295 = vmatprep.subr.bf16.mxu0 %v7022_v34  ;;  %6539 = vmatprep.subr.bf16.mxu1 %v7023_v43 }
 0x1c1   : > { %v5937_v47 = vpop.f32.mrb[16].mxu0  ;;  %4227 = vmatprep.mubr.bf16.mxu0 %v5689_v50  ;;  %v7033_v50 = vld [vmem:[%s8462_s1 + $0x6b8] sm:$0xff]  }
 0x1c2   : > { %v5938_v48 = vpop.f32.mrb[17].mxu0 }
 0x1c3   : > { %v5939_v1 = vadd.f32 %v5938_v48, %v5937_v47  ;;  %v5940_v52 = vpop.f32.mrb[18].mxu0  ;;  %6296 = vmatpush3.bf16.msra.mxu0 %v7024_v40  ;;  %6540 = vmatpush3.bf16.msra.mxu1 %v7023_v43 }
 0x1c4   : > { %v5941_v51 = vpop.f32.mrb[19].mxu0  ;;  %6297 = vmatprep.subr.bf16.mxu0 %v7029_v24  ;;  %6541 = vmatprep.subr.bf16.mxu1 %v7030_v36 }
 0x1c5   : > { %v6562_v56 = vadd.f32 %v5939_v1, %v8246_v45  ;;  %v5942_v62 = vadd.f32 %v5941_v51, %v5940_v52 }
 0x1c6   : > { %4228 = vmatmul.mubr.bf16.gmra.mrb[124].mxu0 %v5688_v2 }
 0x1c7   : > { %v6580_v53 = vadd.f32 %v5942_v62, %v8261_v46  ;;  %6298 = vmatpush3.bf16.msra.mxu0 %v7031_v55  ;;  %6542 = vmatpush3.bf16.msra.mxu1 %v7030_v36  ;;  %v7036_v46 = vld [vmem:[%s8078_s30 + $0x38] ss:$12 sps:$4 sm:$0xff]  }
 0x1c8   : > { %6299 = vmatprep.subr.bf16.mxu0 %v7032_v3  ;;  %6543 = vmatprep.subr.bf16.mxu1 %v7033_v50 }
 0x1c9   : > { %v5943_v57 = vpop.f32.mrb[20].mxu0  ;;  %4617 = vmatprep.mubr.bf16.mxu0 %v8166_v7 }
 0x1ca   : > { %v5944_v45 = vpop.f32.mrb[21].mxu0 }
 0x1cb   : > { %v5945_v10 = vadd.f32 %v5944_v45, %v5943_v57  ;;  %v5946_v5 = vpop.f32.mrb[22].mxu0  ;;  %6300 = vmatpush3.bf16.msra.mxu0 %v7034_v61  ;;  %6544 = vmatpush3.bf16.msra.mxu1 %v7033_v50 }
 0x1cc   : > { %v5947_v38 = vpop.f32.mrb[23].mxu0 }
 0x1cd   : > { %v6553_v2 = vadd.f32 %v5945_v10, %v8283_v54  ;;  %v5948_v58 = vadd.f32 %v5947_v38, %v5946_v5 }
 0x1ce   : > { %4618 = vmatmul.mubr.bf16.vlgmr.msra.gmra.mrb[128].mxu0 %v8190_v30  ;;  %6546 = vmatmul.mubr.bf16.vlgmr.msra.gmra.mrb[0].mxu1 %v7036_v46 }
 0x1cf   : > { %v6571_v19 = vadd.f32 %v5948_v58, %v8293_v14  ;;  %4625 = vmatprep.mubr.bf16.mxu0 %v8202_v8  ;;  %6549 = vmatprep.mubr.bf16.mxu1 %v7037_v59 }
 0x1d1   : > { %v5949_v7 = vpop.f32.mrb[24].mxu0 }
 0x1d2   : > { %v5950_v11 = vpop.f32.mrb[25].mxu0 }
 0x1d3   : > { %v5951_v4 = vadd.f32 %v5950_v11, %v5949_v7  ;;  %v5952_v6 = vpop.f32.mrb[26].mxu0 }
 0x1d4   : > { %v5953_v12 = vpop.f32.mrb[27].mxu0 }
 0x1d5   : > { %v6598_v63 = vadd.f32 %v5951_v4, %v8307_v0  ;;  %v5954_v54 = vadd.f32 %v5953_v12, %v5952_v6 }
 0x1d6   : > { %4626 = vmatmul.mubr.bf16.gmra.mrb[132].mxu0 %v8223_v37  ;;  %6550 = vmatmul.mubr.bf16.gmra.mrb[4].mxu1 %v7038_v15 }
 0x1d7   : > { %v6616_v30 = vadd.f32 %v5954_v54, %v8321_v31  ;;  %4633 = vmatprep.mubr.bf16.mxu0 %v8234_v39 }
 0x1d9   : > { %v5955_v14 = vpop.f32.mrb[28].mxu0 }
 0x1da   : > { %v5956_v8 = vpop.f32.mrb[29].mxu0 }
 0x1db   : > { %v5957_v60 = vadd.f32 %v5956_v8, %v5955_v14  ;;  %v5958_v17 = vpop.f32.mrb[30].mxu0 }
 0x1dc   : > { %v5959_v20 = vpop.f32.mrb[31].mxu0 }
 0x1dd   : > { %v6589_v26 = vadd.f32 %v5957_v60, %v8335_v35  ;;  %v5960_v27 = vadd.f32 %v5959_v20, %v5958_v17 }
 0x1de   : > { %4634 = vmatmul.mubr.bf16.gmra.mrb[136].mxu0 %v8253_v42 }
 0x1df   : > { %v6607_v37 = vadd.f32 %v5960_v27, %v8348_v44  ;;  %4641 = vmatprep.mubr.bf16.mxu0 %v5790_v13 }
 0x1e1   : > { %v5989_v0 = vpop.f32.mrb[32].mxu0 }
 0x1e2   : > { %v5990_v31 = vpop.f32.mrb[33].mxu0 }
 0x1e3   : > { %v5991_v9 = vadd.f32 %v5990_v31, %v5989_v0  ;;  %v5992_v39 = vpop.f32.mrb[34].mxu0 }
 0x1e4   : > { %v5993_v29 = vpop.f32.mrb[35].mxu0 }
 0x1e5   : > { %v6563_v21 = vadd.f32 %v6562_v56, %v5991_v9  ;;  %v5994_v22 = vadd.f32 %v5993_v29, %v5992_v39 }
 0x1e6   : > { %4642 = vmatmul.mubr.bf16.gmra.mrb[140].mxu0 %v5789_v25 }
 0x1e7   : > { %v6581_v23 = vadd.f32 %v6580_v53, %v5994_v22 }
 0x1e9   : > { %v5995_v18 = vpop.f32.mrb[36].mxu0 }
 0x1ea   : > { %v5996_v35 = vpop.f32.mrb[37].mxu0 }
 0x1eb   : > { %v5997_v28 = vadd.f32 %v5996_v35, %v5995_v18  ;;  %v5998_v32 = vpop.f32.mrb[38].mxu0 }
 0x1ec   : > { %v5999_v33 = vpop.f32.mrb[39].mxu0 }
 0x1ed   : > { %v6554_v42 = vadd.f32 %v6553_v2, %v5997_v28  ;;  %v6000_v41 = vadd.f32 %v5999_v33, %v5998_v32 }
 0x1ef   : > { %v6572_v34 = vadd.f32 %v6571_v19, %v6000_v41 }
 0x1f1   : > { %v6001_v43 = vpop.f32.mrb[40].mxu0 }
 0x1f2   : > { %v6002_v44 = vpop.f32.mrb[41].mxu0 }
 0x1f3   : > { %v6003_v40 = vadd.f32 %v6002_v44, %v6001_v43  ;;  %v6004_v24 = vpop.f32.mrb[42].mxu0 }
 0x1f4   : > { %v6005_v36 = vpop.f32.mrb[43].mxu0 }
 0x1f5   : > { %v6599_v47 = vadd.f32 %v6598_v63, %v6003_v40  ;;  %v6006_v48 = vadd.f32 %v6005_v36, %v6004_v24 }
 0x1f7   : > { %v6617_v49 = vadd.f32 %v6616_v30, %v6006_v48 }
 0x1f9   : > { %v6007_v1 = vpop.f32.mrb[44].mxu0 }
 0x1fa   : > { %v6008_v52 = vpop.f32.mrb[45].mxu0 }
 0x1fb   : > { %v6009_v55 = vadd.f32 %v6008_v52, %v6007_v1  ;;  %v6010_v51 = vpop.f32.mrb[46].mxu0 }
 0x1fc   : > { %v6011_v3 = vpop.f32.mrb[47].mxu0 }
 0x1fd   : > { %v6590_v50 = vadd.f32 %v6589_v26, %v6009_v55  ;;  %v6012_v56 = vadd.f32 %v6011_v3, %v6010_v51 }
 0x1ff   : > { %v6608_v62 = vadd.f32 %v6607_v37, %v6012_v56 }
 0x201   : > { %v6041_v53 = vpop.f32.mrb[48].mxu0 }
 0x202   : > { %v6042_v61 = vpop.f32.mrb[49].mxu0 }
 0x203   : > { %v6043_v57 = vadd.f32 %v6042_v61, %v6041_v53  ;;  %v6044_v45 = vpop.f32.mrb[50].mxu0 }
 0x204   : > { %v6045_v10 = vpop.f32.mrb[51].mxu0 }
 0x205   : > { %v6564_v5 = vadd.f32 %v6563_v21, %v6043_v57  ;;  %v6046_v38 = vadd.f32 %v6045_v10, %v6044_v45 }
 0x207   : > { %v6582_v46 = vadd.f32 %v6581_v23, %v6046_v38 }
 0x209   : > { %v6047_v2 = vpop.f32.mrb[52].mxu0 }
 0x20a   : > { %v6048_v58 = vpop.f32.mrb[53].mxu0 }
 0x20b   : > { %v6049_v59 = vadd.f32 %v6048_v58, %v6047_v2  ;;  %v6050_v19 = vpop.f32.mrb[54].mxu0 }
 0x20c   : > { %v6051_v7 = vpop.f32.mrb[55].mxu0 }
 0x20d   : > { %v6555_v11 = vadd.f32 %v6554_v42, %v6049_v59  ;;  %v6052_v4 = vadd.f32 %v6051_v7, %v6050_v19 }
 0x20f   : > { %v6573_v6 = vadd.f32 %v6572_v34, %v6052_v4 }
 0x211   : > { %v6053_v12 = vpop.f32.mrb[56].mxu0 }
 0x212   : > { %v6054_v15 = vpop.f32.mrb[57].mxu0 }
 0x213   : > { %v6055_v63 = vadd.f32 %v6054_v15, %v6053_v12  ;;  %v6056_v54 = vpop.f32.mrb[58].mxu0 }
 0x214   : > { %v6057_v30 = vpop.f32.mrb[59].mxu0 }
 0x215   : > { %v6600_v14 = vadd.f32 %v6599_v47, %v6055_v63  ;;  %v6058_v8 = vadd.f32 %v6057_v30, %v6056_v54 }
 0x217   : > { %v6618_v16 = vadd.f32 %v6617_v49, %v6058_v8 }
 0x219   : > { %v6059_v60 = vpop.f32.mrb[60].mxu0 }
 0x21a   : > { %v6060_v17 = vpop.f32.mrb[61].mxu0 }
 0x21b   : > { %v6061_v20 = vadd.f32 %v6060_v17, %v6059_v60  ;;  %v6062_v26 = vpop.f32.mrb[62].mxu0 }
 0x21c   : > { %v6063_v27 = vpop.f32.mrb[63].mxu0 }
 0x21d   : > { %v6591_v13 = vadd.f32 %v6590_v50, %v6061_v20  ;;  %v6064_v37 = vadd.f32 %v6063_v27, %v6062_v26 }
 0x21f   : > { %v6609_v0 = vadd.f32 %v6608_v62, %v6064_v37 }
 0x221   : > { %v6093_v31 = vpop.f32.mrb[64].mxu0 }
 0x222   : > { %v6094_v9 = vpop.f32.mrb[65].mxu0 }
 0x223   : > { %v6095_v39 = vadd.f32 %v6094_v9, %v6093_v31  ;;  %v6096_v29 = vpop.f32.mrb[66].mxu0 }
 0x224   : > { %v6097_v25 = vpop.f32.mrb[67].mxu0 }
 0x225   : > { %v6565_v21 = vadd.f32 %v6564_v5, %v6095_v39  ;;  %v6098_v22 = vadd.f32 %v6097_v25, %v6096_v29 }
 0x227   : > { %v6583_v23 = vadd.f32 %v6582_v46, %v6098_v22 }
 0x229   : > { %v6099_v18 = vpop.f32.mrb[68].mxu0 }
 0x22a   : > { %v6100_v35 = vpop.f32.mrb[69].mxu0 }
 0x22b   : > { %v6101_v28 = vadd.f32 %v6100_v35, %v6099_v18  ;;  %v6102_v32 = vpop.f32.mrb[70].mxu0 }
 0x22c   : > { %v6103_v33 = vpop.f32.mrb[71].mxu0 }
 0x22d   : > { %v6556_v42 = vadd.f32 %v6555_v11, %v6101_v28  ;;  %v6104_v41 = vadd.f32 %v6103_v33, %v6102_v32 }
 0x22f   : > { %v6574_v34 = vadd.f32 %v6573_v6, %v6104_v41 }
 0x231   : > { %v6105_v43 = vpop.f32.mrb[72].mxu0 }
 0x232   : > { %v6106_v44 = vpop.f32.mrb[73].mxu0 }
 0x233   : > { %v6107_v40 = vadd.f32 %v6106_v44, %v6105_v43  ;;  %v6108_v24 = vpop.f32.mrb[74].mxu0 }
 0x234   : > { %v6109_v36 = vpop.f32.mrb[75].mxu0 }
 0x235   : > { %v6601_v47 = vadd.f32 %v6600_v14, %v6107_v40  ;;  %v6110_v48 = vadd.f32 %v6109_v36, %v6108_v24 }
 0x237   : > { %v6619_v49 = vadd.f32 %v6618_v16, %v6110_v48 }
 0x239   : > { %v6111_v1 = vpop.f32.mrb[76].mxu0 }
 0x23a   : > { %v6112_v52 = vpop.f32.mrb[77].mxu0 }
 0x23b   : > { %v6113_v55 = vadd.f32 %v6112_v52, %v6111_v1  ;;  %v6114_v51 = vpop.f32.mrb[78].mxu0 }
 0x23c   : > { %v6115_v3 = vpop.f32.mrb[79].mxu0 }
 0x23d   : > { %v6592_v50 = vadd.f32 %v6591_v13, %v6113_v55  ;;  %v6116_v56 = vadd.f32 %v6115_v3, %v6114_v51 }
 0x23f   : > { %v6610_v62 = vadd.f32 %v6609_v0, %v6116_v56 }
 0x241   : > { %v6145_v53 = vpop.f32.mrb[80].mxu0 }
 0x242   : > { %v6146_v61 = vpop.f32.mrb[81].mxu0 }
 0x243   : > { %v6147_v57 = vadd.f32 %v6146_v61, %v6145_v53  ;;  %v6148_v45 = vpop.f32.mrb[82].mxu0 }
 0x244   : > { %v6149_v10 = vpop.f32.mrb[83].mxu0 }
 0x245   : > { %v6566_v5 = vadd.f32 %v6565_v21, %v6147_v57  ;;  %v6150_v38 = vadd.f32 %v6149_v10, %v6148_v45 }
 0x247   : > { %v6584_v46 = vadd.f32 %v6583_v23, %v6150_v38 }
 0x249   : > { %v6151_v2 = vpop.f32.mrb[84].mxu0 }
 0x24a   : > { %v6152_v58 = vpop.f32.mrb[85].mxu0 }
 0x24b   : > { %v6153_v59 = vadd.f32 %v6152_v58, %v6151_v2  ;;  %v6154_v19 = vpop.f32.mrb[86].mxu0 }
 0x24c   : > { %v6155_v7 = vpop.f32.mrb[87].mxu0 }
 0x24d   : > { %v6557_v11 = vadd.f32 %v6556_v42, %v6153_v59  ;;  %v6156_v4 = vadd.f32 %v6155_v7, %v6154_v19 }
 0x24f   : > { %v6575_v6 = vadd.f32 %v6574_v34, %v6156_v4 }
 0x251   : > { %v6157_v12 = vpop.f32.mrb[88].mxu0 }
 0x252   : > { %v6158_v15 = vpop.f32.mrb[89].mxu0 }
 0x253   : > { %v6159_v63 = vadd.f32 %v6158_v15, %v6157_v12  ;;  %v6160_v54 = vpop.f32.mrb[90].mxu0 }
 0x254   : > { %v6161_v30 = vpop.f32.mrb[91].mxu0 }
 0x255   : > { %v6602_v14 = vadd.f32 %v6601_v47, %v6159_v63  ;;  %v6162_v8 = vadd.f32 %v6161_v30, %v6160_v54 }
 0x257   : > { %v6620_v16 = vadd.f32 %v6619_v49, %v6162_v8 }
 0x259   : > { %v6163_v60 = vpop.f32.mrb[92].mxu0 }
 0x25a   : > { %v6164_v17 = vpop.f32.mrb[93].mxu0 }
 0x25b   : > { %v6165_v20 = vadd.f32 %v6164_v17, %v6163_v60  ;;  %v6166_v26 = vpop.f32.mrb[94].mxu0 }
 0x25c   : > { %v6167_v27 = vpop.f32.mrb[95].mxu0 }
 0x25d   : > { %v6593_v13 = vadd.f32 %v6592_v50, %v6165_v20  ;;  %v6168_v37 = vadd.f32 %v6167_v27, %v6166_v26 }
 0x25f   : > { %v6611_v0 = vadd.f32 %v6610_v62, %v6168_v37 }
 0x261   : > { %v6197_v31 = vpop.f32.mrb[96].mxu0 }
 0x262   : > { %v6198_v9 = vpop.f32.mrb[97].mxu0 }
 0x263   : > { %v6199_v39 = vadd.f32 %v6198_v9, %v6197_v31  ;;  %v6200_v29 = vpop.f32.mrb[98].mxu0 }
 0x264   : > { %v6201_v25 = vpop.f32.mrb[99].mxu0 }
 0x265   : > { %v6567_v21 = vadd.f32 %v6566_v5, %v6199_v39  ;;  %v6202_v22 = vadd.f32 %v6201_v25, %v6200_v29 }
 0x267   : > { %v6585_v23 = vadd.f32 %v6584_v46, %v6202_v22 }
 0x269   : > { %v6203_v18 = vpop.f32.mrb[100].mxu0 }
 0x26a   : > { %v6204_v35 = vpop.f32.mrb[101].mxu0 }
 0x26b   : > { %v6205_v28 = vadd.f32 %v6204_v35, %v6203_v18  ;;  %v6206_v32 = vpop.f32.mrb[102].mxu0 }
 0x26c   : > { %v6207_v33 = vpop.f32.mrb[103].mxu0 }
 0x26d   : > { %v6558_v42 = vadd.f32 %v6557_v11, %v6205_v28  ;;  %v6208_v41 = vadd.f32 %v6207_v33, %v6206_v32  ;;  %v8408_v32 = vld [vmem:[%s8463_s2] ss:$0 sm:$0xff] }
 0x26e   : > { %v5828_v33 = vld [vmem:[%s7162_s14] sm:$0xff]  }
 0x26f   : > { %v6576_v34 = vadd.f32 %v6575_v6, %v6208_v41 }
 0x271   : > { %v6209_v43 = vpop.f32.mrb[104].mxu0 }
 0x272   : > { %v6210_v44 = vpop.f32.mrb[105].mxu0 }
 0x273   : > { %v6211_v40 = vadd.f32 %v6210_v44, %v6209_v43  ;;  %v6212_v24 = vpop.f32.mrb[106].mxu0  ;;  %v5829_v44 = vunpack.c.l.bf16 %v5828_v33 }
 0x274   : > { %v6213_v36 = vpop.f32.mrb[107].mxu0 }
 0x275   : > { %v6603_v47 = vadd.f32 %v6602_v14, %v6211_v40  ;;  %v6214_v48 = vadd.f32 %v6213_v36, %v6212_v24 }
 0x277   : > { %v6621_v49 = vadd.f32 %v6620_v16, %v6214_v48 }
 0x279   : > { %v6215_v1 = vpop.f32.mrb[108].mxu0 }
 0x27a   : > { %v6216_v52 = vpop.f32.mrb[109].mxu0 }
 0x27b   : > { %v6217_v55 = vadd.f32 %v6216_v52, %v6215_v1  ;;  %v6218_v51 = vpop.f32.mrb[110].mxu0  ;;  %v5830_v52 = vunpack.c.h.bf16 %v5828_v33 }
 0x27c   : > { %v6219_v3 = vpop.f32.mrb[111].mxu0 }
 0x27d   : > { %v6594_v50 = vadd.f32 %v6593_v13, %v6217_v55  ;;  %v6220_v56 = vadd.f32 %v6219_v3, %v6218_v51 }
 0x27f   : > { %v6612_v62 = vadd.f32 %v6611_v0, %v6220_v56 }
 0x281   : > { %v6249_v53 = vpop.f32.mrb[112].mxu0 }
 0x282   : > { %v6250_v61 = vpop.f32.mrb[113].mxu0 }
 0x283   : > { %v6251_v57 = vadd.f32 %v6250_v61, %v6249_v53  ;;  %v6252_v45 = vpop.f32.mrb[114].mxu0 }
 0x284   : > { %v6253_v10 = vpop.f32.mrb[115].mxu0 }
 0x285   : > { %v6568_v5 = vadd.f32 %v6567_v21, %v6251_v57  ;;  %v6254_v38 = vadd.f32 %v6253_v10, %v6252_v45  ;;  %v5863_v57 = vld [vmem:[%s7162_s14 + $0x8] sm:$0xff]  }
 0x287   : > { %v6586_v46 = vadd.f32 %v6585_v23, %v6254_v38 }
 0x289   : > { %v6255_v2 = vpop.f32.mrb[116].mxu0 }
 0x28a   : > { %v6256_v58 = vpop.f32.mrb[117].mxu0 }
 0x28b   : > { %v6257_v59 = vadd.f32 %v6256_v58, %v6255_v2  ;;  %v6258_v19 = vpop.f32.mrb[118].mxu0 }
 0x28c   : > { %v6259_v7 = vpop.f32.mrb[119].mxu0 }
 0x28d   : > { %v6559_v11 = vadd.f32 %v6558_v42, %v6257_v59  ;;  %v6260_v4 = vadd.f32 %v6259_v7, %v6258_v19 }
 0x28f   : > { %v6577_v6 = vadd.f32 %v6576_v34, %v6260_v4  ;;  %v8414_v34 = vld [vmem:[%s8464_s3] ss:$0 sm:$0xff]  ;;  %v5834_v4 = vunpack.c.h.bf16 %v5863_v57 }
 0x291   : > { %v6261_v12 = vpop.f32.mrb[120].mxu0 }
 0x292   : > { %v6262_v15 = vpop.f32.mrb[121].mxu0 }
 0x293   : > { %v6263_v63 = vadd.f32 %v6262_v15, %v6261_v12  ;;  %v6264_v54 = vpop.f32.mrb[122].mxu0 }
 0x294   : > { %v6265_v30 = vpop.f32.mrb[123].mxu0 }
 0x295   : > { %v8397_v14 = vadd.f32 %v6603_v47, %v6263_v63  ;;  %v6266_v8 = vadd.f32 %v6265_v30, %v6264_v54 }
 0x297   : > { %v8399_v16 = vadd.f32 %v6621_v49, %v6266_v8 }
 0x299   : > { %v6267_v60 = vpop.f32.mrb[124].mxu0 }
 0x29a   : > { %v6268_v17 = vpop.f32.mrb[125].mxu0 }
 0x29b   : > { %v6269_v20 = vadd.f32 %v6268_v17, %v6267_v60  ;;  %v6270_v26 = vpop.f32.mrb[126].mxu0 }
 0x29c   : > { %v6271_v27 = vpop.f32.mrb[127].mxu0 }
 0x29d   : > { %v8401_v13 = vadd.f32 %v6594_v50, %v6269_v20  ;;  %v6272_v37 = vadd.f32 %v6271_v27, %v6270_v26  ;;  %v5864_v20 = vld [vmem:[%s7162_s14 + $0x10] sm:$0xff]  }
 0x29f   : > { %v8403_v0 = vadd.f32 %v6612_v62, %v6272_v37 }
 0x2a1   : > { %v6301_v31 = vpop.f32.mrb[128].mxu0  ;;  %v6547_v9 = vpop.f32.mrb[0].mxu1 }
 0x2a2   : > { %v6302_v39 = vpop.f32.mrb[129].mxu0  ;;  %v4684_v29 = vpop.f32.mrb[1].mxu1 }
 0x2a3   : > { %v6303_v25 = vadd.f32 %v6302_v39, %v6301_v31  ;;  %v6304_v21 = vpop.f32.mrb[130].mxu0  ;;  %v6548_v22 = vpop.f32.mrb[2].mxu1 }
 0x2a4   : > { %v6305_v23 = vpop.f32.mrb[131].mxu0  ;;  %v4687_v18 = vpop.f32.mrb[3].mxu1 }
 0x2a5   : > { %v6569_v35 = vadd.f32 %v6568_v5, %v6303_v25  ;;  %v6306_v28 = vadd.f32 %v6305_v23, %v6304_v21  ;;  %v5838_v23 = vunpack.c.h.bf16 %v5864_v20 }
 0x2a7   : > { %v6570_v42 = vadd.f32 %v6569_v35, %v4684_v29  ;;  %v6587_v41 = vadd.f32 %v6586_v46, %v6306_v28  ;;  %v5833_v46 = vunpack.c.l.bf16 %v5863_v57 }
 0x2a9   : > { %v4729_v43 = vmul.f32 %v6570_v42, %v8408_v32  ;;  %v6588_v40 = vadd.f32 %v6587_v41, %v4687_v18  ;;  %v6307_v24 = vpop.f32.mrb[132].mxu0  ;;  %v8417_v36 = vpop.f32.mrb[4].mxu1 }
 0x2aa   : > { %v6308_v47 = vpop.f32.mrb[133].mxu0  ;;  %v4700_v48 = vpop.f32.mrb[5].mxu1 }
 0x2ab   : > { %v4743_v49 = vadd.f32 %v8414_v34, %v4729_v43  ;;  %v4730_v1 = vmul.f32 %v6588_v40, %v8408_v32  ;;  %v6309_v55 = vadd.f32 %v6308_v47, %v6307_v24  ;;  %v6310_v51 = vpop.f32.mrb[134].mxu0  ;;  %v6552_v3 = vpop.f32.mrb[6].mxu1  ;;  %v5865_v40 = vld [vmem:[%s7162_s14 + $0x18] sm:$0xff]  }
 0x2ac   : > { %v6311_v50 = vpop.f32.mrb[135].mxu0  ;;  %v4703_v56 = vpop.f32.mrb[7].mxu1 }
 0x2ad   : > { %v4767_v62 = vadd.f32 %v5829_v44, %v4743_v49  ;;  %v4744_v53 = vadd.f32 %v8414_v34, %v4730_v1  ;;  %v6560_v61 = vadd.f32 %v6559_v11, %v6309_v55  ;;  %v6312_v45 = vadd.f32 %v6311_v50, %v6310_v51 }
 0x2ae   : > { %v5841_v1 = vunpack.c.l.bf16 %v5865_v40 }
 0x2af   : > { %v4768_v10 = vadd.f32 %v5830_v52, %v4744_v53  ;;  %v6561_v5 = vadd.f32 %v6560_v61, %v6547_v9  ;;  %v6578_v38 = vadd.f32 %v6577_v6, %v6312_v45  ;;  %v4775_v2 = vmax.f32 %v4767_v62, 0.0 }
 0x2b0   : > { %v5837_v9 = vunpack.c.l.bf16 %v5864_v20 }
 0x2b1   : > { %v4776_v58 = vmax.f32 %v4768_v10, 0.0  ;;  %v4731_v59 = vmul.f32 %v6561_v5, %v8408_v32  ;;  %v6579_v19 = vadd.f32 %v6578_v38, %v6548_v22  ;;  %v6313_v7 = vpop.f32.mrb[136].mxu0 }
 0x2b2   : > { %v6314_v12 = vpop.f32.mrb[137].mxu0 }
 0x2b3   : > { %v5846_v15 = vpack.c.bf16 %v4776_v58, %v4775_v2  ;;  %v4745_v63 = vadd.f32 %v8414_v34, %v4731_v59  ;;  %v4732_v11 = vmul.f32 %v6579_v19, %v8408_v32  ;;  %v6315_v54 = vadd.f32 %v6314_v12, %v6313_v7  ;;  %v6316_v30 = vpop.f32.mrb[138].mxu0 }
 0x2b4   : > { %v6317_v8 = vpop.f32.mrb[139].mxu0 }
 0x2b5   : > { %5847 = vst [vmem:[%s7167_s17] sm:$0xff] %v5846_v15   ;;  %v4769_v6 = vadd.f32 %v5833_v46, %v4745_v63  ;;  %v4746_v60 = vadd.f32 %v8414_v34, %v4732_v11  ;;  %v6605_v17 = vadd.f32 %v8397_v14, %v6315_v54  ;;  %v6318_v26 = vadd.f32 %v6317_v8, %v6316_v30 }
 0x2b7   : > { %v4770_v27 = vadd.f32 %v5834_v4, %v4746_v60  ;;  %v6606_v37 = vadd.f32 %v6605_v17, %v4700_v48  ;;  %v6623_v31 = vadd.f32 %v8399_v16, %v6318_v26  ;;  %v4777_v39 = vmax.f32 %v4769_v6, 0.0 }
 0x2b9   : > { %v4778_v29 = vmax.f32 %v4770_v27, 0.0  ;;  %v4733_v25 = vmul.f32 %v6606_v37, %v8408_v32  ;;  %v6624_v21 = vadd.f32 %v6623_v31, %v4703_v56  ;;  %v6319_v22 = vpop.f32.mrb[140].mxu0 }
 0x2ba   : > { %v6320_v18 = vpop.f32.mrb[141].mxu0 }
 0x2bb   : > { %v5851_v35 = vpack.c.bf16 %v4778_v29, %v4777_v39  ;;  %v4747_v14 = vadd.f32 %v8414_v34, %v4733_v25  ;;  %v4734_v28 = vmul.f32 %v6624_v21, %v8408_v32  ;;  %v6321_v33 = vadd.f32 %v6320_v18, %v6319_v22  ;;  %v6322_v42 = vpop.f32.mrb[142].mxu0 }
 0x2bc   : > { %v6323_v41 = vpop.f32.mrb[143].mxu0 }
 0x2bd   : > { %5866 = vst [vmem:[%s7167_s17 + $0x8] sm:$0xff] %v5851_v35   ;;  %v4771_v16 = vadd.f32 %v5837_v9, %v4747_v14  ;;  %v4748_v43 = vadd.f32 %v8414_v34, %v4734_v28  ;;  %v6596_v44 = vadd.f32 %v8401_v13, %v6321_v33  ;;  %v6324_v24 = vadd.f32 %v6323_v41, %v6322_v42 }
 0x2be   : > { %v5842_v13 = vunpack.c.h.bf16 %v5865_v40 }
 0x2bf   : > { %v4772_v47 = vadd.f32 %v5838_v23, %v4748_v43  ;;  %v6597_v48 = vadd.f32 %v6596_v44, %v8417_v36  ;;  %v6614_v49 = vadd.f32 %v8403_v0, %v6324_v24  ;;  %v4779_v52 = vmax.f32 %v4771_v16, 0.0 }
 0x2c1   : > { %v4780_v55 = vmax.f32 %v4772_v47, 0.0  ;;  %v4735_v51 = vmul.f32 %v6597_v48, %v8408_v32  ;;  %v6615_v50 = vadd.f32 %v6614_v49, %v6552_v3 }
 0x2c3   : > { %v5856_v56 = vpack.c.bf16 %v4780_v55, %v4779_v52  ;;  %v4749_v62 = vadd.f32 %v8414_v34, %v4735_v51  ;;  %v4736_v53 = vmul.f32 %v6615_v50, %v8408_v32 }
 0x2c5   : > { %5867 = vst [vmem:[%s7167_s17 + $0x10] sm:$0xff] %v5856_v56   ;;  %v4773_v61 = vadd.f32 %v5841_v1, %v4749_v62  ;;  %v4750_v57 = vadd.f32 %v8414_v34, %v4736_v53 }
 0x2c7   : > { %v4774_v36 = vadd.f32 %v5842_v13, %v4750_v57  ;;  %v4781_v45 = vmax.f32 %v4773_v61, 0.0 }
 0x2c9   : > { %v4782_v0 = vmax.f32 %v4774_v36, 0.0 }
 0x2cb   : > { %v5861_v10 = vpack.c.bf16 %v4782_v0, %v4781_v45 }
 0x2cd   : > { %5868 = vst [vmem:[%s7167_s17 + $0x18] sm:$0xff] %v5861_v10  }
 0x2ce PF: > { %s15_s22 = sadd.s32 1, %s7085_s22   ;;  %s8479_s18 = smov %s7077_s20 }
 0x2cf   : > { %p12_p13 = scmp.ge.s32.totalorder %s15_s22, 20   ;;  %s8480_s19 = smov %s7081_s21 }
 0x2d0   : > { %s8481_s20 = smov %s8484_s23  ;;  %s8482_s21 = smov %s8488_s24 }
 0x2d1   :  { %14 = sbr.rel (!%p12_p13) target bundleno = 3 (0x3), region = 118 }

// kernel: basic_block_forward.2
= control target key start
LH: loop header
LB: loop body
LE: loop exit
PB: predicated region body
PF: predicated region fallthrough
CT: control target
= control target key end

     0   :  { %s6955_s15 = smov 0   ;;  %s6957_s16 = smov 0   ;;  %s8279_s0 = inlined_call_operand.vmem [shape: bf16[2,8,8,8,128], index: 0, kind: input, shape index: {}]   ;;  %s8280_s1 = inlined_call_operand.vmem [shape: bf16[9,384,128], index: 1, kind: input, shape index: {}]   ;;  %s8281_s2 = inlined_call_operand.vmem [shape: f32[1,128], index: 2, kind: input, shape index: {}]   ;;  %s8282_s3 = inlined_call_operand.vmem [shape: f32[1,128], index: 3, kind: input, shape index: {}]   ;;  %s8283_s4 = inlined_call_operand.vmem [shape: bf16[2,8,8,8,128], index: 4, kind: output, shape index: {}]  }
   0x1   :  { %s6959_s17 = smov 0   ;;  %s6961_s18 = smov 0  }
   0x2   :  { %s6963_s19 = smov 0  }
   0x3 LB: > { %s23_s20 = sadd.s32 1, %s6918_s17  ;;  %s26_s21 = sadd.s32 1, %s6922_s18  ;;  %s6926_s19 = sphi %s6963_s19, %s14_s19   ;;  %s6922_s18 = sphi %s6961_s18, %s8299_s18   ;;  %s6918_s17 = sphi %s6959_s17, %s8298_s17   ;;  %s6914_s16 = sphi %s6957_s16, %s8297_s16   ;;  %s6910_s15 = sphi %s6955_s15, %s8296_s15  }
   0x4   : > { %p24_p0 = scmp.ge.s32.totalorder %s23_s20, 9  ;;  %p4834_p1 = scmp.ge.s32.totalorder %s6926_s19, 1 }
   0x5   : > { %p196_p2 = scmp.lt.s32.totalorder %s6926_s19, 19 }
   0x6   : > { %s8301_s20 = smov (%p24_p0, %s23_s20), 0  ;;  %s8303_s21 = smov (!%p24_p0, %s26_s21), %s6922_s18 }
   0x7   : > { %p197_p3 = pnand %p4834_p1, %p196_p2  ;;  %p28_p4 = scmp.ge.s32.totalorder %s8303_s21, 2 }
   0x8   : > { %p235_p5 = scmp.lt.s32.totalorder (!%p197_p3), %s6910_s15, 7  ;;  %p237_p6 = scmp.lt.s32.totalorder (!%p197_p3), %s6914_s16, 1 }
   0x9   : > { %s8305_s21 = smov (%p28_p4, %s8303_s21), 0  ;;  %200 = sbr.rel (%p197_p3) target bundleno = 716 (0x2cc), region = 36 }
   0xa   : > { %s4841_s22 = sadd.s32 (!%p197_p3), 4294967295, %s6910_s15  ;;  %p4850_p9 = scmp.ne.s32.totalorder (!%p197_p3), %s6910_s15, 0 }
   0xb   : > { %p249_p7 = scmp.gt.s32.totalorder (!%p197_p3), %s4841_s22, 0  ;;  %p4842_p8 = scmp.lt.s32.totalorder (!%p197_p3), %s4841_s22, 7 }
  0x10   : > { %s236_s23 = scalar_select %p235_p5, %s6910_s15, 7 }
  0x11   : > { %s8307_s16 = smov (!%p237_p6, %s6914_s16), 1  ;;  %s8311_s22 = smov (!%p249_p7, %s4841_s22), 0 }
  0x12   : > { %s8309_s23 = smov (!%p235_p5, %s236_s23), 7  ;;  %s4839_s24 = sshll.u32 %s8307_s16, 6  ;;  %v6928_v0 = vmov (!%p4850_p9), 0  }
  0x13   : > { %s4838_s25 = sshll.u32 %s8309_s23, 3  ;;  %s8313_s22 = smov (!%p4842_p8, %s8311_s22), 7  ;;  %268 = vst [vmem:[#allocation2] sm:$0xff] (!%p4850_p9), %v6928_v0  ;;  %269 = vst [vmem:[#allocation2 + $0x8] sm:$0xf] (!%p4850_p9), %v6928_v0 }
  0x14   : > { %s243_s26 = sadd.s32 %s4839_s24, %s4838_s25  ;;  %s4847_s5 = sshll.u32 %s8313_s22, 3  ;;  %270 = vst [vmem:[#allocation2 + $0xc] sm:$0xff] (!%p4850_p9), %v6928_v0  ;;  %271 = vst [vmem:[#allocation2 + $0x14] sm:$0xf] (!%p4850_p9), %v6928_v0 }
  0x15   : > { %s4840_s27 = sshll.u32 %s243_s26, 2  ;;  %s257_s6 = sadd.s32 %s4847_s5, %s4839_s24  ;;  %272 = vst [vmem:[#allocation2 + $0x18] sm:$0xff] (!%p4850_p9), %v6928_v0  ;;  %273 = vst [vmem:[#allocation2 + $0x20] sm:$0xf] (!%p4850_p9), %v6928_v0 }
  0x16   : > { %s6993_s30 = scalar_lea.vmem %s8279_s0, %s4840_s27  ;;  %s4849_s7 = sshll.u32 %s257_s6, 2  ;;  %274 = vst [vmem:[#allocation2 + $0x24] sm:$0xff] (!%p4850_p9), %v6928_v0  ;;  %275 = vst [vmem:[#allocation2 + $0x2c] sm:$0xf] (!%p4850_p9), %v6928_v0 }
  0x17   : > { %s6998_s10 = scalar_lea.vmem %s8283_s4, %s4849_s7  ;;  %267 = sbr.rel (%p4850_p9) target bundleno = 49 (0x31), region = 40  ;;  %276 = vst [vmem:[#allocation2 + $0x30] sm:$0xff] (!%p4850_p9), %v6928_v0  ;;  %277 = vst [vmem:[#allocation2 + $0x38] sm:$0xf] (!%p4850_p9), %v6928_v0 }
  0x18   : > { %278 = vst [vmem:[#allocation2 + $0x3c] sm:$0xff] (!%p4850_p9), %v6928_v0  ;;  %279 = vst [vmem:[#allocation2 + $0x44] sm:$0xf] (!%p4850_p9), %v6928_v0 }
  0x19   : > { %280 = vst [vmem:[#allocation2 + $0x48] sm:$0xff] (!%p4850_p9), %v6928_v0  ;;  %281 = vst [vmem:[#allocation2 + $0x50] sm:$0xf] (!%p4850_p9), %v6928_v0 }
  0x1a   : > { %282 = vst [vmem:[#allocation2 + $0x54] sm:$0xff] (!%p4850_p9), %v6928_v0  ;;  %283 = vst [vmem:[#allocation2 + $0x5c] sm:$0xf] (!%p4850_p9), %v6928_v0 }
  0x1b   : > { %284 = vst [vmem:[#allocation2 + $0x60] sm:$0xff] (!%p4850_p9), %v6928_v0  ;;  %285 = vst [vmem:[#allocation2 + $0x68] sm:$0xf] (!%p4850_p9), %v6928_v0 }
  0x1c   : > { %286 = vst [vmem:[#allocation2 + $0x6c] sm:$0xff] (!%p4850_p9), %v6928_v0  ;;  %287 = vst [vmem:[#allocation2 + $0x74] sm:$0xf] (!%p4850_p9), %v6928_v0 }
  0x1d   : > { %288 = vst [vmem:[#allocation2 + $0x78] sm:$0xff] (!%p4850_p9), %v6928_v0  ;;  %289 = vst [vmem:[#allocation2 + $0x80] sm:$0xf] (!%p4850_p9), %v6928_v0 }
  0x1e   : > { %290 = vst [vmem:[#allocation2 + $0x84] sm:$0xff] %v6928_v0  ;;  %291 = vst [vmem:[#allocation2 + $0x8c] sm:$0xf] %v6928_v0 }
  0x1f   : > { %292 = vst [vmem:[#allocation2 + $0x90] sm:$0xff] %v6928_v0  ;;  %293 = vst [vmem:[#allocation2 + $0x98] sm:$0xf] %v6928_v0 }
  0x20   : > { %294 = vst [vmem:[#allocation2 + $0x9c] sm:$0xff] %v6928_v0  ;;  %295 = vst [vmem:[#allocation2 + $0xa4] sm:$0xf] %v6928_v0 }
  0x21   : > { %296 = vst [vmem:[#allocation2 + $0xa8] sm:$0xff] %v6928_v0  ;;  %297 = vst [vmem:[#allocation2 + $0xb0] sm:$0xf] %v6928_v0 }
  0x22   : > { %298 = vst [vmem:[#allocation2 + $0xb4] sm:$0xff] %v6928_v0  ;;  %299 = vst [vmem:[#allocation2 + $0xbc] sm:$0xf] %v6928_v0 }
  0x23   : > { %300 = vst [vmem:[#allocation2 + $0xc0] sm:$0xff] %v6928_v0  ;;  %301 = vst [vmem:[#allocation2 + $0xc8] sm:$0xf] %v6928_v0 }
  0x24   : > { %302 = vst [vmem:[#allocation2 + $0xcc] sm:$0xff] %v6928_v0  ;;  %303 = vst [vmem:[#allocation2 + $0xd4] sm:$0xf] %v6928_v0 }
  0x25   : > { %304 = vst [vmem:[#allocation2 + $0xd8] sm:$0xff] %v6928_v0  ;;  %305 = vst [vmem:[#allocation2 + $0xe0] sm:$0xf] %v6928_v0 }
  0x26   : > { %306 = vst [vmem:[#allocation2 + $0xe4] sm:$0xff] %v6928_v0  ;;  %307 = vst [vmem:[#allocation2 + $0xec] sm:$0xf] %v6928_v0 }
  0x27   : > { %308 = vst [vmem:[#allocation2 + $0xf0] sm:$0xff] %v6928_v0  ;;  %309 = vst [vmem:[#allocation2 + $0xf8] sm:$0xf] %v6928_v0 }
  0x28   : > { %310 = vst [vmem:[#allocation2 + $0xfc] sm:$0xff] %v6928_v0  ;;  %311 = vst [vmem:[#allocation2 + $0x104] sm:$0xf] %v6928_v0 }
  0x29   : > { %312 = vst [vmem:[#allocation2 + $0x108] sm:$0xff] %v6928_v0  ;;  %313 = vst [vmem:[#allocation2 + $0x110] sm:$0xf] %v6928_v0 }
  0x2a   : > { %314 = vst [vmem:[#allocation2 + $0x114] sm:$0xff] %v6928_v0  ;;  %315 = vst [vmem:[#allocation2 + $0x11c] sm:$0xf] %v6928_v0 }
  0x2b   : > { %316 = vst [vmem:[#allocation2 + $0x120] sm:$0xff] %v6928_v0  ;;  %317 = vst [vmem:[#allocation2 + $0x128] sm:$0xf] %v6928_v0 }
  0x2c   : > { %318 = vst [vmem:[#allocation2 + $0x12c] sm:$0xff] %v6928_v0  ;;  %319 = vst [vmem:[#allocation2 + $0x134] sm:$0xf] %v6928_v0 }
  0x2d   : > { %320 = vst [vmem:[#allocation2 + $0x138] sm:$0xff] %v6928_v0  ;;  %321 = vst [vmem:[#allocation2 + $0x140] sm:$0xf] %v6928_v0 }
  0x2e   : > { %322 = vst [vmem:[#allocation2 + $0x144] sm:$0xff] %v6928_v0  ;;  %323 = vst [vmem:[#allocation2 + $0x14c] sm:$0xf] %v6928_v0 }
  0x2f   : > { %324 = vst [vmem:[#allocation2 + $0x150] sm:$0xff] %v6928_v0  ;;  %325 = vst [vmem:[#allocation2 + $0x158] sm:$0xf] %v6928_v0 }
  0x30   : > { %326 = vst [vmem:[#allocation2 + $0x15c] sm:$0xff] %v6928_v0  ;;  %327 = vst [vmem:[#allocation2 + $0x164] sm:$0xf] %v6928_v0 }
  0x31 PF: > { %v7002_v1 = vld [vmem:[%s6993_s30] sm:$0xf]  ;;  %v7005_v2 = vld [vmem:[%s6993_s30 + $0x4] sm:$0xf]  ;;  %v7008_v3 = vld [vmem:[%s6993_s30 + $0x8] sm:$0xf] }
  0x32   : > { %v7011_v4 = vld [vmem:[%s6993_s30 + $0xc] sm:$0xf]  ;;  %v7014_v5 = vld [vmem:[%s6993_s30 + $0x10] sm:$0xf]  ;;  %v7017_v6 = vld [vmem:[%s6993_s30 + $0x14] sm:$0xf] }
  0x33   : > { %v7020_v7 = vld [vmem:[%s6993_s30 + $0x18] sm:$0xf]  ;;  %v7023_v8 = vld [vmem:[%s6993_s30 + $0x1c] sm:$0xf]  ;;  %s338_s11 = ssub.s32 0, %s6910_s15  ;;  %p337_p10 = scmp.lt.s32.totalorder %s6910_s15, 0 }
  0x34   : > { %s4851_s12 = smin.u32 %s6910_s15, %s338_s11  ;;  %p336_p12 = scmp.lt.s32.totalorder %s6910_s15, 8 }
  0x35   : > { %6574 = sdivrem.u32 %s4851_s12, 3 }
  0x3e   : > { %s6575_s13 = spop.drf %6574 }
  0x3f   : > { %s342_s14 = ssub.s32 0, %s6575_s13 }
  0x40   : > { %s8315_s14 = smov (!%p337_p10, %s342_s14), %s6575_s13 }
  0x41   : > { %p4853_p11 = scmp.lt.s32.totalorder %s8315_s14, 0  ;;  %s348_s16 = sadd.s32 3, %s8315_s14 }
  0x43   : > { %s8317_s16 = smov (!%p4853_p11, %s348_s16), %s8315_s14 }
  0x44   : > { %p350_p13 = scmp.eq.s32.totalorder %s8317_s16, 0 }
  0x46   : > { %p351_p0 = pnand %p350_p13, %p336_p12 }
  0x47   : > { %356 = vst [vmem:[#allocation2 + $0x10] sm:$0xf] (!%p351_p0), %v7002_v1  ;;  %357 = vst [vmem:[#allocation2 + $0x1c] sm:$0xf] (!%p351_p0), %v7005_v2  ;;  %v365_v9 = vshrl.u32 (!%p351_p0), %v7002_v1, 16  ;;  %vm428_vm0 = vcmask (!%p351_p0), 1043456  }
  0x48   : > { %354 = sbr.rel (%p351_p0) target bundleno = 99 (0x63), region = 44  ;;  %358 = vst [vmem:[#allocation2 + $0x28] sm:$0xf] (!%p351_p0), %v7008_v3  ;;  %359 = vst [vmem:[#allocation2 + $0x34] sm:$0xf] (!%p351_p0), %v7011_v4  ;;  %v368_v10 = vshll.u32 (!%p351_p0), %v7002_v1, 16 }
  0x49   : > { %360 = vst [vmem:[#allocation2 + $0x40] sm:$0xf] (!%p351_p0), %v7014_v5  ;;  %361 = vst [vmem:[#allocation2 + $0x4c] sm:$0xf] (!%p351_p0), %v7017_v6  ;;  %vm429_vm1 = vsmask.f32 (!%p351_p0), 7938 }
  0x4a   : > { %362 = vst [vmem:[#allocation2 + $0x58] sm:$0xf] (!%p351_p0), %v7020_v7  ;;  %363 = vst [vmem:[#allocation2 + $0x64] sm:$0xf] (!%p351_p0), %v7023_v8  ;;  %v372_v11 = vshrl.u32 (!%p351_p0), %v7005_v2, 16  ;;  %v375_v12 = vshll.u32 (!%p351_p0), %v7005_v2, 16 }
  0x4b   : > { %v367_v13 = vrot.slane (!%p351_p0), %v365_v9, 7  ;;  %v431_v14 = vld [vmem:[#allocation2 + $0xc] sm:$0xf] (!%p351_p0)  ;;  %v379_v15 = vshrl.u32 (!%p351_p0), %v7008_v3, 16  ;;  %v382_v16 = vshll.u32 (!%p351_p0), %v7008_v3, 16  ;;  %v386_v17 = vshrl.u32 (!%p351_p0), %v7011_v4, 16  ;;  %vm7050_vm2 = vmand (!%p351_p0), %vm428_vm0, %vm429_vm1 }
  0x4c   : > { %v374_v19 = vrot.slane (!%p351_p0), %v372_v11, 7  ;;  %v434_v20 = vld [vmem:[#allocation2 + $0x18] sm:$0xf] (!%p351_p0)  ;;  %v389_v21 = vshll.u32 (!%p351_p0), %v7011_v4, 16  ;;  %v393_v22 = vshrl.u32 (!%p351_p0), %v7014_v5, 16  ;;  %v396_v23 = vshll.u32 (!%p351_p0), %v7014_v5, 16 }
  0x4d   : > { %v370_v24 = vor.u32 (!%p351_p0), %v368_v10, %v367_v13  ;;  %v381_v25 = vrot.slane (!%p351_p0), %v379_v15, 7  ;;  %v437_v26 = vld [vmem:[#allocation2 + $0x24] sm:$0xf] (!%p351_p0)  ;;  %v388_v27 = vrot.slane (!%p351_p0), %v386_v17, 7  ;;  %v400_v28 = vshrl.u32 (!%p351_p0), %v7017_v6, 16 }
  0x4e   : > { %v377_v29 = vor.u32 (!%p351_p0), %v375_v12, %v374_v19  ;;  %v440_v30 = vld [vmem:[#allocation2 + $0x30] sm:$0xf] (!%p351_p0)  ;;  %v395_v31 = vrot.slane (!%p351_p0), %v393_v22, 7  ;;  %v403_v32 = vshll.u32 (!%p351_p0), %v7017_v6, 16  ;;  %v407_v33 = vshrl.u32 (!%p351_p0), %v7020_v7, 16 }
  0x4f   : > { %v432_v34 = vsel %vm7050_vm2, %v370_v24, %v431_v14  ;;  %v384_v35 = vor.u32 %v382_v16, %v381_v25  ;;  %v391_v36 = vor.u32 %v389_v21, %v388_v27  ;;  %v443_v37 = vld [vmem:[#allocation2 + $0x3c] sm:$0xf]  ;;  %v402_v38 = vrot.slane %v400_v28, 7  ;;  %v446_v41 = vld [vmem:[#allocation2 + $0x48] sm:$0xf] }
  0x50   : > { %433 = vst [vmem:[#allocation2 + $0xc] sm:$0xf] %v432_v34  ;;  %v435_v39 = vsel %vm7050_vm2, %v377_v29, %v434_v20  ;;  %v398_v40 = vor.u32 %v396_v23, %v395_v31  ;;  %v409_v42 = vrot.slane %v407_v33, 7  ;;  %v410_v43 = vshll.u32 %v7020_v7, 16  ;;  %v449_v47 = vld [vmem:[#allocation2 + $0x54] sm:$0xf] }
  0x51   : > { %436 = vst [vmem:[#allocation2 + $0x18] sm:$0xf] %v435_v39  ;;  %v438_v44 = vsel %vm7050_vm2, %v384_v35, %v437_v26  ;;  %v441_v45 = vsel %vm7050_vm2, %v391_v36, %v440_v30  ;;  %v405_v46 = vor.u32 %v403_v32, %v402_v38  ;;  %v414_v48 = vshrl.u32 %v7023_v8, 16  ;;  %v452_v57 = vld [vmem:[#allocation2 + $0x60] sm:$0xf] }
  0x52   : > { %439 = vst [vmem:[#allocation2 + $0x24] sm:$0xf] %v438_v44  ;;  %442 = vst [vmem:[#allocation2 + $0x30] sm:$0xf] %v441_v45  ;;  %v444_v49 = vsel %vm7050_vm2, %v398_v40, %v443_v37  ;;  %v412_v50 = vor.u32 %v410_v43, %v409_v42  ;;  %v417_v51 = vshll.u32 %v7023_v8, 16  ;;  %v455_v52 = vrot.slane %v365_v9, 4 }
  0x53   : > { %445 = vst [vmem:[#allocation2 + $0x3c] sm:$0xf] %v444_v49  ;;  %v447_v53 = vsel %vm7050_vm2, %v405_v46, %v446_v41  ;;  %v416_v54 = vrot.slane %v414_v48, 7  ;;  %v456_v55 = vrot.slane %v368_v10, 5  ;;  %vm495_vm3 = vsmask.f32 3328 }
  0x54   : > { %448 = vst [vmem:[#allocation2 + $0x48] sm:$0xf] %v447_v53  ;;  %v450_v56 = vsel %vm7050_vm2, %v412_v50, %v449_v47  ;;  %v459_v58 = vrot.slane %v372_v11, 4  ;;  %v460_v59 = vrot.slane %v375_v12, 5  ;;  %v463_v60 = vrot.slane %v379_v15, 4  ;;  %vm7078_vm4 = vmand %vm428_vm0, %vm495_vm3 }
  0x55   : > { %451 = vst [vmem:[#allocation2 + $0x54] sm:$0xf] %v450_v56  ;;  %v419_v61 = vor.u32 %v417_v51, %v416_v54  ;;  %v457_v62 = vor.u32 %v456_v55, %v455_v52  ;;  %v464_v63 = vrot.slane %v382_v16, 5  ;;  %v467_v0 = vrot.slane %v386_v17, 4  ;;  %v497_v10 = vld [vmem:[#allocation2 + $0x14] sm:$0xf] }
  0x56   : > { %v461_v13 = vor.u32 %v460_v59, %v459_v58  ;;  %v468_v14 = vrot.slane %v389_v21, 5  ;;  %v471_v19 = vrot.slane %v393_v22, 4  ;;  %v472_v20 = vrot.slane %v396_v23, 5  ;;  %v500_v15 = vld [vmem:[#allocation2 + $0x20] sm:$0xf] }
  0x57   : > { %v453_v11 = vsel %vm7050_vm2, %v419_v61, %v452_v57  ;;  %v458_v12 = vrot.slane %v457_v62, 4  ;;  %v465_v24 = vor.u32 %v464_v63, %v463_v60  ;;  %v475_v25 = vrot.slane %v400_v28, 4  ;;  %v503_v17 = vld [vmem:[#allocation2 + $0x2c] sm:$0xf]  ;;  %v506_v27 = vld [vmem:[#allocation2 + $0x38] sm:$0xf] }
  0x58   : > { %454 = vst [vmem:[#allocation2 + $0x60] sm:$0xf] %v453_v11  ;;  %v462_v16 = vrot.slane %v461_v13, 4  ;;  %v469_v26 = vor.u32 %v468_v14, %v467_v0  ;;  %v473_v29 = vor.u32 %v472_v20, %v471_v19  ;;  %v476_v30 = vrot.slane %v403_v32, 5  ;;  %v509_v22 = vld [vmem:[#allocation2 + $0x44] sm:$0xf] }
  0x59   : > { %v498_v31 = vsel %vm7078_vm4, %v458_v12, %v497_v10  ;;  %v466_v21 = vrot.slane %v465_v24, 4  ;;  %v479_v23 = vrot.slane %v407_v33, 4  ;;  %v480_v34 = vrot.slane %v410_v43, 5  ;;  %v512_v38 = vld [vmem:[#allocation2 + $0x50] sm:$0xf] }
  0x5a   : > { %499 = vst [vmem:[#allocation2 + $0x14] sm:$0xf] %v498_v31  ;;  %v501_v18 = vsel %vm7078_vm4, %v462_v16, %v500_v15  ;;  %v470_v35 = vrot.slane %v469_v26, 4  ;;  %v474_v28 = vrot.slane %v473_v29, 4  ;;  %v477_v36 = vor.u32 %v476_v30, %v475_v25  ;;  %v515_v43 = vld [vmem:[#allocation2 + $0x5c] sm:$0xf] }
  0x5b   : > { %502 = vst [vmem:[#allocation2 + $0x20] sm:$0xf] %v501_v18  ;;  %v504_v37 = vsel %vm7078_vm4, %v466_v21, %v503_v17  ;;  %v481_v32 = vor.u32 %v480_v34, %v479_v23  ;;  %v483_v39 = vrot.slane %v414_v48, 4  ;;  %v484_v40 = vrot.slane %v417_v51, 5  ;;  %v518_v47 = vld [vmem:[#allocation2 + $0x68] sm:$0xf] }
  0x5c   : > { %505 = vst [vmem:[#allocation2 + $0x2c] sm:$0xf] %v504_v37  ;;  %v507_v33 = vsel %vm7078_vm4, %v470_v35, %v506_v27  ;;  %v510_v41 = vsel %vm7078_vm4, %v474_v28, %v509_v22  ;;  %v478_v42 = vrot.slane %v477_v36, 4 }
  0x5d   : > { %508 = vst [vmem:[#allocation2 + $0x38] sm:$0xf] %v507_v33  ;;  %511 = vst [vmem:[#allocation2 + $0x44] sm:$0xf] %v510_v41  ;;  %v482_v44 = vrot.slane %v481_v32, 4  ;;  %v485_v45 = vor.u32 %v484_v40, %v483_v39 }
  0x5e   : > { %v513_v46 = vsel %vm7078_vm4, %v478_v42, %v512_v38 }
  0x5f   : > { %514 = vst [vmem:[#allocation2 + $0x50] sm:$0xf] %v513_v46  ;;  %v516_v48 = vsel %vm7078_vm4, %v482_v44, %v515_v43  ;;  %v486_v49 = vrot.slane %v485_v45, 4 }
  0x60   : > { %517 = vst [vmem:[#allocation2 + $0x5c] sm:$0xf] %v516_v48 }
  0x61   : > { %v519_v50 = vsel %vm7078_vm4, %v486_v49, %v518_v47 }
  0x62   : > { %520 = vst [vmem:[#allocation2 + $0x68] sm:$0xf] %v519_v50 }
  0x63 PF: > { %p521_p1 = scmp.eq.s32.totalorder %s8317_s16, 1 }
  0x65   : > { %p522_p2 = pnand %p521_p1, %p336_p12 }
  0x66   : > { %527 = vst [vmem:[#allocation2 + $0x88] sm:$0xf] (!%p522_p2), %v7002_v1  ;;  %528 = vst [vmem:[#allocation2 + $0x94] sm:$0xf] (!%p522_p2), %v7005_v2  ;;  %v536_v51 = vshrl.u32 (!%p522_p2), %v7002_v1, 16  ;;  %vm599_vm5 = vcmask (!%p522_p2), 1043456  }
  0x67   : > { %525 = sbr.rel (%p522_p2) target bundleno = 130 (0x82), region = 48  ;;  %529 = vst [vmem:[#allocation2 + $0xa0] sm:$0xf] (!%p522_p2), %v7008_v3  ;;  %530 = vst [vmem:[#allocation2 + $0xac] sm:$0xf] (!%p522_p2), %v7011_v4  ;;  %v539_v52 = vshll.u32 (!%p522_p2), %v7002_v1, 16 }
  0x68   : > { %531 = vst [vmem:[#allocation2 + $0xb8] sm:$0xf] (!%p522_p2), %v7014_v5  ;;  %532 = vst [vmem:[#allocation2 + $0xc4] sm:$0xf] (!%p522_p2), %v7017_v6  ;;  %vm600_vm6 = vsmask.f32 (!%p522_p2), 7938 }
  0x69   : > { %533 = vst [vmem:[#allocation2 + $0xd0] sm:$0xf] (!%p522_p2), %v7020_v7  ;;  %534 = vst [vmem:[#allocation2 + $0xdc] sm:$0xf] (!%p522_p2), %v7023_v8  ;;  %v543_v53 = vshrl.u32 (!%p522_p2), %v7005_v2, 16  ;;  %v546_v54 = vshll.u32 (!%p522_p2), %v7005_v2, 16 }
  0x6a   : > { %v538_v55 = vrot.slane (!%p522_p2), %v536_v51, 7  ;;  %v602_v56 = vld [vmem:[#allocation2 + $0x84] sm:$0xf] (!%p522_p2)  ;;  %v550_v57 = vshrl.u32 (!%p522_p2), %v7008_v3, 16  ;;  %v553_v58 = vshll.u32 (!%p522_p2), %v7008_v3, 16  ;;  %v557_v59 = vshrl.u32 (!%p522_p2), %v7011_v4, 16  ;;  %vm7119_vm7 = vmand (!%p522_p2), %vm599_vm5, %vm600_vm6 }
  0x6b   : > { %v545_v61 = vrot.slane (!%p522_p2), %v543_v53, 7  ;;  %v605_v62 = vld [vmem:[#allocation2 + $0x90] sm:$0xf] (!%p522_p2)  ;;  %v560_v63 = vshll.u32 (!%p522_p2), %v7011_v4, 16  ;;  %v564_v0 = vshrl.u32 (!%p522_p2), %v7014_v5, 16  ;;  %v567_v9 = vshll.u32 (!%p522_p2), %v7014_v5, 16 }
  0x6c   : > { %v541_v10 = vor.u32 (!%p522_p2), %v539_v52, %v538_v55  ;;  %v552_v13 = vrot.slane (!%p522_p2), %v550_v57, 7  ;;  %v608_v14 = vld [vmem:[#allocation2 + $0x9c] sm:$0xf] (!%p522_p2)  ;;  %v559_v19 = vrot.slane (!%p522_p2), %v557_v59, 7  ;;  %v571_v20 = vshrl.u32 (!%p522_p2), %v7017_v6, 16 }
  0x6d   : > { %v548_v11 = vor.u32 (!%p522_p2), %v546_v54, %v545_v61  ;;  %v611_v12 = vld [vmem:[#allocation2 + $0xa8] sm:$0xf] (!%p522_p2)  ;;  %v566_v15 = vrot.slane (!%p522_p2), %v564_v0, 7  ;;  %v574_v24 = vshll.u32 (!%p522_p2), %v7017_v6, 16  ;;  %v578_v25 = vshrl.u32 (!%p522_p2), %v7020_v7, 16 }
  0x6e   : > { %v603_v16 = vsel %vm7119_vm7, %v541_v10, %v602_v56  ;;  %v555_v17 = vor.u32 %v553_v58, %v552_v13  ;;  %v562_v26 = vor.u32 %v560_v63, %v559_v19  ;;  %v614_v27 = vld [vmem:[#allocation2 + $0xb4] sm:$0xf]  ;;  %v573_v29 = vrot.slane %v571_v20, 7  ;;  %v617_v21 = vld [vmem:[#allocation2 + $0xc0] sm:$0xf] }
  0x6f   : > { %604 = vst [vmem:[#allocation2 + $0x84] sm:$0xf] %v603_v16  ;;  %v606_v30 = vsel %vm7119_vm7, %v548_v11, %v605_v62  ;;  %v569_v31 = vor.u32 %v567_v9, %v566_v15  ;;  %v580_v22 = vrot.slane %v578_v25, 7  ;;  %v581_v23 = vshll.u32 %v7020_v7, 16  ;;  %v620_v28 = vld [vmem:[#allocation2 + $0xcc] sm:$0xf] }
  0x70   : > { %607 = vst [vmem:[#allocation2 + $0x90] sm:$0xf] %v606_v30  ;;  %v609_v34 = vsel %vm7119_vm7, %v555_v17, %v608_v14  ;;  %v612_v18 = vsel %vm7119_vm7, %v562_v26, %v611_v12  ;;  %v576_v35 = vor.u32 %v574_v24, %v573_v29  ;;  %v585_v36 = vshrl.u32 %v7023_v8, 16  ;;  %v623_v43 = vld [vmem:[#allocation2 + $0xd8] sm:$0xf] }
  0x71   : > { %610 = vst [vmem:[#allocation2 + $0x9c] sm:$0xf] %v609_v34  ;;  %613 = vst [vmem:[#allocation2 + $0xa8] sm:$0xf] %v612_v18  ;;  %v615_v37 = vsel %vm7119_vm7, %v569_v31, %v614_v27  ;;  %v583_v38 = vor.u32 %v581_v23, %v580_v22  ;;  %v588_v32 = vshll.u32 %v7023_v8, 16  ;;  %v626_v39 = vrot.slane %v536_v51, 4 }
  0x72   : > { %616 = vst [vmem:[#allocation2 + $0xb4] sm:$0xf] %v615_v37  ;;  %v618_v40 = vsel %vm7119_vm7, %v576_v35, %v617_v21  ;;  %v587_v33 = vrot.slane %v585_v36, 7  ;;  %v627_v41 = vrot.slane %v539_v52, 5  ;;  %vm666_vm8 = vsmask.f32 3328 }
  0x73   : > { %619 = vst [vmem:[#allocation2 + $0xc0] sm:$0xf] %v618_v40  ;;  %v621_v42 = vsel %vm7119_vm7, %v583_v38, %v620_v28  ;;  %v630_v44 = vrot.slane %v543_v53, 4  ;;  %v631_v45 = vrot.slane %v546_v54, 5  ;;  %v634_v46 = vrot.slane %v550_v57, 4  ;;  %vm7147_vm9 = vmand %vm599_vm5, %vm666_vm8 }
  0x74   : > { %622 = vst [vmem:[#allocation2 + $0xcc] sm:$0xf] %v621_v42  ;;  %v590_v47 = vor.u32 %v588_v32, %v587_v33  ;;  %v628_v48 = vor.u32 %v627_v41, %v626_v39  ;;  %v635_v49 = vrot.slane %v553_v58, 5  ;;  %v638_v50 = vrot.slane %v557_v59, 4  ;;  %v668_v52 = vld [vmem:[#allocation2 + $0x8c] sm:$0xf] }
  0x75   : > { %v632_v55 = vor.u32 %v631_v45, %v630_v44  ;;  %v639_v56 = vrot.slane %v560_v63, 5  ;;  %v642_v61 = vrot.slane %v564_v0, 4  ;;  %v643_v62 = vrot.slane %v567_v9, 5  ;;  %v671_v57 = vld [vmem:[#allocation2 + $0x98] sm:$0xf] }
  0x76   : > { %v624_v53 = vsel %vm7119_vm7, %v590_v47, %v623_v43  ;;  %v629_v54 = vrot.slane %v628_v48, 4  ;;  %v636_v10 = vor.u32 %v635_v49, %v634_v46  ;;  %v646_v13 = vrot.slane %v571_v20, 4  ;;  %v674_v59 = vld [vmem:[#allocation2 + $0xa4] sm:$0xf]  ;;  %v677_v19 = vld [vmem:[#allocation2 + $0xb0] sm:$0xf] }
  0x77   : > { %625 = vst [vmem:[#allocation2 + $0xd8] sm:$0xf] %v624_v53  ;;  %v633_v58 = vrot.slane %v632_v55, 4  ;;  %v640_v14 = vor.u32 %v639_v56, %v638_v50  ;;  %v644_v11 = vor.u32 %v643_v62, %v642_v61  ;;  %v647_v12 = vrot.slane %v574_v24, 5  ;;  %v680_v0 = vld [vmem:[#allocation2 + $0xbc] sm:$0xf] }
  0x78   : > { %v669_v15 = vsel %vm7147_vm9, %v629_v54, %v668_v52  ;;  %v637_v63 = vrot.slane %v636_v10, 4  ;;  %v650_v9 = vrot.slane %v578_v25, 4  ;;  %v651_v16 = vrot.slane %v581_v23, 5  ;;  %v683_v29 = vld [vmem:[#allocation2 + $0xc8] sm:$0xf] }
  0x79   : > { %670 = vst [vmem:[#allocation2 + $0x8c] sm:$0xf] %v669_v15  ;;  %v672_v60 = vsel %vm7147_vm9, %v633_v58, %v671_v57  ;;  %v641_v17 = vrot.slane %v640_v14, 4  ;;  %v645_v20 = vrot.slane %v644_v11, 4  ;;  %v648_v26 = vor.u32 %v647_v12, %v646_v13  ;;  %v686_v23 = vld [vmem:[#allocation2 + $0xd4] sm:$0xf] }
  0x7a   : > { %673 = vst [vmem:[#allocation2 + $0x98] sm:$0xf] %v672_v60  ;;  %v675_v27 = vsel %vm7147_vm9, %v637_v63, %v674_v59  ;;  %v652_v24 = vor.u32 %v651_v16, %v650_v9  ;;  %v654_v30 = vrot.slane %v585_v36, 4  ;;  %v655_v31 = vrot.slane %v588_v32, 5  ;;  %v689_v28 = vld [vmem:[#allocation2 + $0xe0] sm:$0xf] }
  0x7b   : > { %676 = vst [vmem:[#allocation2 + $0xa4] sm:$0xf] %v675_v27  ;;  %v678_v25 = vsel %vm7147_vm9, %v641_v17, %v677_v19  ;;  %v681_v21 = vsel %vm7147_vm9, %v645_v20, %v680_v0  ;;  %v649_v22 = vrot.slane %v648_v26, 4 }
  0x7c   : > { %679 = vst [vmem:[#allocation2 + $0xb0] sm:$0xf] %v678_v25  ;;  %682 = vst [vmem:[#allocation2 + $0xbc] sm:$0xf] %v681_v21  ;;  %v653_v34 = vrot.slane %v652_v24, 4  ;;  %v656_v18 = vor.u32 %v655_v31, %v654_v30 }
  0x7d   : > { %v684_v35 = vsel %vm7147_vm9, %v649_v22, %v683_v29 }
  0x7e   : > { %685 = vst [vmem:[#allocation2 + $0xc8] sm:$0xf] %v684_v35  ;;  %v687_v36 = vsel %vm7147_vm9, %v653_v34, %v686_v23  ;;  %v657_v37 = vrot.slane %v656_v18, 4 }
  0x7f   : > { %688 = vst [vmem:[#allocation2 + $0xd4] sm:$0xf] %v687_v36 }
  0x80   : > { %v690_v38 = vsel %vm7147_vm9, %v657_v37, %v689_v28 }
  0x81   : > { %691 = vst [vmem:[#allocation2 + $0xe0] sm:$0xf] %v690_v38 }
  0x82 PF: > { %p692_p3 = scmp.eq.s32.totalorder %s8317_s16, 2 }
  0x84   : > { %p693_p4 = pnand %p692_p3, %p336_p12 }
  0x85   : > { %698 = vst [vmem:[#allocation2 + $0x100] sm:$0xf] (!%p693_p4), %v7002_v1  ;;  %699 = vst [vmem:[#allocation2 + $0x10c] sm:$0xf] (!%p693_p4), %v7005_v2  ;;  %v707_v32 = vshrl.u32 (!%p693_p4), %v7002_v1, 16  ;;  %vm770_vm10 = vcmask (!%p693_p4), 1043456  }
  0x86   : > { %696 = sbr.rel (%p693_p4) target bundleno = 161 (0xa1), region = 52  ;;  %700 = vst [vmem:[#allocation2 + $0x118] sm:$0xf] (!%p693_p4), %v7008_v3  ;;  %701 = vst [vmem:[#allocation2 + $0x124] sm:$0xf] (!%p693_p4), %v7011_v4  ;;  %v710_v39 = vshll.u32 (!%p693_p4), %v7002_v1, 16 }
  0x87   : > { %702 = vst [vmem:[#allocation2 + $0x130] sm:$0xf] (!%p693_p4), %v7014_v5  ;;  %703 = vst [vmem:[#allocation2 + $0x13c] sm:$0xf] (!%p693_p4), %v7017_v6  ;;  %vm771_vm11 = vsmask.f32 (!%p693_p4), 7938 }
  0x88   : > { %704 = vst [vmem:[#allocation2 + $0x148] sm:$0xf] (!%p693_p4), %v7020_v7  ;;  %705 = vst [vmem:[#allocation2 + $0x154] sm:$0xf] (!%p693_p4), %v7023_v8  ;;  %v714_v40 = vshrl.u32 (!%p693_p4), %v7005_v2, 16  ;;  %v717_v33 = vshll.u32 (!%p693_p4), %v7005_v2, 16 }
  0x89   : > { %v709_v41 = vrot.slane (!%p693_p4), %v707_v32, 7  ;;  %v773_v42 = vld [vmem:[#allocation2 + $0xfc] sm:$0xf] (!%p693_p4)  ;;  %v721_v43 = vshrl.u32 (!%p693_p4), %v7008_v3, 16  ;;  %v724_v44 = vshll.u32 (!%p693_p4), %v7008_v3, 16  ;;  %v728_v45 = vshrl.u32 (!%p693_p4), %v7011_v4, 16  ;;  %vm7188_vm12 = vmand (!%p693_p4), %vm770_vm10, %vm771_vm11 }
  0x8a   : > { %v716_v47 = vrot.slane (!%p693_p4), %v714_v40, 7  ;;  %v776_v48 = vld [vmem:[#allocation2 + $0x108] sm:$0xf] (!%p693_p4)  ;;  %v731_v1 = vshll.u32 (!%p693_p4), %v7011_v4, 16  ;;  %v735_v49 = vshrl.u32 (!%p693_p4), %v7014_v5, 16  ;;  %v738_v2 = vshll.u32 (!%p693_p4), %v7014_v5, 16 }
  0x8b   : > { %v712_v50 = vor.u32 (!%p693_p4), %v710_v39, %v709_v41  ;;  %v723_v51 = vrot.slane (!%p693_p4), %v721_v43, 7  ;;  %v779_v52 = vld [vmem:[#allocation2 + $0x114] sm:$0xf] (!%p693_p4)  ;;  %v730_v55 = vrot.slane (!%p693_p4), %v728_v45, 7  ;;  %v742_v3 = vshrl.u32 (!%p693_p4), %v7017_v6, 16 }
  0x8c   : > { %v719_v56 = vor.u32 (!%p693_p4), %v717_v33, %v716_v47  ;;  %v782_v61 = vld [vmem:[#allocation2 + $0x120] sm:$0xf] (!%p693_p4)  ;;  %v737_v62 = vrot.slane (!%p693_p4), %v735_v49, 7  ;;  %v745_v53 = vshll.u32 (!%p693_p4), %v7017_v6, 16  ;;  %v749_v54 = vshrl.u32 (!%p693_p4), %v7020_v7, 16 }
  0x8d   : > { %v774_v4 = vsel %vm7188_vm12, %v712_v50, %v773_v42  ;;  %v726_v57 = vor.u32 %v724_v44, %v723_v51  ;;  %v733_v10 = vor.u32 %v731_v1, %v730_v55  ;;  %v785_v13 = vld [vmem:[#allocation2 + $0x12c] sm:$0xf]  ;;  %v744_v5 = vrot.slane %v742_v3, 7  ;;  %v788_v14 = vld [vmem:[#allocation2 + $0x138] sm:$0xf] }
  0x8e   : > { %775 = vst [vmem:[#allocation2 + $0xfc] sm:$0xf] %v774_v4  ;;  %v777_v58 = vsel %vm7188_vm12, %v719_v56, %v776_v48  ;;  %v740_v59 = vor.u32 %v738_v2, %v737_v62  ;;  %v751_v19 = vrot.slane %v749_v54, 7  ;;  %v752_v11 = vshll.u32 %v7020_v7, 16  ;;  %v791_v63 = vld [vmem:[#allocation2 + $0x144] sm:$0xf] }
  0x8f   : > { %778 = vst [vmem:[#allocation2 + $0x108] sm:$0xf] %v777_v58  ;;  %v780_v6 = vsel %vm7188_vm12, %v726_v57, %v779_v52  ;;  %v783_v12 = vsel %vm7188_vm12, %v733_v10, %v782_v61  ;;  %v747_v15 = vor.u32 %v745_v53, %v744_v5  ;;  %v756_v0 = vshrl.u32 %v7023_v8, 16  ;;  %v794_v29 = vld [vmem:[#allocation2 + $0x150] sm:$0xf] }
  0x90   : > { %781 = vst [vmem:[#allocation2 + $0x114] sm:$0xf] %v780_v6  ;;  %784 = vst [vmem:[#allocation2 + $0x120] sm:$0xf] %v783_v12  ;;  %v786_v9 = vsel %vm7188_vm12, %v740_v59, %v785_v13  ;;  %v754_v16 = vor.u32 %v752_v11, %v751_v19  ;;  %v759_v60 = vshll.u32 %v7023_v8, 16  ;;  %v797_v7 = vrot.slane %v707_v32, 4 }
  0x91   : > { %787 = vst [vmem:[#allocation2 + $0x12c] sm:$0xf] %v786_v9  ;;  %v789_v17 = vsel %vm7188_vm12, %v747_v15, %v788_v14  ;;  %v758_v20 = vrot.slane %v756_v0, 7  ;;  %v798_v26 = vrot.slane %v710_v39, 5  ;;  %vm837_vm13 = vsmask.f32 3328 }
  0x92   : > { %790 = vst [vmem:[#allocation2 + $0x138] sm:$0xf] %v789_v17  ;;  %v792_v27 = vsel %vm7188_vm12, %v754_v16, %v791_v63  ;;  %v801_v24 = vrot.slane %v714_v40, 4  ;;  %v802_v30 = vrot.slane %v717_v33, 5  ;;  %v805_v31 = vrot.slane %v721_v43, 4  ;;  %vm7216_vm14 = vmand %vm770_vm10, %vm837_vm13 }
  0x93   : > { %793 = vst [vmem:[#allocation2 + $0x144] sm:$0xf] %v792_v27  ;;  %v761_v25 = vor.u32 %v759_v60, %v758_v20  ;;  %v799_v21 = vor.u32 %v798_v26, %v797_v7  ;;  %v806_v8 = vrot.slane %v724_v44, 5  ;;  %v809_v22 = vrot.slane %v728_v45, 4  ;;  %v839_v34 = vld [vmem:[#allocation2 + $0x104] sm:$0xf] }
  0x94   : > { %v803_v18 = vor.u32 %v802_v30, %v801_v24  ;;  %v810_v35 = vrot.slane %v731_v1, 5  ;;  %v813_v28 = vrot.slane %v735_v49, 4  ;;  %v814_v36 = vrot.slane %v738_v2, 5  ;;  %v842_v32 = vld [vmem:[#allocation2 + $0x110] sm:$0xf] }
  0x95   : > { %v795_v37 = vsel %vm7188_vm12, %v761_v25, %v794_v29  ;;  %v800_v38 = vrot.slane %v799_v21, 4  ;;  %v807_v39 = vor.u32 %v806_v8, %v805_v31  ;;  %v817_v40 = vrot.slane %v742_v3, 4  ;;  %v845_v41 = vld [vmem:[#allocation2 + $0x11c] sm:$0xf]  ;;  %v848_v43 = vld [vmem:[#allocation2 + $0x128] sm:$0xf] }
  0x96   : > { %796 = vst [vmem:[#allocation2 + $0x150] sm:$0xf] %v795_v37  ;;  %v804_v33 = vrot.slane %v803_v18, 4  ;;  %v811_v42 = vor.u32 %v810_v35, %v809_v22  ;;  %v815_v44 = vor.u32 %v814_v36, %v813_v28  ;;  %v818_v45 = vrot.slane %v745_v53, 5  ;;  %v851_v1 = vld [vmem:[#allocation2 + $0x134] sm:$0xf] }
  0x97   : > { %v840_v47 = vsel %vm7216_vm14, %v800_v38, %v839_v34  ;;  %v808_v48 = vrot.slane %v807_v39, 4  ;;  %v821_v49 = vrot.slane %v749_v54, 4  ;;  %v822_v2 = vrot.slane %v752_v11, 5  ;;  %v854_v3 = vld [vmem:[#allocation2 + $0x140] sm:$0xf] }
  0x98   : > { %841 = vst [vmem:[#allocation2 + $0x104] sm:$0xf] %v840_v47  ;;  %v843_v46 = vsel %vm7216_vm14, %v804_v33, %v842_v32  ;;  %v812_v50 = vrot.slane %v811_v42, 4  ;;  %v816_v51 = vrot.slane %v815_v44, 4  ;;  %v819_v52 = vor.u32 %v818_v45, %v817_v40  ;;  %v857_v57 = vld [vmem:[#allocation2 + $0x14c] sm:$0xf] }
  0x99   : > { %844 = vst [vmem:[#allocation2 + $0x110] sm:$0xf] %v843_v46  ;;  %v846_v55 = vsel %vm7216_vm14, %v808_v48, %v845_v41  ;;  %v823_v56 = vor.u32 %v822_v2, %v821_v49  ;;  %v825_v61 = vrot.slane %v756_v0, 4  ;;  %v826_v62 = vrot.slane %v759_v60, 5  ;;  %v860_v58 = vld [vmem:[#allocation2 + $0x158] sm:$0xf] }
  0x9a   : > { %847 = vst [vmem:[#allocation2 + $0x11c] sm:$0xf] %v846_v55  ;;  %v849_v53 = vsel %vm7216_vm14, %v812_v50, %v848_v43  ;;  %v852_v54 = vsel %vm7216_vm14, %v816_v51, %v851_v1  ;;  %v820_v4 = vrot.slane %v819_v52, 4 }
  0x9b   : > { %850 = vst [vmem:[#allocation2 + $0x128] sm:$0xf] %v849_v53  ;;  %853 = vst [vmem:[#allocation2 + $0x134] sm:$0xf] %v852_v54  ;;  %v824_v10 = vrot.slane %v823_v56, 4  ;;  %v827_v13 = vor.u32 %v826_v62, %v825_v61 }
  0x9c   : > { %v855_v5 = vsel %vm7216_vm14, %v820_v4, %v854_v3 }
  0x9d   : > { %856 = vst [vmem:[#allocation2 + $0x140] sm:$0xf] %v855_v5  ;;  %v858_v59 = vsel %vm7216_vm14, %v824_v10, %v857_v57  ;;  %v828_v14 = vrot.slane %v827_v13, 4 }
  0x9e   : > { %859 = vst [vmem:[#allocation2 + $0x14c] sm:$0xf] %v858_v59 }
  0x9f   : > { %v861_v19 = vsel %vm7216_vm14, %v828_v14, %v860_v58 }
  0xa0   : > { %862 = vst [vmem:[#allocation2 + $0x158] sm:$0xf] %v861_v19 }
  0xa1 PF: > { %p4854_p5 = scmp.ne.s32.totalorder %s6910_s15, 8 }
  0xa2   : > { %v6929_v11 = vmov (!%p4854_p5), 0  }
  0xa3   : > { %866 = sbr.rel (%p4854_p5) target bundleno = 171 (0xab), region = 56  ;;  %868 = vst [vmem:[#allocation2 + $0xfc] sm:$0xff] (!%p4854_p5), %v6929_v11  ;;  %869 = vst [vmem:[#allocation2 + $0x104] sm:$0xf] (!%p4854_p5), %v6929_v11 }
  0xa4   : > { %870 = vst [vmem:[#allocation2 + $0x108] sm:$0xff] (!%p4854_p5), %v6929_v11  ;;  %871 = vst [vmem:[#allocation2 + $0x110] sm:$0xf] (!%p4854_p5), %v6929_v11 }
  0xa5   : > { %872 = vst [vmem:[#allocation2 + $0x114] sm:$0xff] (!%p4854_p5), %v6929_v11  ;;  %873 = vst [vmem:[#allocation2 + $0x11c] sm:$0xf] (!%p4854_p5), %v6929_v11 }
  0xa6   : > { %874 = vst [vmem:[#allocation2 + $0x120] sm:$0xff] (!%p4854_p5), %v6929_v11  ;;  %875 = vst [vmem:[#allocation2 + $0x128] sm:$0xf] (!%p4854_p5), %v6929_v11 }
  0xa7   : > { %876 = vst [vmem:[#allocation2 + $0x12c] sm:$0xff] (!%p4854_p5), %v6929_v11  ;;  %877 = vst [vmem:[#allocation2 + $0x134] sm:$0xf] (!%p4854_p5), %v6929_v11 }
  0xa8   : > { %878 = vst [vmem:[#allocation2 + $0x138] sm:$0xff] (!%p4854_p5), %v6929_v11  ;;  %879 = vst [vmem:[#allocation2 + $0x140] sm:$0xf] (!%p4854_p5), %v6929_v11 }
  0xa9   : > { %880 = vst [vmem:[#allocation2 + $0x144] sm:$0xff] (!%p4854_p5), %v6929_v11  ;;  %881 = vst [vmem:[#allocation2 + $0x14c] sm:$0xf] (!%p4854_p5), %v6929_v11 }
  0xaa   : > { %882 = vst [vmem:[#allocation2 + $0x150] sm:$0xff] %v6929_v11  ;;  %883 = vst [vmem:[#allocation2 + $0x158] sm:$0xf] %v6929_v11 }
  0xab PF: > { %p4855_p6 = scmp.lt.s32.totalorder %s6910_s15, 1 }
  0xac   : > { %v6576_v6 = vld [vmem:[%s8280_s1 + $0x100] sm:$0xff] (!%p4855_p6)   ;;  %s7244_s24 = sadd.s32 (!%p4855_p6), 1, %s6910_s15  ;;  %v6579_v63 = vld [vmem:[%s8280_s1 + $0x108] sm:$0xff] (!%p4855_p6)   ;;  %s7261_s9 = sadd.s32 (!%p4855_p6), 2, %s6910_s15  ;;  %v6582_v16 = vld [vmem:[%s8280_s1 + $0x110] sm:$0xff] (!%p4855_p6)  }
  0xad   : > { %887 = sbr.rel (%p4855_p6) target bundleno = 716 (0x2cc), region = 60  ;;  %v6577_v12 = vld [vmem:[%s8280_s1 + $0x140] sm:$0xff] (!%p4855_p6)   ;;  %5710 = vmatprep.subr.bf16.mxu0 (!%p4855_p6), %v6576_v6  ;;  %s892_s29 = ssub.s32 (!%p4855_p6), 0, %s7244_s24  ;;  %v6580_v0 = vld [vmem:[%s8280_s1 + $0x148] sm:$0xff] (!%p4855_p6)   ;;  %v6583_v60 = vld [vmem:[%s8280_s1 + $0x150] sm:$0xff] (!%p4855_p6)  }
  0xae   : > { %v6578_v15 = vld [vmem:[%s8280_s1 + $0xc0] sm:$0xff] (!%p4855_p6)   ;;  %6178 = vmatprep.subr.bf16.mxu1 (!%p4855_p6), %v6577_v12  ;;  %s4856_s6 = smin.u32 (!%p4855_p6), %s892_s29, %s7244_s24  ;;  %v6581_v9 = vld [vmem:[%s8280_s1 + $0xc8] sm:$0xff] (!%p4855_p6)   ;;  %s2131_s16 = ssub.s32 (!%p4855_p6), 0, %s7261_s9  ;;  %v6584_v7 = vld [vmem:[%s8280_s1 + $0xd0] sm:$0xff] (!%p4855_p6)  }
  0xaf   : > { %5711 = vmatpush3.bf16.msra.mxu0 (!%p4855_p6), %v6578_v15  ;;  %6179 = vmatpush3.bf16.msra.mxu1 (!%p4855_p6), %v6577_v12  ;;  %6882 = sdivrem.u32 (!%p4855_p6), %s4856_s6, 3  ;;  %s5098_s25 = smin.u32 (!%p4855_p6), %s2131_s16, %s7261_s9  ;;  %v6585_v17 = vld [vmem:[%s8280_s1 + $0x118] sm:$0xff] (!%p4855_p6)   ;;  %v6588_v27 = vld [vmem:[%s8280_s1 + $0x120] sm:$0xff] (!%p4855_p6)   ;;  %v6591_v30 = vld [vmem:[%s8280_s1 + $0x128] sm:$0xff] (!%p4855_p6)  }
  0xb0   : > { %5712 = vmatprep.subr.bf16.mxu0 (!%p4855_p6), %v6579_v63  ;;  %6180 = vmatprep.subr.bf16.mxu1 (!%p4855_p6), %v6580_v0  ;;  %6884 = sdivrem.u32 (!%p4855_p6), %s5098_s25, 3  ;;  %v6586_v20 = vld [vmem:[%s8280_s1 + $0x158] sm:$0xff] (!%p4855_p6)   ;;  %p891_p7 = scmp.lt.s32.totalorder (!%p4855_p6), %s7244_s24, 0  ;;  %v6589_v29 = vld [vmem:[%s8280_s1 + $0x160] sm:$0xff] (!%p4855_p6)   ;;  %v6592_v31 = vld [vmem:[%s8280_s1 + $0x168] sm:$0xff] (!%p4855_p6)  }
  0xb1   : > { %v6587_v26 = vld [vmem:[%s8280_s1 + $0xd8] sm:$0xff] (!%p4855_p6)   ;;  %v6590_v24 = vld [vmem:[%s8280_s1 + $0xe0] sm:$0xff] (!%p4855_p6)   ;;  %v6593_v25 = vld [vmem:[%s8280_s1 + $0xe8] sm:$0xff] (!%p4855_p6)   ;;  %p2130_p9 = scmp.lt.s32.totalorder (!%p4855_p6), %s7261_s9, 0  ;;  %s7567_s30 = sadd.s32 (!%p4855_p6), 3, %s6910_s15 }
  0xb2   : > { %v6594_v21 = vld [vmem:[%s8280_s1 + $0x130] sm:$0xff] (!%p4855_p6)   ;;  %v6597_v23 = vld [vmem:[%s8280_s1 + $0x138] sm:$0xff] (!%p4855_p6)   ;;  %v6603_v38 = vld [vmem:[%s8280_s1 + $0x40] sm:$0xff] (!%p4855_p6)   ;;  %s3387_s8 = ssub.s32 (!%p4855_p6), 0, %s7567_s30  ;;  %p3386_p11 = scmp.lt.s32.totalorder (!%p4855_p6), %s7567_s30, 0 }
  0xb3   : > { %5713 = vmatpush3.bf16.msra.mxu0 (!%p4855_p6), %v6581_v9  ;;  %6181 = vmatpush3.bf16.msra.mxu1 (!%p4855_p6), %v6580_v0  ;;  %v6595_v8 = vld [vmem:[%s8280_s1 + $0x170] sm:$0xff] (!%p4855_p6)   ;;  %v6598_v34 = vld [vmem:[%s8280_s1 + $0x178] sm:$0xff] (!%p4855_p6)   ;;  %v6604_v32 = vld [vmem:[%s8280_s1 + $0x80] sm:$0xff] (!%p4855_p6)   ;;  %s5388_s15 = smin.u32 (!%p4855_p6), %s3387_s8, %s7567_s30 }
  0xb4   : > { %5714 = vmatprep.subr.bf16.mxu0 %v6582_v16  ;;  %6182 = vmatprep.subr.bf16.mxu1 %v6583_v60  ;;  %v6596_v22 = vld [vmem:[%s8280_s1 + $0xf0] sm:$0xff]   ;;  %v6599_v37 = vld [vmem:[%s8280_s1 + $0xf8] sm:$0xff]   ;;  %v6606_v39 = vld [vmem:[%s8280_s1] sm:$0xff]   ;;  %6886 = sdivrem.u32 %s5388_s15, 3 }
  0xb5   : > { %v6607_v33 = vld [vmem:[%s8280_s1 + $0x48] sm:$0xff]   ;;  %v6612_v48 = vld [vmem:[%s8280_s1 + $0x50] sm:$0xff]   ;;  %v6615_v2 = vld [vmem:[%s8280_s1 + $0x58] sm:$0xff]  }
  0xb6   : > { %v6608_v41 = vld [vmem:[%s8280_s1 + $0x88] sm:$0xff]   ;;  %v6613_v1 = vld [vmem:[%s8280_s1 + $0x90] sm:$0xff]   ;;  %v6616_v46 = vld [vmem:[%s8280_s1 + $0x98] sm:$0xff]  }
  0xb7   : > { %5715 = vmatpush3.bf16.msra.mxu0 %v6584_v7  ;;  %6183 = vmatpush3.bf16.msra.mxu1 %v6583_v60  ;;  %v6609_v45 = vld [vmem:[%s8280_s1 + $0x8] sm:$0xff]   ;;  %v6614_v49 = vld [vmem:[%s8280_s1 + $0x10] sm:$0xff]   ;;  %v6617_v55 = vld [vmem:[%s8280_s1 + $0x18] sm:$0xff]  }
  0xb8   : > { %5716 = vmatprep.subr.bf16.mxu0 %v6585_v17  ;;  %6184 = vmatprep.subr.bf16.mxu1 %v6586_v20  ;;  %s6883_s14 = spop.drf %6882  ;;  %v6620_v56 = vld [vmem:[%s8280_s1 + $0x60] sm:$0xff]   ;;  %v6623_v53 = vld [vmem:[%s8280_s1 + $0x68] sm:$0xff]   ;;  %v6629_v58 = vld [vmem:[%s8280_s1 + $0x70] sm:$0xff]  }
  0xb9   : > { %s896_s16 = ssub.s32 0, %s6883_s14  ;;  %v6621_v61 = vld [vmem:[%s8280_s1 + $0xa0] sm:$0xff]   ;;  %v6624_v54 = vld [vmem:[%s8280_s1 + $0xa8] sm:$0xff]   ;;  %v6630_v19 = vld [vmem:[%s8280_s1 + $0xb0] sm:$0xff]   ;;  %s6885_s6 = spop.drf %6884 }
  0xba   : > { %s8319_s16 = smov (!%p891_p7, %s896_s16), %s6883_s14  ;;  %v6622_v62 = vld [vmem:[%s8280_s1 + $0x20] sm:$0xff]   ;;  %v6625_v5 = vld [vmem:[%s8280_s1 + $0x28] sm:$0xff]   ;;  %v6632_v11 = vld [vmem:[%s8280_s1 + $0x30] sm:$0xff]   ;;  %s2135_s13 = ssub.s32 0, %s6885_s6 }
  0xbb   : > { %5717 = vmatpush3.bf16.msra.mxu0 %v6587_v26  ;;  %6185 = vmatpush3.bf16.msra.mxu1 %v6586_v20  ;;  %p4858_p8 = scmp.lt.s32.totalorder %s8319_s16, 0  ;;  %s902_s28 = sadd.s32 3, %s8319_s16  ;;  %v6633_v6 = vld [vmem:[%s8280_s1 + $0x78] sm:$0xff]   ;;  %v6639_v60 = vld [vmem:[%s8280_s1 + $0x1c0] sm:$0xff]   ;;  %v6643_v26 = vld [vmem:[%s8280_s1 + $0x1c8] sm:$0xff]  }
  0xbc   : > { %5718 = vmatprep.subr.bf16.mxu0 %v6588_v27  ;;  %6186 = vmatprep.subr.bf16.mxu1 %v6589_v29  ;;  %v6634_v12 = vld [vmem:[%s8280_s1 + $0xb8] sm:$0xff]   ;;  %v6640_v7 = vld [vmem:[%s8280_s1 + $0x200] sm:$0xff]   ;;  %s8323_s13 = smov (!%p2130_p9, %s2135_s13), %s6885_s6 }
  0xbd   : > { %s8321_s28 = smov (!%p4858_p8, %s902_s28), %s8319_s16  ;;  %v6635_v9 = vld [vmem:[%s8280_s1 + $0x38] sm:$0xff]   ;;  %v6642_v20 = vld [vmem:[%s8280_s1 + $0x180] sm:$0xff]   ;;  %p5100_p10 = scmp.lt.s32.totalorder %s8323_s13, 0 }
  0xbe   : > { %s5684_s11 = smul.u32 120, %s8321_s28  ;;  %s2141_s7 = sadd.s32 3, %s8323_s13 }
  0xbf   : > { %5719 = vmatpush3.bf16.msra.mxu0 %v6590_v24  ;;  %6187 = vmatpush3.bf16.msra.mxu1 %v6589_v29  ;;  %v6644_v29 = vld [vmem:[%s8280_s1 + $0x208] sm:$0xff]   ;;  %s8325_s7 = smov (!%p5100_p10, %s2141_s7), %s8323_s13  ;;  %s6887_s9 = spop.drf %6886 }
  0xc0   : > { %5720 = vmatprep.subr.bf16.mxu0 %v6591_v30  ;;  %6188 = vmatprep.subr.bf16.mxu1 %v6592_v31  ;;  %s7320_s24 = scalar_lea.vmem [#allocation2], %s5684_s11  ;;  %v6645_v24 = vld [vmem:[%s8280_s1 + $0x188] sm:$0xff]   ;;  %s5685_s13 = smul.u32 120, %s8325_s7 }
  0xc1   : > { %v7323_v18 = vld [vmem:[%s7320_s24 + $0xc] sm:$0xff]  ;;  %v7326_v35 = vld [vmem:[%s7320_s24 + $0x18] sm:$0xff]  ;;  %v6602_v36 = vld [vmem:[%s7320_s24 + $0x14] ss:$12 sps:$4 sm:$0xff]   ;;  %s3391_s6 = ssub.s32 0, %s6887_s9 }
  0xc2   : > { %v4926_v28 = vcombine.high %v7323_v18, %v7326_v35  ;;  %6194 = vmatprep.mubr.bf16.mxu1 %v6602_v36  ;;  %v6605_v40 = vld [vmem:[%s7320_s24 + $0x2c] ss:$12 sps:$4 sm:$0xff]   ;;  %v7351_v42 = vld [vmem:[%s7320_s24 + $0x24] sm:$0xff]  ;;  %v4925_v43 = vcombine.low %v7323_v18, %v7326_v35  ;;  %v7356_v44 = vld [vmem:[%s7320_s24 + $0x30] sm:$0xff]  ;;  %s7617_s26 = scalar_lea.vmem [#allocation2], %s5685_s13  ;;  %s8327_s6 = smov (!%p3386_p11, %s3391_s6), %s6887_s9 }
  0xc3   : > { %5721 = vmatpush3.bf16.msra.mxu0 %v6593_v25  ;;  %6189 = vmatpush3.bf16.msra.mxu1 %v6592_v31  ;;  %v4929_v47 = vcombine.high %v7351_v42, %v7356_v44  ;;  %v7379_v50 = vld [vmem:[%s7320_s24 + $0x3c] sm:$0xff]  ;;  %v4928_v51 = vcombine.low %v7351_v42, %v7356_v44  ;;  %v7384_v52 = vld [vmem:[%s7320_s24 + $0x48] sm:$0xff]  ;;  %v7407_v4 = vld [vmem:[%s7320_s24 + $0x54] sm:$0xff]  ;;  %v7466_v30 = vcombine.high %v7326_v35, %v7351_v42  ;;  %p5390_p12 = scmp.lt.s32.totalorder %s8327_s6, 0  ;;  %s3397_s25 = sadd.s32 3, %s8327_s6 }
  0xc4   : > { %5722 = vmatprep.subr.bf16.mxu0 %v6594_v21  ;;  %6190 = vmatprep.subr.bf16.mxu1 %v6595_v8  ;;  %v4932_v3 = vcombine.high %v7379_v50, %v7384_v52  ;;  %v6628_v57 = vld [vmem:[%s7320_s24 + $0x44] ss:$12 sps:$4 sm:$0xff]   ;;  %v4931_v10 = vcombine.low %v7379_v50, %v7384_v52  ;;  %v6631_v14 = vld [vmem:[%s7320_s24 + $0x5c] ss:$12 sps:$4 sm:$0xff]   ;;  %v6641_v17 = vld [vmem:[%s7320_s24 + $0x20] ss:$12 sps:$4 sm:$0xff]  }
  0xc5   : > { %1279 = vmatprep.mubr.bf16.mxu0 %v4926_v28  ;;  %v7413_v13 = vld [vmem:[%s7320_s24 + $0x60] sm:$0xff]  ;;  %v6638_v15 = vld [vmem:[%s7320_s24 + $0x8] ss:$12 sps:$4 sm:$0xff]   ;;  %s8329_s25 = smov (!%p5390_p12, %s3397_s25), %s8327_s6 }
  0xc6   : > { %v4935_v59 = vcombine.high %v7407_v4, %v7413_v13  ;;  %v4934_v63 = vcombine.low %v7407_v4, %v7413_v13  ;;  %v907_v0 = vld [vmem:[%s7320_s24] sm:$0xff]  ;;  %v6648_v31 = vld [vmem:[%s8280_s1 + $0x1d0] sm:$0xff]   ;;  %s5686_s30 = smul.u32 120, %s8329_s25 }
  0xc7   : > { %5723 = vmatpush3.bf16.msra.mxu0 %v6596_v22  ;;  %6191 = vmatpush3.bf16.msra.mxu1 %v6595_v8  ;;  %v4962_v16 = vcombine.high %v907_v0, %v7323_v18  ;;  %v4961_v27 = vcombine.low %v907_v0, %v7323_v18  ;;  %v6649_v25 = vld [vmem:[%s8280_s1 + $0x210] sm:$0xff]   ;;  %v6651_v8 = vld [vmem:[%s8280_s1 + $0x1d8] sm:$0xff]   ;;  %v7483_v22 = vcombine.low %v7326_v35, %v7351_v42  ;;  %v6656_v18 = vld [vmem:[%s8280_s1 + $0x1e0] sm:$0xff]  }
  0xc8   : > { %5724 = vmatprep.subr.bf16.mxu0 %v6597_v23  ;;  %6192 = vmatprep.subr.bf16.mxu1 %v6598_v34  ;;  %v6650_v21 = vld [vmem:[%s8280_s1 + $0x190] sm:$0xff]   ;;  %v6652_v23 = vld [vmem:[%s8280_s1 + $0x218] sm:$0xff]   ;;  %v7497_v35 = vcombine.high %v7356_v44, %v7379_v50  ;;  %v6657_v36 = vld [vmem:[%s8280_s1 + $0x220] sm:$0xff]   ;;  %v7527_v42 = vcombine.high %v7384_v52, %v7407_v4 }
  0xc9   : > { %v6664_v28 = vld [vmem:[%s7320_s24 + $0x38] ss:$12 sps:$4 sm:$0xff]   ;;  %v6696_v0 = vld [vmem:[%s8280_s1 + $0x2f0] sm:$0xff]  }
  0xcb   : > { %5725 = vmatpush3.bf16.msra.mxu0 %v6599_v37  ;;  %6193 = vmatpush3.bf16.msra.mxu1 %v6598_v34  ;;  %v6653_v34 = vld [vmem:[%s8280_s1 + $0x198] sm:$0xff]   ;;  %v6658_v37 = vld [vmem:[%s8280_s1 + $0x1a0] sm:$0xff]  }
  0xcc   : > { %5762 = vmatprep.subr.bf16.mxu0 %v6603_v38  ;;  %6202 = vmatprep.subr.bf16.mxu1 %v6604_v32  ;;  %v6659_v38 = vld [vmem:[%s8280_s1 + $0x1e8] sm:$0xff]  }
  0xce   : > { %1280 = vmatmul.mubr.bf16.vlgmr.msra.gmra.mrb[0].mxu0 %v4925_v43  ;;  %6195 = vmatmul.mubr.bf16.vlgmr.msra.gmra.mrb[0].mxu1 %v6605_v40  ;;  %v6660_v40 = vld [vmem:[%s8280_s1 + $0x228] sm:$0xff]  }
  0xcf   : > { %5763 = vmatpush3.bf16.msra.mxu0 %v6606_v39  ;;  %6203 = vmatpush3.bf16.msra.mxu1 %v6604_v32  ;;  %v6667_v32 = vld [vmem:[%s7320_s24 + $0x50] ss:$12 sps:$4 sm:$0xff]   ;;  %v7513_v39 = vcombine.low %v7356_v44, %v7379_v50  ;;  %v6672_v43 = vld [vmem:[%s7320_s24 + $0x20] ss:$12 sps:$4 sm:$0xff]   ;;  %v6675_v50 = vld [vmem:[%s7320_s24 + $0x38] ss:$12 sps:$4 sm:$0xff]  }
  0xd0   : > { %5764 = vmatprep.subr.bf16.mxu0 %v6607_v33  ;;  %6204 = vmatprep.subr.bf16.mxu1 %v6608_v41  ;;  %v6661_v33 = vld [vmem:[%s8280_s1 + $0x1a8] sm:$0xff]   ;;  %v6666_v44 = vld [vmem:[%s8280_s1 + $0x230] sm:$0xff]  }
  0xd1   : > { %1287 = vmatprep.mubr.bf16.mxu0 %v4929_v47  ;;  %6198 = vmatprep.mubr.bf16.mxu1 %v6628_v57  ;;  %v6669_v47 = vld [vmem:[%s8280_s1 + $0x1f8] sm:$0xff]  }
  0xd2   : > { %v6685_v57 = vld [vmem:[%s8280_s1 + $0x258] sm:$0xff]  }
  0xd3   : > { %5765 = vmatpush3.bf16.msra.mxu0 %v6609_v45  ;;  %6205 = vmatpush3.bf16.msra.mxu1 %v6608_v41  ;;  %v6665_v41 = vld [vmem:[%s8280_s1 + $0x1f0] sm:$0xff]  }
  0xd4   : > { %5766 = vmatprep.subr.bf16.mxu0 %v6612_v48  ;;  %6206 = vmatprep.subr.bf16.mxu1 %v6613_v1  ;;  %v6668_v45 = vld [vmem:[%s8280_s1 + $0x1b0] sm:$0xff]   ;;  %v7542_v48 = vcombine.low %v7384_v52, %v7407_v4  ;;  %v6677_v52 = vld [vmem:[%s8280_s1 + $0x288] sm:$0xff]   ;;  %v6684_v4 = vld [vmem:[%s8280_s1 + $0x2d8] sm:$0xff]  }
  0xd6   : > { %1288 = vmatmul.mubr.bf16.gmra.mrb[4].mxu0 %v4928_v51  ;;  %6199 = vmatmul.mubr.bf16.gmra.mrb[4].mxu1 %v6631_v14  ;;  %v6676_v51 = vld [vmem:[%s8280_s1 + $0x240] sm:$0xff]   ;;  %v6689_v14 = vld [vmem:[%s8280_s1 + $0x2a8] sm:$0xff]  }
  0xd7   : > { %5767 = vmatpush3.bf16.msra.mxu0 %v6614_v49  ;;  %6207 = vmatpush3.bf16.msra.mxu1 %v6613_v1  ;;  %v6670_v1 = vld [vmem:[%s8280_s1 + $0x238] sm:$0xff]  }
  0xd8   : > { %5768 = vmatprep.subr.bf16.mxu0 %v6615_v2  ;;  %6208 = vmatprep.subr.bf16.mxu1 %v6616_v46  ;;  %v6671_v49 = vld [vmem:[%s8280_s1 + $0x1b8] sm:$0xff]   ;;  %v6673_v2 = vld [vmem:[%s8280_s1 + $0x280] sm:$0xff]  }
  0xd9   : > { %1295 = vmatprep.mubr.bf16.mxu0 %v4932_v3  ;;  %6218 = vmatprep.mubr.bf16.mxu1 %v6638_v15  ;;  %v6679_v3 = vld [vmem:[%s8280_s1 + $0x248] sm:$0xff]  }
  0xdb   : > { %5769 = vmatpush3.bf16.msra.mxu0 %v6617_v55  ;;  %6209 = vmatpush3.bf16.msra.mxu1 %v6616_v46  ;;  %v6674_v46 = vld [vmem:[%s8280_s1 + $0x2c0] sm:$0xff]   ;;  %v6678_v55 = vld [vmem:[%s8280_s1 + $0x2c8] sm:$0xff]  }
  0xdc   : > { %5770 = vmatprep.subr.bf16.mxu0 %v6620_v56  ;;  %6210 = vmatprep.subr.bf16.mxu1 %v6621_v61  ;;  %v6680_v56 = vld [vmem:[%s8280_s1 + $0x290] sm:$0xff]  }
  0xde   : > { %1296 = vmatmul.mubr.bf16.gmra.mrb[8].mxu0 %v4931_v10  ;;  %v6686_v10 = vld [vmem:[%s8280_s1 + $0x2a0] sm:$0xff]  }
  0xdf   : > { %5771 = vmatpush3.bf16.msra.mxu0 %v6622_v62  ;;  %6211 = vmatpush3.bf16.msra.mxu1 %v6621_v61  ;;  %v6681_v61 = vld [vmem:[%s8280_s1 + $0x2d0] sm:$0xff]  }
  0xe0   : > { %5772 = vmatprep.subr.bf16.mxu0 %v6623_v53  ;;  %6212 = vmatprep.subr.bf16.mxu1 %v6624_v54  ;;  %v6682_v62 = vld [vmem:[%s8280_s1 + $0x250] sm:$0xff]   ;;  %v6683_v53 = vld [vmem:[%s8280_s1 + $0x298] sm:$0xff]  }
  0xe1   : > { %1303 = vmatprep.mubr.bf16.mxu0 %v4935_v59  ;;  %v6688_v59 = vld [vmem:[%s8280_s1 + $0x260] sm:$0xff]  }
  0xe3   : > { %5773 = vmatpush3.bf16.msra.mxu0 %v6625_v5  ;;  %6213 = vmatpush3.bf16.msra.mxu1 %v6624_v54  ;;  %v6694_v54 = vld [vmem:[%s7320_s24 + $0x50] ss:$12 sps:$4 sm:$0xff]   ;;  %v6697_v5 = vld [vmem:[%s7320_s24 + $0x68] ss:$12 sps:$4 sm:$0xff]  }
  0xe4   : > { %5774 = vmatprep.subr.bf16.mxu0 %v6629_v58  ;;  %6214 = vmatprep.subr.bf16.mxu1 %v6630_v19  ;;  %v6687_v58 = vld [vmem:[%s8280_s1 + $0x2e0] sm:$0xff]  }
  0xe6   : > { %1304 = vmatmul.mubr.bf16.gmra.mrb[12].mxu0 %v4934_v63  ;;  %v6695_v63 = vld [vmem:[%s8280_s1 + $0x2b0] sm:$0xff]  }
  0xe7   : > { %5775 = vmatpush3.bf16.msra.mxu0 %v6632_v11  ;;  %6215 = vmatpush3.bf16.msra.mxu1 %v6630_v19  ;;  %v6690_v19 = vld [vmem:[%s8280_s1 + $0x2e8] sm:$0xff]  }
  0xe8   : > { %5776 = vmatprep.subr.bf16.mxu0 %v6633_v6  ;;  %6216 = vmatprep.subr.bf16.mxu1 %v6634_v12  ;;  %v6704_v11 = vld [vmem:[%s7617_s26 + $0x8] ss:$12 sps:$4 sm:$0xff]   ;;  %v5012_v6 = vld [vmem:[%s7320_s24 + $0x6c] sm:$0xff]  ;;  %s7909_s24 = scalar_lea.vmem [#allocation2], %s5686_s30 }
  0xe9   : > { %1617 = vmatprep.mubr.bf16.mxu0 %v4962_v16  ;;  %v5072_v15 = vcombine.high %v7413_v13, %v5012_v6  ;;  %v7634_v16 = vld [vmem:[%s7617_s26 + $0xc] sm:$0xff] }
  0xeb   : > { %5777 = vmatpush3.bf16.msra.mxu0 %v6635_v9  ;;  %6217 = vmatpush3.bf16.msra.mxu1 %v6634_v12  ;;  %v6691_v12 = vld [vmem:[%s8280_s1 + $0x268] sm:$0xff]   ;;  %v2146_v9 = vld [vmem:[%s7617_s26] sm:$0xff] }
  0xec   : > { %5814 = vmatprep.subr.bf16.mxu0 %v6639_v60  ;;  %6226 = vmatprep.subr.bf16.mxu1 %v6640_v7  ;;  %v6698_v60 = vld [vmem:[%s8280_s1 + $0x270] sm:$0xff]  }
  0xee   : > { %1618 = vmatmul.mubr.bf16.vlgmr.msra.gmra.mrb[16].mxu0 %v4961_v27  ;;  %6219 = vmatmul.mubr.bf16.vlgmr.msra.gmra.mrb[0].mxu1 %v6641_v17  ;;  %v5071_v17 = vcombine.low %v7413_v13, %v5012_v6  ;;  %v6701_v27 = vld [vmem:[%s8280_s1 + $0x278] sm:$0xff]   ;;  %v6705_v13 = vld [vmem:[%s8280_s1 + $0x340] sm:$0xff]  }
  0xef   : > { %5815 = vmatpush3.bf16.msra.mxu0 %v6642_v20  ;;  %6227 = vmatpush3.bf16.msra.mxu1 %v6640_v7  ;;  %v6699_v7 = vld [vmem:[%s8280_s1 + $0x2b8] sm:$0xff]  }
  0xf0   : > { %5816 = vmatprep.subr.bf16.mxu0 %v6643_v26  ;;  %6228 = vmatprep.subr.bf16.mxu1 %v6644_v29  ;;  %v6700_v20 = vld [vmem:[%s8280_s1 + $0x2f8] sm:$0xff]   ;;  %v5151_v26 = vcombine.high %v2146_v9, %v7634_v16 }
  0xf1   : > { %1625 = vmatprep.mubr.bf16.mxu0 %v7466_v30  ;;  %6222 = vmatprep.mubr.bf16.mxu1 %v6664_v28  ;;  %v6716_v28 = vld [vmem:[%s8280_s1 + $0x310] sm:$0xff]  }
  0xf3   : > { %5817 = vmatpush3.bf16.msra.mxu0 %v6645_v24  ;;  %6229 = vmatpush3.bf16.msra.mxu1 %v6644_v29  ;;  %v6706_v29 = vld [vmem:[%s8280_s1 + $0x380] sm:$0xff]  }
  0xf4   : > { %5818 = vmatprep.subr.bf16.mxu0 %v6648_v31  ;;  %6230 = vmatprep.subr.bf16.mxu1 %v6649_v25  ;;  %v6708_v24 = vld [vmem:[%s8280_s1 + $0x300] sm:$0xff]   ;;  %v6709_v31 = vld [vmem:[%s8280_s1 + $0x348] sm:$0xff]  }
  0xf6   : > { %1626 = vmatmul.mubr.bf16.gmra.mrb[20].mxu0 %v7483_v22  ;;  %6223 = vmatmul.mubr.bf16.gmra.mrb[4].mxu1 %v6667_v32  ;;  %v7700_v32 = vld [vmem:[%s7617_s26 + $0x3c] sm:$0xff] }
  0xf7   : > { %5819 = vmatpush3.bf16.msra.mxu0 %v6650_v21  ;;  %6231 = vmatpush3.bf16.msra.mxu1 %v6649_v25  ;;  %v6710_v25 = vld [vmem:[%s8280_s1 + $0x388] sm:$0xff]   ;;  %v7667_v21 = vld [vmem:[%s7617_s26 + $0x18] sm:$0xff] }
  0xf8   : > { %5820 = vmatprep.subr.bf16.mxu0 %v6651_v8  ;;  %6232 = vmatprep.subr.bf16.mxu1 %v6652_v23  ;;  %v5150_v8 = vcombine.low %v2146_v9, %v7634_v16  ;;  %v6754_v9 = vld [vmem:[%s8280_s1 + $0x458] sm:$0xff]  }
  0xf9   : > { %1633 = vmatprep.mubr.bf16.mxu0 %v7497_v35  ;;  %6242 = vmatprep.mubr.bf16.mxu1 %v6672_v43  ;;  %v6722_v43 = vld [vmem:[%s8280_s1 + $0x360] sm:$0xff]  }
  0xfb   : > { %5821 = vmatpush3.bf16.msra.mxu0 %v6653_v34  ;;  %6233 = vmatpush3.bf16.msra.mxu1 %v6652_v23  ;;  %v6711_v23 = vld [vmem:[%s8280_s1 + $0x308] sm:$0xff]  }
  0xfc   : > { %5822 = vmatprep.subr.bf16.mxu0 %v6656_v18  ;;  %6234 = vmatprep.subr.bf16.mxu1 %v6657_v36  ;;  %v6714_v18 = vld [vmem:[%s8280_s1 + $0x350] sm:$0xff]  }
  0xfe   : > { %1634 = vmatmul.mubr.bf16.gmra.mrb[24].mxu0 %v7513_v39 }
  0xff   : > { %5823 = vmatpush3.bf16.msra.mxu0 %v6658_v37  ;;  %6235 = vmatpush3.bf16.msra.mxu1 %v6657_v36  ;;  %v6717_v36 = vld [vmem:[%s8280_s1 + $0x358] sm:$0xff]  }
 0x100   : > { %5824 = vmatprep.subr.bf16.mxu0 %v6659_v38  ;;  %6236 = vmatprep.subr.bf16.mxu1 %v6660_v40  ;;  %v6718_v37 = vld [vmem:[%s8280_s1 + $0x398] sm:$0xff]   ;;  %v7697_v38 = vld [vmem:[%s7617_s26 + $0x30] sm:$0xff] }
 0x101   : > { %1641 = vmatprep.mubr.bf16.mxu0 %v7527_v42 }
 0x103   : > { %5825 = vmatpush3.bf16.msra.mxu0 %v6661_v33  ;;  %6237 = vmatpush3.bf16.msra.mxu1 %v6660_v40  ;;  %v6733_v33 = vld [vmem:[%s7617_s26 + $0x50] ss:$12 sps:$4 sm:$0xff]  }
 0x104   : > { %5826 = vmatprep.subr.bf16.mxu0 %v6665_v41  ;;  %6238 = vmatprep.subr.bf16.mxu1 %v6666_v44  ;;  %v6719_v41 = vld [vmem:[%s8280_s1 + $0x318] sm:$0xff]  }
 0x106   : > { %1642 = vmatmul.mubr.bf16.gmra.mrb[28].mxu0 %v7542_v48 }
 0x107   : > { %5827 = vmatpush3.bf16.msra.mxu0 %v6668_v45  ;;  %6239 = vmatpush3.bf16.msra.mxu1 %v6666_v44  ;;  %v6723_v44 = vld [vmem:[%s8280_s1 + $0x3a0] sm:$0xff]  }
 0x108   : > { %5828 = vmatprep.subr.bf16.mxu0 %v6669_v47  ;;  %6240 = vmatprep.subr.bf16.mxu1 %v6670_v1  ;;  %v6724_v45 = vld [vmem:[%s8280_s1 + $0x320] sm:$0xff]   ;;  %v6725_v47 = vld [vmem:[%s8280_s1 + $0x368] sm:$0xff]  }
 0x109   : > { %2023 = vmatprep.mubr.bf16.mxu0 %v7466_v30  ;;  %v6707_v30 = vld [vmem:[%s7617_s26 + $0x20] ss:$12 sps:$4 sm:$0xff]  }
 0x10b   : > { %5829 = vmatpush3.bf16.msra.mxu0 %v6671_v49  ;;  %6241 = vmatpush3.bf16.msra.mxu1 %v6670_v1  ;;  %v7733_v1 = vld [vmem:[%s7617_s26 + $0x48] sm:$0xff]  ;;  %v6740_v49 = vld [vmem:[%s7617_s26 + $0x14] ss:$12 sps:$4 sm:$0xff]  }
 0x10c   : > { %5866 = vmatprep.subr.bf16.mxu0 %v6673_v2  ;;  %6250 = vmatprep.subr.bf16.mxu1 %v6674_v46  ;;  %v7738_v2 = vcombine.low %v7697_v38, %v7700_v32 }
 0x10e   : > { %2024 = vmatmul.mubr.bf16.vlgmr.msra.gmra.mrb[32].mxu0 %v7483_v22  ;;  %6243 = vmatmul.mubr.bf16.vlgmr.msra.gmra.mrb[0].mxu1 %v6675_v50  ;;  %v7671_v22 = vld [vmem:[%s7617_s26 + $0x24] sm:$0xff] }
 0x10f   : > { %5867 = vmatpush3.bf16.msra.mxu0 %v6676_v51  ;;  %6251 = vmatpush3.bf16.msra.mxu1 %v6674_v46  ;;  %v7678_v34 = vcombine.high %v7667_v21, %v7671_v22  ;;  %v7705_v40 = vcombine.low %v7667_v21, %v7671_v22  ;;  %v7741_v46 = vld [vmem:[%s7617_s26 + $0x54] sm:$0xff]  ;;  %v6727_v50 = vld [vmem:[%s8280_s1 + $0x328] sm:$0xff]   ;;  %v5255_v6 = vcombine.high %v7671_v22, %v7697_v38 }
 0x110   : > { %5868 = vmatprep.subr.bf16.mxu0 %v6677_v52  ;;  %6252 = vmatprep.subr.bf16.mxu1 %v6678_v55  ;;  %v7749_v51 = vcombine.high %v7733_v1, %v7741_v46  ;;  %v6731_v52 = vld [vmem:[%s8280_s1 + $0x370] sm:$0xff]  }
 0x111   : > { %2031 = vmatprep.mubr.bf16.mxu0 %v7497_v35  ;;  %6246 = vmatprep.mubr.bf16.mxu1 %v6694_v54  ;;  %v6715_v35 = vld [vmem:[%s8280_s1 + $0x390] sm:$0xff]   ;;  %v5252_v54 = vcombine.high %v7634_v16, %v7667_v21 }
 0x113   : > { %5869 = vmatpush3.bf16.msra.mxu0 %v6679_v3  ;;  %6253 = vmatpush3.bf16.msra.mxu1 %v6678_v55  ;;  %v6732_v55 = vld [vmem:[%s8280_s1 + $0x3b0] sm:$0xff]  }
 0x114   : > { %5870 = vmatprep.subr.bf16.mxu0 %v6680_v56  ;;  %6254 = vmatprep.subr.bf16.mxu1 %v6681_v61  ;;  %v6734_v3 = vld [vmem:[%s8280_s1 + $0x330] sm:$0xff]   ;;  %v6735_v56 = vld [vmem:[%s8280_s1 + $0x378] sm:$0xff]  }
 0x116   : > { %2032 = vmatmul.mubr.bf16.gmra.mrb[36].mxu0 %v7513_v39  ;;  %6247 = vmatmul.mubr.bf16.gmra.mrb[4].mxu1 %v6697_v5  ;;  %v6730_v39 = vld [vmem:[%s7617_s26 + $0x38] ss:$12 sps:$4 sm:$0xff]  }
 0x117   : > { %5871 = vmatpush3.bf16.msra.mxu0 %v6682_v62  ;;  %6255 = vmatpush3.bf16.msra.mxu1 %v6681_v61  ;;  %v7766_v61 = vcombine.low %v7733_v1, %v7741_v46  ;;  %v6736_v62 = vld [vmem:[%s8280_s1 + $0x3b8] sm:$0xff]   ;;  %v6744_v5 = vld [vmem:[%s8280_s1 + $0x3c0] sm:$0xff]  }
 0x118   : > { %5872 = vmatprep.subr.bf16.mxu0 %v6683_v53  ;;  %6256 = vmatprep.subr.bf16.mxu1 %v6684_v4  ;;  %v6737_v53 = vld [vmem:[%s8280_s1 + $0x338] sm:$0xff]  }
 0x119   : > { %2039 = vmatprep.mubr.bf16.mxu0 %v7527_v42  ;;  %6266 = vmatprep.mubr.bf16.mxu1 %v6704_v11  ;;  %v7714_v42 = vcombine.high %v7697_v38, %v7700_v32  ;;  %v6750_v11 = vld [vmem:[%s8280_s1 + $0x410] sm:$0xff]  }
 0x11b   : > { %5873 = vmatpush3.bf16.msra.mxu0 %v6685_v57  ;;  %6257 = vmatpush3.bf16.msra.mxu1 %v6684_v4  ;;  %v6741_v4 = vld [vmem:[%s8280_s1 + $0x400] sm:$0xff]  }
 0x11c   : > { %5874 = vmatprep.subr.bf16.mxu0 %v6686_v10  ;;  %6258 = vmatprep.subr.bf16.mxu1 %v6687_v58  ;;  %v6742_v57 = vld [vmem:[%s8280_s1 + $0x440] sm:$0xff]   ;;  %v6743_v10 = vld [vmem:[%s7617_s26 + $0x2c] ss:$12 sps:$4 sm:$0xff]  }
 0x11e   : > { %2040 = vmatmul.mubr.bf16.gmra.mrb[40].mxu0 %v7542_v48  ;;  %v6726_v48 = vld [vmem:[%s8280_s1 + $0x3a8] sm:$0xff]  }
 0x11f   : > { %5875 = vmatpush3.bf16.msra.mxu0 %v6688_v59  ;;  %6259 = vmatpush3.bf16.msra.mxu1 %v6687_v58  ;;  %v6745_v58 = vld [vmem:[%s8280_s1 + $0x408] sm:$0xff]   ;;  %v5251_v59 = vcombine.low %v7634_v16, %v7667_v21  ;;  %v5254_v16 = vcombine.low %v7671_v22, %v7697_v38  ;;  %v6768_v22 = vld [vmem:[%s8280_s1 + $0x470] sm:$0xff]   ;;  %v6776_v38 = vld [vmem:[%s8280_s1 + $0x500] sm:$0xff]  }
 0x120   : > { %5876 = vmatprep.subr.bf16.mxu0 %v6689_v14  ;;  %6260 = vmatprep.subr.bf16.mxu1 %v6690_v19  ;;  %v6746_v14 = vld [vmem:[%s8280_s1 + $0x448] sm:$0xff]  }
 0x121   : > { %2047 = vmatprep.mubr.bf16.mxu0 %v5072_v15  ;;  %v6751_v15 = vld [vmem:[%s8280_s1 + $0x450] sm:$0xff]  }
 0x123   : > { %5877 = vmatpush3.bf16.msra.mxu0 %v6691_v12  ;;  %6261 = vmatpush3.bf16.msra.mxu1 %v6690_v19  ;;  %v6747_v19 = vld [vmem:[%s8280_s1 + $0x3c8] sm:$0xff]   ;;  %v6766_v12 = vld [vmem:[%s7617_s26 + $0x44] ss:$12 sps:$4 sm:$0xff]  }
 0x124   : > { %5878 = vmatprep.subr.bf16.mxu0 %v6695_v63  ;;  %6262 = vmatprep.subr.bf16.mxu1 %v6696_v0  ;;  %v6752_v63 = vld [vmem:[%s8280_s1 + $0x3d0] sm:$0xff]  }
 0x126   : > { %2048 = vmatmul.mubr.bf16.gmra.mrb[44].mxu0 %v5071_v17  ;;  %v6758_v17 = vld [vmem:[%s8280_s1 + $0x420] sm:$0xff]  }
 0x127   : > { %5879 = vmatpush3.bf16.msra.mxu0 %v6698_v60  ;;  %6263 = vmatpush3.bf16.msra.mxu1 %v6696_v0  ;;  %v6753_v0 = vld [vmem:[%s8280_s1 + $0x418] sm:$0xff]  }
 0x128   : > { %5880 = vmatprep.subr.bf16.mxu0 %v6699_v7  ;;  %6264 = vmatprep.subr.bf16.mxu1 %v6700_v20  ;;  %v6769_v60 = vld [vmem:[%s7617_s26 + $0x5c] ss:$12 sps:$4 sm:$0xff]  }
 0x129   : > { %2451 = vmatprep.mubr.bf16.mxu0 %v5151_v26  ;;  %v6755_v7 = vld [vmem:[%s8280_s1 + $0x3d8] sm:$0xff]   ;;  %v6774_v26 = vld [vmem:[%s7617_s26 + $0x20] ss:$12 sps:$4 sm:$0xff]  }
 0x12b   : > { %5881 = vmatpush3.bf16.msra.mxu0 %v6701_v27  ;;  %6265 = vmatpush3.bf16.msra.mxu1 %v6700_v20  ;;  %v5258_v20 = vcombine.high %v7700_v32, %v7733_v1  ;;  %v6759_v27 = vld [vmem:[%s8280_s1 + $0x460] sm:$0xff]  }
 0x12c   : > { %5918 = vmatprep.subr.bf16.mxu0 %v6705_v13  ;;  %6274 = vmatprep.subr.bf16.mxu1 %v6706_v29  ;;  %v6760_v13 = vld [vmem:[%s8280_s1 + $0x3e0] sm:$0xff]  }
 0x12e   : > { %2452 = vmatmul.mubr.bf16.vlgmr.msra.gmra.mrb[48].mxu0 %v5150_v8  ;;  %6267 = vmatmul.mubr.bf16.vlgmr.msra.gmra.mrb[0].mxu1 %v6707_v30  ;;  %v5257_v30 = vcombine.low %v7700_v32, %v7733_v1  ;;  %v6767_v8 = vld [vmem:[%s8280_s1 + $0x430] sm:$0xff]   ;;  %v6777_v32 = vld [vmem:[%s7617_s26 + $0x38] ss:$12 sps:$4 sm:$0xff]  }
 0x12f   : > { %5919 = vmatpush3.bf16.msra.mxu0 %v6708_v24  ;;  %6275 = vmatpush3.bf16.msra.mxu1 %v6706_v29  ;;  %v6761_v29 = vld [vmem:[%s8280_s1 + $0x428] sm:$0xff]  }
 0x130   : > { %5920 = vmatprep.subr.bf16.mxu0 %v6709_v31  ;;  %6276 = vmatprep.subr.bf16.mxu1 %v6710_v25  ;;  %v6762_v24 = vld [vmem:[%s8280_s1 + $0x468] sm:$0xff]   ;;  %v7844_v31 = vld [vmem:[%s7617_s26 + $0x60] sm:$0xff] }
 0x131   : > { %2459 = vmatprep.mubr.bf16.mxu0 %v7678_v34  ;;  %6270 = vmatprep.mubr.bf16.mxu1 %v6730_v39  ;;  %v5261_v21 = vcombine.high %v7741_v46, %v7844_v31  ;;  %v6778_v39 = vld [vmem:[%s8280_s1 + $0x480] sm:$0xff]   ;;  %v6806_v1 = vld [vmem:[%s7909_s24 + $0x8] ss:$12 sps:$4 sm:$0xff]  }
 0x133   : > { %5921 = vmatpush3.bf16.msra.mxu0 %v6711_v23  ;;  %6277 = vmatpush3.bf16.msra.mxu1 %v6710_v25  ;;  %v6763_v25 = vld [vmem:[%s8280_s1 + $0x3e8] sm:$0xff]   ;;  %v6770_v23 = vld [vmem:[%s8280_s1 + $0x3f0] sm:$0xff]  }
 0x134   : > { %5922 = vmatprep.subr.bf16.mxu0 %v6714_v18  ;;  %6278 = vmatprep.subr.bf16.mxu1 %v6715_v35  ;;  %v6771_v18 = vld [vmem:[%s8280_s1 + $0x438] sm:$0xff]  }
 0x136   : > { %2460 = vmatmul.mubr.bf16.gmra.mrb[52].mxu0 %v7705_v40  ;;  %6271 = vmatmul.mubr.bf16.gmra.mrb[4].mxu1 %v6733_v33  ;;  %v6779_v33 = vld [vmem:[%s8280_s1 + $0x4c8] sm:$0xff]  }
 0x137   : > { %5923 = vmatpush3.bf16.msra.mxu0 %v6716_v28  ;;  %6279 = vmatpush3.bf16.msra.mxu1 %v6715_v35  ;;  %v5260_v35 = vcombine.low %v7741_v46, %v7844_v31  ;;  %v6772_v28 = vld [vmem:[%s8280_s1 + $0x478] sm:$0xff]   ;;  %v6788_v46 = vld [vmem:[%s8280_s1 + $0x4e0] sm:$0xff]  }
 0x138   : > { %5924 = vmatprep.subr.bf16.mxu0 %v6717_v36  ;;  %6280 = vmatprep.subr.bf16.mxu1 %v6718_v37  ;;  %v6773_v36 = vld [vmem:[%s8280_s1 + $0x3f8] sm:$0xff]  }
 0x139   : > { %2467 = vmatprep.mubr.bf16.mxu0 %v7714_v42  ;;  %6290 = vmatprep.mubr.bf16.mxu1 %v6740_v49  ;;  %v6787_v49 = vld [vmem:[%s8280_s1 + $0x498] sm:$0xff]  }
 0x13b   : > { %5925 = vmatpush3.bf16.msra.mxu0 %v6719_v41  ;;  %6281 = vmatpush3.bf16.msra.mxu1 %v6718_v37  ;;  %v6775_v37 = vld [vmem:[%s8280_s1 + $0x4c0] sm:$0xff]   ;;  %v6780_v41 = vld [vmem:[%s8280_s1 + $0x508] sm:$0xff]  }
 0x13c   : > { %5926 = vmatprep.subr.bf16.mxu0 %v6722_v43  ;;  %6282 = vmatprep.subr.bf16.mxu1 %v6723_v44  ;;  %v6782_v43 = vld [vmem:[%s8280_s1 + $0x4d0] sm:$0xff]  }
 0x13e   : > { %2468 = vmatmul.mubr.bf16.gmra.mrb[56].mxu0 %v7738_v2 }
 0x13f   : > { %5927 = vmatpush3.bf16.msra.mxu0 %v6724_v45  ;;  %6283 = vmatpush3.bf16.msra.mxu1 %v6723_v44  ;;  %v6796_v44 = vld [vmem:[%s7617_s26 + $0x50] ss:$12 sps:$4 sm:$0xff]  }
 0x140   : > { %5928 = vmatprep.subr.bf16.mxu0 %v6725_v47  ;;  %6284 = vmatprep.subr.bf16.mxu1 %v6726_v48  ;;  %v6783_v45 = vld [vmem:[%s8280_s1 + $0x510] sm:$0xff]   ;;  %v6785_v47 = vld [vmem:[%s8280_s1 + $0x4d8] sm:$0xff]  }
 0x141   : > { %2475 = vmatprep.mubr.bf16.mxu0 %v7749_v51 }
 0x143   : > { %5929 = vmatpush3.bf16.msra.mxu0 %v6727_v50  ;;  %6285 = vmatpush3.bf16.msra.mxu1 %v6726_v48  ;;  %v6786_v48 = vld [vmem:[%s8280_s1 + $0x518] sm:$0xff]   ;;  %v6789_v50 = vld [vmem:[%s8280_s1 + $0x520] sm:$0xff]  }
 0x144   : > { %5930 = vmatprep.subr.bf16.mxu0 %v6731_v52  ;;  %6286 = vmatprep.subr.bf16.mxu1 %v6732_v55  ;;  %v6791_v52 = vld [vmem:[%s8280_s1 + $0x4e8] sm:$0xff]  }
 0x146   : > { %2476 = vmatmul.mubr.bf16.gmra.mrb[60].mxu0 %v7766_v61 }
 0x147   : > { %5931 = vmatpush3.bf16.msra.mxu0 %v6734_v3  ;;  %6287 = vmatpush3.bf16.msra.mxu1 %v6732_v55  ;;  %v6792_v55 = vld [vmem:[%s8280_s1 + $0x528] sm:$0xff]  }
 0x148   : > { %5932 = vmatprep.subr.bf16.mxu0 %v6735_v56  ;;  %6288 = vmatprep.subr.bf16.mxu1 %v6736_v62  ;;  %v6793_v3 = vld [vmem:[%s8280_s1 + $0x4a8] sm:$0xff]  }
 0x149   : > { %2865 = vmatprep.mubr.bf16.mxu0 %v5252_v54  ;;  %v3402_v54 = vld [vmem:[%s7909_s24] sm:$0xff] }
 0x14b   : > { %5933 = vmatpush3.bf16.msra.mxu0 %v6737_v53  ;;  %6289 = vmatpush3.bf16.msra.mxu1 %v6736_v62  ;;  %v6797_v62 = vld [vmem:[%s8280_s1 + $0x4f0] sm:$0xff]  }
 0x14c   : > { %5970 = vmatprep.subr.bf16.mxu0 %v6741_v4  ;;  %6298 = vmatprep.subr.bf16.mxu1 %v6742_v57  ;;  %v6798_v53 = vld [vmem:[%s8280_s1 + $0x530] sm:$0xff]  }
 0x14d   : > { %v7953_v4 = vld [vmem:[%s7909_s24 + $0xc] sm:$0xff] }
 0x14e   : > { %2866 = vmatmul.mubr.bf16.vlgmr.msra.gmra.mrb[64].mxu0 %v5251_v59  ;;  %6291 = vmatmul.mubr.bf16.vlgmr.msra.gmra.mrb[0].mxu1 %v6743_v10  ;;  %v6803_v59 = vld [vmem:[%s8280_s1 + $0x4b8] sm:$0xff]  }
 0x14f   : > { %5971 = vmatpush3.bf16.msra.mxu0 %v6744_v5  ;;  %6299 = vmatpush3.bf16.msra.mxu1 %v6742_v57  ;;  %v6801_v57 = vld [vmem:[%s8280_s1 + $0x4f8] sm:$0xff]  }
 0x150   : > { %5972 = vmatprep.subr.bf16.mxu0 %v6745_v58  ;;  %6300 = vmatprep.subr.bf16.mxu1 %v6746_v14  ;;  %v6802_v5 = vld [vmem:[%s8280_s1 + $0x538] sm:$0xff]   ;;  %v5441_v58 = vcombine.high %v3402_v54, %v7953_v4 }
 0x151   : > { %2873 = vmatprep.mubr.bf16.mxu0 %v5255_v6  ;;  %6294 = vmatprep.mubr.bf16.mxu1 %v6766_v12  ;;  %v6809_v6 = vld [vmem:[%s7909_s24 + $0x20] ss:$12 sps:$4 sm:$0xff]  }
 0x152   : > { %v6811_v12 = vld [vmem:[%s8280_s1 + $0x588] sm:$0xff]  }
 0x153   : > { %5973 = vmatpush3.bf16.msra.mxu0 %v6747_v19  ;;  %6301 = vmatpush3.bf16.msra.mxu1 %v6746_v14  ;;  %v6807_v14 = vld [vmem:[%s8280_s1 + $0x580] sm:$0xff]  }
 0x154   : > { %5974 = vmatprep.subr.bf16.mxu0 %v6750_v11  ;;  %6302 = vmatprep.subr.bf16.mxu1 %v6751_v15  ;;  %v6808_v19 = vld [vmem:[%s8280_s1 + $0x5c0] sm:$0xff]  }
 0x155   : > { %v6810_v11 = vld [vmem:[%s8280_s1 + $0x540] sm:$0xff]  }
 0x156   : > { %2874 = vmatmul.mubr.bf16.gmra.mrb[68].mxu0 %v5254_v16  ;;  %6295 = vmatmul.mubr.bf16.gmra.mrb[4].mxu1 %v6769_v60  ;;  %v6813_v16 = vld [vmem:[%s8280_s1 + $0x548] sm:$0xff]   ;;  %v6816_v60 = vld [vmem:[%s8280_s1 + $0x590] sm:$0xff]  }
 0x157   : > { %5975 = vmatpush3.bf16.msra.mxu0 %v6752_v63  ;;  %6303 = vmatpush3.bf16.msra.mxu1 %v6751_v15  ;;  %v6812_v15 = vld [vmem:[%s8280_s1 + $0x5c8] sm:$0xff]   ;;  %v7983_v63 = vld [vmem:[%s7909_s24 + $0x18] sm:$0xff] }
 0x158   : > { %5976 = vmatprep.subr.bf16.mxu0 %v6753_v0  ;;  %6304 = vmatprep.subr.bf16.mxu1 %v6754_v9  ;;  %v5440_v0 = vcombine.low %v3402_v54, %v7953_v4 }
 0x159   : > { %2881 = vmatprep.mubr.bf16.mxu0 %v5258_v20  ;;  %6314 = vmatprep.mubr.bf16.mxu1 %v6774_v26  ;;  %v6817_v20 = vld [vmem:[%s8280_s1 + $0x5d0] sm:$0xff]  }
 0x15a   : > { %v6818_v26 = vld [vmem:[%s8280_s1 + $0x550] sm:$0xff]  }
 0x15b   : > { %5977 = vmatpush3.bf16.msra.mxu0 %v6755_v7  ;;  %6305 = vmatpush3.bf16.msra.mxu1 %v6754_v9  ;;  %v7987_v9 = vld [vmem:[%s7909_s24 + $0x24] sm:$0xff] }
 0x15c   : > { %5978 = vmatprep.subr.bf16.mxu0 %v6758_v17  ;;  %6306 = vmatprep.subr.bf16.mxu1 %v6759_v27  ;;  %v7997_v7 = vcombine.high %v7983_v63, %v7987_v9  ;;  %v6832_v17 = vld [vmem:[%s7909_s24 + $0x38] ss:$12 sps:$4 sm:$0xff]  }
 0x15e   : > { %2882 = vmatmul.mubr.bf16.gmra.mrb[72].mxu0 %v5257_v30  ;;  %v8021_v30 = vcombine.low %v7983_v63, %v7987_v9 }
 0x15f   : > { %5979 = vmatpush3.bf16.msra.mxu0 %v6760_v13  ;;  %6307 = vmatpush3.bf16.msra.mxu1 %v6759_v27  ;;  %v6819_v27 = vld [vmem:[%s8280_s1 + $0x598] sm:$0xff]  }
 0x160   : > { %5980 = vmatprep.subr.bf16.mxu0 %v6761_v29  ;;  %6308 = vmatprep.subr.bf16.mxu1 %v6762_v24  ;;  %v6820_v13 = vld [vmem:[%s8280_s1 + $0x5d8] sm:$0xff]   ;;  %v8014_v29 = vld [vmem:[%s7909_s24 + $0x30] sm:$0xff] }
 0x161   : > { %2889 = vmatprep.mubr.bf16.mxu0 %v5261_v21  ;;  %v6824_v21 = vld [vmem:[%s8280_s1 + $0x5a0] sm:$0xff]  }
 0x163   : > { %5981 = vmatpush3.bf16.msra.mxu0 %v6763_v25  ;;  %6309 = vmatpush3.bf16.msra.mxu1 %v6762_v24  ;;  %v8017_v24 = vld [vmem:[%s7909_s24 + $0x3c] sm:$0xff] }
 0x164   : > { %5982 = vmatprep.subr.bf16.mxu0 %v6767_v8  ;;  %6310 = vmatprep.subr.bf16.mxu1 %v6768_v22  ;;  %v6821_v25 = vld [vmem:[%s8280_s1 + $0x558] sm:$0xff]   ;;  %v8033_v8 = vcombine.high %v8014_v29, %v8017_v24 }
 0x166   : > { %2890 = vmatmul.mubr.bf16.gmra.mrb[76].mxu0 %v5260_v35  ;;  %v6827_v35 = vld [vmem:[%s8280_s1 + $0x5a8] sm:$0xff]  }
 0x167   : > { %5983 = vmatpush3.bf16.msra.mxu0 %v6770_v23  ;;  %6311 = vmatpush3.bf16.msra.mxu1 %v6768_v22  ;;  %v6842_v22 = vld [vmem:[%s7909_s24 + $0x14] ss:$12 sps:$4 sm:$0xff]  }
 0x168   : > { %5984 = vmatprep.subr.bf16.mxu0 %v6771_v18  ;;  %6312 = vmatprep.subr.bf16.mxu1 %v6772_v28  ;;  %v6825_v23 = vld [vmem:[%s8280_s1 + $0x5e0] sm:$0xff]  }
 0x169   : > { %3279 = vmatprep.mubr.bf16.mxu0 %v7678_v34  ;;  %v6781_v34 = vld [vmem:[%s8280_s1 + $0x488] sm:$0xff]   ;;  %v6826_v18 = vld [vmem:[%s8280_s1 + $0x560] sm:$0xff]  }
 0x16b   : > { %5985 = vmatpush3.bf16.msra.mxu0 %v6773_v36  ;;  %6313 = vmatpush3.bf16.msra.mxu1 %v6772_v28  ;;  %v6828_v28 = vld [vmem:[%s8280_s1 + $0x5e8] sm:$0xff]  }
 0x16c   : > { %6022 = vmatprep.subr.bf16.mxu0 %v6775_v37  ;;  %6322 = vmatprep.subr.bf16.mxu1 %v6776_v38  ;;  %v8050_v36 = vld [vmem:[%s7909_s24 + $0x48] sm:$0xff]  ;;  %v8054_v37 = vcombine.low %v8014_v29, %v8017_v24 }
 0x16e   : > { %3280 = vmatmul.mubr.bf16.vlgmr.msra.gmra.mrb[80].mxu0 %v7705_v40  ;;  %6315 = vmatmul.mubr.bf16.vlgmr.msra.gmra.mrb[0].mxu1 %v6777_v32  ;;  %v6784_v40 = vld [vmem:[%s8280_s1 + $0x490] sm:$0xff]   ;;  %v6829_v32 = vld [vmem:[%s8280_s1 + $0x568] sm:$0xff]  }
 0x16f   : > { %6023 = vmatpush3.bf16.msra.mxu0 %v6778_v39  ;;  %6323 = vmatpush3.bf16.msra.mxu1 %v6776_v38  ;;  %v8057_v38 = vld [vmem:[%s7909_s24 + $0x54] sm:$0xff] }
 0x170   : > { %6024 = vmatprep.subr.bf16.mxu0 %v6779_v33  ;;  %6324 = vmatprep.subr.bf16.mxu1 %v6780_v41  ;;  %v8065_v39 = vcombine.high %v8050_v36, %v8057_v38  ;;  %v6833_v33 = vld [vmem:[%s8280_s1 + $0x5b0] sm:$0xff]  }
 0x171   : > { %3287 = vmatprep.mubr.bf16.mxu0 %v7714_v42  ;;  %6318 = vmatprep.mubr.bf16.mxu1 %v6796_v44  ;;  %v6799_v42 = vld [vmem:[%s7617_s26 + $0x68] ss:$12 sps:$4 sm:$0xff]  }
 0x172   : > { %v6836_v44 = vld [vmem:[%s8280_s1 + $0x570] sm:$0xff]  }
 0x173   : > { %6025 = vmatpush3.bf16.msra.mxu0 %v6781_v34  ;;  %6325 = vmatpush3.bf16.msra.mxu1 %v6780_v41  ;;  %v6834_v41 = vld [vmem:[%s8280_s1 + $0x5f0] sm:$0xff]  }
 0x174   : > { %6026 = vmatprep.subr.bf16.mxu0 %v6782_v43  ;;  %6326 = vmatprep.subr.bf16.mxu1 %v6783_v45 }
 0x176   : > { %3288 = vmatmul.mubr.bf16.gmra.mrb[84].mxu0 %v7738_v2  ;;  %6319 = vmatmul.mubr.bf16.gmra.mrb[4].mxu1 %v6799_v42  ;;  %v6790_v2 = vld [vmem:[%s8280_s1 + $0x4a0] sm:$0xff]   ;;  %v8084_v42 = vcombine.low %v8050_v36, %v8057_v38 }
 0x177   : > { %6027 = vmatpush3.bf16.msra.mxu0 %v6784_v40  ;;  %6327 = vmatpush3.bf16.msra.mxu1 %v6783_v45 }
 0x178   : > { %6028 = vmatprep.subr.bf16.mxu0 %v6785_v47  ;;  %6328 = vmatprep.subr.bf16.mxu1 %v6786_v48  ;;  %v6837_v47 = vld [vmem:[%s8280_s1 + $0x5b8] sm:$0xff]  }
 0x179   : > { %3295 = vmatprep.mubr.bf16.mxu0 %v7749_v51  ;;  %6338 = vmatprep.mubr.bf16.mxu1 %v6806_v1  ;;  %v5302_v51 = vld [vmem:[%s7617_s26 + $0x6c] sm:$0xff]  ;;  %v6838_v1 = vld [vmem:[%s8280_s1 + $0x5f8] sm:$0xff]  }
 0x17a   : > { %v5362_v56 = vcombine.high %v7844_v31, %v5302_v51  ;;  %v5361_v10 = vcombine.low %v7844_v31, %v5302_v51  ;;  %v6835_v31 = vld [vmem:[%s7909_s24 + $0x50] ss:$12 sps:$4 sm:$0xff]   ;;  %v6843_v51 = vld [vmem:[%s8280_s1 + $0x640] sm:$0xff]  }
 0x17b   : > { %6029 = vmatpush3.bf16.msra.mxu0 %v6787_v49  ;;  %6329 = vmatpush3.bf16.msra.mxu1 %v6786_v48  ;;  %v8090_v49 = vld [vmem:[%s7909_s24 + $0x60] sm:$0xff] }
 0x17c   : > { %6030 = vmatprep.subr.bf16.mxu0 %v6788_v46  ;;  %6330 = vmatprep.subr.bf16.mxu1 %v6789_v50 }
 0x17e   : > { %3296 = vmatmul.mubr.bf16.gmra.mrb[88].mxu0 %v7766_v61  ;;  %v6800_v61 = vld [vmem:[%s8280_s1 + $0x4b0] sm:$0xff]  }
 0x17f   : > { %6031 = vmatpush3.bf16.msra.mxu0 %v6790_v2  ;;  %6331 = vmatpush3.bf16.msra.mxu1 %v6789_v50  ;;  %v5551_v50 = vcombine.high %v8057_v38, %v8090_v49  ;;  %v5550_v2 = vcombine.low %v8057_v38, %v8090_v49 }
 0x180   : > { %6032 = vmatprep.subr.bf16.mxu0 %v6791_v52  ;;  %6332 = vmatprep.subr.bf16.mxu1 %v6792_v55  ;;  %v6839_v52 = vld [vmem:[%s8280_s1 + $0x578] sm:$0xff]  }
 0x181   : > { %3303 = vmatprep.mubr.bf16.mxu0 %v5362_v56 }
 0x183   : > { %6033 = vmatpush3.bf16.msra.mxu0 %v6793_v3  ;;  %6333 = vmatpush3.bf16.msra.mxu1 %v6792_v55  ;;  %v5542_v55 = vcombine.high %v7953_v4, %v7983_v63  ;;  %v6844_v3 = vld [vmem:[%s8280_s1 + $0x680] sm:$0xff]  }
 0x184   : > { %6034 = vmatprep.subr.bf16.mxu0 %v6797_v62  ;;  %6334 = vmatprep.subr.bf16.mxu1 %v6798_v53 }
 0x186   : > { %3304 = vmatmul.mubr.bf16.gmra.mrb[92].mxu0 %v5361_v10  ;;  %v6847_v10 = vld [vmem:[%s8280_s1 + $0x648] sm:$0xff]  }
 0x187   : > { %6035 = vmatpush3.bf16.msra.mxu0 %v6800_v61  ;;  %6335 = vmatpush3.bf16.msra.mxu1 %v6798_v53  ;;  %v6845_v53 = vld [vmem:[%s7909_s24 + $0x2c] ss:$12 sps:$4 sm:$0xff]   ;;  %v6846_v61 = vld [vmem:[%s8280_s1 + $0x600] sm:$0xff]  }
 0x188   : > { %6036 = vmatprep.subr.bf16.mxu0 %v6801_v57  ;;  %6336 = vmatprep.subr.bf16.mxu1 %v6802_v5 }
 0x189   : > { %3707 = vmatprep.mubr.bf16.mxu0 %v5441_v58  ;;  %v5541_v58 = vcombine.low %v7953_v4, %v7983_v63  ;;  %v6867_v4 = vld [vmem:[%s7909_s24 + $0x44] ss:$12 sps:$4 sm:$0xff]  }
 0x18b   : > { %6037 = vmatpush3.bf16.msra.mxu0 %v6803_v59  ;;  %6337 = vmatpush3.bf16.msra.mxu1 %v6802_v5  ;;  %v6848_v59 = vld [vmem:[%s8280_s1 + $0x688] sm:$0xff]  }
 0x18c   : > { %6074 = vmatprep.subr.bf16.mxu0 %v6807_v14  ;;  %6346 = vmatprep.subr.bf16.mxu1 %v6808_v19 }
 0x18e   : > { %3708 = vmatmul.mubr.bf16.vlgmr.msra.gmra.mrb[96].mxu0 %v5440_v0  ;;  %6339 = vmatmul.mubr.bf16.vlgmr.msra.gmra.mrb[0].mxu1 %v6809_v6  ;;  %v6852_v6 = vld [vmem:[%s8280_s1 + $0x650] sm:$0xff]  }
 0x18f   : > { %6075 = vmatpush3.bf16.msra.mxu0 %v6810_v11  ;;  %6347 = vmatpush3.bf16.msra.mxu1 %v6808_v19  ;;  %v6849_v19 = vld [vmem:[%s8280_s1 + $0x608] sm:$0xff]   ;;  %v5545_v11 = vcombine.high %v7987_v9, %v8014_v29 }
 0x190   : > { %6076 = vmatprep.subr.bf16.mxu0 %v6811_v12  ;;  %6348 = vmatprep.subr.bf16.mxu1 %v6812_v15  ;;  %v6853_v12 = vld [vmem:[%s8280_s1 + $0x690] sm:$0xff]  }
 0x191   : > { %3715 = vmatprep.mubr.bf16.mxu0 %v7997_v7  ;;  %6342 = vmatprep.mubr.bf16.mxu1 %v6832_v17 }
 0x193   : > { %6077 = vmatpush3.bf16.msra.mxu0 %v6813_v16  ;;  %6349 = vmatpush3.bf16.msra.mxu1 %v6812_v15 }
 0x194   : > { %6078 = vmatprep.subr.bf16.mxu0 %v6816_v60  ;;  %6350 = vmatprep.subr.bf16.mxu1 %v6817_v20  ;;  %v6854_v60 = vld [vmem:[%s8280_s1 + $0x610] sm:$0xff]  }
 0x196   : > { %3716 = vmatmul.mubr.bf16.gmra.mrb[100].mxu0 %v8021_v30  ;;  %6343 = vmatmul.mubr.bf16.gmra.mrb[4].mxu1 %v6835_v31 }
 0x197   : > { %6079 = vmatpush3.bf16.msra.mxu0 %v6818_v26  ;;  %6351 = vmatpush3.bf16.msra.mxu1 %v6817_v20  ;;  %v5544_v20 = vcombine.low %v7987_v9, %v8014_v29  ;;  %v6855_v26 = vld [vmem:[%s8280_s1 + $0x658] sm:$0xff]   ;;  %v5548_v29 = vcombine.high %v8017_v24, %v8050_v36 }
 0x198   : > { %6080 = vmatprep.subr.bf16.mxu0 %v6819_v27  ;;  %6352 = vmatprep.subr.bf16.mxu1 %v6820_v13  ;;  %v6856_v27 = vld [vmem:[%s8280_s1 + $0x698] sm:$0xff]  }
 0x199   : > { %3723 = vmatprep.mubr.bf16.mxu0 %v8033_v8  ;;  %6362 = vmatprep.mubr.bf16.mxu1 %v6842_v22  ;;  %v6857_v9 = vld [vmem:[%s8280_s1 + $0x618] sm:$0xff]   ;;  %v6861_v22 = vld [vmem:[%s8280_s1 + $0x6a0] sm:$0xff]  }
 0x19b   : > { %6081 = vmatpush3.bf16.msra.mxu0 %v6821_v25  ;;  %6353 = vmatpush3.bf16.msra.mxu1 %v6820_v13  ;;  %v6869_v13 = vld [vmem:[%s7909_s24 + $0x5c] ss:$12 sps:$4 sm:$0xff]   ;;  %v6876_v25 = vld [vmem:[%s7909_s24 + $0x20] ss:$12 sps:$4 sm:$0xff]  }
 0x19c   : > { %6082 = vmatprep.subr.bf16.mxu0 %v6824_v21  ;;  %6354 = vmatprep.subr.bf16.mxu1 %v6825_v23  ;;  %v6860_v21 = vld [vmem:[%s8280_s1 + $0x660] sm:$0xff]  }
 0x19e   : > { %3724 = vmatmul.mubr.bf16.gmra.mrb[104].mxu0 %v8054_v37 }
 0x19f   : > { %6083 = vmatpush3.bf16.msra.mxu0 %v6826_v18  ;;  %6355 = vmatpush3.bf16.msra.mxu1 %v6825_v23 }
 0x1a0   : > { %6084 = vmatprep.subr.bf16.mxu0 %v6827_v35  ;;  %6356 = vmatprep.subr.bf16.mxu1 %v6828_v28 }
 0x1a1   : > { %v5726_v34 = vpop.f32.mrb[0].mxu0  ;;  %3731 = vmatprep.mubr.bf16.mxu0 %v8065_v39 }
 0x1a2   : > { %v5727_v43 = vpop.f32.mrb[1].mxu0 }
 0x1a3   : > { %v8077_v45 = vadd.f32 %v5727_v43, %v5726_v34  ;;  %v5729_v40 = vpop.f32.mrb[2].mxu0  ;;  %6085 = vmatpush3.bf16.msra.mxu0 %v6829_v32  ;;  %6357 = vmatpush3.bf16.msra.mxu1 %v6828_v28  ;;  %v6862_v32 = vld [vmem:[%s8280_s1 + $0x620] sm:$0xff]   ;;  %v6863_v34 = vld [vmem:[%s8280_s1 + $0x668] sm:$0xff]  }
 0x1a4   : > { %v5730_v48 = vpop.f32.mrb[3].mxu0  ;;  %6086 = vmatprep.subr.bf16.mxu0 %v6833_v33  ;;  %6358 = vmatprep.subr.bf16.mxu1 %v6834_v41  ;;  %v6864_v43 = vld [vmem:[%s8280_s1 + $0x6a8] sm:$0xff]  }
 0x1a5   : > { %v8092_v46 = vadd.f32 %v5730_v48, %v5729_v40  ;;  %v6865_v40 = vld [vmem:[%s8280_s1 + $0x628] sm:$0xff]  }
 0x1a6   : > { %3732 = vmatmul.mubr.bf16.gmra.mrb[108].mxu0 %v8084_v42 }
 0x1a7   : > { %6087 = vmatpush3.bf16.msra.mxu0 %v6836_v44  ;;  %6359 = vmatpush3.bf16.msra.mxu1 %v6834_v41  ;;  %v5547_v41 = vcombine.low %v8017_v24, %v8050_v36  ;;  %v6870_v24 = vld [vmem:[%s8280_s1 + $0x670] sm:$0xff]  }
 0x1a8   : > { %6088 = vmatprep.subr.bf16.mxu0 %v6837_v47  ;;  %6360 = vmatprep.subr.bf16.mxu1 %v6838_v1  ;;  %v6871_v36 = vld [vmem:[%s8280_s1 + $0x6b0] sm:$0xff]  }
 0x1a9   : > { %v5732_v56 = vpop.f32.mrb[4].mxu0  ;;  %4121 = vmatprep.mubr.bf16.mxu0 %v5542_v55  ;;  %v6872_v55 = vld [vmem:[%s8280_s1 + $0x630] sm:$0xff]  }
 0x1aa   : > { %v5733_v62 = vpop.f32.mrb[5].mxu0 }
 0x1ab   : > { %v8114_v54 = vadd.f32 %v5733_v62, %v5732_v56  ;;  %v5735_v57 = vpop.f32.mrb[6].mxu0  ;;  %6089 = vmatpush3.bf16.msra.mxu0 %v6839_v52  ;;  %6361 = vmatpush3.bf16.msra.mxu1 %v6838_v1 }
 0x1ac   : > { %v5736_v5 = vpop.f32.mrb[7].mxu0  ;;  %6126 = vmatprep.subr.bf16.mxu0 %v6843_v51  ;;  %6370 = vmatprep.subr.bf16.mxu1 %v6844_v3 }
 0x1ad   : > { %v8124_v14 = vadd.f32 %v5736_v5, %v5735_v57 }
 0x1ae   : > { %4122 = vmatmul.mubr.bf16.vlgmr.msra.gmra.mrb[112].mxu0 %v5541_v58  ;;  %6363 = vmatmul.mubr.bf16.vlgmr.msra.gmra.mrb[0].mxu1 %v6845_v53 }
 0x1af   : > { %6127 = vmatpush3.bf16.msra.mxu0 %v6846_v61  ;;  %6371 = vmatpush3.bf16.msra.mxu1 %v6844_v3  ;;  %v6873_v3 = vld [vmem:[%s8280_s1 + $0x678] sm:$0xff]  }
 0x1b0   : > { %6128 = vmatprep.subr.bf16.mxu0 %v6847_v10  ;;  %6372 = vmatprep.subr.bf16.mxu1 %v6848_v59  ;;  %v6875_v61 = vld [vmem:[%s8280_s1 + $0x638] sm:$0xff]  }
 0x1b1   : > { %v5738_v15 = vpop.f32.mrb[8].mxu0  ;;  %4129 = vmatprep.mubr.bf16.mxu0 %v5545_v11  ;;  %6366 = vmatprep.mubr.bf16.mxu1 %v6867_v4 }
 0x1b2   : > { %v5739_v63 = vpop.f32.mrb[9].mxu0 }
 0x1b3   : > { %v8138_v0 = vadd.f32 %v5739_v63, %v5738_v15  ;;  %v5741_v16 = vpop.f32.mrb[10].mxu0  ;;  %6129 = vmatpush3.bf16.msra.mxu0 %v6849_v19  ;;  %6373 = vmatpush3.bf16.msra.mxu1 %v6848_v59  ;;  %v6878_v59 = vld [vmem:[%s7909_s24 + $0x50] ss:$12 sps:$4 sm:$0xff]   ;;  %v6879_v15 = vld [vmem:[%s7909_s24 + $0x68] ss:$12 sps:$4 sm:$0xff]  }
 0x1b4   : > { %v5742_v17 = vpop.f32.mrb[11].mxu0  ;;  %6130 = vmatprep.subr.bf16.mxu0 %v6852_v6  ;;  %6374 = vmatprep.subr.bf16.mxu1 %v6853_v12 }
 0x1b5   : > { %v8152_v31 = vadd.f32 %v5742_v17, %v5741_v16  ;;  %v5592_v16 = vld [vmem:[%s7909_s24 + $0x6c] sm:$0xff] }
 0x1b6   : > { %4130 = vmatmul.mubr.bf16.gmra.mrb[116].mxu0 %v5544_v20  ;;  %6367 = vmatmul.mubr.bf16.gmra.mrb[4].mxu1 %v6869_v13  ;;  %v5652_v13 = vcombine.high %v8090_v49, %v5592_v16 }
 0x1b7   : > { %6131 = vmatpush3.bf16.msra.mxu0 %v6854_v60  ;;  %6375 = vmatpush3.bf16.msra.mxu1 %v6853_v12 }
 0x1b8   : > { %6132 = vmatprep.subr.bf16.mxu0 %v6855_v26  ;;  %6376 = vmatprep.subr.bf16.mxu1 %v6856_v27 }
 0x1b9   : > { %v5744_v23 = vpop.f32.mrb[12].mxu0  ;;  %4137 = vmatprep.mubr.bf16.mxu0 %v5548_v29  ;;  %6386 = vmatprep.mubr.bf16.mxu1 %v6876_v25  ;;  %v5651_v25 = vcombine.low %v8090_v49, %v5592_v16 }
 0x1ba   : > { %v5745_v18 = vpop.f32.mrb[13].mxu0 }
 0x1bb   : > { %v8166_v35 = vadd.f32 %v5745_v18, %v5744_v23  ;;  %v5747_v28 = vpop.f32.mrb[14].mxu0  ;;  %6133 = vmatpush3.bf16.msra.mxu0 %v6857_v9  ;;  %6377 = vmatpush3.bf16.msra.mxu1 %v6856_v27 }
 0x1bc   : > { %v5748_v33 = vpop.f32.mrb[15].mxu0  ;;  %6134 = vmatprep.subr.bf16.mxu0 %v6860_v21  ;;  %6378 = vmatprep.subr.bf16.mxu1 %v6861_v22 }
 0x1bd   : > { %v8179_v44 = vadd.f32 %v5748_v33, %v5747_v28 }
 0x1be   : > { %4138 = vmatmul.mubr.bf16.gmra.mrb[120].mxu0 %v5547_v41 }
 0x1bf   : > { %6135 = vmatpush3.bf16.msra.mxu0 %v6862_v32  ;;  %6379 = vmatpush3.bf16.msra.mxu1 %v6861_v22 }
 0x1c0   : > { %6136 = vmatprep.subr.bf16.mxu0 %v6863_v34  ;;  %6380 = vmatprep.subr.bf16.mxu1 %v6864_v43 }
 0x1c1   : > { %v5778_v47 = vpop.f32.mrb[16].mxu0  ;;  %4145 = vmatprep.mubr.bf16.mxu0 %v5551_v50  ;;  %v6874_v50 = vld [vmem:[%s8280_s1 + $0x6b8] sm:$0xff]  }
 0x1c2   : > { %v5779_v48 = vpop.f32.mrb[17].mxu0 }
 0x1c3   : > { %v5780_v1 = vadd.f32 %v5779_v48, %v5778_v47  ;;  %v5781_v52 = vpop.f32.mrb[18].mxu0  ;;  %6137 = vmatpush3.bf16.msra.mxu0 %v6865_v40  ;;  %6381 = vmatpush3.bf16.msra.mxu1 %v6864_v43 }
 0x1c4   : > { %v5782_v51 = vpop.f32.mrb[19].mxu0  ;;  %6138 = vmatprep.subr.bf16.mxu0 %v6870_v24  ;;  %6382 = vmatprep.subr.bf16.mxu1 %v6871_v36 }
 0x1c5   : > { %v6403_v56 = vadd.f32 %v5780_v1, %v8077_v45  ;;  %v5783_v62 = vadd.f32 %v5782_v51, %v5781_v52 }
 0x1c6   : > { %4146 = vmatmul.mubr.bf16.gmra.mrb[124].mxu0 %v5550_v2 }
 0x1c7   : > { %v6421_v53 = vadd.f32 %v5783_v62, %v8092_v46  ;;  %6139 = vmatpush3.bf16.msra.mxu0 %v6872_v55  ;;  %6383 = vmatpush3.bf16.msra.mxu1 %v6871_v36  ;;  %v6877_v46 = vld [vmem:[%s7909_s24 + $0x38] ss:$12 sps:$4 sm:$0xff]  }
 0x1c8   : > { %6140 = vmatprep.subr.bf16.mxu0 %v6873_v3  ;;  %6384 = vmatprep.subr.bf16.mxu1 %v6874_v50 }
 0x1c9   : > { %v5784_v57 = vpop.f32.mrb[20].mxu0  ;;  %4535 = vmatprep.mubr.bf16.mxu0 %v7997_v7 }
 0x1ca   : > { %v5785_v45 = vpop.f32.mrb[21].mxu0 }
 0x1cb   : > { %v5786_v10 = vadd.f32 %v5785_v45, %v5784_v57  ;;  %v5787_v5 = vpop.f32.mrb[22].mxu0  ;;  %6141 = vmatpush3.bf16.msra.mxu0 %v6875_v61  ;;  %6385 = vmatpush3.bf16.msra.mxu1 %v6874_v50 }
 0x1cc   : > { %v5788_v38 = vpop.f32.mrb[23].mxu0 }
 0x1cd   : > { %v6394_v2 = vadd.f32 %v5786_v10, %v8114_v54  ;;  %v5789_v58 = vadd.f32 %v5788_v38, %v5787_v5 }
 0x1ce   : > { %4536 = vmatmul.mubr.bf16.vlgmr.msra.gmra.mrb[128].mxu0 %v8021_v30  ;;  %6387 = vmatmul.mubr.bf16.vlgmr.msra.gmra.mrb[0].mxu1 %v6877_v46 }
 0x1cf   : > { %v6412_v19 = vadd.f32 %v5789_v58, %v8124_v14  ;;  %4543 = vmatprep.mubr.bf16.mxu0 %v8033_v8  ;;  %6390 = vmatprep.mubr.bf16.mxu1 %v6878_v59 }
 0x1d1   : > { %v5790_v7 = vpop.f32.mrb[24].mxu0 }
 0x1d2   : > { %v5791_v11 = vpop.f32.mrb[25].mxu0 }
 0x1d3   : > { %v5792_v4 = vadd.f32 %v5791_v11, %v5790_v7  ;;  %v5793_v6 = vpop.f32.mrb[26].mxu0 }
 0x1d4   : > { %v5794_v12 = vpop.f32.mrb[27].mxu0 }
 0x1d5   : > { %v6439_v63 = vadd.f32 %v5792_v4, %v8138_v0  ;;  %v5795_v54 = vadd.f32 %v5794_v12, %v5793_v6 }
 0x1d6   : > { %4544 = vmatmul.mubr.bf16.gmra.mrb[132].mxu0 %v8054_v37  ;;  %6391 = vmatmul.mubr.bf16.gmra.mrb[4].mxu1 %v6879_v15 }
 0x1d7   : > { %v6457_v30 = vadd.f32 %v5795_v54, %v8152_v31  ;;  %4551 = vmatprep.mubr.bf16.mxu0 %v8065_v39 }
 0x1d9   : > { %v5796_v14 = vpop.f32.mrb[28].mxu0 }
 0x1da   : > { %v5797_v8 = vpop.f32.mrb[29].mxu0 }
 0x1db   : > { %v5798_v60 = vadd.f32 %v5797_v8, %v5796_v14  ;;  %v5799_v17 = vpop.f32.mrb[30].mxu0 }
 0x1dc   : > { %v5800_v20 = vpop.f32.mrb[31].mxu0 }
 0x1dd   : > { %v6430_v26 = vadd.f32 %v5798_v60, %v8166_v35  ;;  %v5801_v27 = vadd.f32 %v5800_v20, %v5799_v17 }
 0x1de   : > { %4552 = vmatmul.mubr.bf16.gmra.mrb[136].mxu0 %v8084_v42 }
 0x1df   : > { %v6448_v37 = vadd.f32 %v5801_v27, %v8179_v44  ;;  %4559 = vmatprep.mubr.bf16.mxu0 %v5652_v13 }
 0x1e1   : > { %v5830_v0 = vpop.f32.mrb[32].mxu0 }
 0x1e2   : > { %v5831_v31 = vpop.f32.mrb[33].mxu0 }
 0x1e3   : > { %v5832_v9 = vadd.f32 %v5831_v31, %v5830_v0  ;;  %v5833_v39 = vpop.f32.mrb[34].mxu0 }
 0x1e4   : > { %v5834_v29 = vpop.f32.mrb[35].mxu0 }
 0x1e5   : > { %v6404_v21 = vadd.f32 %v6403_v56, %v5832_v9  ;;  %v5835_v22 = vadd.f32 %v5834_v29, %v5833_v39 }
 0x1e6   : > { %4560 = vmatmul.mubr.bf16.gmra.mrb[140].mxu0 %v5651_v25 }
 0x1e7   : > { %v6422_v23 = vadd.f32 %v6421_v53, %v5835_v22 }
 0x1e9   : > { %v5836_v18 = vpop.f32.mrb[36].mxu0 }
 0x1ea   : > { %v5837_v35 = vpop.f32.mrb[37].mxu0 }
 0x1eb   : > { %v5838_v28 = vadd.f32 %v5837_v35, %v5836_v18  ;;  %v5839_v32 = vpop.f32.mrb[38].mxu0 }
 0x1ec   : > { %v5840_v33 = vpop.f32.mrb[39].mxu0 }
 0x1ed   : > { %v6395_v42 = vadd.f32 %v6394_v2, %v5838_v28  ;;  %v5841_v41 = vadd.f32 %v5840_v33, %v5839_v32 }
 0x1ef   : > { %v6413_v34 = vadd.f32 %v6412_v19, %v5841_v41 }
 0x1f1   : > { %v5842_v43 = vpop.f32.mrb[40].mxu0 }
 0x1f2   : > { %v5843_v44 = vpop.f32.mrb[41].mxu0 }
 0x1f3   : > { %v5844_v40 = vadd.f32 %v5843_v44, %v5842_v43  ;;  %v5845_v24 = vpop.f32.mrb[42].mxu0 }
 0x1f4   : > { %v5846_v36 = vpop.f32.mrb[43].mxu0 }
 0x1f5   : > { %v6440_v47 = vadd.f32 %v6439_v63, %v5844_v40  ;;  %v5847_v48 = vadd.f32 %v5846_v36, %v5845_v24 }
 0x1f7   : > { %v6458_v49 = vadd.f32 %v6457_v30, %v5847_v48 }
 0x1f9   : > { %v5848_v1 = vpop.f32.mrb[44].mxu0 }
 0x1fa   : > { %v5849_v52 = vpop.f32.mrb[45].mxu0 }
 0x1fb   : > { %v5850_v55 = vadd.f32 %v5849_v52, %v5848_v1  ;;  %v5851_v51 = vpop.f32.mrb[46].mxu0 }
 0x1fc   : > { %v5852_v3 = vpop.f32.mrb[47].mxu0 }
 0x1fd   : > { %v6431_v50 = vadd.f32 %v6430_v26, %v5850_v55  ;;  %v5853_v56 = vadd.f32 %v5852_v3, %v5851_v51 }
 0x1ff   : > { %v6449_v62 = vadd.f32 %v6448_v37, %v5853_v56 }
 0x201   : > { %v5882_v53 = vpop.f32.mrb[48].mxu0 }
 0x202   : > { %v5883_v61 = vpop.f32.mrb[49].mxu0 }
 0x203   : > { %v5884_v57 = vadd.f32 %v5883_v61, %v5882_v53  ;;  %v5885_v45 = vpop.f32.mrb[50].mxu0 }
 0x204   : > { %v5886_v10 = vpop.f32.mrb[51].mxu0 }
 0x205   : > { %v6405_v5 = vadd.f32 %v6404_v21, %v5884_v57  ;;  %v5887_v38 = vadd.f32 %v5886_v10, %v5885_v45 }
 0x207   : > { %v6423_v46 = vadd.f32 %v6422_v23, %v5887_v38 }
 0x209   : > { %v5888_v2 = vpop.f32.mrb[52].mxu0 }
 0x20a   : > { %v5889_v58 = vpop.f32.mrb[53].mxu0 }
 0x20b   : > { %v5890_v59 = vadd.f32 %v5889_v58, %v5888_v2  ;;  %v5891_v19 = vpop.f32.mrb[54].mxu0 }
 0x20c   : > { %v5892_v7 = vpop.f32.mrb[55].mxu0 }
 0x20d   : > { %v6396_v11 = vadd.f32 %v6395_v42, %v5890_v59  ;;  %v5893_v4 = vadd.f32 %v5892_v7, %v5891_v19 }
 0x20f   : > { %v6414_v6 = vadd.f32 %v6413_v34, %v5893_v4 }
 0x211   : > { %v5894_v12 = vpop.f32.mrb[56].mxu0 }
 0x212   : > { %v5895_v15 = vpop.f32.mrb[57].mxu0 }
 0x213   : > { %v5896_v63 = vadd.f32 %v5895_v15, %v5894_v12  ;;  %v5897_v54 = vpop.f32.mrb[58].mxu0 }
 0x214   : > { %v5898_v30 = vpop.f32.mrb[59].mxu0 }
 0x215   : > { %v6441_v14 = vadd.f32 %v6440_v47, %v5896_v63  ;;  %v5899_v8 = vadd.f32 %v5898_v30, %v5897_v54 }
 0x217   : > { %v6459_v16 = vadd.f32 %v6458_v49, %v5899_v8 }
 0x219   : > { %v5900_v60 = vpop.f32.mrb[60].mxu0 }
 0x21a   : > { %v5901_v17 = vpop.f32.mrb[61].mxu0 }
 0x21b   : > { %v5902_v20 = vadd.f32 %v5901_v17, %v5900_v60  ;;  %v5903_v26 = vpop.f32.mrb[62].mxu0 }
 0x21c   : > { %v5904_v27 = vpop.f32.mrb[63].mxu0 }
 0x21d   : > { %v6432_v13 = vadd.f32 %v6431_v50, %v5902_v20  ;;  %v5905_v37 = vadd.f32 %v5904_v27, %v5903_v26 }
 0x21f   : > { %v6450_v0 = vadd.f32 %v6449_v62, %v5905_v37 }
 0x221   : > { %v5934_v31 = vpop.f32.mrb[64].mxu0 }
 0x222   : > { %v5935_v9 = vpop.f32.mrb[65].mxu0 }
 0x223   : > { %v5936_v39 = vadd.f32 %v5935_v9, %v5934_v31  ;;  %v5937_v29 = vpop.f32.mrb[66].mxu0 }
 0x224   : > { %v5938_v25 = vpop.f32.mrb[67].mxu0 }
 0x225   : > { %v6406_v21 = vadd.f32 %v6405_v5, %v5936_v39  ;;  %v5939_v22 = vadd.f32 %v5938_v25, %v5937_v29 }
 0x227   : > { %v6424_v23 = vadd.f32 %v6423_v46, %v5939_v22 }
 0x229   : > { %v5940_v18 = vpop.f32.mrb[68].mxu0 }
 0x22a   : > { %v5941_v35 = vpop.f32.mrb[69].mxu0 }
 0x22b   : > { %v5942_v28 = vadd.f32 %v5941_v35, %v5940_v18  ;;  %v5943_v32 = vpop.f32.mrb[70].mxu0 }
 0x22c   : > { %v5944_v33 = vpop.f32.mrb[71].mxu0 }
 0x22d   : > { %v6397_v42 = vadd.f32 %v6396_v11, %v5942_v28  ;;  %v5945_v41 = vadd.f32 %v5944_v33, %v5943_v32 }
 0x22f   : > { %v6415_v34 = vadd.f32 %v6414_v6, %v5945_v41 }
 0x231   : > { %v5946_v43 = vpop.f32.mrb[72].mxu0 }
 0x232   : > { %v5947_v44 = vpop.f32.mrb[73].mxu0 }
 0x233   : > { %v5948_v40 = vadd.f32 %v5947_v44, %v5946_v43  ;;  %v5949_v24 = vpop.f32.mrb[74].mxu0 }
 0x234   : > { %v5950_v36 = vpop.f32.mrb[75].mxu0 }
 0x235   : > { %v6442_v47 = vadd.f32 %v6441_v14, %v5948_v40  ;;  %v5951_v48 = vadd.f32 %v5950_v36, %v5949_v24 }
 0x237   : > { %v6460_v49 = vadd.f32 %v6459_v16, %v5951_v48 }
 0x239   : > { %v5952_v1 = vpop.f32.mrb[76].mxu0 }
 0x23a   : > { %v5953_v52 = vpop.f32.mrb[77].mxu0 }
 0x23b   : > { %v5954_v55 = vadd.f32 %v5953_v52, %v5952_v1  ;;  %v5955_v51 = vpop.f32.mrb[78].mxu0 }
 0x23c   : > { %v5956_v3 = vpop.f32.mrb[79].mxu0 }
 0x23d   : > { %v6433_v50 = vadd.f32 %v6432_v13, %v5954_v55  ;;  %v5957_v56 = vadd.f32 %v5956_v3, %v5955_v51 }
 0x23f   : > { %v6451_v62 = vadd.f32 %v6450_v0, %v5957_v56 }
 0x241   : > { %v5986_v53 = vpop.f32.mrb[80].mxu0 }
 0x242   : > { %v5987_v61 = vpop.f32.mrb[81].mxu0 }
 0x243   : > { %v5988_v57 = vadd.f32 %v5987_v61, %v5986_v53  ;;  %v5989_v45 = vpop.f32.mrb[82].mxu0 }
 0x244   : > { %v5990_v10 = vpop.f32.mrb[83].mxu0 }
 0x245   : > { %v6407_v5 = vadd.f32 %v6406_v21, %v5988_v57  ;;  %v5991_v38 = vadd.f32 %v5990_v10, %v5989_v45 }
 0x247   : > { %v6425_v46 = vadd.f32 %v6424_v23, %v5991_v38 }
 0x249   : > { %v5992_v2 = vpop.f32.mrb[84].mxu0 }
 0x24a   : > { %v5993_v58 = vpop.f32.mrb[85].mxu0 }
 0x24b   : > { %v5994_v59 = vadd.f32 %v5993_v58, %v5992_v2  ;;  %v5995_v19 = vpop.f32.mrb[86].mxu0 }
 0x24c   : > { %v5996_v7 = vpop.f32.mrb[87].mxu0 }
 0x24d   : > { %v6398_v11 = vadd.f32 %v6397_v42, %v5994_v59  ;;  %v5997_v4 = vadd.f32 %v5996_v7, %v5995_v19 }
 0x24f   : > { %v6416_v6 = vadd.f32 %v6415_v34, %v5997_v4 }
 0x251   : > { %v5998_v12 = vpop.f32.mrb[88].mxu0 }
 0x252   : > { %v5999_v15 = vpop.f32.mrb[89].mxu0 }
 0x253   : > { %v6000_v63 = vadd.f32 %v5999_v15, %v5998_v12  ;;  %v6001_v54 = vpop.f32.mrb[90].mxu0 }
 0x254   : > { %v6002_v30 = vpop.f32.mrb[91].mxu0 }
 0x255   : > { %v6443_v14 = vadd.f32 %v6442_v47, %v6000_v63  ;;  %v6003_v8 = vadd.f32 %v6002_v30, %v6001_v54 }
 0x257   : > { %v6461_v16 = vadd.f32 %v6460_v49, %v6003_v8 }
 0x259   : > { %v6004_v60 = vpop.f32.mrb[92].mxu0 }
 0x25a   : > { %v6005_v17 = vpop.f32.mrb[93].mxu0 }
 0x25b   : > { %v6006_v20 = vadd.f32 %v6005_v17, %v6004_v60  ;;  %v6007_v26 = vpop.f32.mrb[94].mxu0 }
 0x25c   : > { %v6008_v27 = vpop.f32.mrb[95].mxu0 }
 0x25d   : > { %v6434_v13 = vadd.f32 %v6433_v50, %v6006_v20  ;;  %v6009_v37 = vadd.f32 %v6008_v27, %v6007_v26 }
 0x25f   : > { %v6452_v0 = vadd.f32 %v6451_v62, %v6009_v37 }
 0x261   : > { %v6038_v31 = vpop.f32.mrb[96].mxu0 }
 0x262   : > { %v6039_v9 = vpop.f32.mrb[97].mxu0 }
 0x263   : > { %v6040_v39 = vadd.f32 %v6039_v9, %v6038_v31  ;;  %v6041_v29 = vpop.f32.mrb[98].mxu0 }
 0x264   : > { %v6042_v25 = vpop.f32.mrb[99].mxu0 }
 0x265   : > { %v6408_v21 = vadd.f32 %v6407_v5, %v6040_v39  ;;  %v6043_v22 = vadd.f32 %v6042_v25, %v6041_v29 }
 0x267   : > { %v6426_v23 = vadd.f32 %v6425_v46, %v6043_v22 }
 0x269   : > { %v6044_v18 = vpop.f32.mrb[100].mxu0 }
 0x26a   : > { %v6045_v35 = vpop.f32.mrb[101].mxu0 }
 0x26b   : > { %v6046_v28 = vadd.f32 %v6045_v35, %v6044_v18  ;;  %v6047_v32 = vpop.f32.mrb[102].mxu0 }
 0x26c   : > { %v6048_v33 = vpop.f32.mrb[103].mxu0 }
 0x26d   : > { %v6399_v42 = vadd.f32 %v6398_v11, %v6046_v28  ;;  %v6049_v41 = vadd.f32 %v6048_v33, %v6047_v32  ;;  %v8235_v32 = vld [vmem:[%s8281_s2] ss:$0 sm:$0xff] }
 0x26f   : > { %v6417_v34 = vadd.f32 %v6416_v6, %v6049_v41  ;;  %v8240_v41 = vld [vmem:[%s8282_s3] ss:$0 sm:$0xff] }
 0x271   : > { %v6050_v43 = vpop.f32.mrb[104].mxu0 }
 0x272   : > { %v6051_v44 = vpop.f32.mrb[105].mxu0 }
 0x273   : > { %v6052_v40 = vadd.f32 %v6051_v44, %v6050_v43  ;;  %v6053_v24 = vpop.f32.mrb[106].mxu0 }
 0x274   : > { %v6054_v36 = vpop.f32.mrb[107].mxu0 }
 0x275   : > { %v6444_v47 = vadd.f32 %v6443_v14, %v6052_v40  ;;  %v6055_v48 = vadd.f32 %v6054_v36, %v6053_v24 }
 0x277   : > { %v6462_v49 = vadd.f32 %v6461_v16, %v6055_v48 }
 0x279   : > { %v6056_v1 = vpop.f32.mrb[108].mxu0 }
 0x27a   : > { %v6057_v52 = vpop.f32.mrb[109].mxu0 }
 0x27b   : > { %v6058_v55 = vadd.f32 %v6057_v52, %v6056_v1  ;;  %v6059_v51 = vpop.f32.mrb[110].mxu0 }
 0x27c   : > { %v6060_v3 = vpop.f32.mrb[111].mxu0 }
 0x27d   : > { %v6435_v50 = vadd.f32 %v6434_v13, %v6058_v55  ;;  %v6061_v56 = vadd.f32 %v6060_v3, %v6059_v51 }
 0x27f   : > { %v6453_v62 = vadd.f32 %v6452_v0, %v6061_v56 }
 0x281   : > { %v6090_v53 = vpop.f32.mrb[112].mxu0 }
 0x282   : > { %v6091_v61 = vpop.f32.mrb[113].mxu0 }
 0x283   : > { %v6092_v57 = vadd.f32 %v6091_v61, %v6090_v53  ;;  %v6093_v45 = vpop.f32.mrb[114].mxu0 }
 0x284   : > { %v6094_v10 = vpop.f32.mrb[115].mxu0 }
 0x285   : > { %v6409_v5 = vadd.f32 %v6408_v21, %v6092_v57  ;;  %v6095_v38 = vadd.f32 %v6094_v10, %v6093_v45 }
 0x287   : > { %v6427_v46 = vadd.f32 %v6426_v23, %v6095_v38 }
 0x289   : > { %v6096_v2 = vpop.f32.mrb[116].mxu0 }
 0x28a   : > { %v6097_v58 = vpop.f32.mrb[117].mxu0 }
 0x28b   : > { %v6098_v59 = vadd.f32 %v6097_v58, %v6096_v2  ;;  %v6099_v19 = vpop.f32.mrb[118].mxu0 }
 0x28c   : > { %v6100_v7 = vpop.f32.mrb[119].mxu0 }
 0x28d   : > { %v6400_v11 = vadd.f32 %v6399_v42, %v6098_v59  ;;  %v6101_v4 = vadd.f32 %v6100_v7, %v6099_v19 }
 0x28f   : > { %v6418_v6 = vadd.f32 %v6417_v34, %v6101_v4 }
 0x291   : > { %v6102_v12 = vpop.f32.mrb[120].mxu0 }
 0x292   : > { %v6103_v15 = vpop.f32.mrb[121].mxu0 }
 0x293   : > { %v6104_v63 = vadd.f32 %v6103_v15, %v6102_v12  ;;  %v6105_v54 = vpop.f32.mrb[122].mxu0 }
 0x294   : > { %v6106_v30 = vpop.f32.mrb[123].mxu0 }
 0x295   : > { %v6445_v14 = vadd.f32 %v6444_v47, %v6104_v63  ;;  %v6107_v8 = vadd.f32 %v6106_v30, %v6105_v54 }
 0x297   : > { %v6463_v16 = vadd.f32 %v6462_v49, %v6107_v8 }
 0x299   : > { %v6108_v60 = vpop.f32.mrb[124].mxu0 }
 0x29a   : > { %v6109_v17 = vpop.f32.mrb[125].mxu0 }
 0x29b   : > { %v6110_v20 = vadd.f32 %v6109_v17, %v6108_v60  ;;  %v6111_v26 = vpop.f32.mrb[126].mxu0 }
 0x29c   : > { %v6112_v27 = vpop.f32.mrb[127].mxu0 }
 0x29d   : > { %v8228_v13 = vadd.f32 %v6435_v50, %v6110_v20  ;;  %v6113_v37 = vadd.f32 %v6112_v27, %v6111_v26 }
 0x29f   : > { %v8230_v0 = vadd.f32 %v6453_v62, %v6113_v37 }
 0x2a1   : > { %v6142_v31 = vpop.f32.mrb[128].mxu0  ;;  %v6388_v9 = vpop.f32.mrb[0].mxu1 }
 0x2a2   : > { %v6143_v39 = vpop.f32.mrb[129].mxu0  ;;  %v4602_v29 = vpop.f32.mrb[1].mxu1 }
 0x2a3   : > { %v6144_v25 = vadd.f32 %v6143_v39, %v6142_v31  ;;  %v6145_v21 = vpop.f32.mrb[130].mxu0  ;;  %v6389_v22 = vpop.f32.mrb[2].mxu1 }
 0x2a4   : > { %v6146_v23 = vpop.f32.mrb[131].mxu0  ;;  %v4605_v18 = vpop.f32.mrb[3].mxu1 }
 0x2a5   : > { %v6410_v35 = vadd.f32 %v6409_v5, %v6144_v25  ;;  %v6147_v28 = vadd.f32 %v6146_v23, %v6145_v21 }
 0x2a7   : > { %v6411_v33 = vadd.f32 %v6410_v35, %v4602_v29  ;;  %v6428_v42 = vadd.f32 %v6427_v46, %v6147_v28 }
 0x2a9   : > { %v4647_v34 = vmul.f32 %v6411_v33, %v8235_v32  ;;  %v6429_v43 = vadd.f32 %v6428_v42, %v4605_v18  ;;  %v6148_v44 = vpop.f32.mrb[132].mxu0  ;;  %v6392_v40 = vpop.f32.mrb[4].mxu1 }
 0x2aa   : > { %v6149_v24 = vpop.f32.mrb[133].mxu0  ;;  %v4618_v36 = vpop.f32.mrb[5].mxu1 }
 0x2ab   : > { %v4661_v47 = vadd.f32 %v8240_v41, %v4647_v34  ;;  %v4648_v48 = vmul.f32 %v6429_v43, %v8235_v32  ;;  %v6150_v49 = vadd.f32 %v6149_v24, %v6148_v44  ;;  %v6151_v1 = vpop.f32.mrb[134].mxu0  ;;  %v6393_v52 = vpop.f32.mrb[6].mxu1 }
 0x2ac   : > { %v6152_v55 = vpop.f32.mrb[135].mxu0  ;;  %v4621_v51 = vpop.f32.mrb[7].mxu1 }
 0x2ad   : > { %v4662_v3 = vadd.f32 %v8240_v41, %v4648_v48  ;;  %v6401_v50 = vadd.f32 %v6400_v11, %v6150_v49  ;;  %v6153_v56 = vadd.f32 %v6152_v55, %v6151_v1  ;;  %v4669_v62 = vmax.f32 %v4661_v47, 0.0 }
 0x2af   : > { %v4670_v53 = vmax.f32 %v4662_v3, 0.0  ;;  %v6402_v61 = vadd.f32 %v6401_v50, %v6388_v9  ;;  %v6419_v57 = vadd.f32 %v6418_v6, %v6153_v56 }
 0x2b1   : > { %v5690_v45 = vpack.c.bf16 %v4670_v53, %v4669_v62  ;;  %v4649_v10 = vmul.f32 %v6402_v61, %v8235_v32  ;;  %v6420_v5 = vadd.f32 %v6419_v57, %v6389_v22  ;;  %v6154_v38 = vpop.f32.mrb[136].mxu0 }
 0x2b2   : > { %v6155_v46 = vpop.f32.mrb[137].mxu0 }
 0x2b3   : > { %5691 = vst [vmem:[%s6998_s10] sm:$0xff] %v5690_v45   ;;  %v4663_v2 = vadd.f32 %v8240_v41, %v4649_v10  ;;  %v4650_v58 = vmul.f32 %v6420_v5, %v8235_v32  ;;  %v6156_v59 = vadd.f32 %v6155_v46, %v6154_v38  ;;  %v6157_v19 = vpop.f32.mrb[138].mxu0 }
 0x2b4   : > { %v6158_v7 = vpop.f32.mrb[139].mxu0 }
 0x2b5   : > { %v4664_v11 = vadd.f32 %v8240_v41, %v4650_v58  ;;  %v6446_v4 = vadd.f32 %v6445_v14, %v6156_v59  ;;  %v6159_v12 = vadd.f32 %v6158_v7, %v6157_v19  ;;  %v4671_v6 = vmax.f32 %v4663_v2, 0.0 }
 0x2b7   : > { %v4672_v15 = vmax.f32 %v4664_v11, 0.0  ;;  %v6447_v63 = vadd.f32 %v6446_v4, %v4618_v36  ;;  %v6464_v54 = vadd.f32 %v6463_v16, %v6159_v12 }
 0x2b9   : > { %v5695_v30 = vpack.c.bf16 %v4672_v15, %v4671_v6  ;;  %v4651_v8 = vmul.f32 %v6447_v63, %v8235_v32  ;;  %v6465_v60 = vadd.f32 %v6464_v54, %v4621_v51  ;;  %v6160_v17 = vpop.f32.mrb[140].mxu0 }
 0x2ba   : > { %v6161_v20 = vpop.f32.mrb[141].mxu0 }
 0x2bb   : > { %5707 = vst [vmem:[%s6998_s10 + $0x8] sm:$0xff] %v5695_v30   ;;  %v4665_v26 = vadd.f32 %v8240_v41, %v4651_v8  ;;  %v4652_v27 = vmul.f32 %v6465_v60, %v8235_v32  ;;  %v6162_v37 = vadd.f32 %v6161_v20, %v6160_v17  ;;  %v6163_v31 = vpop.f32.mrb[142].mxu0 }
 0x2bc   : > { %v6164_v14 = vpop.f32.mrb[143].mxu0 }
 0x2bd   : > { %v4666_v9 = vadd.f32 %v8240_v41, %v4652_v27  ;;  %v6437_v39 = vadd.f32 %v8228_v13, %v6162_v37  ;;  %v6165_v16 = vadd.f32 %v6164_v14, %v6163_v31  ;;  %v4673_v29 = vmax.f32 %v4665_v26, 0.0 }
 0x2bf   : > { %v4674_v25 = vmax.f32 %v4666_v9, 0.0  ;;  %v6438_v21 = vadd.f32 %v6437_v39, %v6392_v40  ;;  %v6455_v22 = vadd.f32 %v8230_v0, %v6165_v16 }
 0x2c1   : > { %v5700_v23 = vpack.c.bf16 %v4674_v25, %v4673_v29  ;;  %v4653_v18 = vmul.f32 %v6438_v21, %v8235_v32  ;;  %v6456_v35 = vadd.f32 %v6455_v22, %v6393_v52 }
 0x2c3   : > { %5708 = vst [vmem:[%s6998_s10 + $0x10] sm:$0xff] %v5700_v23   ;;  %v4667_v28 = vadd.f32 %v8240_v41, %v4653_v18  ;;  %v4654_v33 = vmul.f32 %v6456_v35, %v8235_v32 }
 0x2c5   : > { %v4668_v42 = vadd.f32 %v8240_v41, %v4654_v33  ;;  %v4675_v34 = vmax.f32 %v4667_v28, 0.0 }
 0x2c7   : > { %v4676_v13 = vmax.f32 %v4668_v42, 0.0 }
 0x2c9   : > { %v5705_v43 = vpack.c.bf16 %v4676_v13, %v4675_v34 }
 0x2cb   : > { %5709 = vst [vmem:[%s6998_s10 + $0x18] sm:$0xff] %v5705_v43  }
 0x2cc PF: > { %s14_s19 = sadd.s32 1, %s6926_s19   ;;  %s8296_s15 = smov %s6918_s17 }
 0x2cd   : > { %p11_p13 = scmp.ge.s32.totalorder %s14_s19, 20   ;;  %s8297_s16 = smov %s6922_s18 }
 0x2ce   : > { %s8298_s17 = smov %s8301_s20  ;;  %s8299_s18 = smov %s8305_s21 }
 0x2cf   :  { %13 = sbr.rel (!%p11_p13) target bundleno = 3 (0x3), region = 111 }

</bundles_post_ra>
